<compile_context>
chip_gen: v7x
topology: tpu7x:2x2x1
jax: 0.10.0
libtpu: 0.0.40
codegen_flags: <defaults>
</compile_context>

<pallas_src>
from functools import partial

import jax
import jax.numpy as jnp
from jax.experimental import pallas as pl
from jax.experimental.pallas import tpu as pltpu


# ----------------------------------------------------------------------------
# Fused Pallas kernel: encoder [+ RK4 step(s)] + decoder for a block of images.
# Each 3x3 same-padded conv = 9 small MXU dots (bf16 x bf16 -> f32) on lane-
# shifted views of a zero-padded flat buffer -- no im2col materialisation.
# ----------------------------------------------------------------------------
def _fused_kernel(x_ref, wch_ref, whc_ref, bh_ref, bc_ref, z_ref, dec_ref,
                  *, H, W, n_ts, mode):
    HW = H * W
    PAD = W + 1                                   # flat zero-pad covers dy=+-1, dx=+-1
    B_blk = x_ref.shape[0]
    bf16 = jnp.bfloat16

    # Hoisted border-mask math (JAX does not CSE iota/compare): output-pixel column
    # index on the lane axis.  Assumes row-major (y*W + x) flattening.
    col = jax.lax.broadcasted_iota(jnp.int32, (1, HW), 1) % W
    keep_for_left_tap = col <= W - 2              # zero input col W-1 (dx = -1 wrap)
    keep_for_right_tap = col >= 1                 # zero input col 0   (dx = +1 wrap)

    # Biases, loaded once per grid step (f32, (Cout, 1) broadcast over lanes).
    b_h = [bh_ref[i] for i in range(2)]           # (HID, 1)
    b_c = [bc_ref[i] for i in range(2)]           # (C, 1)

    def conv3x3(a, w_ref_, cidx, bias, relu):
        """(Cin, HW) f32 -> (Cout, HW) f32.  bf16 operands, f32 accumulation."""
        cin = a.shape[0]
        zpad = jnp.zeros((cin, PAD), bf16)
        # Three padded source buffers: the column wrapped by the dx=-1 / dx=+1 taps is
        # zeroed once per conv (f32 select, v5e-safe) instead of masking every side tap.
        srcs = []
        for keep in (keep_for_left_tap, None, keep_for_right_tap):
            am = a if keep is None else jnp.where(keep, a, 0.0)
            srcs.append(jnp.concatenate([zpad, am.astype(bf16), zpad], axis=1))
        acc = None
        for ky in range(3):
            for kx in range(3):
                start = (ky - 1) * W + (kx - 1) + PAD            # static lane slice
                patch = srcs[kx][:, start:start + HW]            # (Cin, HW) bf16
                w_tap = w_ref_[cidx, ky * 3 + kx]                # (Cout, Cin) bf16
                d = jnp.dot(w_tap, patch, preferred_element_type=jnp.float32)
                acc = d if acc is None else acc + d
        acc = acc + bias
        return jnp.maximum(acc, 0.0) if relu else acc

    def encoder(a):
        h = conv3x3(a, wch_ref, 0, b_h[0], relu=True)
        return conv3x3(h, whc_ref, 0, b_c[0], relu=False)

    def decoder(a):
        h = conv3x3(a, wch_ref, 1, b_h[1], relu=True)
        return conv3x3(h, whc_ref, 1, b_c[1], relu=False)

    def rk4(z, dt=0.1):                           # classical RK4, dz/dt = encoder(z)
        k1 = encoder(z)
        k2 = encoder(z + (0.5 * dt) * k1)
        k3 = encoder(z + (0.5 * dt) * k2)
        k4 = encoder(z + dt * k3)
        return z + (dt / 6.0) * (k1 + 2.0 * k2 + 2.0 * k3 + k4)

    for b in range(B_blk):                        # small, fully unrolled
        z = encoder(x_ref[b])                     # (C, HW) f32
        if mode == "train":
            if n_ts == 1:
                z = rk4(z)
            z_ref[b] = z.astype(z_ref.dtype)
            dec_ref[b] = decoder(z).astype(dec_ref.dtype)
        else:                                     # 'pred': fused timestep loop
            z_ref[0, b] = z.astype(z_ref.dtype)
            dec_ref[0, b] = decoder(z).astype(dec_ref.dtype)
            for t in range(1, n_ts):
                z = rk4(z)
                z_ref[t, b] = z.astype(z_ref.dtype)
                dec_ref[t, b] = decoder(z).astype(dec_ref.dtype)


def _forward_call(pm, x_cm, *, H, W, n_ts, mode, batch_block=None):
    """One fused forward (train) or full n_ts rollout (pred) on (N, C, H*W) input."""
    N, C, HW = x_cm.shape
    if batch_block is None:
        # Default: keep the grid length at 2 so both v7x TensorCores get work while
        # single-TC v5e/v6e only pay two grid steps of fixed overhead.
        batch_block = max(1, N // 2)
        while N % batch_block:
            batch_block -= 1
    assert N % batch_block == 0, (N, batch_block)
    grid = (N // batch_block,)

    kernel = partial(_fused_kernel, H=H, W=W, n_ts=n_ts, mode=mode)

    x_spec = pl.BlockSpec((batch_block, C, HW), lambda n: (n, 0, 0))

    def full_spec(arr):                           # whole array, constant block index
        nd = arr.ndim
        def imap(n):
            return (0,) * nd
        return pl.BlockSpec(arr.shape, imap)

    in_specs = [x_spec, full_spec(pm["wch"]), full_spec(pm["whc"]),
                full_spec(pm["bh"]), full_spec(pm["bc"])]

    if mode == "train":
        out_shape = (jax.ShapeDtypeStruct((N, C, HW), x_cm.dtype),
                     jax.ShapeDtypeStruct((N, C, HW), x_cm.dtype))
        out_specs = (x_spec, x_spec)
    else:                                         # 'pred'
        out_shape = (jax.ShapeDtypeStruct((n_ts, N, C, HW), x_cm.dtype),
                     jax.ShapeDtypeStruct((n_ts, N, C, HW), x_cm.dtype))
        o_spec = pl.BlockSpec((n_ts, batch_block, C, HW), lambda n: (0, n, 0, 0))
        out_specs = (o_spec, o_spec)

    return pl.pallas_call(
        kernel,
        out_shape=out_shape,
        grid=grid,
        in_specs=in_specs,
        out_specs=out_specs,
        compiler_params=pltpu.CompilerParams(
            dimension_semantics=("parallel",)),   # batch blocks -> both v7x TCs
    )(x_cm, pm["wch"], pm["whc"], pm["bh"], pm["bc"])


def _prepare_params(params):
    """HWIO conv weights -> stacked (2, 9, Cout, Cin) bf16 tap matrices + f32 biases."""
    def taps(w):                                  # (3,3,Cin,Cout) -> (9, Cout, Cin)
        cout, cin = w.shape[3], w.shape[2]
        return jnp.transpose(w, (0, 1, 3, 2)).reshape(9, cout, cin)
    wch = jnp.stack([taps(params["enc_w1"]), taps(params["dec_w1"])]).astype(jnp.bfloat16)
    whc = jnp.stack([taps(params["enc_w2"]), taps(params["dec_w2"])]).astype(jnp.bfloat16)
    bh = jnp.stack([params["enc_b1"].reshape(-1, 1),
                    params["dec_b1"].reshape(-1, 1)]).astype(jnp.float32)
    bc = jnp.stack([params["enc_b2"].reshape(-1, 1),
                    params["dec_b2"].reshape(-1, 1)]).astype(jnp.float32)
    return dict(wch=wch, whc=whc, bh=bh, bc=bc)


# ----------------------------------------------------------------------------
# Full model forward (mirrors the PyTorch `model.forward`)
# ----------------------------------------------------------------------------
def model_forward(params, x_nchw, n_ts=1, mode="train", batch_block=None):
    N, C, H, W = x_nchw.shape
    x_cm = x_nchw.reshape(N, C, H * W)            # NCHW -> (N,C,HW): free reshape
    pm = _prepare_params(params)
    if mode == "train":
        if n_ts not in (0, 1):
            raise ValueError("mode='train' only supports n_ts in {0, 1} "
                             "(same as the reference module).")
        z_cm, dec_cm = _forward_call(pm, x_cm, H=H, W=W, n_ts=n_ts, mode="train",
                                     batch_block=batch_block)
        return z_cm.reshape(N, C, H, W), dec_cm.reshape(N, C, H, W)
    if mode == "pred":
        z_cm, dec_cm = _forward_call(pm, x_cm, H=H, W=W, n_ts=n_ts, mode="pred",
                                     batch_block=batch_block)
        return (z_cm.reshape(n_ts, N, C, H, W), dec_cm.reshape(n_ts, N, C, H, W))
    raise ValueError(f"unknown mode: {mode!r}")


# ----------------------------------------------------------------------------
# Pure-XLA reference (numerical sanity check only)
# ----------------------------------------------------------------------------
def _reference_forward(params, x_nchw, n_ts=1, mode="train", bf16_operands=True):
    """With bf16_operands=True this mirrors the kernel's precision choice (bf16 matmul
    operands, f32 accumulation) so a tight tolerance checks conv/RK4 structure rather
    than bf16 rounding; with False it is the exact-f32 reference."""
    dn = ("NCHW", "HWIO", "NCHW")

    def conv(a, w, b, relu):
        if bf16_operands:
            a, w = a.astype(jnp.bfloat16), w.astype(jnp.bfloat16)
        y = jax.lax.conv_general_dilated(a, w, (1, 1), "SAME",
                                         dimension_numbers=dn,
                                         preferred_element_type=jnp.float32,
                                         precision=jax.lax.Precision.HIGHEST)
        y = y + b.reshape(1, -1, 1, 1)
        return jnp.maximum(y, 0.0) if relu else y

    enc = lambda a: conv(conv(a, params["enc_w1"], params["enc_b1"], True),
                         params["enc_w2"], params["enc_b2"], False)
    dec = lambda a: conv(conv(a, params["dec_w1"], params["dec_b1"], True),
                         params["dec_w2"], params["dec_b2"], False)

    def rk4(z, dt=0.1):
        k1 = enc(z)
        k2 = enc(z + 0.5 * dt * k1)
        k3 = enc(z + 0.5 * dt * k2)
        k4 = enc(z + dt * k3)
        return z + (dt / 6.0) * (k1 + 2.0 * k2 + 2.0 * k3 + k4)

    if mode == "train":
        z = enc(x_nchw)
        if n_ts == 1:
            z = rk4(z)
        return z, dec(z)
    z_list = [enc(x_nchw)]
    dec_list = [dec(z_list[0])]
    for i in range(n_ts - 1):
        z_list.append(rk4(z_list[i]))
        dec_list.append(dec(z_list[-1]))
    return jnp.stack(z_list, axis=0), jnp.stack(dec_list, axis=0)


# ----------------------------------------------------------------------------
# Deterministic parameter init (synthetic weights, HWIO layout)
# ----------------------------------------------------------------------------
def init_params(key, c, hidden):
    def conv_init(k, cin, cout):
        kw, kb = jax.random.split(k)
        scale = 1.0 / jnp.sqrt(jnp.float32(cin * 9))
        w = jax.random.normal(kw, (3, 3, cin, cout), jnp.float32) * scale
        b = jax.random.normal(kb, (cout,), jnp.float32) * 0.01
        return w, b

    k1, k2, k3, k4 = jax.random.split(key, 4)
    enc_w1, enc_b1 = conv_init(k1, c, hidden)
    enc_w2, enc_b2 = conv_init(k2, hidden, c)
    dec_w1, dec_b1 = conv_init(k3, c, hidden)
    dec_w2, dec_b2 = conv_init(k4, hidden, c)
    return dict(enc_w1=enc_w1, enc_b1=enc_b1, enc_w2=enc_w2, enc_b2=enc_b2,
                dec_w1=dec_w1, dec_b1=dec_b1, dec_w2=dec_w2, dec_b2=dec_b2)


if __name__ == "__main__":
    key = jax.random.PRNGKey(0)
    k_param, k_x = jax.random.split(key)

    N, C, H, W = 2, 4, 16, 16
    HIDDEN = 32

    params = init_params(k_param, C, HIDDEN)
    x = jax.random.normal(k_x, (N, C, H, W), jnp.float32)

    # --- train mode (encoder -> one RK4 step -> decoder), the default path ---
    fwd = jax.jit(partial(model_forward, n_ts=1, mode="train"))
    z, decoded = fwd(params, x)
    jax.block_until_ready((z, decoded))
    assert z.shape == (N, C, H, W) and decoded.shape == (N, C, H, W)

    # Structural check vs. an XLA reference with the same precision choice (tight tol).
    z_ref, d_ref = _reference_forward(params, x, n_ts=1, mode="train", bf16_operands=True)
    err_z = float(jnp.max(jnp.abs(z - z_ref)))
    err_d = float(jnp.max(jnp.abs(decoded - d_ref)))
    assert err_z < 2e-2 and err_d < 2e-2, (err_z, err_d)
    # Loose check vs. the exact-f32 reference (bounds the bf16-operand drift).
    z_f32, d_f32 = _reference_forward(params, x, n_ts=1, mode="train", bf16_operands=False)
    err_z32 = float(jnp.max(jnp.abs(z - z_f32)))
    err_d32 = float(jnp.max(jnp.abs(decoded - d_f32)))
    assert err_z32 < 2e-1 and err_d32 < 2e-1, (err_z32, err_d32)

    # --- pred mode: the whole n_ts timestep rollout is fused into one pallas_call ---
    n_ts = 3
    fwd_pred = jax.jit(partial(model_forward, n_ts=n_ts, mode="pred"))
    zp, dp = fwd_pred(params, x)
    jax.block_until_ready((zp, dp))
    assert zp.shape == (n_ts, N, C, H, W) and dp.shape == (n_ts, N, C, H, W)
    zp_ref, dp_ref = _reference_forward(params, x, n_ts=n_ts, mode="pred",
                                        bf16_operands=True)
    err_zp = float(jnp.max(jnp.abs(zp - zp_ref)))
    err_dp = float(jnp.max(jnp.abs(dp - dp_ref)))
    assert err_zp < 2e-2 and err_dp < 2e-2, (err_zp, err_dp)

    print("KERNEL_OK")
</pallas_src>

<mosaic_0001>
module attributes {stable_mosaic.version = 11 : i64} {
  func.func @_fused_kernel(%arg0: i32, %arg1: memref<1x4x256xf32, #tpu.memory_space<vmem>>, %arg2: memref<2x9x32x4xbf16, #tpu.memory_space<vmem>>, %arg3: memref<2x9x4x32xbf16, #tpu.memory_space<vmem>>, %arg4: memref<2x32x1xf32, #tpu.memory_space<vmem>>, %arg5: memref<2x4x1xf32, #tpu.memory_space<vmem>>, %arg6: memref<1x4x256xf32, #tpu.memory_space<vmem>>, %arg7: memref<1x4x256xf32, #tpu.memory_space<vmem>>) attributes {dimension_semantics = [#tpu.dimension_semantics<parallel>], iteration_bounds = array<i64: 2>, scalar_prefetch = 0 : i64, scratch_operands = 0 : i64, tpu.core_type = #tpu.core_type<tc>, window_params = [{transform_indices = @transform_0, window_bounds = array<i64: 1, 4, 256>}, {pipeline_mode = #tpu.pipeline_mode<synchronous>, transform_indices = @transform_1, window_bounds = array<i64: 2, 9, 32, 4>}, {pipeline_mode = #tpu.pipeline_mode<synchronous>, transform_indices = @transform_2, window_bounds = array<i64: 2, 9, 4, 32>}, {pipeline_mode = #tpu.pipeline_mode<synchronous>, transform_indices = @transform_3, window_bounds = array<i64: 2, 32, 1>}, {pipeline_mode = #tpu.pipeline_mode<synchronous>, transform_indices = @transform_4, window_bounds = array<i64: 2, 4, 1>}, {transform_indices = @transform_5, window_bounds = array<i64: 1, 4, 256>}, {transform_indices = @transform_6, window_bounds = array<i64: 1, 4, 256>}]} {
    %0 = tpu.iota {dimensions = array<i32: 1>} : vector<1x256xi32>
    %c16_i32 = arith.constant 16 : i32
    %c0_i32 = arith.constant 0 : i32
    %1 = arith.cmpi eq, %c16_i32, %c0_i32 : i32
    %c1_i32 = arith.constant 1 : i32
    %2 = arith.select %1, %c1_i32, %c16_i32 : i32
    %3 = vector.broadcast %2 : i32 to vector<1x256xi32>
    %4 = arith.remsi %0, %3 : vector<1x256xi32>
    %c0_i32_0 = arith.constant 0 : i32
    %5 = vector.broadcast %c0_i32_0 : i32 to vector<1x256xi32>
    %6 = arith.cmpi ne, %4, %5 : vector<1x256xi32>
    %c0_i32_1 = arith.constant 0 : i32
    %7 = vector.broadcast %c0_i32_1 : i32 to vector<1x256xi32>
    %8 = arith.cmpi slt, %4, %7 : vector<1x256xi32>
    %c0_i32_2 = arith.constant 0 : i32
    %9 = arith.cmpi slt, %2, %c0_i32_2 : i32
    %10 = vector.broadcast %9 : i1 to vector<1x256xi1>
    %11 = vector.broadcast %10 : vector<1x256xi1> to vector<1x256xi1>
    %12 = arith.xori %8, %11 : vector<1x256xi1>
    %13 = arith.andi %12, %6 : vector<1x256xi1>
    %14 = vector.broadcast %2 : i32 to vector<1x256xi32>
    %15 = arith.addi %4, %14 : vector<1x256xi32>
    %16 = arith.select %13, %15, %4 : vector<1x256xi1>, vector<1x256xi32>
    %c14_i32 = arith.constant 14 : i32
    %17 = vector.broadcast %c14_i32 : i32 to vector<1x256xi32>
    %18 = arith.cmpi sle, %16, %17 : vector<1x256xi32>
    %c1_i32_3 = arith.constant 1 : i32
    %19 = vector.broadcast %c1_i32_3 : i32 to vector<1x256xi32>
    %20 = arith.cmpi sge, %16, %19 : vector<1x256xi32>
    %c0 = arith.constant 0 : index
    %c0_4 = arith.constant 0 : index
    %c0_5 = arith.constant 0 : index
    %21 = vector.load %arg4[%c0, %c0_4, %c0_5] : memref<2x32x1xf32, #tpu.memory_space<vmem>>, vector<1x32x1xf32>
    %22 = vector.shape_cast %21 : vector<1x32x1xf32> to vector<32x1xf32>
    %c1 = arith.constant 1 : index
    %c0_6 = arith.constant 0 : index
    %c0_7 = arith.constant 0 : index
    %23 = vector.load %arg4[%c1, %c0_6, %c0_7] : memref<2x32x1xf32, #tpu.memory_space<vmem>>, vector<1x32x1xf32>
    %24 = vector.shape_cast %23 : vector<1x32x1xf32> to vector<32x1xf32>
    %c0_8 = arith.constant 0 : index
    %c0_9 = arith.constant 0 : index
    %c0_10 = arith.constant 0 : index
    %25 = vector.load %arg5[%c0_8, %c0_9, %c0_10] : memref<2x4x1xf32, #tpu.memory_space<vmem>>, vector<1x4x1xf32>
    %26 = vector.shape_cast %25 : vector<1x4x1xf32> to vector<4x1xf32>
    %c1_11 = arith.constant 1 : index
    %c0_12 = arith.constant 0 : index
    %c0_13 = arith.constant 0 : index
    %27 = vector.load %arg5[%c1_11, %c0_12, %c0_13] : memref<2x4x1xf32, #tpu.memory_space<vmem>>, vector<1x4x1xf32>
    %28 = vector.shape_cast %27 : vector<1x4x1xf32> to vector<4x1xf32>
    %c0_14 = arith.constant 0 : index
    %c0_15 = arith.constant 0 : index
    %c0_16 = arith.constant 0 : index
    %29 = vector.load %arg1[%c0_14, %c0_15, %c0_16] : memref<1x4x256xf32, #tpu.memory_space<vmem>>, vector<1x4x256xf32>
    %30 = vector.shape_cast %29 : vector<1x4x256xf32> to vector<4x256xf32>
    %cst = arith.constant 0.000000e+00 : bf16
    %31 = vector.broadcast %cst : bf16 to vector<4x17xbf16>
    %cst_17 = arith.constant 0.000000e+00 : f32
    %32 = vector.shape_cast %18 : vector<1x256xi1> to vector<1x256xi1>
    %33 = vector.broadcast %32 : vector<1x256xi1> to vector<4x256xi1>
    %34 = vector.broadcast %cst_17 : f32 to vector<4x256xf32>
    %35 = arith.select %33, %30, %34 : vector<4x256xi1>, vector<4x256xf32>
    %36 = arith.truncf %35 : vector<4x256xf32> to vector<4x256xbf16>
    %37 = tpu.concatenate %31, %36, %31 in 1 : vector<4x17xbf16>, vector<4x256xbf16>, vector<4x17xbf16> -> vector<4x290xbf16>
    %38 = arith.truncf %30 : vector<4x256xf32> to vector<4x256xbf16>
    %39 = tpu.concatenate %31, %38, %31 in 1 : vector<4x17xbf16>, vector<4x256xbf16>, vector<4x17xbf16> -> vector<4x290xbf16>
    %cst_18 = arith.constant 0.000000e+00 : f32
    %40 = vector.shape_cast %20 : vector<1x256xi1> to vector<1x256xi1>
    %41 = vector.broadcast %40 : vector<1x256xi1> to vector<4x256xi1>
    %42 = vector.broadcast %cst_18 : f32 to vector<4x256xf32>
    %43 = arith.select %41, %30, %42 : vector<4x256xi1>, vector<4x256xf32>
    %44 = arith.truncf %43 : vector<4x256xf32> to vector<4x256xbf16>
    %45 = tpu.concatenate %31, %44, %31 in 1 : vector<4x17xbf16>, vector<4x256xbf16>, vector<4x17xbf16> -> vector<4x290xbf16>
    %46 = vector.extract_strided_slice %37 {offsets = [0, 0], sizes = [4, 256], strides = [1, 1]} : vector<4x290xbf16> to vector<4x256xbf16>
    %c0_19 = arith.constant 0 : index
    %c0_20 = arith.constant 0 : index
    %c0_21 = arith.constant 0 : index
    %c0_22 = arith.constant 0 : index
    %47 = vector.load %arg2[%c0_19, %c0_20, %c0_21, %c0_22] : memref<2x9x32x4xbf16, #tpu.memory_space<vmem>>, vector<1x1x32x4xbf16>
    %48 = vector.shape_cast %47 : vector<1x1x32x4xbf16> to vector<32x4xbf16>
    %cst_23 = arith.constant dense<0.000000e+00> : vector<32x256xf32>
    %49 = tpu.matmul %48, %46, %cst_23 {dimension_numbers = #tpu.dot_dimension_numbers<[1], [0], [0], [1], [0, 0, 1, 1], [], []>} : vector<32x4xbf16>, vector<4x256xbf16>, vector<32x256xf32> -> vector<32x256xf32>
    %50 = vector.extract_strided_slice %39 {offsets = [0, 1], sizes = [4, 256], strides = [1, 1]} : vector<4x290xbf16> to vector<4x256xbf16>
    %c0_24 = arith.constant 0 : index
    %c1_25 = arith.constant 1 : index
    %c0_26 = arith.constant 0 : index
    %c0_27 = arith.constant 0 : index
    %51 = vector.load %arg2[%c0_24, %c1_25, %c0_26, %c0_27] : memref<2x9x32x4xbf16, #tpu.memory_space<vmem>>, vector<1x1x32x4xbf16>
    %52 = vector.shape_cast %51 : vector<1x1x32x4xbf16> to vector<32x4xbf16>
    %cst_28 = arith.constant dense<0.000000e+00> : vector<32x256xf32>
    %53 = tpu.matmul %52, %50, %cst_28 {dimension_numbers = #tpu.dot_dimension_numbers<[1], [0], [0], [1], [0, 0, 1, 1], [], []>} : vector<32x4xbf16>, vector<4x256xbf16>, vector<32x256xf32> -> vector<32x256xf32>
    %54 = arith.addf %49, %53 : vector<32x256xf32>
    %55 = vector.extract_strided_slice %45 {offsets = [0, 2], sizes = [4, 256], strides = [1, 1]} : vector<4x290xbf16> to vector<4x256xbf16>
    %c0_29 = arith.constant 0 : index
    %c2 = arith.constant 2 : index
    %c0_30 = arith.constant 0 : index
    %c0_31 = arith.constant 0 : index
    %56 = vector.load %arg2[%c0_29, %c2, %c0_30, %c0_31] : memref<2x9x32x4xbf16, #tpu.memory_space<vmem>>, vector<1x1x32x4xbf16>
    %57 = vector.shape_cast %56 : vector<1x1x32x4xbf16> to vector<32x4xbf16>
    %cst_32 = arith.constant dense<0.000000e+00> : vector<32x256xf32>
    %58 = tpu.matmul %57, %55, %cst_32 {dimension_numbers = #tpu.dot_dimension_numbers<[1], [0], [0], [1], [0, 0, 1, 1], [], []>} : vector<32x4xbf16>, vector<4x256xbf16>, vector<32x256xf32> -> vector<32x256xf32>
    %59 = arith.addf %54, %58 : vector<32x256xf32>
    %60 = vector.extract_strided_slice %37 {offsets = [0, 16], sizes = [4, 256], strides = [1, 1]} : vector<4x290xbf16> to vector<4x256xbf16>
    %c0_33 = arith.constant 0 : index
    %c3 = arith.constant 3 : index
    %c0_34 = arith.constant 0 : index
    %c0_35 = arith.constant 0 : index
    %61 = vector.load %arg2[%c0_33, %c3, %c0_34, %c0_35] : memref<2x9x32x4xbf16, #tpu.memory_space<vmem>>, vector<1x1x32x4xbf16>
    %62 = vector.shape_cast %61 : vector<1x1x32x4xbf16> to vector<32x4xbf16>
    %cst_36 = arith.constant dense<0.000000e+00> : vector<32x256xf32>
    %63 = tpu.matmul %62, %60, %cst_36 {dimension_numbers = #tpu.dot_dimension_numbers<[1], [0], [0], [1], [0, 0, 1, 1], [], []>} : vector<32x4xbf16>, vector<4x256xbf16>, vector<32x256xf32> -> vector<32x256xf32>
    %64 = arith.addf %59, %63 : vector<32x256xf32>
    %65 = vector.extract_strided_slice %39 {offsets = [0, 17], sizes = [4, 256], strides = [1, 1]} : vector<4x290xbf16> to vector<4x256xbf16>
    %c0_37 = arith.constant 0 : index
    %c4 = arith.constant 4 : index
    %c0_38 = arith.constant 0 : index
    %c0_39 = arith.constant 0 : index
    %66 = vector.load %arg2[%c0_37, %c4, %c0_38, %c0_39] : memref<2x9x32x4xbf16, #tpu.memory_space<vmem>>, vector<1x1x32x4xbf16>
    %67 = vector.shape_cast %66 : vector<1x1x32x4xbf16> to vector<32x4xbf16>
    %cst_40 = arith.constant dense<0.000000e+00> : vector<32x256xf32>
    %68 = tpu.matmul %67, %65, %cst_40 {dimension_numbers = #tpu.dot_dimension_numbers<[1], [0], [0], [1], [0, 0, 1, 1], [], []>} : vector<32x4xbf16>, vector<4x256xbf16>, vector<32x256xf32> -> vector<32x256xf32>
    %69 = arith.addf %64, %68 : vector<32x256xf32>
    %70 = vector.extract_strided_slice %45 {offsets = [0, 18], sizes = [4, 256], strides = [1, 1]} : vector<4x290xbf16> to vector<4x256xbf16>
    %c0_41 = arith.constant 0 : index
    %c5 = arith.constant 5 : index
    %c0_42 = arith.constant 0 : index
    %c0_43 = arith.constant 0 : index
    %71 = vector.load %arg2[%c0_41, %c5, %c0_42, %c0_43] : memref<2x9x32x4xbf16, #tpu.memory_space<vmem>>, vector<1x1x32x4xbf16>
    %72 = vector.shape_cast %71 : vector<1x1x32x4xbf16> to vector<32x4xbf16>
    %cst_44 = arith.constant dense<0.000000e+00> : vector<32x256xf32>
    %73 = tpu.matmul %72, %70, %cst_44 {dimension_numbers = #tpu.dot_dimension_numbers<[1], [0], [0], [1], [0, 0, 1, 1], [], []>} : vector<32x4xbf16>, vector<4x256xbf16>, vector<32x256xf32> -> vector<32x256xf32>
    %74 = arith.addf %69, %73 : vector<32x256xf32>
    %75 = vector.extract_strided_slice %37 {offsets = [0, 32], sizes = [4, 256], strides = [1, 1]} : vector<4x290xbf16> to vector<4x256xbf16>
    %c0_45 = arith.constant 0 : index
    %c6 = arith.constant 6 : index
    %c0_46 = arith.constant 0 : index
    %c0_47 = arith.constant 0 : index
    %76 = vector.load %arg2[%c0_45, %c6, %c0_46, %c0_47] : memref<2x9x32x4xbf16, #tpu.memory_space<vmem>>, vector<1x1x32x4xbf16>
    %77 = vector.shape_cast %76 : vector<1x1x32x4xbf16> to vector<32x4xbf16>
    %cst_48 = arith.constant dense<0.000000e+00> : vector<32x256xf32>
    %78 = tpu.matmul %77, %75, %cst_48 {dimension_numbers = #tpu.dot_dimension_numbers<[1], [0], [0], [1], [0, 0, 1, 1], [], []>} : vector<32x4xbf16>, vector<4x256xbf16>, vector<32x256xf32> -> vector<32x256xf32>
    %79 = arith.addf %74, %78 : vector<32x256xf32>
    %80 = vector.extract_strided_slice %39 {offsets = [0, 33], sizes = [4, 256], strides = [1, 1]} : vector<4x290xbf16> to vector<4x256xbf16>
    %c0_49 = arith.constant 0 : index
    %c7 = arith.constant 7 : index
    %c0_50 = arith.constant 0 : index
    %c0_51 = arith.constant 0 : index
    %81 = vector.load %arg2[%c0_49, %c7, %c0_50, %c0_51] : memref<2x9x32x4xbf16, #tpu.memory_space<vmem>>, vector<1x1x32x4xbf16>
    %82 = vector.shape_cast %81 : vector<1x1x32x4xbf16> to vector<32x4xbf16>
    %cst_52 = arith.constant dense<0.000000e+00> : vector<32x256xf32>
    %83 = tpu.matmul %82, %80, %cst_52 {dimension_numbers = #tpu.dot_dimension_numbers<[1], [0], [0], [1], [0, 0, 1, 1], [], []>} : vector<32x4xbf16>, vector<4x256xbf16>, vector<32x256xf32> -> vector<32x256xf32>
    %84 = arith.addf %79, %83 : vector<32x256xf32>
    %85 = vector.extract_strided_slice %45 {offsets = [0, 34], sizes = [4, 256], strides = [1, 1]} : vector<4x290xbf16> to vector<4x256xbf16>
    %c0_53 = arith.constant 0 : index
    %c8 = arith.constant 8 : index
    %c0_54 = arith.constant 0 : index
    %c0_55 = arith.constant 0 : index
    %86 = vector.load %arg2[%c0_53, %c8, %c0_54, %c0_55] : memref<2x9x32x4xbf16, #tpu.memory_space<vmem>>, vector<1x1x32x4xbf16>
    %87 = vector.shape_cast %86 : vector<1x1x32x4xbf16> to vector<32x4xbf16>
    %cst_56 = arith.constant dense<0.000000e+00> : vector<32x256xf32>
    %88 = tpu.matmul %87, %85, %cst_56 {dimension_numbers = #tpu.dot_dimension_numbers<[1], [0], [0], [1], [0, 0, 1, 1], [], []>} : vector<32x4xbf16>, vector<4x256xbf16>, vector<32x256xf32> -> vector<32x256xf32>
    %89 = arith.addf %84, %88 : vector<32x256xf32>
    %90 = vector.broadcast %22 : vector<32x1xf32> to vector<32x256xf32>
    %91 = arith.addf %89, %90 : vector<32x256xf32>
    %cst_57 = arith.constant 0.000000e+00 : f32
    %92 = vector.broadcast %cst_57 : f32 to vector<32x256xf32>
    %93 = arith.maximumf %91, %92 : vector<32x256xf32>
    %cst_58 = arith.constant 0.000000e+00 : bf16
    %94 = vector.broadcast %cst_58 : bf16 to vector<32x17xbf16>
    %cst_59 = arith.constant 0.000000e+00 : f32
    %95 = vector.shape_cast %18 : vector<1x256xi1> to vector<1x256xi1>
    %96 = vector.broadcast %95 : vector<1x256xi1> to vector<32x256xi1>
    %97 = vector.broadcast %cst_59 : f32 to vector<32x256xf32>
    %98 = arith.select %96, %93, %97 : vector<32x256xi1>, vector<32x256xf32>
    %99 = arith.truncf %98 : vector<32x256xf32> to vector<32x256xbf16>
    %100 = tpu.concatenate %94, %99, %94 in 1 : vector<32x17xbf16>, vector<32x256xbf16>, vector<32x17xbf16> -> vector<32x290xbf16>
    %101 = arith.truncf %93 : vector<32x256xf32> to vector<32x256xbf16>
    %102 = tpu.concatenate %94, %101, %94 in 1 : vector<32x17xbf16>, vector<32x256xbf16>, vector<32x17xbf16> -> vector<32x290xbf16>
    %cst_60 = arith.constant 0.000000e+00 : f32
    %103 = vector.shape_cast %20 : vector<1x256xi1> to vector<1x256xi1>
    %104 = vector.broadcast %103 : vector<1x256xi1> to vector<32x256xi1>
    %105 = vector.broadcast %cst_60 : f32 to vector<32x256xf32>
    %106 = arith.select %104, %93, %105 : vector<32x256xi1>, vector<32x256xf32>
    %107 = arith.truncf %106 : vector<32x256xf32> to vector<32x256xbf16>
    %108 = tpu.concatenate %94, %107, %94 in 1 : vector<32x17xbf16>, vector<32x256xbf16>, vector<32x17xbf16> -> vector<32x290xbf16>
    %109 = vector.extract_strided_slice %100 {offsets = [0, 0], sizes = [32, 256], strides = [1, 1]} : vector<32x290xbf16> to vector<32x256xbf16>
    %c0_61 = arith.constant 0 : index
    %c0_62 = arith.constant 0 : index
    %c0_63 = arith.constant 0 : index
    %c0_64 = arith.constant 0 : index
    %110 = vector.load %arg3[%c0_61, %c0_62, %c0_63, %c0_64] : memref<2x9x4x32xbf16, #tpu.memory_space<vmem>>, vector<1x1x4x32xbf16>
    %111 = vector.shape_cast %110 : vector<1x1x4x32xbf16> to vector<4x32xbf16>
    %cst_65 = arith.constant dense<0.000000e+00> : vector<4x256xf32>
    %112 = tpu.matmul %111, %109, %cst_65 {dimension_numbers = #tpu.dot_dimension_numbers<[1], [0], [0], [1], [0, 0, 1, 1], [], []>} : vector<4x32xbf16>, vector<32x256xbf16>, vector<4x256xf32> -> vector<4x256xf32>
    %113 = vector.extract_strided_slice %102 {offsets = [0, 1], sizes = [32, 256], strides = [1, 1]} : vector<32x290xbf16> to vector<32x256xbf16>
    %c0_66 = arith.constant 0 : index
    %c1_67 = arith.constant 1 : index
    %c0_68 = arith.constant 0 : index
    %c0_69 = arith.constant 0 : index
    %114 = vector.load %arg3[%c0_66, %c1_67, %c0_68, %c0_69] : memref<2x9x4x32xbf16, #tpu.memory_space<vmem>>, vector<1x1x4x32xbf16>
    %115 = vector.shape_cast %114 : vector<1x1x4x32xbf16> to vector<4x32xbf16>
    %cst_70 = arith.constant dense<0.000000e+00> : vector<4x256xf32>
    %116 = tpu.matmul %115, %113, %cst_70 {dimension_numbers = #tpu.dot_dimension_numbers<[1], [0], [0], [1], [0, 0, 1, 1], [], []>} : vector<4x32xbf16>, vector<32x256xbf16>, vector<4x256xf32> -> vector<4x256xf32>
    %117 = arith.addf %112, %116 : vector<4x256xf32>
    %118 = vector.extract_strided_slice %108 {offsets = [0, 2], sizes = [32, 256], strides = [1, 1]} : vector<32x290xbf16> to vector<32x256xbf16>
    %c0_71 = arith.constant 0 : index
    %c2_72 = arith.constant 2 : index
    %c0_73 = arith.constant 0 : index
    %c0_74 = arith.constant 0 : index
    %119 = vector.load %arg3[%c0_71, %c2_72, %c0_73, %c0_74] : memref<2x9x4x32xbf16, #tpu.memory_space<vmem>>, vector<1x1x4x32xbf16>
    %120 = vector.shape_cast %119 : vector<1x1x4x32xbf16> to vector<4x32xbf16>
    %cst_75 = arith.constant dense<0.000000e+00> : vector<4x256xf32>
    %121 = tpu.matmul %120, %118, %cst_75 {dimension_numbers = #tpu.dot_dimension_numbers<[1], [0], [0], [1], [0, 0, 1, 1], [], []>} : vector<4x32xbf16>, vector<32x256xbf16>, vector<4x256xf32> -> vector<4x256xf32>
    %122 = arith.addf %117, %121 : vector<4x256xf32>
    %123 = vector.extract_strided_slice %100 {offsets = [0, 16], sizes = [32, 256], strides = [1, 1]} : vector<32x290xbf16> to vector<32x256xbf16>
    %c0_76 = arith.constant 0 : index
    %c3_77 = arith.constant 3 : index
    %c0_78 = arith.constant 0 : index
    %c0_79 = arith.constant 0 : index
    %124 = vector.load %arg3[%c0_76, %c3_77, %c0_78, %c0_79] : memref<2x9x4x32xbf16, #tpu.memory_space<vmem>>, vector<1x1x4x32xbf16>
    %125 = vector.shape_cast %124 : vector<1x1x4x32xbf16> to vector<4x32xbf16>
    %cst_80 = arith.constant dense<0.000000e+00> : vector<4x256xf32>
    %126 = tpu.matmul %125, %123, %cst_80 {dimension_numbers = #tpu.dot_dimension_numbers<[1], [0], [0], [1], [0, 0, 1, 1], [], []>} : vector<4x32xbf16>, vector<32x256xbf16>, vector<4x256xf32> -> vector<4x256xf32>
    %127 = arith.addf %122, %126 : vector<4x256xf32>
    %128 = vector.extract_strided_slice %102 {offsets = [0, 17], sizes = [32, 256], strides = [1, 1]} : vector<32x290xbf16> to vector<32x256xbf16>
    %c0_81 = arith.constant 0 : index
    %c4_82 = arith.constant 4 : index
    %c0_83 = arith.constant 0 : index
    %c0_84 = arith.constant 0 : index
    %129 = vector.load %arg3[%c0_81, %c4_82, %c0_83, %c0_84] : memref<2x9x4x32xbf16, #tpu.memory_space<vmem>>, vector<1x1x4x32xbf16>
    %130 = vector.shape_cast %129 : vector<1x1x4x32xbf16> to vector<4x32xbf16>
    %cst_85 = arith.constant dense<0.000000e+00> : vector<4x256xf32>
    %131 = tpu.matmul %130, %128, %cst_85 {dimension_numbers = #tpu.dot_dimension_numbers<[1], [0], [0], [1], [0, 0, 1, 1], [], []>} : vector<4x32xbf16>, vector<32x256xbf16>, vector<4x256xf32> -> vector<4x256xf32>
    %132 = arith.addf %127, %131 : vector<4x256xf32>
    %133 = vector.extract_strided_slice %108 {offsets = [0, 18], sizes = [32, 256], strides = [1, 1]} : vector<32x290xbf16> to vector<32x256xbf16>
    %c0_86 = arith.constant 0 : index
    %c5_87 = arith.constant 5 : index
    %c0_88 = arith.constant 0 : index
    %c0_89 = arith.constant 0 : index
    %134 = vector.load %arg3[%c0_86, %c5_87, %c0_88, %c0_89] : memref<2x9x4x32xbf16, #tpu.memory_space<vmem>>, vector<1x1x4x32xbf16>
    %135 = vector.shape_cast %134 : vector<1x1x4x32xbf16> to vector<4x32xbf16>
    %cst_90 = arith.constant dense<0.000000e+00> : vector<4x256xf32>
    %136 = tpu.matmul %135, %133, %cst_90 {dimension_numbers = #tpu.dot_dimension_numbers<[1], [0], [0], [1], [0, 0, 1, 1], [], []>} : vector<4x32xbf16>, vector<32x256xbf16>, vector<4x256xf32> -> vector<4x256xf32>
    %137 = arith.addf %132, %136 : vector<4x256xf32>
    %138 = vector.extract_strided_slice %100 {offsets = [0, 32], sizes = [32, 256], strides = [1, 1]} : vector<32x290xbf16> to vector<32x256xbf16>
    %c0_91 = arith.constant 0 : index
    %c6_92 = arith.constant 6 : index
    %c0_93 = arith.constant 0 : index
    %c0_94 = arith.constant 0 : index
    %139 = vector.load %arg3[%c0_91, %c6_92, %c0_93, %c0_94] : memref<2x9x4x32xbf16, #tpu.memory_space<vmem>>, vector<1x1x4x32xbf16>
    %140 = vector.shape_cast %139 : vector<1x1x4x32xbf16> to vector<4x32xbf16>
    %cst_95 = arith.constant dense<0.000000e+00> : vector<4x256xf32>
    %141 = tpu.matmul %140, %138, %cst_95 {dimension_numbers = #tpu.dot_dimension_numbers<[1], [0], [0], [1], [0, 0, 1, 1], [], []>} : vector<4x32xbf16>, vector<32x256xbf16>, vector<4x256xf32> -> vector<4x256xf32>
    %142 = arith.addf %137, %141 : vector<4x256xf32>
    %143 = vector.extract_strided_slice %102 {offsets = [0, 33], sizes = [32, 256], strides = [1, 1]} : vector<32x290xbf16> to vector<32x256xbf16>
    %c0_96 = arith.constant 0 : index
    %c7_97 = arith.constant 7 : index
    %c0_98 = arith.constant 0 : index
    %c0_99 = arith.constant 0 : index
    %144 = vector.load %arg3[%c0_96, %c7_97, %c0_98, %c0_99] : memref<2x9x4x32xbf16, #tpu.memory_space<vmem>>, vector<1x1x4x32xbf16>
    %145 = vector.shape_cast %144 : vector<1x1x4x32xbf16> to vector<4x32xbf16>
    %cst_100 = arith.constant dense<0.000000e+00> : vector<4x256xf32>
    %146 = tpu.matmul %145, %143, %cst_100 {dimension_numbers = #tpu.dot_dimension_numbers<[1], [0], [0], [1], [0, 0, 1, 1], [], []>} : vector<4x32xbf16>, vector<32x256xbf16>, vector<4x256xf32> -> vector<4x256xf32>
    %147 = arith.addf %142, %146 : vector<4x256xf32>
    %148 = vector.extract_strided_slice %108 {offsets = [0, 34], sizes = [32, 256], strides = [1, 1]} : vector<32x290xbf16> to vector<32x256xbf16>
    %c0_101 = arith.constant 0 : index
    %c8_102 = arith.constant 8 : index
    %c0_103 = arith.constant 0 : index
    %c0_104 = arith.constant 0 : index
    %149 = vector.load %arg3[%c0_101, %c8_102, %c0_103, %c0_104] : memref<2x9x4x32xbf16, #tpu.memory_space<vmem>>, vector<1x1x4x32xbf16>
    %150 = vector.shape_cast %149 : vector<1x1x4x32xbf16> to vector<4x32xbf16>
    %cst_105 = arith.constant dense<0.000000e+00> : vector<4x256xf32>
    %151 = tpu.matmul %150, %148, %cst_105 {dimension_numbers = #tpu.dot_dimension_numbers<[1], [0], [0], [1], [0, 0, 1, 1], [], []>} : vector<4x32xbf16>, vector<32x256xbf16>, vector<4x256xf32> -> vector<4x256xf32>
    %152 = arith.addf %147, %151 : vector<4x256xf32>
    %153 = vector.broadcast %26 : vector<4x1xf32> to vector<4x256xf32>
    %154 = arith.addf %152, %153 : vector<4x256xf32>
    %cst_106 = arith.constant 0.000000e+00 : bf16
    %155 = vector.broadcast %cst_106 : bf16 to vector<4x17xbf16>
    %cst_107 = arith.constant 0.000000e+00 : f32
    %156 = vector.shape_cast %18 : vector<1x256xi1> to vector<1x256xi1>
    %157 = vector.broadcast %156 : vector<1x256xi1> to vector<4x256xi1>
    %158 = vector.broadcast %cst_107 : f32 to vector<4x256xf32>
    %159 = arith.select %157, %154, %158 : vector<4x256xi1>, vector<4x256xf32>
    %160 = arith.truncf %159 : vector<4x256xf32> to vector<4x256xbf16>
    %161 = tpu.concatenate %155, %160, %155 in 1 : vector<4x17xbf16>, vector<4x256xbf16>, vector<4x17xbf16> -> vector<4x290xbf16>
    %162 = arith.truncf %154 : vector<4x256xf32> to vector<4x256xbf16>
    %163 = tpu.concatenate %155, %162, %155 in 1 : vector<4x17xbf16>, vector<4x256xbf16>, vector<4x17xbf16> -> vector<4x290xbf16>
    %cst_108 = arith.constant 0.000000e+00 : f32
    %164 = vector.shape_cast %20 : vector<1x256xi1> to vector<1x256xi1>
    %165 = vector.broadcast %164 : vector<1x256xi1> to vector<4x256xi1>
    %166 = vector.broadcast %cst_108 : f32 to vector<4x256xf32>
    %167 = arith.select %165, %154, %166 : vector<4x256xi1>, vector<4x256xf32>
    %168 = arith.truncf %167 : vector<4x256xf32> to vector<4x256xbf16>
    %169 = tpu.concatenate %155, %168, %155 in 1 : vector<4x17xbf16>, vector<4x256xbf16>, vector<4x17xbf16> -> vector<4x290xbf16>
    %170 = vector.extract_strided_slice %161 {offsets = [0, 0], sizes = [4, 256], strides = [1, 1]} : vector<4x290xbf16> to vector<4x256xbf16>
    %c0_109 = arith.constant 0 : index
    %c0_110 = arith.constant 0 : index
    %c0_111 = arith.constant 0 : index
    %c0_112 = arith.constant 0 : index
    %171 = vector.load %arg2[%c0_109, %c0_110, %c0_111, %c0_112] : memref<2x9x32x4xbf16, #tpu.memory_space<vmem>>, vector<1x1x32x4xbf16>
    %172 = vector.shape_cast %171 : vector<1x1x32x4xbf16> to vector<32x4xbf16>
    %cst_113 = arith.constant dense<0.000000e+00> : vector<32x256xf32>
    %173 = tpu.matmul %172, %170, %cst_113 {dimension_numbers = #tpu.dot_dimension_numbers<[1], [0], [0], [1], [0, 0, 1, 1], [], []>} : vector<32x4xbf16>, vector<4x256xbf16>, vector<32x256xf32> -> vector<32x256xf32>
    %174 = vector.extract_strided_slice %163 {offsets = [0, 1], sizes = [4, 256], strides = [1, 1]} : vector<4x290xbf16> to vector<4x256xbf16>
    %c0_114 = arith.constant 0 : index
    %c1_115 = arith.constant 1 : index
    %c0_116 = arith.constant 0 : index
    %c0_117 = arith.constant 0 : index
    %175 = vector.load %arg2[%c0_114, %c1_115, %c0_116, %c0_117] : memref<2x9x32x4xbf16, #tpu.memory_space<vmem>>, vector<1x1x32x4xbf16>
    %176 = vector.shape_cast %175 : vector<1x1x32x4xbf16> to vector<32x4xbf16>
    %cst_118 = arith.constant dense<0.000000e+00> : vector<32x256xf32>
    %177 = tpu.matmul %176, %174, %cst_118 {dimension_numbers = #tpu.dot_dimension_numbers<[1], [0], [0], [1], [0, 0, 1, 1], [], []>} : vector<32x4xbf16>, vector<4x256xbf16>, vector<32x256xf32> -> vector<32x256xf32>
    %178 = arith.addf %173, %177 : vector<32x256xf32>
    %179 = vector.extract_strided_slice %169 {offsets = [0, 2], sizes = [4, 256], strides = [1, 1]} : vector<4x290xbf16> to vector<4x256xbf16>
    %c0_119 = arith.constant 0 : index
    %c2_120 = arith.constant 2 : index
    %c0_121 = arith.constant 0 : index
    %c0_122 = arith.constant 0 : index
    %180 = vector.load %arg2[%c0_119, %c2_120, %c0_121, %c0_122] : memref<2x9x32x4xbf16, #tpu.memory_space<vmem>>, vector<1x1x32x4xbf16>
    %181 = vector.shape_cast %180 : vector<1x1x32x4xbf16> to vector<32x4xbf16>
    %cst_123 = arith.constant dense<0.000000e+00> : vector<32x256xf32>
    %182 = tpu.matmul %181, %179, %cst_123 {dimension_numbers = #tpu.dot_dimension_numbers<[1], [0], [0], [1], [0, 0, 1, 1], [], []>} : vector<32x4xbf16>, vector<4x256xbf16>, vector<32x256xf32> -> vector<32x256xf32>
    %183 = arith.addf %178, %182 : vector<32x256xf32>
    %184 = vector.extract_strided_slice %161 {offsets = [0, 16], sizes = [4, 256], strides = [1, 1]} : vector<4x290xbf16> to vector<4x256xbf16>
    %c0_124 = arith.constant 0 : index
    %c3_125 = arith.constant 3 : index
    %c0_126 = arith.constant 0 : index
    %c0_127 = arith.constant 0 : index
    %185 = vector.load %arg2[%c0_124, %c3_125, %c0_126, %c0_127] : memref<2x9x32x4xbf16, #tpu.memory_space<vmem>>, vector<1x1x32x4xbf16>
    %186 = vector.shape_cast %185 : vector<1x1x32x4xbf16> to vector<32x4xbf16>
    %cst_128 = arith.constant dense<0.000000e+00> : vector<32x256xf32>
    %187 = tpu.matmul %186, %184, %cst_128 {dimension_numbers = #tpu.dot_dimension_numbers<[1], [0], [0], [1], [0, 0, 1, 1], [], []>} : vector<32x4xbf16>, vector<4x256xbf16>, vector<32x256xf32> -> vector<32x256xf32>
    %188 = arith.addf %183, %187 : vector<32x256xf32>
    %189 = vector.extract_strided_slice %163 {offsets = [0, 17], sizes = [4, 256], strides = [1, 1]} : vector<4x290xbf16> to vector<4x256xbf16>
    %c0_129 = arith.constant 0 : index
    %c4_130 = arith.constant 4 : index
    %c0_131 = arith.constant 0 : index
    %c0_132 = arith.constant 0 : index
    %190 = vector.load %arg2[%c0_129, %c4_130, %c0_131, %c0_132] : memref<2x9x32x4xbf16, #tpu.memory_space<vmem>>, vector<1x1x32x4xbf16>
    %191 = vector.shape_cast %190 : vector<1x1x32x4xbf16> to vector<32x4xbf16>
    %cst_133 = arith.constant dense<0.000000e+00> : vector<32x256xf32>
    %192 = tpu.matmul %191, %189, %cst_133 {dimension_numbers = #tpu.dot_dimension_numbers<[1], [0], [0], [1], [0, 0, 1, 1], [], []>} : vector<32x4xbf16>, vector<4x256xbf16>, vector<32x256xf32> -> vector<32x256xf32>
    %193 = arith.addf %188, %192 : vector<32x256xf32>
    %194 = vector.extract_strided_slice %169 {offsets = [0, 18], sizes = [4, 256], strides = [1, 1]} : vector<4x290xbf16> to vector<4x256xbf16>
    %c0_134 = arith.constant 0 : index
    %c5_135 = arith.constant 5 : index
    %c0_136 = arith.constant 0 : index
    %c0_137 = arith.constant 0 : index
    %195 = vector.load %arg2[%c0_134, %c5_135, %c0_136, %c0_137] : memref<2x9x32x4xbf16, #tpu.memory_space<vmem>>, vector<1x1x32x4xbf16>
    %196 = vector.shape_cast %195 : vector<1x1x32x4xbf16> to vector<32x4xbf16>
    %cst_138 = arith.constant dense<0.000000e+00> : vector<32x256xf32>
    %197 = tpu.matmul %196, %194, %cst_138 {dimension_numbers = #tpu.dot_dimension_numbers<[1], [0], [0], [1], [0, 0, 1, 1], [], []>} : vector<32x4xbf16>, vector<4x256xbf16>, vector<32x256xf32> -> vector<32x256xf32>
    %198 = arith.addf %193, %197 : vector<32x256xf32>
    %199 = vector.extract_strided_slice %161 {offsets = [0, 32], sizes = [4, 256], strides = [1, 1]} : vector<4x290xbf16> to vector<4x256xbf16>
    %c0_139 = arith.constant 0 : index
    %c6_140 = arith.constant 6 : index
    %c0_141 = arith.constant 0 : index
    %c0_142 = arith.constant 0 : index
    %200 = vector.load %arg2[%c0_139, %c6_140, %c0_141, %c0_142] : memref<2x9x32x4xbf16, #tpu.memory_space<vmem>>, vector<1x1x32x4xbf16>
    %201 = vector.shape_cast %200 : vector<1x1x32x4xbf16> to vector<32x4xbf16>
    %cst_143 = arith.constant dense<0.000000e+00> : vector<32x256xf32>
    %202 = tpu.matmul %201, %199, %cst_143 {dimension_numbers = #tpu.dot_dimension_numbers<[1], [0], [0], [1], [0, 0, 1, 1], [], []>} : vector<32x4xbf16>, vector<4x256xbf16>, vector<32x256xf32> -> vector<32x256xf32>
    %203 = arith.addf %198, %202 : vector<32x256xf32>
    %204 = vector.extract_strided_slice %163 {offsets = [0, 33], sizes = [4, 256], strides = [1, 1]} : vector<4x290xbf16> to vector<4x256xbf16>
    %c0_144 = arith.constant 0 : index
    %c7_145 = arith.constant 7 : index
    %c0_146 = arith.constant 0 : index
    %c0_147 = arith.constant 0 : index
    %205 = vector.load %arg2[%c0_144, %c7_145, %c0_146, %c0_147] : memref<2x9x32x4xbf16, #tpu.memory_space<vmem>>, vector<1x1x32x4xbf16>
    %206 = vector.shape_cast %205 : vector<1x1x32x4xbf16> to vector<32x4xbf16>
    %cst_148 = arith.constant dense<0.000000e+00> : vector<32x256xf32>
    %207 = tpu.matmul %206, %204, %cst_148 {dimension_numbers = #tpu.dot_dimension_numbers<[1], [0], [0], [1], [0, 0, 1, 1], [], []>} : vector<32x4xbf16>, vector<4x256xbf16>, vector<32x256xf32> -> vector<32x256xf32>
    %208 = arith.addf %203, %207 : vector<32x256xf32>
    %209 = vector.extract_strided_slice %169 {offsets = [0, 34], sizes = [4, 256], strides = [1, 1]} : vector<4x290xbf16> to vector<4x256xbf16>
    %c0_149 = arith.constant 0 : index
    %c8_150 = arith.constant 8 : index
    %c0_151 = arith.constant 0 : index
    %c0_152 = arith.constant 0 : index
    %210 = vector.load %arg2[%c0_149, %c8_150, %c0_151, %c0_152] : memref<2x9x32x4xbf16, #tpu.memory_space<vmem>>, vector<1x1x32x4xbf16>
    %211 = vector.shape_cast %210 : vector<1x1x32x4xbf16> to vector<32x4xbf16>
    %cst_153 = arith.constant dense<0.000000e+00> : vector<32x256xf32>
    %212 = tpu.matmul %211, %209, %cst_153 {dimension_numbers = #tpu.dot_dimension_numbers<[1], [0], [0], [1], [0, 0, 1, 1], [], []>} : vector<32x4xbf16>, vector<4x256xbf16>, vector<32x256xf32> -> vector<32x256xf32>
    %213 = arith.addf %208, %212 : vector<32x256xf32>
    %214 = vector.broadcast %22 : vector<32x1xf32> to vector<32x256xf32>
    %215 = arith.addf %213, %214 : vector<32x256xf32>
    %cst_154 = arith.constant 0.000000e+00 : f32
    %216 = vector.broadcast %cst_154 : f32 to vector<32x256xf32>
    %217 = arith.maximumf %215, %216 : vector<32x256xf32>
    %cst_155 = arith.constant 0.000000e+00 : bf16
    %218 = vector.broadcast %cst_155 : bf16 to vector<32x17xbf16>
    %cst_156 = arith.constant 0.000000e+00 : f32
    %219 = vector.shape_cast %18 : vector<1x256xi1> to vector<1x256xi1>
    %220 = vector.broadcast %219 : vector<1x256xi1> to vector<32x256xi1>
    %221 = vector.broadcast %cst_156 : f32 to vector<32x256xf32>
    %222 = arith.select %220, %217, %221 : vector<32x256xi1>, vector<32x256xf32>
    %223 = arith.truncf %222 : vector<32x256xf32> to vector<32x256xbf16>
    %224 = tpu.concatenate %218, %223, %218 in 1 : vector<32x17xbf16>, vector<32x256xbf16>, vector<32x17xbf16> -> vector<32x290xbf16>
    %225 = arith.truncf %217 : vector<32x256xf32> to vector<32x256xbf16>
    %226 = tpu.concatenate %218, %225, %218 in 1 : vector<32x17xbf16>, vector<32x256xbf16>, vector<32x17xbf16> -> vector<32x290xbf16>
    %cst_157 = arith.constant 0.000000e+00 : f32
    %227 = vector.shape_cast %20 : vector<1x256xi1> to vector<1x256xi1>
    %228 = vector.broadcast %227 : vector<1x256xi1> to vector<32x256xi1>
    %229 = vector.broadcast %cst_157 : f32 to vector<32x256xf32>
    %230 = arith.select %228, %217, %229 : vector<32x256xi1>, vector<32x256xf32>
    %231 = arith.truncf %230 : vector<32x256xf32> to vector<32x256xbf16>
    %232 = tpu.concatenate %218, %231, %218 in 1 : vector<32x17xbf16>, vector<32x256xbf16>, vector<32x17xbf16> -> vector<32x290xbf16>
    %233 = vector.extract_strided_slice %224 {offsets = [0, 0], sizes = [32, 256], strides = [1, 1]} : vector<32x290xbf16> to vector<32x256xbf16>
    %c0_158 = arith.constant 0 : index
    %c0_159 = arith.constant 0 : index
    %c0_160 = arith.constant 0 : index
    %c0_161 = arith.constant 0 : index
    %234 = vector.load %arg3[%c0_158, %c0_159, %c0_160, %c0_161] : memref<2x9x4x32xbf16, #tpu.memory_space<vmem>>, vector<1x1x4x32xbf16>
    %235 = vector.shape_cast %234 : vector<1x1x4x32xbf16> to vector<4x32xbf16>
    %cst_162 = arith.constant dense<0.000000e+00> : vector<4x256xf32>
    %236 = tpu.matmul %235, %233, %cst_162 {dimension_numbers = #tpu.dot_dimension_numbers<[1], [0], [0], [1], [0, 0, 1, 1], [], []>} : vector<4x32xbf16>, vector<32x256xbf16>, vector<4x256xf32> -> vector<4x256xf32>
    %237 = vector.extract_strided_slice %226 {offsets = [0, 1], sizes = [32, 256], strides = [1, 1]} : vector<32x290xbf16> to vector<32x256xbf16>
    %c0_163 = arith.constant 0 : index
    %c1_164 = arith.constant 1 : index
    %c0_165 = arith.constant 0 : index
    %c0_166 = arith.constant 0 : index
    %238 = vector.load %arg3[%c0_163, %c1_164, %c0_165, %c0_166] : memref<2x9x4x32xbf16, #tpu.memory_space<vmem>>, vector<1x1x4x32xbf16>
    %239 = vector.shape_cast %238 : vector<1x1x4x32xbf16> to vector<4x32xbf16>
    %cst_167 = arith.constant dense<0.000000e+00> : vector<4x256xf32>
    %240 = tpu.matmul %239, %237, %cst_167 {dimension_numbers = #tpu.dot_dimension_numbers<[1], [0], [0], [1], [0, 0, 1, 1], [], []>} : vector<4x32xbf16>, vector<32x256xbf16>, vector<4x256xf32> -> vector<4x256xf32>
    %241 = arith.addf %236, %240 : vector<4x256xf32>
    %242 = vector.extract_strided_slice %232 {offsets = [0, 2], sizes = [32, 256], strides = [1, 1]} : vector<32x290xbf16> to vector<32x256xbf16>
    %c0_168 = arith.constant 0 : index
    %c2_169 = arith.constant 2 : index
    %c0_170 = arith.constant 0 : index
    %c0_171 = arith.constant 0 : index
    %243 = vector.load %arg3[%c0_168, %c2_169, %c0_170, %c0_171] : memref<2x9x4x32xbf16, #tpu.memory_space<vmem>>, vector<1x1x4x32xbf16>
    %244 = vector.shape_cast %243 : vector<1x1x4x32xbf16> to vector<4x32xbf16>
    %cst_172 = arith.constant dense<0.000000e+00> : vector<4x256xf32>
    %245 = tpu.matmul %244, %242, %cst_172 {dimension_numbers = #tpu.dot_dimension_numbers<[1], [0], [0], [1], [0, 0, 1, 1], [], []>} : vector<4x32xbf16>, vector<32x256xbf16>, vector<4x256xf32> -> vector<4x256xf32>
    %246 = arith.addf %241, %245 : vector<4x256xf32>
    %247 = vector.extract_strided_slice %224 {offsets = [0, 16], sizes = [32, 256], strides = [1, 1]} : vector<32x290xbf16> to vector<32x256xbf16>
    %c0_173 = arith.constant 0 : index
    %c3_174 = arith.constant 3 : index
    %c0_175 = arith.constant 0 : index
    %c0_176 = arith.constant 0 : index
    %248 = vector.load %arg3[%c0_173, %c3_174, %c0_175, %c0_176] : memref<2x9x4x32xbf16, #tpu.memory_space<vmem>>, vector<1x1x4x32xbf16>
    %249 = vector.shape_cast %248 : vector<1x1x4x32xbf16> to vector<4x32xbf16>
    %cst_177 = arith.constant dense<0.000000e+00> : vector<4x256xf32>
    %250 = tpu.matmul %249, %247, %cst_177 {dimension_numbers = #tpu.dot_dimension_numbers<[1], [0], [0], [1], [0, 0, 1, 1], [], []>} : vector<4x32xbf16>, vector<32x256xbf16>, vector<4x256xf32> -> vector<4x256xf32>
    %251 = arith.addf %246, %250 : vector<4x256xf32>
    %252 = vector.extract_strided_slice %226 {offsets = [0, 17], sizes = [32, 256], strides = [1, 1]} : vector<32x290xbf16> to vector<32x256xbf16>
    %c0_178 = arith.constant 0 : index
    %c4_179 = arith.constant 4 : index
    %c0_180 = arith.constant 0 : index
    %c0_181 = arith.constant 0 : index
    %253 = vector.load %arg3[%c0_178, %c4_179, %c0_180, %c0_181] : memref<2x9x4x32xbf16, #tpu.memory_space<vmem>>, vector<1x1x4x32xbf16>
    %254 = vector.shape_cast %253 : vector<1x1x4x32xbf16> to vector<4x32xbf16>
    %cst_182 = arith.constant dense<0.000000e+00> : vector<4x256xf32>
    %255 = tpu.matmul %254, %252, %cst_182 {dimension_numbers = #tpu.dot_dimension_numbers<[1], [0], [0], [1], [0, 0, 1, 1], [], []>} : vector<4x32xbf16>, vector<32x256xbf16>, vector<4x256xf32> -> vector<4x256xf32>
    %256 = arith.addf %251, %255 : vector<4x256xf32>
    %257 = vector.extract_strided_slice %232 {offsets = [0, 18], sizes = [32, 256], strides = [1, 1]} : vector<32x290xbf16> to vector<32x256xbf16>
    %c0_183 = arith.constant 0 : index
    %c5_184 = arith.constant 5 : index
    %c0_185 = arith.constant 0 : index
    %c0_186 = arith.constant 0 : index
    %258 = vector.load %arg3[%c0_183, %c5_184, %c0_185, %c0_186] : memref<2x9x4x32xbf16, #tpu.memory_space<vmem>>, vector<1x1x4x32xbf16>
    %259 = vector.shape_cast %258 : vector<1x1x4x32xbf16> to vector<4x32xbf16>
    %cst_187 = arith.constant dense<0.000000e+00> : vector<4x256xf32>
    %260 = tpu.matmul %259, %257, %cst_187 {dimension_numbers = #tpu.dot_dimension_numbers<[1], [0], [0], [1], [0, 0, 1, 1], [], []>} : vector<4x32xbf16>, vector<32x256xbf16>, vector<4x256xf32> -> vector<4x256xf32>
    %261 = arith.addf %256, %260 : vector<4x256xf32>
    %262 = vector.extract_strided_slice %224 {offsets = [0, 32], sizes = [32, 256], strides = [1, 1]} : vector<32x290xbf16> to vector<32x256xbf16>
    %c0_188 = arith.constant 0 : index
    %c6_189 = arith.constant 6 : index
    %c0_190 = arith.constant 0 : index
    %c0_191 = arith.constant 0 : index
    %263 = vector.load %arg3[%c0_188, %c6_189, %c0_190, %c0_191] : memref<2x9x4x32xbf16, #tpu.memory_space<vmem>>, vector<1x1x4x32xbf16>
    %264 = vector.shape_cast %263 : vector<1x1x4x32xbf16> to vector<4x32xbf16>
    %cst_192 = arith.constant dense<0.000000e+00> : vector<4x256xf32>
    %265 = tpu.matmul %264, %262, %cst_192 {dimension_numbers = #tpu.dot_dimension_numbers<[1], [0], [0], [1], [0, 0, 1, 1], [], []>} : vector<4x32xbf16>, vector<32x256xbf16>, vector<4x256xf32> -> vector<4x256xf32>
    %266 = arith.addf %261, %265 : vector<4x256xf32>
    %267 = vector.extract_strided_slice %226 {offsets = [0, 33], sizes = [32, 256], strides = [1, 1]} : vector<32x290xbf16> to vector<32x256xbf16>
    %c0_193 = arith.constant 0 : index
    %c7_194 = arith.constant 7 : index
    %c0_195 = arith.constant 0 : index
    %c0_196 = arith.constant 0 : index
    %268 = vector.load %arg3[%c0_193, %c7_194, %c0_195, %c0_196] : memref<2x9x4x32xbf16, #tpu.memory_space<vmem>>, vector<1x1x4x32xbf16>
    %269 = vector.shape_cast %268 : vector<1x1x4x32xbf16> to vector<4x32xbf16>
    %cst_197 = arith.constant dense<0.000000e+00> : vector<4x256xf32>
    %270 = tpu.matmul %269, %267, %cst_197 {dimension_numbers = #tpu.dot_dimension_numbers<[1], [0], [0], [1], [0, 0, 1, 1], [], []>} : vector<4x32xbf16>, vector<32x256xbf16>, vector<4x256xf32> -> vector<4x256xf32>
    %271 = arith.addf %266, %270 : vector<4x256xf32>
    %272 = vector.extract_strided_slice %232 {offsets = [0, 34], sizes = [32, 256], strides = [1, 1]} : vector<32x290xbf16> to vector<32x256xbf16>
    %c0_198 = arith.constant 0 : index
    %c8_199 = arith.constant 8 : index
    %c0_200 = arith.constant 0 : index
    %c0_201 = arith.constant 0 : index
    %273 = vector.load %arg3[%c0_198, %c8_199, %c0_200, %c0_201] : memref<2x9x4x32xbf16, #tpu.memory_space<vmem>>, vector<1x1x4x32xbf16>
    %274 = vector.shape_cast %273 : vector<1x1x4x32xbf16> to vector<4x32xbf16>
    %cst_202 = arith.constant dense<0.000000e+00> : vector<4x256xf32>
    %275 = tpu.matmul %274, %272, %cst_202 {dimension_numbers = #tpu.dot_dimension_numbers<[1], [0], [0], [1], [0, 0, 1, 1], [], []>} : vector<4x32xbf16>, vector<32x256xbf16>, vector<4x256xf32> -> vector<4x256xf32>
    %276 = arith.addf %271, %275 : vector<4x256xf32>
    %277 = vector.broadcast %26 : vector<4x1xf32> to vector<4x256xf32>
    %278 = arith.addf %276, %277 : vector<4x256xf32>
    %cst_203 = arith.constant 5.000000e-02 : f32
    %279 = vector.broadcast %cst_203 : f32 to vector<4x256xf32>
    %280 = arith.mulf %279, %278 : vector<4x256xf32>
    %281 = arith.addf %154, %280 : vector<4x256xf32>
    %cst_204 = arith.constant 0.000000e+00 : bf16
    %282 = vector.broadcast %cst_204 : bf16 to vector<4x17xbf16>
    %cst_205 = arith.constant 0.000000e+00 : f32
    %283 = vector.shape_cast %18 : vector<1x256xi1> to vector<1x256xi1>
    %284 = vector.broadcast %283 : vector<1x256xi1> to vector<4x256xi1>
    %285 = vector.broadcast %cst_205 : f32 to vector<4x256xf32>
    %286 = arith.select %284, %281, %285 : vector<4x256xi1>, vector<4x256xf32>
    %287 = arith.truncf %286 : vector<4x256xf32> to vector<4x256xbf16>
    %288 = tpu.concatenate %282, %287, %282 in 1 : vector<4x17xbf16>, vector<4x256xbf16>, vector<4x17xbf16> -> vector<4x290xbf16>
    %289 = arith.truncf %281 : vector<4x256xf32> to vector<4x256xbf16>
    %290 = tpu.concatenate %282, %289, %282 in 1 : vector<4x17xbf16>, vector<4x256xbf16>, vector<4x17xbf16> -> vector<4x290xbf16>
    %cst_206 = arith.constant 0.000000e+00 : f32
    %291 = vector.shape_cast %20 : vector<1x256xi1> to vector<1x256xi1>
    %292 = vector.broadcast %291 : vector<1x256xi1> to vector<4x256xi1>
    %293 = vector.broadcast %cst_206 : f32 to vector<4x256xf32>
    %294 = arith.select %292, %281, %293 : vector<4x256xi1>, vector<4x256xf32>
    %295 = arith.truncf %294 : vector<4x256xf32> to vector<4x256xbf16>
    %296 = tpu.concatenate %282, %295, %282 in 1 : vector<4x17xbf16>, vector<4x256xbf16>, vector<4x17xbf16> -> vector<4x290xbf16>
    %297 = vector.extract_strided_slice %288 {offsets = [0, 0], sizes = [4, 256], strides = [1, 1]} : vector<4x290xbf16> to vector<4x256xbf16>
    %c0_207 = arith.constant 0 : index
    %c0_208 = arith.constant 0 : index
    %c0_209 = arith.constant 0 : index
    %c0_210 = arith.constant 0 : index
    %298 = vector.load %arg2[%c0_207, %c0_208, %c0_209, %c0_210] : memref<2x9x32x4xbf16, #tpu.memory_space<vmem>>, vector<1x1x32x4xbf16>
    %299 = vector.shape_cast %298 : vector<1x1x32x4xbf16> to vector<32x4xbf16>
    %cst_211 = arith.constant dense<0.000000e+00> : vector<32x256xf32>
    %300 = tpu.matmul %299, %297, %cst_211 {dimension_numbers = #tpu.dot_dimension_numbers<[1], [0], [0], [1], [0, 0, 1, 1], [], []>} : vector<32x4xbf16>, vector<4x256xbf16>, vector<32x256xf32> -> vector<32x256xf32>
    %301 = vector.extract_strided_slice %290 {offsets = [0, 1], sizes = [4, 256], strides = [1, 1]} : vector<4x290xbf16> to vector<4x256xbf16>
    %c0_212 = arith.constant 0 : index
    %c1_213 = arith.constant 1 : index
    %c0_214 = arith.constant 0 : index
    %c0_215 = arith.constant 0 : index
    %302 = vector.load %arg2[%c0_212, %c1_213, %c0_214, %c0_215] : memref<2x9x32x4xbf16, #tpu.memory_space<vmem>>, vector<1x1x32x4xbf16>
    %303 = vector.shape_cast %302 : vector<1x1x32x4xbf16> to vector<32x4xbf16>
    %cst_216 = arith.constant dense<0.000000e+00> : vector<32x256xf32>
    %304 = tpu.matmul %303, %301, %cst_216 {dimension_numbers = #tpu.dot_dimension_numbers<[1], [0], [0], [1], [0, 0, 1, 1], [], []>} : vector<32x4xbf16>, vector<4x256xbf16>, vector<32x256xf32> -> vector<32x256xf32>
    %305 = arith.addf %300, %304 : vector<32x256xf32>
    %306 = vector.extract_strided_slice %296 {offsets = [0, 2], sizes = [4, 256], strides = [1, 1]} : vector<4x290xbf16> to vector<4x256xbf16>
    %c0_217 = arith.constant 0 : index
    %c2_218 = arith.constant 2 : index
    %c0_219 = arith.constant 0 : index
    %c0_220 = arith.constant 0 : index
    %307 = vector.load %arg2[%c0_217, %c2_218, %c0_219, %c0_220] : memref<2x9x32x4xbf16, #tpu.memory_space<vmem>>, vector<1x1x32x4xbf16>
    %308 = vector.shape_cast %307 : vector<1x1x32x4xbf16> to vector<32x4xbf16>
    %cst_221 = arith.constant dense<0.000000e+00> : vector<32x256xf32>
    %309 = tpu.matmul %308, %306, %cst_221 {dimension_numbers = #tpu.dot_dimension_numbers<[1], [0], [0], [1], [0, 0, 1, 1], [], []>} : vector<32x4xbf16>, vector<4x256xbf16>, vector<32x256xf32> -> vector<32x256xf32>
    %310 = arith.addf %305, %309 : vector<32x256xf32>
    %311 = vector.extract_strided_slice %288 {offsets = [0, 16], sizes = [4, 256], strides = [1, 1]} : vector<4x290xbf16> to vector<4x256xbf16>
    %c0_222 = arith.constant 0 : index
    %c3_223 = arith.constant 3 : index
    %c0_224 = arith.constant 0 : index
    %c0_225 = arith.constant 0 : index
    %312 = vector.load %arg2[%c0_222, %c3_223, %c0_224, %c0_225] : memref<2x9x32x4xbf16, #tpu.memory_space<vmem>>, vector<1x1x32x4xbf16>
    %313 = vector.shape_cast %312 : vector<1x1x32x4xbf16> to vector<32x4xbf16>
    %cst_226 = arith.constant dense<0.000000e+00> : vector<32x256xf32>
    %314 = tpu.matmul %313, %311, %cst_226 {dimension_numbers = #tpu.dot_dimension_numbers<[1], [0], [0], [1], [0, 0, 1, 1], [], []>} : vector<32x4xbf16>, vector<4x256xbf16>, vector<32x256xf32> -> vector<32x256xf32>
    %315 = arith.addf %310, %314 : vector<32x256xf32>
    %316 = vector.extract_strided_slice %290 {offsets = [0, 17], sizes = [4, 256], strides = [1, 1]} : vector<4x290xbf16> to vector<4x256xbf16>
    %c0_227 = arith.constant 0 : index
    %c4_228 = arith.constant 4 : index
    %c0_229 = arith.constant 0 : index
    %c0_230 = arith.constant 0 : index
    %317 = vector.load %arg2[%c0_227, %c4_228, %c0_229, %c0_230] : memref<2x9x32x4xbf16, #tpu.memory_space<vmem>>, vector<1x1x32x4xbf16>
    %318 = vector.shape_cast %317 : vector<1x1x32x4xbf16> to vector<32x4xbf16>
    %cst_231 = arith.constant dense<0.000000e+00> : vector<32x256xf32>
    %319 = tpu.matmul %318, %316, %cst_231 {dimension_numbers = #tpu.dot_dimension_numbers<[1], [0], [0], [1], [0, 0, 1, 1], [], []>} : vector<32x4xbf16>, vector<4x256xbf16>, vector<32x256xf32> -> vector<32x256xf32>
    %320 = arith.addf %315, %319 : vector<32x256xf32>
    %321 = vector.extract_strided_slice %296 {offsets = [0, 18], sizes = [4, 256], strides = [1, 1]} : vector<4x290xbf16> to vector<4x256xbf16>
    %c0_232 = arith.constant 0 : index
    %c5_233 = arith.constant 5 : index
    %c0_234 = arith.constant 0 : index
    %c0_235 = arith.constant 0 : index
    %322 = vector.load %arg2[%c0_232, %c5_233, %c0_234, %c0_235] : memref<2x9x32x4xbf16, #tpu.memory_space<vmem>>, vector<1x1x32x4xbf16>
    %323 = vector.shape_cast %322 : vector<1x1x32x4xbf16> to vector<32x4xbf16>
    %cst_236 = arith.constant dense<0.000000e+00> : vector<32x256xf32>
    %324 = tpu.matmul %323, %321, %cst_236 {dimension_numbers = #tpu.dot_dimension_numbers<[1], [0], [0], [1], [0, 0, 1, 1], [], []>} : vector<32x4xbf16>, vector<4x256xbf16>, vector<32x256xf32> -> vector<32x256xf32>
    %325 = arith.addf %320, %324 : vector<32x256xf32>
    %326 = vector.extract_strided_slice %288 {offsets = [0, 32], sizes = [4, 256], strides = [1, 1]} : vector<4x290xbf16> to vector<4x256xbf16>
    %c0_237 = arith.constant 0 : index
    %c6_238 = arith.constant 6 : index
    %c0_239 = arith.constant 0 : index
    %c0_240 = arith.constant 0 : index
    %327 = vector.load %arg2[%c0_237, %c6_238, %c0_239, %c0_240] : memref<2x9x32x4xbf16, #tpu.memory_space<vmem>>, vector<1x1x32x4xbf16>
    %328 = vector.shape_cast %327 : vector<1x1x32x4xbf16> to vector<32x4xbf16>
    %cst_241 = arith.constant dense<0.000000e+00> : vector<32x256xf32>
    %329 = tpu.matmul %328, %326, %cst_241 {dimension_numbers = #tpu.dot_dimension_numbers<[1], [0], [0], [1], [0, 0, 1, 1], [], []>} : vector<32x4xbf16>, vector<4x256xbf16>, vector<32x256xf32> -> vector<32x256xf32>
    %330 = arith.addf %325, %329 : vector<32x256xf32>
    %331 = vector.extract_strided_slice %290 {offsets = [0, 33], sizes = [4, 256], strides = [1, 1]} : vector<4x290xbf16> to vector<4x256xbf16>
    %c0_242 = arith.constant 0 : index
    %c7_243 = arith.constant 7 : index
    %c0_244 = arith.constant 0 : index
    %c0_245 = arith.constant 0 : index
    %332 = vector.load %arg2[%c0_242, %c7_243, %c0_244, %c0_245] : memref<2x9x32x4xbf16, #tpu.memory_space<vmem>>, vector<1x1x32x4xbf16>
    %333 = vector.shape_cast %332 : vector<1x1x32x4xbf16> to vector<32x4xbf16>
    %cst_246 = arith.constant dense<0.000000e+00> : vector<32x256xf32>
    %334 = tpu.matmul %333, %331, %cst_246 {dimension_numbers = #tpu.dot_dimension_numbers<[1], [0], [0], [1], [0, 0, 1, 1], [], []>} : vector<32x4xbf16>, vector<4x256xbf16>, vector<32x256xf32> -> vector<32x256xf32>
    %335 = arith.addf %330, %334 : vector<32x256xf32>
    %336 = vector.extract_strided_slice %296 {offsets = [0, 34], sizes = [4, 256], strides = [1, 1]} : vector<4x290xbf16> to vector<4x256xbf16>
    %c0_247 = arith.constant 0 : index
    %c8_248 = arith.constant 8 : index
    %c0_249 = arith.constant 0 : index
    %c0_250 = arith.constant 0 : index
    %337 = vector.load %arg2[%c0_247, %c8_248, %c0_249, %c0_250] : memref<2x9x32x4xbf16, #tpu.memory_space<vmem>>, vector<1x1x32x4xbf16>
    %338 = vector.shape_cast %337 : vector<1x1x32x4xbf16> to vector<32x4xbf16>
    %cst_251 = arith.constant dense<0.000000e+00> : vector<32x256xf32>
    %339 = tpu.matmul %338, %336, %cst_251 {dimension_numbers = #tpu.dot_dimension_numbers<[1], [0], [0], [1], [0, 0, 1, 1], [], []>} : vector<32x4xbf16>, vector<4x256xbf16>, vector<32x256xf32> -> vector<32x256xf32>
    %340 = arith.addf %335, %339 : vector<32x256xf32>
    %341 = vector.broadcast %22 : vector<32x1xf32> to vector<32x256xf32>
    %342 = arith.addf %340, %341 : vector<32x256xf32>
    %cst_252 = arith.constant 0.000000e+00 : f32
    %343 = vector.broadcast %cst_252 : f32 to vector<32x256xf32>
    %344 = arith.maximumf %342, %343 : vector<32x256xf32>
    %cst_253 = arith.constant 0.000000e+00 : bf16
    %345 = vector.broadcast %cst_253 : bf16 to vector<32x17xbf16>
    %cst_254 = arith.constant 0.000000e+00 : f32
    %346 = vector.shape_cast %18 : vector<1x256xi1> to vector<1x256xi1>
    %347 = vector.broadcast %346 : vector<1x256xi1> to vector<32x256xi1>
    %348 = vector.broadcast %cst_254 : f32 to vector<32x256xf32>
    %349 = arith.select %347, %344, %348 : vector<32x256xi1>, vector<32x256xf32>
    %350 = arith.truncf %349 : vector<32x256xf32> to vector<32x256xbf16>
    %351 = tpu.concatenate %345, %350, %345 in 1 : vector<32x17xbf16>, vector<32x256xbf16>, vector<32x17xbf16> -> vector<32x290xbf16>
    %352 = arith.truncf %344 : vector<32x256xf32> to vector<32x256xbf16>
    %353 = tpu.concatenate %345, %352, %345 in 1 : vector<32x17xbf16>, vector<32x256xbf16>, vector<32x17xbf16> -> vector<32x290xbf16>
    %cst_255 = arith.constant 0.000000e+00 : f32
    %354 = vector.shape_cast %20 : vector<1x256xi1> to vector<1x256xi1>
    %355 = vector.broadcast %354 : vector<1x256xi1> to vector<32x256xi1>
    %356 = vector.broadcast %cst_255 : f32 to vector<32x256xf32>
    %357 = arith.select %355, %344, %356 : vector<32x256xi1>, vector<32x256xf32>
    %358 = arith.truncf %357 : vector<32x256xf32> to vector<32x256xbf16>
    %359 = tpu.concatenate %345, %358, %345 in 1 : vector<32x17xbf16>, vector<32x256xbf16>, vector<32x17xbf16> -> vector<32x290xbf16>
    %360 = vector.extract_strided_slice %351 {offsets = [0, 0], sizes = [32, 256], strides = [1, 1]} : vector<32x290xbf16> to vector<32x256xbf16>
    %c0_256 = arith.constant 0 : index
    %c0_257 = arith.constant 0 : index
    %c0_258 = arith.constant 0 : index
    %c0_259 = arith.constant 0 : index
    %361 = vector.load %arg3[%c0_256, %c0_257, %c0_258, %c0_259] : memref<2x9x4x32xbf16, #tpu.memory_space<vmem>>, vector<1x1x4x32xbf16>
    %362 = vector.shape_cast %361 : vector<1x1x4x32xbf16> to vector<4x32xbf16>
    %cst_260 = arith.constant dense<0.000000e+00> : vector<4x256xf32>
    %363 = tpu.matmul %362, %360, %cst_260 {dimension_numbers = #tpu.dot_dimension_numbers<[1], [0], [0], [1], [0, 0, 1, 1], [], []>} : vector<4x32xbf16>, vector<32x256xbf16>, vector<4x256xf32> -> vector<4x256xf32>
    %364 = vector.extract_strided_slice %353 {offsets = [0, 1], sizes = [32, 256], strides = [1, 1]} : vector<32x290xbf16> to vector<32x256xbf16>
    %c0_261 = arith.constant 0 : index
    %c1_262 = arith.constant 1 : index
    %c0_263 = arith.constant 0 : index
    %c0_264 = arith.constant 0 : index
    %365 = vector.load %arg3[%c0_261, %c1_262, %c0_263, %c0_264] : memref<2x9x4x32xbf16, #tpu.memory_space<vmem>>, vector<1x1x4x32xbf16>
    %366 = vector.shape_cast %365 : vector<1x1x4x32xbf16> to vector<4x32xbf16>
    %cst_265 = arith.constant dense<0.000000e+00> : vector<4x256xf32>
    %367 = tpu.matmul %366, %364, %cst_265 {dimension_numbers = #tpu.dot_dimension_numbers<[1], [0], [0], [1], [0, 0, 1, 1], [], []>} : vector<4x32xbf16>, vector<32x256xbf16>, vector<4x256xf32> -> vector<4x256xf32>
    %368 = arith.addf %363, %367 : vector<4x256xf32>
    %369 = vector.extract_strided_slice %359 {offsets = [0, 2], sizes = [32, 256], strides = [1, 1]} : vector<32x290xbf16> to vector<32x256xbf16>
    %c0_266 = arith.constant 0 : index
    %c2_267 = arith.constant 2 : index
    %c0_268 = arith.constant 0 : index
    %c0_269 = arith.constant 0 : index
    %370 = vector.load %arg3[%c0_266, %c2_267, %c0_268, %c0_269] : memref<2x9x4x32xbf16, #tpu.memory_space<vmem>>, vector<1x1x4x32xbf16>
    %371 = vector.shape_cast %370 : vector<1x1x4x32xbf16> to vector<4x32xbf16>
    %cst_270 = arith.constant dense<0.000000e+00> : vector<4x256xf32>
    %372 = tpu.matmul %371, %369, %cst_270 {dimension_numbers = #tpu.dot_dimension_numbers<[1], [0], [0], [1], [0, 0, 1, 1], [], []>} : vector<4x32xbf16>, vector<32x256xbf16>, vector<4x256xf32> -> vector<4x256xf32>
    %373 = arith.addf %368, %372 : vector<4x256xf32>
    %374 = vector.extract_strided_slice %351 {offsets = [0, 16], sizes = [32, 256], strides = [1, 1]} : vector<32x290xbf16> to vector<32x256xbf16>
    %c0_271 = arith.constant 0 : index
    %c3_272 = arith.constant 3 : index
    %c0_273 = arith.constant 0 : index
    %c0_274 = arith.constant 0 : index
    %375 = vector.load %arg3[%c0_271, %c3_272, %c0_273, %c0_274] : memref<2x9x4x32xbf16, #tpu.memory_space<vmem>>, vector<1x1x4x32xbf16>
    %376 = vector.shape_cast %375 : vector<1x1x4x32xbf16> to vector<4x32xbf16>
    %cst_275 = arith.constant dense<0.000000e+00> : vector<4x256xf32>
    %377 = tpu.matmul %376, %374, %cst_275 {dimension_numbers = #tpu.dot_dimension_numbers<[1], [0], [0], [1], [0, 0, 1, 1], [], []>} : vector<4x32xbf16>, vector<32x256xbf16>, vector<4x256xf32> -> vector<4x256xf32>
    %378 = arith.addf %373, %377 : vector<4x256xf32>
    %379 = vector.extract_strided_slice %353 {offsets = [0, 17], sizes = [32, 256], strides = [1, 1]} : vector<32x290xbf16> to vector<32x256xbf16>
    %c0_276 = arith.constant 0 : index
    %c4_277 = arith.constant 4 : index
    %c0_278 = arith.constant 0 : index
    %c0_279 = arith.constant 0 : index
    %380 = vector.load %arg3[%c0_276, %c4_277, %c0_278, %c0_279] : memref<2x9x4x32xbf16, #tpu.memory_space<vmem>>, vector<1x1x4x32xbf16>
    %381 = vector.shape_cast %380 : vector<1x1x4x32xbf16> to vector<4x32xbf16>
    %cst_280 = arith.constant dense<0.000000e+00> : vector<4x256xf32>
    %382 = tpu.matmul %381, %379, %cst_280 {dimension_numbers = #tpu.dot_dimension_numbers<[1], [0], [0], [1], [0, 0, 1, 1], [], []>} : vector<4x32xbf16>, vector<32x256xbf16>, vector<4x256xf32> -> vector<4x256xf32>
    %383 = arith.addf %378, %382 : vector<4x256xf32>
    %384 = vector.extract_strided_slice %359 {offsets = [0, 18], sizes = [32, 256], strides = [1, 1]} : vector<32x290xbf16> to vector<32x256xbf16>
    %c0_281 = arith.constant 0 : index
    %c5_282 = arith.constant 5 : index
    %c0_283 = arith.constant 0 : index
    %c0_284 = arith.constant 0 : index
    %385 = vector.load %arg3[%c0_281, %c5_282, %c0_283, %c0_284] : memref<2x9x4x32xbf16, #tpu.memory_space<vmem>>, vector<1x1x4x32xbf16>
    %386 = vector.shape_cast %385 : vector<1x1x4x32xbf16> to vector<4x32xbf16>
    %cst_285 = arith.constant dense<0.000000e+00> : vector<4x256xf32>
    %387 = tpu.matmul %386, %384, %cst_285 {dimension_numbers = #tpu.dot_dimension_numbers<[1], [0], [0], [1], [0, 0, 1, 1], [], []>} : vector<4x32xbf16>, vector<32x256xbf16>, vector<4x256xf32> -> vector<4x256xf32>
    %388 = arith.addf %383, %387 : vector<4x256xf32>
    %389 = vector.extract_strided_slice %351 {offsets = [0, 32], sizes = [32, 256], strides = [1, 1]} : vector<32x290xbf16> to vector<32x256xbf16>
    %c0_286 = arith.constant 0 : index
    %c6_287 = arith.constant 6 : index
    %c0_288 = arith.constant 0 : index
    %c0_289 = arith.constant 0 : index
    %390 = vector.load %arg3[%c0_286, %c6_287, %c0_288, %c0_289] : memref<2x9x4x32xbf16, #tpu.memory_space<vmem>>, vector<1x1x4x32xbf16>
    %391 = vector.shape_cast %390 : vector<1x1x4x32xbf16> to vector<4x32xbf16>
    %cst_290 = arith.constant dense<0.000000e+00> : vector<4x256xf32>
    %392 = tpu.matmul %391, %389, %cst_290 {dimension_numbers = #tpu.dot_dimension_numbers<[1], [0], [0], [1], [0, 0, 1, 1], [], []>} : vector<4x32xbf16>, vector<32x256xbf16>, vector<4x256xf32> -> vector<4x256xf32>
    %393 = arith.addf %388, %392 : vector<4x256xf32>
    %394 = vector.extract_strided_slice %353 {offsets = [0, 33], sizes = [32, 256], strides = [1, 1]} : vector<32x290xbf16> to vector<32x256xbf16>
    %c0_291 = arith.constant 0 : index
    %c7_292 = arith.constant 7 : index
    %c0_293 = arith.constant 0 : index
    %c0_294 = arith.constant 0 : index
    %395 = vector.load %arg3[%c0_291, %c7_292, %c0_293, %c0_294] : memref<2x9x4x32xbf16, #tpu.memory_space<vmem>>, vector<1x1x4x32xbf16>
    %396 = vector.shape_cast %395 : vector<1x1x4x32xbf16> to vector<4x32xbf16>
    %cst_295 = arith.constant dense<0.000000e+00> : vector<4x256xf32>
    %397 = tpu.matmul %396, %394, %cst_295 {dimension_numbers = #tpu.dot_dimension_numbers<[1], [0], [0], [1], [0, 0, 1, 1], [], []>} : vector<4x32xbf16>, vector<32x256xbf16>, vector<4x256xf32> -> vector<4x256xf32>
    %398 = arith.addf %393, %397 : vector<4x256xf32>
    %399 = vector.extract_strided_slice %359 {offsets = [0, 34], sizes = [32, 256], strides = [1, 1]} : vector<32x290xbf16> to vector<32x256xbf16>
    %c0_296 = arith.constant 0 : index
    %c8_297 = arith.constant 8 : index
    %c0_298 = arith.constant 0 : index
    %c0_299 = arith.constant 0 : index
    %400 = vector.load %arg3[%c0_296, %c8_297, %c0_298, %c0_299] : memref<2x9x4x32xbf16, #tpu.memory_space<vmem>>, vector<1x1x4x32xbf16>
    %401 = vector.shape_cast %400 : vector<1x1x4x32xbf16> to vector<4x32xbf16>
    %cst_300 = arith.constant dense<0.000000e+00> : vector<4x256xf32>
    %402 = tpu.matmul %401, %399, %cst_300 {dimension_numbers = #tpu.dot_dimension_numbers<[1], [0], [0], [1], [0, 0, 1, 1], [], []>} : vector<4x32xbf16>, vector<32x256xbf16>, vector<4x256xf32> -> vector<4x256xf32>
    %403 = arith.addf %398, %402 : vector<4x256xf32>
    %404 = vector.broadcast %26 : vector<4x1xf32> to vector<4x256xf32>
    %405 = arith.addf %403, %404 : vector<4x256xf32>
    %cst_301 = arith.constant 5.000000e-02 : f32
    %406 = vector.broadcast %cst_301 : f32 to vector<4x256xf32>
    %407 = arith.mulf %406, %405 : vector<4x256xf32>
    %408 = arith.addf %154, %407 : vector<4x256xf32>
    %cst_302 = arith.constant 0.000000e+00 : bf16
    %409 = vector.broadcast %cst_302 : bf16 to vector<4x17xbf16>
    %cst_303 = arith.constant 0.000000e+00 : f32
    %410 = vector.shape_cast %18 : vector<1x256xi1> to vector<1x256xi1>
    %411 = vector.broadcast %410 : vector<1x256xi1> to vector<4x256xi1>
    %412 = vector.broadcast %cst_303 : f32 to vector<4x256xf32>
    %413 = arith.select %411, %408, %412 : vector<4x256xi1>, vector<4x256xf32>
    %414 = arith.truncf %413 : vector<4x256xf32> to vector<4x256xbf16>
    %415 = tpu.concatenate %409, %414, %409 in 1 : vector<4x17xbf16>, vector<4x256xbf16>, vector<4x17xbf16> -> vector<4x290xbf16>
    %416 = arith.truncf %408 : vector<4x256xf32> to vector<4x256xbf16>
    %417 = tpu.concatenate %409, %416, %409 in 1 : vector<4x17xbf16>, vector<4x256xbf16>, vector<4x17xbf16> -> vector<4x290xbf16>
    %cst_304 = arith.constant 0.000000e+00 : f32
    %418 = vector.shape_cast %20 : vector<1x256xi1> to vector<1x256xi1>
    %419 = vector.broadcast %418 : vector<1x256xi1> to vector<4x256xi1>
    %420 = vector.broadcast %cst_304 : f32 to vector<4x256xf32>
    %421 = arith.select %419, %408, %420 : vector<4x256xi1>, vector<4x256xf32>
    %422 = arith.truncf %421 : vector<4x256xf32> to vector<4x256xbf16>
    %423 = tpu.concatenate %409, %422, %409 in 1 : vector<4x17xbf16>, vector<4x256xbf16>, vector<4x17xbf16> -> vector<4x290xbf16>
    %424 = vector.extract_strided_slice %415 {offsets = [0, 0], sizes = [4, 256], strides = [1, 1]} : vector<4x290xbf16> to vector<4x256xbf16>
    %c0_305 = arith.constant 0 : index
    %c0_306 = arith.constant 0 : index
    %c0_307 = arith.constant 0 : index
    %c0_308 = arith.constant 0 : index
    %425 = vector.load %arg2[%c0_305, %c0_306, %c0_307, %c0_308] : memref<2x9x32x4xbf16, #tpu.memory_space<vmem>>, vector<1x1x32x4xbf16>
    %426 = vector.shape_cast %425 : vector<1x1x32x4xbf16> to vector<32x4xbf16>
    %cst_309 = arith.constant dense<0.000000e+00> : vector<32x256xf32>
    %427 = tpu.matmul %426, %424, %cst_309 {dimension_numbers = #tpu.dot_dimension_numbers<[1], [0], [0], [1], [0, 0, 1, 1], [], []>} : vector<32x4xbf16>, vector<4x256xbf16>, vector<32x256xf32> -> vector<32x256xf32>
    %428 = vector.extract_strided_slice %417 {offsets = [0, 1], sizes = [4, 256], strides = [1, 1]} : vector<4x290xbf16> to vector<4x256xbf16>
    %c0_310 = arith.constant 0 : index
    %c1_311 = arith.constant 1 : index
    %c0_312 = arith.constant 0 : index
    %c0_313 = arith.constant 0 : index
    %429 = vector.load %arg2[%c0_310, %c1_311, %c0_312, %c0_313] : memref<2x9x32x4xbf16, #tpu.memory_space<vmem>>, vector<1x1x32x4xbf16>
    %430 = vector.shape_cast %429 : vector<1x1x32x4xbf16> to vector<32x4xbf16>
    %cst_314 = arith.constant dense<0.000000e+00> : vector<32x256xf32>
    %431 = tpu.matmul %430, %428, %cst_314 {dimension_numbers = #tpu.dot_dimension_numbers<[1], [0], [0], [1], [0, 0, 1, 1], [], []>} : vector<32x4xbf16>, vector<4x256xbf16>, vector<32x256xf32> -> vector<32x256xf32>
    %432 = arith.addf %427, %431 : vector<32x256xf32>
    %433 = vector.extract_strided_slice %423 {offsets = [0, 2], sizes = [4, 256], strides = [1, 1]} : vector<4x290xbf16> to vector<4x256xbf16>
    %c0_315 = arith.constant 0 : index
    %c2_316 = arith.constant 2 : index
    %c0_317 = arith.constant 0 : index
    %c0_318 = arith.constant 0 : index
    %434 = vector.load %arg2[%c0_315, %c2_316, %c0_317, %c0_318] : memref<2x9x32x4xbf16, #tpu.memory_space<vmem>>, vector<1x1x32x4xbf16>
    %435 = vector.shape_cast %434 : vector<1x1x32x4xbf16> to vector<32x4xbf16>
    %cst_319 = arith.constant dense<0.000000e+00> : vector<32x256xf32>
    %436 = tpu.matmul %435, %433, %cst_319 {dimension_numbers = #tpu.dot_dimension_numbers<[1], [0], [0], [1], [0, 0, 1, 1], [], []>} : vector<32x4xbf16>, vector<4x256xbf16>, vector<32x256xf32> -> vector<32x256xf32>
    %437 = arith.addf %432, %436 : vector<32x256xf32>
    %438 = vector.extract_strided_slice %415 {offsets = [0, 16], sizes = [4, 256], strides = [1, 1]} : vector<4x290xbf16> to vector<4x256xbf16>
    %c0_320 = arith.constant 0 : index
    %c3_321 = arith.constant 3 : index
    %c0_322 = arith.constant 0 : index
    %c0_323 = arith.constant 0 : index
    %439 = vector.load %arg2[%c0_320, %c3_321, %c0_322, %c0_323] : memref<2x9x32x4xbf16, #tpu.memory_space<vmem>>, vector<1x1x32x4xbf16>
    %440 = vector.shape_cast %439 : vector<1x1x32x4xbf16> to vector<32x4xbf16>
    %cst_324 = arith.constant dense<0.000000e+00> : vector<32x256xf32>
    %441 = tpu.matmul %440, %438, %cst_324 {dimension_numbers = #tpu.dot_dimension_numbers<[1], [0], [0], [1], [0, 0, 1, 1], [], []>} : vector<32x4xbf16>, vector<4x256xbf16>, vector<32x256xf32> -> vector<32x256xf32>
    %442 = arith.addf %437, %441 : vector<32x256xf32>
    %443 = vector.extract_strided_slice %417 {offsets = [0, 17], sizes = [4, 256], strides = [1, 1]} : vector<4x290xbf16> to vector<4x256xbf16>
    %c0_325 = arith.constant 0 : index
    %c4_326 = arith.constant 4 : index
    %c0_327 = arith.constant 0 : index
    %c0_328 = arith.constant 0 : index
    %444 = vector.load %arg2[%c0_325, %c4_326, %c0_327, %c0_328] : memref<2x9x32x4xbf16, #tpu.memory_space<vmem>>, vector<1x1x32x4xbf16>
    %445 = vector.shape_cast %444 : vector<1x1x32x4xbf16> to vector<32x4xbf16>
    %cst_329 = arith.constant dense<0.000000e+00> : vector<32x256xf32>
    %446 = tpu.matmul %445, %443, %cst_329 {dimension_numbers = #tpu.dot_dimension_numbers<[1], [0], [0], [1], [0, 0, 1, 1], [], []>} : vector<32x4xbf16>, vector<4x256xbf16>, vector<32x256xf32> -> vector<32x256xf32>
    %447 = arith.addf %442, %446 : vector<32x256xf32>
    %448 = vector.extract_strided_slice %423 {offsets = [0, 18], sizes = [4, 256], strides = [1, 1]} : vector<4x290xbf16> to vector<4x256xbf16>
    %c0_330 = arith.constant 0 : index
    %c5_331 = arith.constant 5 : index
    %c0_332 = arith.constant 0 : index
    %c0_333 = arith.constant 0 : index
    %449 = vector.load %arg2[%c0_330, %c5_331, %c0_332, %c0_333] : memref<2x9x32x4xbf16, #tpu.memory_space<vmem>>, vector<1x1x32x4xbf16>
    %450 = vector.shape_cast %449 : vector<1x1x32x4xbf16> to vector<32x4xbf16>
    %cst_334 = arith.constant dense<0.000000e+00> : vector<32x256xf32>
    %451 = tpu.matmul %450, %448, %cst_334 {dimension_numbers = #tpu.dot_dimension_numbers<[1], [0], [0], [1], [0, 0, 1, 1], [], []>} : vector<32x4xbf16>, vector<4x256xbf16>, vector<32x256xf32> -> vector<32x256xf32>
    %452 = arith.addf %447, %451 : vector<32x256xf32>
    %453 = vector.extract_strided_slice %415 {offsets = [0, 32], sizes = [4, 256], strides = [1, 1]} : vector<4x290xbf16> to vector<4x256xbf16>
    %c0_335 = arith.constant 0 : index
    %c6_336 = arith.constant 6 : index
    %c0_337 = arith.constant 0 : index
    %c0_338 = arith.constant 0 : index
    %454 = vector.load %arg2[%c0_335, %c6_336, %c0_337, %c0_338] : memref<2x9x32x4xbf16, #tpu.memory_space<vmem>>, vector<1x1x32x4xbf16>
    %455 = vector.shape_cast %454 : vector<1x1x32x4xbf16> to vector<32x4xbf16>
    %cst_339 = arith.constant dense<0.000000e+00> : vector<32x256xf32>
    %456 = tpu.matmul %455, %453, %cst_339 {dimension_numbers = #tpu.dot_dimension_numbers<[1], [0], [0], [1], [0, 0, 1, 1], [], []>} : vector<32x4xbf16>, vector<4x256xbf16>, vector<32x256xf32> -> vector<32x256xf32>
    %457 = arith.addf %452, %456 : vector<32x256xf32>
    %458 = vector.extract_strided_slice %417 {offsets = [0, 33], sizes = [4, 256], strides = [1, 1]} : vector<4x290xbf16> to vector<4x256xbf16>
    %c0_340 = arith.constant 0 : index
    %c7_341 = arith.constant 7 : index
    %c0_342 = arith.constant 0 : index
    %c0_343 = arith.constant 0 : index
    %459 = vector.load %arg2[%c0_340, %c7_341, %c0_342, %c0_343] : memref<2x9x32x4xbf16, #tpu.memory_space<vmem>>, vector<1x1x32x4xbf16>
    %460 = vector.shape_cast %459 : vector<1x1x32x4xbf16> to vector<32x4xbf16>
    %cst_344 = arith.constant dense<0.000000e+00> : vector<32x256xf32>
    %461 = tpu.matmul %460, %458, %cst_344 {dimension_numbers = #tpu.dot_dimension_numbers<[1], [0], [0], [1], [0, 0, 1, 1], [], []>} : vector<32x4xbf16>, vector<4x256xbf16>, vector<32x256xf32> -> vector<32x256xf32>
    %462 = arith.addf %457, %461 : vector<32x256xf32>
    %463 = vector.extract_strided_slice %423 {offsets = [0, 34], sizes = [4, 256], strides = [1, 1]} : vector<4x290xbf16> to vector<4x256xbf16>
    %c0_345 = arith.constant 0 : index
    %c8_346 = arith.constant 8 : index
    %c0_347 = arith.constant 0 : index
    %c0_348 = arith.constant 0 : index
    %464 = vector.load %arg2[%c0_345, %c8_346, %c0_347, %c0_348] : memref<2x9x32x4xbf16, #tpu.memory_space<vmem>>, vector<1x1x32x4xbf16>
    %465 = vector.shape_cast %464 : vector<1x1x32x4xbf16> to vector<32x4xbf16>
    %cst_349 = arith.constant dense<0.000000e+00> : vector<32x256xf32>
    %466 = tpu.matmul %465, %463, %cst_349 {dimension_numbers = #tpu.dot_dimension_numbers<[1], [0], [0], [1], [0, 0, 1, 1], [], []>} : vector<32x4xbf16>, vector<4x256xbf16>, vector<32x256xf32> -> vector<32x256xf32>
    %467 = arith.addf %462, %466 : vector<32x256xf32>
    %468 = vector.broadcast %22 : vector<32x1xf32> to vector<32x256xf32>
    %469 = arith.addf %467, %468 : vector<32x256xf32>
    %cst_350 = arith.constant 0.000000e+00 : f32
    %470 = vector.broadcast %cst_350 : f32 to vector<32x256xf32>
    %471 = arith.maximumf %469, %470 : vector<32x256xf32>
    %cst_351 = arith.constant 0.000000e+00 : bf16
    %472 = vector.broadcast %cst_351 : bf16 to vector<32x17xbf16>
    %cst_352 = arith.constant 0.000000e+00 : f32
    %473 = vector.shape_cast %18 : vector<1x256xi1> to vector<1x256xi1>
    %474 = vector.broadcast %473 : vector<1x256xi1> to vector<32x256xi1>
    %475 = vector.broadcast %cst_352 : f32 to vector<32x256xf32>
    %476 = arith.select %474, %471, %475 : vector<32x256xi1>, vector<32x256xf32>
    %477 = arith.truncf %476 : vector<32x256xf32> to vector<32x256xbf16>
    %478 = tpu.concatenate %472, %477, %472 in 1 : vector<32x17xbf16>, vector<32x256xbf16>, vector<32x17xbf16> -> vector<32x290xbf16>
    %479 = arith.truncf %471 : vector<32x256xf32> to vector<32x256xbf16>
    %480 = tpu.concatenate %472, %479, %472 in 1 : vector<32x17xbf16>, vector<32x256xbf16>, vector<32x17xbf16> -> vector<32x290xbf16>
    %cst_353 = arith.constant 0.000000e+00 : f32
    %481 = vector.shape_cast %20 : vector<1x256xi1> to vector<1x256xi1>
    %482 = vector.broadcast %481 : vector<1x256xi1> to vector<32x256xi1>
    %483 = vector.broadcast %cst_353 : f32 to vector<32x256xf32>
    %484 = arith.select %482, %471, %483 : vector<32x256xi1>, vector<32x256xf32>
    %485 = arith.truncf %484 : vector<32x256xf32> to vector<32x256xbf16>
    %486 = tpu.concatenate %472, %485, %472 in 1 : vector<32x17xbf16>, vector<32x256xbf16>, vector<32x17xbf16> -> vector<32x290xbf16>
    %487 = vector.extract_strided_slice %478 {offsets = [0, 0], sizes = [32, 256], strides = [1, 1]} : vector<32x290xbf16> to vector<32x256xbf16>
    %c0_354 = arith.constant 0 : index
    %c0_355 = arith.constant 0 : index
    %c0_356 = arith.constant 0 : index
    %c0_357 = arith.constant 0 : index
    %488 = vector.load %arg3[%c0_354, %c0_355, %c0_356, %c0_357] : memref<2x9x4x32xbf16, #tpu.memory_space<vmem>>, vector<1x1x4x32xbf16>
    %489 = vector.shape_cast %488 : vector<1x1x4x32xbf16> to vector<4x32xbf16>
    %cst_358 = arith.constant dense<0.000000e+00> : vector<4x256xf32>
    %490 = tpu.matmul %489, %487, %cst_358 {dimension_numbers = #tpu.dot_dimension_numbers<[1], [0], [0], [1], [0, 0, 1, 1], [], []>} : vector<4x32xbf16>, vector<32x256xbf16>, vector<4x256xf32> -> vector<4x256xf32>
    %491 = vector.extract_strided_slice %480 {offsets = [0, 1], sizes = [32, 256], strides = [1, 1]} : vector<32x290xbf16> to vector<32x256xbf16>
    %c0_359 = arith.constant 0 : index
    %c1_360 = arith.constant 1 : index
    %c0_361 = arith.constant 0 : index
    %c0_362 = arith.constant 0 : index
    %492 = vector.load %arg3[%c0_359, %c1_360, %c0_361, %c0_362] : memref<2x9x4x32xbf16, #tpu.memory_space<vmem>>, vector<1x1x4x32xbf16>
    %493 = vector.shape_cast %492 : vector<1x1x4x32xbf16> to vector<4x32xbf16>
    %cst_363 = arith.constant dense<0.000000e+00> : vector<4x256xf32>
    %494 = tpu.matmul %493, %491, %cst_363 {dimension_numbers = #tpu.dot_dimension_numbers<[1], [0], [0], [1], [0, 0, 1, 1], [], []>} : vector<4x32xbf16>, vector<32x256xbf16>, vector<4x256xf32> -> vector<4x256xf32>
    %495 = arith.addf %490, %494 : vector<4x256xf32>
    %496 = vector.extract_strided_slice %486 {offsets = [0, 2], sizes = [32, 256], strides = [1, 1]} : vector<32x290xbf16> to vector<32x256xbf16>
    %c0_364 = arith.constant 0 : index
    %c2_365 = arith.constant 2 : index
    %c0_366 = arith.constant 0 : index
    %c0_367 = arith.constant 0 : index
    %497 = vector.load %arg3[%c0_364, %c2_365, %c0_366, %c0_367] : memref<2x9x4x32xbf16, #tpu.memory_space<vmem>>, vector<1x1x4x32xbf16>
    %498 = vector.shape_cast %497 : vector<1x1x4x32xbf16> to vector<4x32xbf16>
    %cst_368 = arith.constant dense<0.000000e+00> : vector<4x256xf32>
    %499 = tpu.matmul %498, %496, %cst_368 {dimension_numbers = #tpu.dot_dimension_numbers<[1], [0], [0], [1], [0, 0, 1, 1], [], []>} : vector<4x32xbf16>, vector<32x256xbf16>, vector<4x256xf32> -> vector<4x256xf32>
    %500 = arith.addf %495, %499 : vector<4x256xf32>
    %501 = vector.extract_strided_slice %478 {offsets = [0, 16], sizes = [32, 256], strides = [1, 1]} : vector<32x290xbf16> to vector<32x256xbf16>
    %c0_369 = arith.constant 0 : index
    %c3_370 = arith.constant 3 : index
    %c0_371 = arith.constant 0 : index
    %c0_372 = arith.constant 0 : index
    %502 = vector.load %arg3[%c0_369, %c3_370, %c0_371, %c0_372] : memref<2x9x4x32xbf16, #tpu.memory_space<vmem>>, vector<1x1x4x32xbf16>
    %503 = vector.shape_cast %502 : vector<1x1x4x32xbf16> to vector<4x32xbf16>
    %cst_373 = arith.constant dense<0.000000e+00> : vector<4x256xf32>
    %504 = tpu.matmul %503, %501, %cst_373 {dimension_numbers = #tpu.dot_dimension_numbers<[1], [0], [0], [1], [0, 0, 1, 1], [], []>} : vector<4x32xbf16>, vector<32x256xbf16>, vector<4x256xf32> -> vector<4x256xf32>
    %505 = arith.addf %500, %504 : vector<4x256xf32>
    %506 = vector.extract_strided_slice %480 {offsets = [0, 17], sizes = [32, 256], strides = [1, 1]} : vector<32x290xbf16> to vector<32x256xbf16>
    %c0_374 = arith.constant 0 : index
    %c4_375 = arith.constant 4 : index
    %c0_376 = arith.constant 0 : index
    %c0_377 = arith.constant 0 : index
    %507 = vector.load %arg3[%c0_374, %c4_375, %c0_376, %c0_377] : memref<2x9x4x32xbf16, #tpu.memory_space<vmem>>, vector<1x1x4x32xbf16>
    %508 = vector.shape_cast %507 : vector<1x1x4x32xbf16> to vector<4x32xbf16>
    %cst_378 = arith.constant dense<0.000000e+00> : vector<4x256xf32>
    %509 = tpu.matmul %508, %506, %cst_378 {dimension_numbers = #tpu.dot_dimension_numbers<[1], [0], [0], [1], [0, 0, 1, 1], [], []>} : vector<4x32xbf16>, vector<32x256xbf16>, vector<4x256xf32> -> vector<4x256xf32>
    %510 = arith.addf %505, %509 : vector<4x256xf32>
    %511 = vector.extract_strided_slice %486 {offsets = [0, 18], sizes = [32, 256], strides = [1, 1]} : vector<32x290xbf16> to vector<32x256xbf16>
    %c0_379 = arith.constant 0 : index
    %c5_380 = arith.constant 5 : index
    %c0_381 = arith.constant 0 : index
    %c0_382 = arith.constant 0 : index
    %512 = vector.load %arg3[%c0_379, %c5_380, %c0_381, %c0_382] : memref<2x9x4x32xbf16, #tpu.memory_space<vmem>>, vector<1x1x4x32xbf16>
    %513 = vector.shape_cast %512 : vector<1x1x4x32xbf16> to vector<4x32xbf16>
    %cst_383 = arith.constant dense<0.000000e+00> : vector<4x256xf32>
    %514 = tpu.matmul %513, %511, %cst_383 {dimension_numbers = #tpu.dot_dimension_numbers<[1], [0], [0], [1], [0, 0, 1, 1], [], []>} : vector<4x32xbf16>, vector<32x256xbf16>, vector<4x256xf32> -> vector<4x256xf32>
    %515 = arith.addf %510, %514 : vector<4x256xf32>
    %516 = vector.extract_strided_slice %478 {offsets = [0, 32], sizes = [32, 256], strides = [1, 1]} : vector<32x290xbf16> to vector<32x256xbf16>
    %c0_384 = arith.constant 0 : index
    %c6_385 = arith.constant 6 : index
    %c0_386 = arith.constant 0 : index
    %c0_387 = arith.constant 0 : index
    %517 = vector.load %arg3[%c0_384, %c6_385, %c0_386, %c0_387] : memref<2x9x4x32xbf16, #tpu.memory_space<vmem>>, vector<1x1x4x32xbf16>
    %518 = vector.shape_cast %517 : vector<1x1x4x32xbf16> to vector<4x32xbf16>
    %cst_388 = arith.constant dense<0.000000e+00> : vector<4x256xf32>
    %519 = tpu.matmul %518, %516, %cst_388 {dimension_numbers = #tpu.dot_dimension_numbers<[1], [0], [0], [1], [0, 0, 1, 1], [], []>} : vector<4x32xbf16>, vector<32x256xbf16>, vector<4x256xf32> -> vector<4x256xf32>
    %520 = arith.addf %515, %519 : vector<4x256xf32>
    %521 = vector.extract_strided_slice %480 {offsets = [0, 33], sizes = [32, 256], strides = [1, 1]} : vector<32x290xbf16> to vector<32x256xbf16>
    %c0_389 = arith.constant 0 : index
    %c7_390 = arith.constant 7 : index
    %c0_391 = arith.constant 0 : index
    %c0_392 = arith.constant 0 : index
    %522 = vector.load %arg3[%c0_389, %c7_390, %c0_391, %c0_392] : memref<2x9x4x32xbf16, #tpu.memory_space<vmem>>, vector<1x1x4x32xbf16>
    %523 = vector.shape_cast %522 : vector<1x1x4x32xbf16> to vector<4x32xbf16>
    %cst_393 = arith.constant dense<0.000000e+00> : vector<4x256xf32>
    %524 = tpu.matmul %523, %521, %cst_393 {dimension_numbers = #tpu.dot_dimension_numbers<[1], [0], [0], [1], [0, 0, 1, 1], [], []>} : vector<4x32xbf16>, vector<32x256xbf16>, vector<4x256xf32> -> vector<4x256xf32>
    %525 = arith.addf %520, %524 : vector<4x256xf32>
    %526 = vector.extract_strided_slice %486 {offsets = [0, 34], sizes = [32, 256], strides = [1, 1]} : vector<32x290xbf16> to vector<32x256xbf16>
    %c0_394 = arith.constant 0 : index
    %c8_395 = arith.constant 8 : index
    %c0_396 = arith.constant 0 : index
    %c0_397 = arith.constant 0 : index
    %527 = vector.load %arg3[%c0_394, %c8_395, %c0_396, %c0_397] : memref<2x9x4x32xbf16, #tpu.memory_space<vmem>>, vector<1x1x4x32xbf16>
    %528 = vector.shape_cast %527 : vector<1x1x4x32xbf16> to vector<4x32xbf16>
    %cst_398 = arith.constant dense<0.000000e+00> : vector<4x256xf32>
    %529 = tpu.matmul %528, %526, %cst_398 {dimension_numbers = #tpu.dot_dimension_numbers<[1], [0], [0], [1], [0, 0, 1, 1], [], []>} : vector<4x32xbf16>, vector<32x256xbf16>, vector<4x256xf32> -> vector<4x256xf32>
    %530 = arith.addf %525, %529 : vector<4x256xf32>
    %531 = vector.broadcast %26 : vector<4x1xf32> to vector<4x256xf32>
    %532 = arith.addf %530, %531 : vector<4x256xf32>
    %cst_399 = arith.constant 1.000000e-01 : f32
    %533 = vector.broadcast %cst_399 : f32 to vector<4x256xf32>
    %534 = arith.mulf %533, %532 : vector<4x256xf32>
    %535 = arith.addf %154, %534 : vector<4x256xf32>
    %cst_400 = arith.constant 0.000000e+00 : bf16
    %536 = vector.broadcast %cst_400 : bf16 to vector<4x17xbf16>
    %cst_401 = arith.constant 0.000000e+00 : f32
    %537 = vector.shape_cast %18 : vector<1x256xi1> to vector<1x256xi1>
    %538 = vector.broadcast %537 : vector<1x256xi1> to vector<4x256xi1>
    %539 = vector.broadcast %cst_401 : f32 to vector<4x256xf32>
    %540 = arith.select %538, %535, %539 : vector<4x256xi1>, vector<4x256xf32>
    %541 = arith.truncf %540 : vector<4x256xf32> to vector<4x256xbf16>
    %542 = tpu.concatenate %536, %541, %536 in 1 : vector<4x17xbf16>, vector<4x256xbf16>, vector<4x17xbf16> -> vector<4x290xbf16>
    %543 = arith.truncf %535 : vector<4x256xf32> to vector<4x256xbf16>
    %544 = tpu.concatenate %536, %543, %536 in 1 : vector<4x17xbf16>, vector<4x256xbf16>, vector<4x17xbf16> -> vector<4x290xbf16>
    %cst_402 = arith.constant 0.000000e+00 : f32
    %545 = vector.shape_cast %20 : vector<1x256xi1> to vector<1x256xi1>
    %546 = vector.broadcast %545 : vector<1x256xi1> to vector<4x256xi1>
    %547 = vector.broadcast %cst_402 : f32 to vector<4x256xf32>
    %548 = arith.select %546, %535, %547 : vector<4x256xi1>, vector<4x256xf32>
    %549 = arith.truncf %548 : vector<4x256xf32> to vector<4x256xbf16>
    %550 = tpu.concatenate %536, %549, %536 in 1 : vector<4x17xbf16>, vector<4x256xbf16>, vector<4x17xbf16> -> vector<4x290xbf16>
    %551 = vector.extract_strided_slice %542 {offsets = [0, 0], sizes = [4, 256], strides = [1, 1]} : vector<4x290xbf16> to vector<4x256xbf16>
    %c0_403 = arith.constant 0 : index
    %c0_404 = arith.constant 0 : index
    %c0_405 = arith.constant 0 : index
    %c0_406 = arith.constant 0 : index
    %552 = vector.load %arg2[%c0_403, %c0_404, %c0_405, %c0_406] : memref<2x9x32x4xbf16, #tpu.memory_space<vmem>>, vector<1x1x32x4xbf16>
    %553 = vector.shape_cast %552 : vector<1x1x32x4xbf16> to vector<32x4xbf16>
    %cst_407 = arith.constant dense<0.000000e+00> : vector<32x256xf32>
    %554 = tpu.matmul %553, %551, %cst_407 {dimension_numbers = #tpu.dot_dimension_numbers<[1], [0], [0], [1], [0, 0, 1, 1], [], []>} : vector<32x4xbf16>, vector<4x256xbf16>, vector<32x256xf32> -> vector<32x256xf32>
    %555 = vector.extract_strided_slice %544 {offsets = [0, 1], sizes = [4, 256], strides = [1, 1]} : vector<4x290xbf16> to vector<4x256xbf16>
    %c0_408 = arith.constant 0 : index
    %c1_409 = arith.constant 1 : index
    %c0_410 = arith.constant 0 : index
    %c0_411 = arith.constant 0 : index
    %556 = vector.load %arg2[%c0_408, %c1_409, %c0_410, %c0_411] : memref<2x9x32x4xbf16, #tpu.memory_space<vmem>>, vector<1x1x32x4xbf16>
    %557 = vector.shape_cast %556 : vector<1x1x32x4xbf16> to vector<32x4xbf16>
    %cst_412 = arith.constant dense<0.000000e+00> : vector<32x256xf32>
    %558 = tpu.matmul %557, %555, %cst_412 {dimension_numbers = #tpu.dot_dimension_numbers<[1], [0], [0], [1], [0, 0, 1, 1], [], []>} : vector<32x4xbf16>, vector<4x256xbf16>, vector<32x256xf32> -> vector<32x256xf32>
    %559 = arith.addf %554, %558 : vector<32x256xf32>
    %560 = vector.extract_strided_slice %550 {offsets = [0, 2], sizes = [4, 256], strides = [1, 1]} : vector<4x290xbf16> to vector<4x256xbf16>
    %c0_413 = arith.constant 0 : index
    %c2_414 = arith.constant 2 : index
    %c0_415 = arith.constant 0 : index
    %c0_416 = arith.constant 0 : index
    %561 = vector.load %arg2[%c0_413, %c2_414, %c0_415, %c0_416] : memref<2x9x32x4xbf16, #tpu.memory_space<vmem>>, vector<1x1x32x4xbf16>
    %562 = vector.shape_cast %561 : vector<1x1x32x4xbf16> to vector<32x4xbf16>
    %cst_417 = arith.constant dense<0.000000e+00> : vector<32x256xf32>
    %563 = tpu.matmul %562, %560, %cst_417 {dimension_numbers = #tpu.dot_dimension_numbers<[1], [0], [0], [1], [0, 0, 1, 1], [], []>} : vector<32x4xbf16>, vector<4x256xbf16>, vector<32x256xf32> -> vector<32x256xf32>
    %564 = arith.addf %559, %563 : vector<32x256xf32>
    %565 = vector.extract_strided_slice %542 {offsets = [0, 16], sizes = [4, 256], strides = [1, 1]} : vector<4x290xbf16> to vector<4x256xbf16>
    %c0_418 = arith.constant 0 : index
    %c3_419 = arith.constant 3 : index
    %c0_420 = arith.constant 0 : index
    %c0_421 = arith.constant 0 : index
    %566 = vector.load %arg2[%c0_418, %c3_419, %c0_420, %c0_421] : memref<2x9x32x4xbf16, #tpu.memory_space<vmem>>, vector<1x1x32x4xbf16>
    %567 = vector.shape_cast %566 : vector<1x1x32x4xbf16> to vector<32x4xbf16>
    %cst_422 = arith.constant dense<0.000000e+00> : vector<32x256xf32>
    %568 = tpu.matmul %567, %565, %cst_422 {dimension_numbers = #tpu.dot_dimension_numbers<[1], [0], [0], [1], [0, 0, 1, 1], [], []>} : vector<32x4xbf16>, vector<4x256xbf16>, vector<32x256xf32> -> vector<32x256xf32>
    %569 = arith.addf %564, %568 : vector<32x256xf32>
    %570 = vector.extract_strided_slice %544 {offsets = [0, 17], sizes = [4, 256], strides = [1, 1]} : vector<4x290xbf16> to vector<4x256xbf16>
    %c0_423 = arith.constant 0 : index
    %c4_424 = arith.constant 4 : index
    %c0_425 = arith.constant 0 : index
    %c0_426 = arith.constant 0 : index
    %571 = vector.load %arg2[%c0_423, %c4_424, %c0_425, %c0_426] : memref<2x9x32x4xbf16, #tpu.memory_space<vmem>>, vector<1x1x32x4xbf16>
    %572 = vector.shape_cast %571 : vector<1x1x32x4xbf16> to vector<32x4xbf16>
    %cst_427 = arith.constant dense<0.000000e+00> : vector<32x256xf32>
    %573 = tpu.matmul %572, %570, %cst_427 {dimension_numbers = #tpu.dot_dimension_numbers<[1], [0], [0], [1], [0, 0, 1, 1], [], []>} : vector<32x4xbf16>, vector<4x256xbf16>, vector<32x256xf32> -> vector<32x256xf32>
    %574 = arith.addf %569, %573 : vector<32x256xf32>
    %575 = vector.extract_strided_slice %550 {offsets = [0, 18], sizes = [4, 256], strides = [1, 1]} : vector<4x290xbf16> to vector<4x256xbf16>
    %c0_428 = arith.constant 0 : index
    %c5_429 = arith.constant 5 : index
    %c0_430 = arith.constant 0 : index
    %c0_431 = arith.constant 0 : index
    %576 = vector.load %arg2[%c0_428, %c5_429, %c0_430, %c0_431] : memref<2x9x32x4xbf16, #tpu.memory_space<vmem>>, vector<1x1x32x4xbf16>
    %577 = vector.shape_cast %576 : vector<1x1x32x4xbf16> to vector<32x4xbf16>
    %cst_432 = arith.constant dense<0.000000e+00> : vector<32x256xf32>
    %578 = tpu.matmul %577, %575, %cst_432 {dimension_numbers = #tpu.dot_dimension_numbers<[1], [0], [0], [1], [0, 0, 1, 1], [], []>} : vector<32x4xbf16>, vector<4x256xbf16>, vector<32x256xf32> -> vector<32x256xf32>
    %579 = arith.addf %574, %578 : vector<32x256xf32>
    %580 = vector.extract_strided_slice %542 {offsets = [0, 32], sizes = [4, 256], strides = [1, 1]} : vector<4x290xbf16> to vector<4x256xbf16>
    %c0_433 = arith.constant 0 : index
    %c6_434 = arith.constant 6 : index
    %c0_435 = arith.constant 0 : index
    %c0_436 = arith.constant 0 : index
    %581 = vector.load %arg2[%c0_433, %c6_434, %c0_435, %c0_436] : memref<2x9x32x4xbf16, #tpu.memory_space<vmem>>, vector<1x1x32x4xbf16>
    %582 = vector.shape_cast %581 : vector<1x1x32x4xbf16> to vector<32x4xbf16>
    %cst_437 = arith.constant dense<0.000000e+00> : vector<32x256xf32>
    %583 = tpu.matmul %582, %580, %cst_437 {dimension_numbers = #tpu.dot_dimension_numbers<[1], [0], [0], [1], [0, 0, 1, 1], [], []>} : vector<32x4xbf16>, vector<4x256xbf16>, vector<32x256xf32> -> vector<32x256xf32>
    %584 = arith.addf %579, %583 : vector<32x256xf32>
    %585 = vector.extract_strided_slice %544 {offsets = [0, 33], sizes = [4, 256], strides = [1, 1]} : vector<4x290xbf16> to vector<4x256xbf16>
    %c0_438 = arith.constant 0 : index
    %c7_439 = arith.constant 7 : index
    %c0_440 = arith.constant 0 : index
    %c0_441 = arith.constant 0 : index
    %586 = vector.load %arg2[%c0_438, %c7_439, %c0_440, %c0_441] : memref<2x9x32x4xbf16, #tpu.memory_space<vmem>>, vector<1x1x32x4xbf16>
    %587 = vector.shape_cast %586 : vector<1x1x32x4xbf16> to vector<32x4xbf16>
    %cst_442 = arith.constant dense<0.000000e+00> : vector<32x256xf32>
    %588 = tpu.matmul %587, %585, %cst_442 {dimension_numbers = #tpu.dot_dimension_numbers<[1], [0], [0], [1], [0, 0, 1, 1], [], []>} : vector<32x4xbf16>, vector<4x256xbf16>, vector<32x256xf32> -> vector<32x256xf32>
    %589 = arith.addf %584, %588 : vector<32x256xf32>
    %590 = vector.extract_strided_slice %550 {offsets = [0, 34], sizes = [4, 256], strides = [1, 1]} : vector<4x290xbf16> to vector<4x256xbf16>
    %c0_443 = arith.constant 0 : index
    %c8_444 = arith.constant 8 : index
    %c0_445 = arith.constant 0 : index
    %c0_446 = arith.constant 0 : index
    %591 = vector.load %arg2[%c0_443, %c8_444, %c0_445, %c0_446] : memref<2x9x32x4xbf16, #tpu.memory_space<vmem>>, vector<1x1x32x4xbf16>
    %592 = vector.shape_cast %591 : vector<1x1x32x4xbf16> to vector<32x4xbf16>
    %cst_447 = arith.constant dense<0.000000e+00> : vector<32x256xf32>
    %593 = tpu.matmul %592, %590, %cst_447 {dimension_numbers = #tpu.dot_dimension_numbers<[1], [0], [0], [1], [0, 0, 1, 1], [], []>} : vector<32x4xbf16>, vector<4x256xbf16>, vector<32x256xf32> -> vector<32x256xf32>
    %594 = arith.addf %589, %593 : vector<32x256xf32>
    %595 = vector.broadcast %22 : vector<32x1xf32> to vector<32x256xf32>
    %596 = arith.addf %594, %595 : vector<32x256xf32>
    %cst_448 = arith.constant 0.000000e+00 : f32
    %597 = vector.broadcast %cst_448 : f32 to vector<32x256xf32>
    %598 = arith.maximumf %596, %597 : vector<32x256xf32>
    %cst_449 = arith.constant 0.000000e+00 : bf16
    %599 = vector.broadcast %cst_449 : bf16 to vector<32x17xbf16>
    %cst_450 = arith.constant 0.000000e+00 : f32
    %600 = vector.shape_cast %18 : vector<1x256xi1> to vector<1x256xi1>
    %601 = vector.broadcast %600 : vector<1x256xi1> to vector<32x256xi1>
    %602 = vector.broadcast %cst_450 : f32 to vector<32x256xf32>
    %603 = arith.select %601, %598, %602 : vector<32x256xi1>, vector<32x256xf32>
    %604 = arith.truncf %603 : vector<32x256xf32> to vector<32x256xbf16>
    %605 = tpu.concatenate %599, %604, %599 in 1 : vector<32x17xbf16>, vector<32x256xbf16>, vector<32x17xbf16> -> vector<32x290xbf16>
    %606 = arith.truncf %598 : vector<32x256xf32> to vector<32x256xbf16>
    %607 = tpu.concatenate %599, %606, %599 in 1 : vector<32x17xbf16>, vector<32x256xbf16>, vector<32x17xbf16> -> vector<32x290xbf16>
    %cst_451 = arith.constant 0.000000e+00 : f32
    %608 = vector.shape_cast %20 : vector<1x256xi1> to vector<1x256xi1>
    %609 = vector.broadcast %608 : vector<1x256xi1> to vector<32x256xi1>
    %610 = vector.broadcast %cst_451 : f32 to vector<32x256xf32>
    %611 = arith.select %609, %598, %610 : vector<32x256xi1>, vector<32x256xf32>
    %612 = arith.truncf %611 : vector<32x256xf32> to vector<32x256xbf16>
    %613 = tpu.concatenate %599, %612, %599 in 1 : vector<32x17xbf16>, vector<32x256xbf16>, vector<32x17xbf16> -> vector<32x290xbf16>
    %614 = vector.extract_strided_slice %605 {offsets = [0, 0], sizes = [32, 256], strides = [1, 1]} : vector<32x290xbf16> to vector<32x256xbf16>
    %c0_452 = arith.constant 0 : index
    %c0_453 = arith.constant 0 : index
    %c0_454 = arith.constant 0 : index
    %c0_455 = arith.constant 0 : index
    %615 = vector.load %arg3[%c0_452, %c0_453, %c0_454, %c0_455] : memref<2x9x4x32xbf16, #tpu.memory_space<vmem>>, vector<1x1x4x32xbf16>
    %616 = vector.shape_cast %615 : vector<1x1x4x32xbf16> to vector<4x32xbf16>
    %cst_456 = arith.constant dense<0.000000e+00> : vector<4x256xf32>
    %617 = tpu.matmul %616, %614, %cst_456 {dimension_numbers = #tpu.dot_dimension_numbers<[1], [0], [0], [1], [0, 0, 1, 1], [], []>} : vector<4x32xbf16>, vector<32x256xbf16>, vector<4x256xf32> -> vector<4x256xf32>
    %618 = vector.extract_strided_slice %607 {offsets = [0, 1], sizes = [32, 256], strides = [1, 1]} : vector<32x290xbf16> to vector<32x256xbf16>
    %c0_457 = arith.constant 0 : index
    %c1_458 = arith.constant 1 : index
    %c0_459 = arith.constant 0 : index
    %c0_460 = arith.constant 0 : index
    %619 = vector.load %arg3[%c0_457, %c1_458, %c0_459, %c0_460] : memref<2x9x4x32xbf16, #tpu.memory_space<vmem>>, vector<1x1x4x32xbf16>
    %620 = vector.shape_cast %619 : vector<1x1x4x32xbf16> to vector<4x32xbf16>
    %cst_461 = arith.constant dense<0.000000e+00> : vector<4x256xf32>
    %621 = tpu.matmul %620, %618, %cst_461 {dimension_numbers = #tpu.dot_dimension_numbers<[1], [0], [0], [1], [0, 0, 1, 1], [], []>} : vector<4x32xbf16>, vector<32x256xbf16>, vector<4x256xf32> -> vector<4x256xf32>
    %622 = arith.addf %617, %621 : vector<4x256xf32>
    %623 = vector.extract_strided_slice %613 {offsets = [0, 2], sizes = [32, 256], strides = [1, 1]} : vector<32x290xbf16> to vector<32x256xbf16>
    %c0_462 = arith.constant 0 : index
    %c2_463 = arith.constant 2 : index
    %c0_464 = arith.constant 0 : index
    %c0_465 = arith.constant 0 : index
    %624 = vector.load %arg3[%c0_462, %c2_463, %c0_464, %c0_465] : memref<2x9x4x32xbf16, #tpu.memory_space<vmem>>, vector<1x1x4x32xbf16>
    %625 = vector.shape_cast %624 : vector<1x1x4x32xbf16> to vector<4x32xbf16>
    %cst_466 = arith.constant dense<0.000000e+00> : vector<4x256xf32>
    %626 = tpu.matmul %625, %623, %cst_466 {dimension_numbers = #tpu.dot_dimension_numbers<[1], [0], [0], [1], [0, 0, 1, 1], [], []>} : vector<4x32xbf16>, vector<32x256xbf16>, vector<4x256xf32> -> vector<4x256xf32>
    %627 = arith.addf %622, %626 : vector<4x256xf32>
    %628 = vector.extract_strided_slice %605 {offsets = [0, 16], sizes = [32, 256], strides = [1, 1]} : vector<32x290xbf16> to vector<32x256xbf16>
    %c0_467 = arith.constant 0 : index
    %c3_468 = arith.constant 3 : index
    %c0_469 = arith.constant 0 : index
    %c0_470 = arith.constant 0 : index
    %629 = vector.load %arg3[%c0_467, %c3_468, %c0_469, %c0_470] : memref<2x9x4x32xbf16, #tpu.memory_space<vmem>>, vector<1x1x4x32xbf16>
    %630 = vector.shape_cast %629 : vector<1x1x4x32xbf16> to vector<4x32xbf16>
    %cst_471 = arith.constant dense<0.000000e+00> : vector<4x256xf32>
    %631 = tpu.matmul %630, %628, %cst_471 {dimension_numbers = #tpu.dot_dimension_numbers<[1], [0], [0], [1], [0, 0, 1, 1], [], []>} : vector<4x32xbf16>, vector<32x256xbf16>, vector<4x256xf32> -> vector<4x256xf32>
    %632 = arith.addf %627, %631 : vector<4x256xf32>
    %633 = vector.extract_strided_slice %607 {offsets = [0, 17], sizes = [32, 256], strides = [1, 1]} : vector<32x290xbf16> to vector<32x256xbf16>
    %c0_472 = arith.constant 0 : index
    %c4_473 = arith.constant 4 : index
    %c0_474 = arith.constant 0 : index
    %c0_475 = arith.constant 0 : index
    %634 = vector.load %arg3[%c0_472, %c4_473, %c0_474, %c0_475] : memref<2x9x4x32xbf16, #tpu.memory_space<vmem>>, vector<1x1x4x32xbf16>
    %635 = vector.shape_cast %634 : vector<1x1x4x32xbf16> to vector<4x32xbf16>
    %cst_476 = arith.constant dense<0.000000e+00> : vector<4x256xf32>
    %636 = tpu.matmul %635, %633, %cst_476 {dimension_numbers = #tpu.dot_dimension_numbers<[1], [0], [0], [1], [0, 0, 1, 1], [], []>} : vector<4x32xbf16>, vector<32x256xbf16>, vector<4x256xf32> -> vector<4x256xf32>
    %637 = arith.addf %632, %636 : vector<4x256xf32>
    %638 = vector.extract_strided_slice %613 {offsets = [0, 18], sizes = [32, 256], strides = [1, 1]} : vector<32x290xbf16> to vector<32x256xbf16>
    %c0_477 = arith.constant 0 : index
    %c5_478 = arith.constant 5 : index
    %c0_479 = arith.constant 0 : index
    %c0_480 = arith.constant 0 : index
    %639 = vector.load %arg3[%c0_477, %c5_478, %c0_479, %c0_480] : memref<2x9x4x32xbf16, #tpu.memory_space<vmem>>, vector<1x1x4x32xbf16>
    %640 = vector.shape_cast %639 : vector<1x1x4x32xbf16> to vector<4x32xbf16>
    %cst_481 = arith.constant dense<0.000000e+00> : vector<4x256xf32>
    %641 = tpu.matmul %640, %638, %cst_481 {dimension_numbers = #tpu.dot_dimension_numbers<[1], [0], [0], [1], [0, 0, 1, 1], [], []>} : vector<4x32xbf16>, vector<32x256xbf16>, vector<4x256xf32> -> vector<4x256xf32>
    %642 = arith.addf %637, %641 : vector<4x256xf32>
    %643 = vector.extract_strided_slice %605 {offsets = [0, 32], sizes = [32, 256], strides = [1, 1]} : vector<32x290xbf16> to vector<32x256xbf16>
    %c0_482 = arith.constant 0 : index
    %c6_483 = arith.constant 6 : index
    %c0_484 = arith.constant 0 : index
    %c0_485 = arith.constant 0 : index
    %644 = vector.load %arg3[%c0_482, %c6_483, %c0_484, %c0_485] : memref<2x9x4x32xbf16, #tpu.memory_space<vmem>>, vector<1x1x4x32xbf16>
    %645 = vector.shape_cast %644 : vector<1x1x4x32xbf16> to vector<4x32xbf16>
    %cst_486 = arith.constant dense<0.000000e+00> : vector<4x256xf32>
    %646 = tpu.matmul %645, %643, %cst_486 {dimension_numbers = #tpu.dot_dimension_numbers<[1], [0], [0], [1], [0, 0, 1, 1], [], []>} : vector<4x32xbf16>, vector<32x256xbf16>, vector<4x256xf32> -> vector<4x256xf32>
    %647 = arith.addf %642, %646 : vector<4x256xf32>
    %648 = vector.extract_strided_slice %607 {offsets = [0, 33], sizes = [32, 256], strides = [1, 1]} : vector<32x290xbf16> to vector<32x256xbf16>
    %c0_487 = arith.constant 0 : index
    %c7_488 = arith.constant 7 : index
    %c0_489 = arith.constant 0 : index
    %c0_490 = arith.constant 0 : index
    %649 = vector.load %arg3[%c0_487, %c7_488, %c0_489, %c0_490] : memref<2x9x4x32xbf16, #tpu.memory_space<vmem>>, vector<1x1x4x32xbf16>
    %650 = vector.shape_cast %649 : vector<1x1x4x32xbf16> to vector<4x32xbf16>
    %cst_491 = arith.constant dense<0.000000e+00> : vector<4x256xf32>
    %651 = tpu.matmul %650, %648, %cst_491 {dimension_numbers = #tpu.dot_dimension_numbers<[1], [0], [0], [1], [0, 0, 1, 1], [], []>} : vector<4x32xbf16>, vector<32x256xbf16>, vector<4x256xf32> -> vector<4x256xf32>
    %652 = arith.addf %647, %651 : vector<4x256xf32>
    %653 = vector.extract_strided_slice %613 {offsets = [0, 34], sizes = [32, 256], strides = [1, 1]} : vector<32x290xbf16> to vector<32x256xbf16>
    %c0_492 = arith.constant 0 : index
    %c8_493 = arith.constant 8 : index
    %c0_494 = arith.constant 0 : index
    %c0_495 = arith.constant 0 : index
    %654 = vector.load %arg3[%c0_492, %c8_493, %c0_494, %c0_495] : memref<2x9x4x32xbf16, #tpu.memory_space<vmem>>, vector<1x1x4x32xbf16>
    %655 = vector.shape_cast %654 : vector<1x1x4x32xbf16> to vector<4x32xbf16>
    %cst_496 = arith.constant dense<0.000000e+00> : vector<4x256xf32>
    %656 = tpu.matmul %655, %653, %cst_496 {dimension_numbers = #tpu.dot_dimension_numbers<[1], [0], [0], [1], [0, 0, 1, 1], [], []>} : vector<4x32xbf16>, vector<32x256xbf16>, vector<4x256xf32> -> vector<4x256xf32>
    %657 = arith.addf %652, %656 : vector<4x256xf32>
    %658 = vector.broadcast %26 : vector<4x1xf32> to vector<4x256xf32>
    %659 = arith.addf %657, %658 : vector<4x256xf32>
    %cst_497 = arith.constant 2.000000e+00 : f32
    %660 = vector.broadcast %cst_497 : f32 to vector<4x256xf32>
    %661 = arith.mulf %660, %405 : vector<4x256xf32>
    %662 = arith.addf %278, %661 : vector<4x256xf32>
    %cst_498 = arith.constant 2.000000e+00 : f32
    %663 = vector.broadcast %cst_498 : f32 to vector<4x256xf32>
    %664 = arith.mulf %663, %532 : vector<4x256xf32>
    %665 = arith.addf %662, %664 : vector<4x256xf32>
    %666 = arith.addf %665, %659 : vector<4x256xf32>
    %cst_499 = arith.constant 0.0166666675 : f32
    %667 = vector.broadcast %cst_499 : f32 to vector<4x256xf32>
    %668 = arith.mulf %667, %666 : vector<4x256xf32>
    %669 = arith.addf %154, %668 : vector<4x256xf32>
    %c0_500 = arith.constant 0 : index
    %c0_501 = arith.constant 0 : index
    %c0_502 = arith.constant 0 : index
    %670 = vector.load %arg6[%c0_500, %c0_501, %c0_502] : memref<1x4x256xf32, #tpu.memory_space<vmem>>, vector<1x4x256xf32>
    %671 = vector.shape_cast %670 : vector<1x4x256xf32> to vector<4x256xf32>
    %672 = vector.shape_cast %669 : vector<4x256xf32> to vector<1x4x256xf32>
    tpu.vector_store %arg6[%c0_500, %c0_501, %c0_502], %672 {strides = array<i32>} : memref<1x4x256xf32, #tpu.memory_space<vmem>>, vector<1x4x256xf32>,
    %cst_503 = arith.constant 0.000000e+00 : bf16
    %673 = vector.broadcast %cst_503 : bf16 to vector<4x17xbf16>
    %cst_504 = arith.constant 0.000000e+00 : f32
    %674 = vector.shape_cast %18 : vector<1x256xi1> to vector<1x256xi1>
    %675 = vector.broadcast %674 : vector<1x256xi1> to vector<4x256xi1>
    %676 = vector.broadcast %cst_504 : f32 to vector<4x256xf32>
    %677 = arith.select %675, %669, %676 : vector<4x256xi1>, vector<4x256xf32>
    %678 = arith.truncf %677 : vector<4x256xf32> to vector<4x256xbf16>
    %679 = tpu.concatenate %673, %678, %673 in 1 : vector<4x17xbf16>, vector<4x256xbf16>, vector<4x17xbf16> -> vector<4x290xbf16>
    %680 = arith.truncf %669 : vector<4x256xf32> to vector<4x256xbf16>
    %681 = tpu.concatenate %673, %680, %673 in 1 : vector<4x17xbf16>, vector<4x256xbf16>, vector<4x17xbf16> -> vector<4x290xbf16>
    %cst_505 = arith.constant 0.000000e+00 : f32
    %682 = vector.shape_cast %20 : vector<1x256xi1> to vector<1x256xi1>
    %683 = vector.broadcast %682 : vector<1x256xi1> to vector<4x256xi1>
    %684 = vector.broadcast %cst_505 : f32 to vector<4x256xf32>
    %685 = arith.select %683, %669, %684 : vector<4x256xi1>, vector<4x256xf32>
    %686 = arith.truncf %685 : vector<4x256xf32> to vector<4x256xbf16>
    %687 = tpu.concatenate %673, %686, %673 in 1 : vector<4x17xbf16>, vector<4x256xbf16>, vector<4x17xbf16> -> vector<4x290xbf16>
    %688 = vector.extract_strided_slice %679 {offsets = [0, 0], sizes = [4, 256], strides = [1, 1]} : vector<4x290xbf16> to vector<4x256xbf16>
    %c1_506 = arith.constant 1 : index
    %c0_507 = arith.constant 0 : index
    %c0_508 = arith.constant 0 : index
    %c0_509 = arith.constant 0 : index
    %689 = vector.load %arg2[%c1_506, %c0_507, %c0_508, %c0_509] : memref<2x9x32x4xbf16, #tpu.memory_space<vmem>>, vector<1x1x32x4xbf16>
    %690 = vector.shape_cast %689 : vector<1x1x32x4xbf16> to vector<32x4xbf16>
    %cst_510 = arith.constant dense<0.000000e+00> : vector<32x256xf32>
    %691 = tpu.matmul %690, %688, %cst_510 {dimension_numbers = #tpu.dot_dimension_numbers<[1], [0], [0], [1], [0, 0, 1, 1], [], []>} : vector<32x4xbf16>, vector<4x256xbf16>, vector<32x256xf32> -> vector<32x256xf32>
    %692 = vector.extract_strided_slice %681 {offsets = [0, 1], sizes = [4, 256], strides = [1, 1]} : vector<4x290xbf16> to vector<4x256xbf16>
    %c1_511 = arith.constant 1 : index
    %c1_512 = arith.constant 1 : index
    %c0_513 = arith.constant 0 : index
    %c0_514 = arith.constant 0 : index
    %693 = vector.load %arg2[%c1_511, %c1_512, %c0_513, %c0_514] : memref<2x9x32x4xbf16, #tpu.memory_space<vmem>>, vector<1x1x32x4xbf16>
    %694 = vector.shape_cast %693 : vector<1x1x32x4xbf16> to vector<32x4xbf16>
    %cst_515 = arith.constant dense<0.000000e+00> : vector<32x256xf32>
    %695 = tpu.matmul %694, %692, %cst_515 {dimension_numbers = #tpu.dot_dimension_numbers<[1], [0], [0], [1], [0, 0, 1, 1], [], []>} : vector<32x4xbf16>, vector<4x256xbf16>, vector<32x256xf32> -> vector<32x256xf32>
    %696 = arith.addf %691, %695 : vector<32x256xf32>
    %697 = vector.extract_strided_slice %687 {offsets = [0, 2], sizes = [4, 256], strides = [1, 1]} : vector<4x290xbf16> to vector<4x256xbf16>
    %c1_516 = arith.constant 1 : index
    %c2_517 = arith.constant 2 : index
    %c0_518 = arith.constant 0 : index
    %c0_519 = arith.constant 0 : index
    %698 = vector.load %arg2[%c1_516, %c2_517, %c0_518, %c0_519] : memref<2x9x32x4xbf16, #tpu.memory_space<vmem>>, vector<1x1x32x4xbf16>
    %699 = vector.shape_cast %698 : vector<1x1x32x4xbf16> to vector<32x4xbf16>
    %cst_520 = arith.constant dense<0.000000e+00> : vector<32x256xf32>
    %700 = tpu.matmul %699, %697, %cst_520 {dimension_numbers = #tpu.dot_dimension_numbers<[1], [0], [0], [1], [0, 0, 1, 1], [], []>} : vector<32x4xbf16>, vector<4x256xbf16>, vector<32x256xf32> -> vector<32x256xf32>
    %701 = arith.addf %696, %700 : vector<32x256xf32>
    %702 = vector.extract_strided_slice %679 {offsets = [0, 16], sizes = [4, 256], strides = [1, 1]} : vector<4x290xbf16> to vector<4x256xbf16>
    %c1_521 = arith.constant 1 : index
    %c3_522 = arith.constant 3 : index
    %c0_523 = arith.constant 0 : index
    %c0_524 = arith.constant 0 : index
    %703 = vector.load %arg2[%c1_521, %c3_522, %c0_523, %c0_524] : memref<2x9x32x4xbf16, #tpu.memory_space<vmem>>, vector<1x1x32x4xbf16>
    %704 = vector.shape_cast %703 : vector<1x1x32x4xbf16> to vector<32x4xbf16>
    %cst_525 = arith.constant dense<0.000000e+00> : vector<32x256xf32>
    %705 = tpu.matmul %704, %702, %cst_525 {dimension_numbers = #tpu.dot_dimension_numbers<[1], [0], [0], [1], [0, 0, 1, 1], [], []>} : vector<32x4xbf16>, vector<4x256xbf16>, vector<32x256xf32> -> vector<32x256xf32>
    %706 = arith.addf %701, %705 : vector<32x256xf32>
    %707 = vector.extract_strided_slice %681 {offsets = [0, 17], sizes = [4, 256], strides = [1, 1]} : vector<4x290xbf16> to vector<4x256xbf16>
    %c1_526 = arith.constant 1 : index
    %c4_527 = arith.constant 4 : index
    %c0_528 = arith.constant 0 : index
    %c0_529 = arith.constant 0 : index
    %708 = vector.load %arg2[%c1_526, %c4_527, %c0_528, %c0_529] : memref<2x9x32x4xbf16, #tpu.memory_space<vmem>>, vector<1x1x32x4xbf16>
    %709 = vector.shape_cast %708 : vector<1x1x32x4xbf16> to vector<32x4xbf16>
    %cst_530 = arith.constant dense<0.000000e+00> : vector<32x256xf32>
    %710 = tpu.matmul %709, %707, %cst_530 {dimension_numbers = #tpu.dot_dimension_numbers<[1], [0], [0], [1], [0, 0, 1, 1], [], []>} : vector<32x4xbf16>, vector<4x256xbf16>, vector<32x256xf32> -> vector<32x256xf32>
    %711 = arith.addf %706, %710 : vector<32x256xf32>
    %712 = vector.extract_strided_slice %687 {offsets = [0, 18], sizes = [4, 256], strides = [1, 1]} : vector<4x290xbf16> to vector<4x256xbf16>
    %c1_531 = arith.constant 1 : index
    %c5_532 = arith.constant 5 : index
    %c0_533 = arith.constant 0 : index
    %c0_534 = arith.constant 0 : index
    %713 = vector.load %arg2[%c1_531, %c5_532, %c0_533, %c0_534] : memref<2x9x32x4xbf16, #tpu.memory_space<vmem>>, vector<1x1x32x4xbf16>
    %714 = vector.shape_cast %713 : vector<1x1x32x4xbf16> to vector<32x4xbf16>
    %cst_535 = arith.constant dense<0.000000e+00> : vector<32x256xf32>
    %715 = tpu.matmul %714, %712, %cst_535 {dimension_numbers = #tpu.dot_dimension_numbers<[1], [0], [0], [1], [0, 0, 1, 1], [], []>} : vector<32x4xbf16>, vector<4x256xbf16>, vector<32x256xf32> -> vector<32x256xf32>
    %716 = arith.addf %711, %715 : vector<32x256xf32>
    %717 = vector.extract_strided_slice %679 {offsets = [0, 32], sizes = [4, 256], strides = [1, 1]} : vector<4x290xbf16> to vector<4x256xbf16>
    %c1_536 = arith.constant 1 : index
    %c6_537 = arith.constant 6 : index
    %c0_538 = arith.constant 0 : index
    %c0_539 = arith.constant 0 : index
    %718 = vector.load %arg2[%c1_536, %c6_537, %c0_538, %c0_539] : memref<2x9x32x4xbf16, #tpu.memory_space<vmem>>, vector<1x1x32x4xbf16>
    %719 = vector.shape_cast %718 : vector<1x1x32x4xbf16> to vector<32x4xbf16>
    %cst_540 = arith.constant dense<0.000000e+00> : vector<32x256xf32>
    %720 = tpu.matmul %719, %717, %cst_540 {dimension_numbers = #tpu.dot_dimension_numbers<[1], [0], [0], [1], [0, 0, 1, 1], [], []>} : vector<32x4xbf16>, vector<4x256xbf16>, vector<32x256xf32> -> vector<32x256xf32>
    %721 = arith.addf %716, %720 : vector<32x256xf32>
    %722 = vector.extract_strided_slice %681 {offsets = [0, 33], sizes = [4, 256], strides = [1, 1]} : vector<4x290xbf16> to vector<4x256xbf16>
    %c1_541 = arith.constant 1 : index
    %c7_542 = arith.constant 7 : index
    %c0_543 = arith.constant 0 : index
    %c0_544 = arith.constant 0 : index
    %723 = vector.load %arg2[%c1_541, %c7_542, %c0_543, %c0_544] : memref<2x9x32x4xbf16, #tpu.memory_space<vmem>>, vector<1x1x32x4xbf16>
    %724 = vector.shape_cast %723 : vector<1x1x32x4xbf16> to vector<32x4xbf16>
    %cst_545 = arith.constant dense<0.000000e+00> : vector<32x256xf32>
    %725 = tpu.matmul %724, %722, %cst_545 {dimension_numbers = #tpu.dot_dimension_numbers<[1], [0], [0], [1], [0, 0, 1, 1], [], []>} : vector<32x4xbf16>, vector<4x256xbf16>, vector<32x256xf32> -> vector<32x256xf32>
    %726 = arith.addf %721, %725 : vector<32x256xf32>
    %727 = vector.extract_strided_slice %687 {offsets = [0, 34], sizes = [4, 256], strides = [1, 1]} : vector<4x290xbf16> to vector<4x256xbf16>
    %c1_546 = arith.constant 1 : index
    %c8_547 = arith.constant 8 : index
    %c0_548 = arith.constant 0 : index
    %c0_549 = arith.constant 0 : index
    %728 = vector.load %arg2[%c1_546, %c8_547, %c0_548, %c0_549] : memref<2x9x32x4xbf16, #tpu.memory_space<vmem>>, vector<1x1x32x4xbf16>
    %729 = vector.shape_cast %728 : vector<1x1x32x4xbf16> to vector<32x4xbf16>
    %cst_550 = arith.constant dense<0.000000e+00> : vector<32x256xf32>
    %730 = tpu.matmul %729, %727, %cst_550 {dimension_numbers = #tpu.dot_dimension_numbers<[1], [0], [0], [1], [0, 0, 1, 1], [], []>} : vector<32x4xbf16>, vector<4x256xbf16>, vector<32x256xf32> -> vector<32x256xf32>
    %731 = arith.addf %726, %730 : vector<32x256xf32>
    %732 = vector.broadcast %24 : vector<32x1xf32> to vector<32x256xf32>
    %733 = arith.addf %731, %732 : vector<32x256xf32>
    %cst_551 = arith.constant 0.000000e+00 : f32
    %734 = vector.broadcast %cst_551 : f32 to vector<32x256xf32>
    %735 = arith.maximumf %733, %734 : vector<32x256xf32>
    %cst_552 = arith.constant 0.000000e+00 : bf16
    %736 = vector.broadcast %cst_552 : bf16 to vector<32x17xbf16>
    %cst_553 = arith.constant 0.000000e+00 : f32
    %737 = vector.shape_cast %18 : vector<1x256xi1> to vector<1x256xi1>
    %738 = vector.broadcast %737 : vector<1x256xi1> to vector<32x256xi1>
    %739 = vector.broadcast %cst_553 : f32 to vector<32x256xf32>
    %740 = arith.select %738, %735, %739 : vector<32x256xi1>, vector<32x256xf32>
    %741 = arith.truncf %740 : vector<32x256xf32> to vector<32x256xbf16>
    %742 = tpu.concatenate %736, %741, %736 in 1 : vector<32x17xbf16>, vector<32x256xbf16>, vector<32x17xbf16> -> vector<32x290xbf16>
    %743 = arith.truncf %735 : vector<32x256xf32> to vector<32x256xbf16>
    %744 = tpu.concatenate %736, %743, %736 in 1 : vector<32x17xbf16>, vector<32x256xbf16>, vector<32x17xbf16> -> vector<32x290xbf16>
    %cst_554 = arith.constant 0.000000e+00 : f32
    %745 = vector.shape_cast %20 : vector<1x256xi1> to vector<1x256xi1>
    %746 = vector.broadcast %745 : vector<1x256xi1> to vector<32x256xi1>
    %747 = vector.broadcast %cst_554 : f32 to vector<32x256xf32>
    %748 = arith.select %746, %735, %747 : vector<32x256xi1>, vector<32x256xf32>
    %749 = arith.truncf %748 : vector<32x256xf32> to vector<32x256xbf16>
    %750 = tpu.concatenate %736, %749, %736 in 1 : vector<32x17xbf16>, vector<32x256xbf16>, vector<32x17xbf16> -> vector<32x290xbf16>
    %751 = vector.extract_strided_slice %742 {offsets = [0, 0], sizes = [32, 256], strides = [1, 1]} : vector<32x290xbf16> to vector<32x256xbf16>
    %c1_555 = arith.constant 1 : index
    %c0_556 = arith.constant 0 : index
    %c0_557 = arith.constant 0 : index
    %c0_558 = arith.constant 0 : index
    %752 = vector.load %arg3[%c1_555, %c0_556, %c0_557, %c0_558] : memref<2x9x4x32xbf16, #tpu.memory_space<vmem>>, vector<1x1x4x32xbf16>
    %753 = vector.shape_cast %752 : vector<1x1x4x32xbf16> to vector<4x32xbf16>
    %cst_559 = arith.constant dense<0.000000e+00> : vector<4x256xf32>
    %754 = tpu.matmul %753, %751, %cst_559 {dimension_numbers = #tpu.dot_dimension_numbers<[1], [0], [0], [1], [0, 0, 1, 1], [], []>} : vector<4x32xbf16>, vector<32x256xbf16>, vector<4x256xf32> -> vector<4x256xf32>
    %755 = vector.extract_strided_slice %744 {offsets = [0, 1], sizes = [32, 256], strides = [1, 1]} : vector<32x290xbf16> to vector<32x256xbf16>
    %c1_560 = arith.constant 1 : index
    %c1_561 = arith.constant 1 : index
    %c0_562 = arith.constant 0 : index
    %c0_563 = arith.constant 0 : index
    %756 = vector.load %arg3[%c1_560, %c1_561, %c0_562, %c0_563] : memref<2x9x4x32xbf16, #tpu.memory_space<vmem>>, vector<1x1x4x32xbf16>
    %757 = vector.shape_cast %756 : vector<1x1x4x32xbf16> to vector<4x32xbf16>
    %cst_564 = arith.constant dense<0.000000e+00> : vector<4x256xf32>
    %758 = tpu.matmul %757, %755, %cst_564 {dimension_numbers = #tpu.dot_dimension_numbers<[1], [0], [0], [1], [0, 0, 1, 1], [], []>} : vector<4x32xbf16>, vector<32x256xbf16>, vector<4x256xf32> -> vector<4x256xf32>
    %759 = arith.addf %754, %758 : vector<4x256xf32>
    %760 = vector.extract_strided_slice %750 {offsets = [0, 2], sizes = [32, 256], strides = [1, 1]} : vector<32x290xbf16> to vector<32x256xbf16>
    %c1_565 = arith.constant 1 : index
    %c2_566 = arith.constant 2 : index
    %c0_567 = arith.constant 0 : index
    %c0_568 = arith.constant 0 : index
    %761 = vector.load %arg3[%c1_565, %c2_566, %c0_567, %c0_568] : memref<2x9x4x32xbf16, #tpu.memory_space<vmem>>, vector<1x1x4x32xbf16>
    %762 = vector.shape_cast %761 : vector<1x1x4x32xbf16> to vector<4x32xbf16>
    %cst_569 = arith.constant dense<0.000000e+00> : vector<4x256xf32>
    %763 = tpu.matmul %762, %760, %cst_569 {dimension_numbers = #tpu.dot_dimension_numbers<[1], [0], [0], [1], [0, 0, 1, 1], [], []>} : vector<4x32xbf16>, vector<32x256xbf16>, vector<4x256xf32> -> vector<4x256xf32>
    %764 = arith.addf %759, %763 : vector<4x256xf32>
    %765 = vector.extract_strided_slice %742 {offsets = [0, 16], sizes = [32, 256], strides = [1, 1]} : vector<32x290xbf16> to vector<32x256xbf16>
    %c1_570 = arith.constant 1 : index
    %c3_571 = arith.constant 3 : index
    %c0_572 = arith.constant 0 : index
    %c0_573 = arith.constant 0 : index
    %766 = vector.load %arg3[%c1_570, %c3_571, %c0_572, %c0_573] : memref<2x9x4x32xbf16, #tpu.memory_space<vmem>>, vector<1x1x4x32xbf16>
    %767 = vector.shape_cast %766 : vector<1x1x4x32xbf16> to vector<4x32xbf16>
    %cst_574 = arith.constant dense<0.000000e+00> : vector<4x256xf32>
    %768 = tpu.matmul %767, %765, %cst_574 {dimension_numbers = #tpu.dot_dimension_numbers<[1], [0], [0], [1], [0, 0, 1, 1], [], []>} : vector<4x32xbf16>, vector<32x256xbf16>, vector<4x256xf32> -> vector<4x256xf32>
    %769 = arith.addf %764, %768 : vector<4x256xf32>
    %770 = vector.extract_strided_slice %744 {offsets = [0, 17], sizes = [32, 256], strides = [1, 1]} : vector<32x290xbf16> to vector<32x256xbf16>
    %c1_575 = arith.constant 1 : index
    %c4_576 = arith.constant 4 : index
    %c0_577 = arith.constant 0 : index
    %c0_578 = arith.constant 0 : index
    %771 = vector.load %arg3[%c1_575, %c4_576, %c0_577, %c0_578] : memref<2x9x4x32xbf16, #tpu.memory_space<vmem>>, vector<1x1x4x32xbf16>
    %772 = vector.shape_cast %771 : vector<1x1x4x32xbf16> to vector<4x32xbf16>
    %cst_579 = arith.constant dense<0.000000e+00> : vector<4x256xf32>
    %773 = tpu.matmul %772, %770, %cst_579 {dimension_numbers = #tpu.dot_dimension_numbers<[1], [0], [0], [1], [0, 0, 1, 1], [], []>} : vector<4x32xbf16>, vector<32x256xbf16>, vector<4x256xf32> -> vector<4x256xf32>
    %774 = arith.addf %769, %773 : vector<4x256xf32>
    %775 = vector.extract_strided_slice %750 {offsets = [0, 18], sizes = [32, 256], strides = [1, 1]} : vector<32x290xbf16> to vector<32x256xbf16>
    %c1_580 = arith.constant 1 : index
    %c5_581 = arith.constant 5 : index
    %c0_582 = arith.constant 0 : index
    %c0_583 = arith.constant 0 : index
    %776 = vector.load %arg3[%c1_580, %c5_581, %c0_582, %c0_583] : memref<2x9x4x32xbf16, #tpu.memory_space<vmem>>, vector<1x1x4x32xbf16>
    %777 = vector.shape_cast %776 : vector<1x1x4x32xbf16> to vector<4x32xbf16>
    %cst_584 = arith.constant dense<0.000000e+00> : vector<4x256xf32>
    %778 = tpu.matmul %777, %775, %cst_584 {dimension_numbers = #tpu.dot_dimension_numbers<[1], [0], [0], [1], [0, 0, 1, 1], [], []>} : vector<4x32xbf16>, vector<32x256xbf16>, vector<4x256xf32> -> vector<4x256xf32>
    %779 = arith.addf %774, %778 : vector<4x256xf32>
    %780 = vector.extract_strided_slice %742 {offsets = [0, 32], sizes = [32, 256], strides = [1, 1]} : vector<32x290xbf16> to vector<32x256xbf16>
    %c1_585 = arith.constant 1 : index
    %c6_586 = arith.constant 6 : index
    %c0_587 = arith.constant 0 : index
    %c0_588 = arith.constant 0 : index
    %781 = vector.load %arg3[%c1_585, %c6_586, %c0_587, %c0_588] : memref<2x9x4x32xbf16, #tpu.memory_space<vmem>>, vector<1x1x4x32xbf16>
    %782 = vector.shape_cast %781 : vector<1x1x4x32xbf16> to vector<4x32xbf16>
    %cst_589 = arith.constant dense<0.000000e+00> : vector<4x256xf32>
    %783 = tpu.matmul %782, %780, %cst_589 {dimension_numbers = #tpu.dot_dimension_numbers<[1], [0], [0], [1], [0, 0, 1, 1], [], []>} : vector<4x32xbf16>, vector<32x256xbf16>, vector<4x256xf32> -> vector<4x256xf32>
    %784 = arith.addf %779, %783 : vector<4x256xf32>
    %785 = vector.extract_strided_slice %744 {offsets = [0, 33], sizes = [32, 256], strides = [1, 1]} : vector<32x290xbf16> to vector<32x256xbf16>
    %c1_590 = arith.constant 1 : index
    %c7_591 = arith.constant 7 : index
    %c0_592 = arith.constant 0 : index
    %c0_593 = arith.constant 0 : index
    %786 = vector.load %arg3[%c1_590, %c7_591, %c0_592, %c0_593] : memref<2x9x4x32xbf16, #tpu.memory_space<vmem>>, vector<1x1x4x32xbf16>
    %787 = vector.shape_cast %786 : vector<1x1x4x32xbf16> to vector<4x32xbf16>
    %cst_594 = arith.constant dense<0.000000e+00> : vector<4x256xf32>
    %788 = tpu.matmul %787, %785, %cst_594 {dimension_numbers = #tpu.dot_dimension_numbers<[1], [0], [0], [1], [0, 0, 1, 1], [], []>} : vector<4x32xbf16>, vector<32x256xbf16>, vector<4x256xf32> -> vector<4x256xf32>
    %789 = arith.addf %784, %788 : vector<4x256xf32>
    %790 = vector.extract_strided_slice %750 {offsets = [0, 34], sizes = [32, 256], strides = [1, 1]} : vector<32x290xbf16> to vector<32x256xbf16>
    %c1_595 = arith.constant 1 : index
    %c8_596 = arith.constant 8 : index
    %c0_597 = arith.constant 0 : index
    %c0_598 = arith.constant 0 : index
    %791 = vector.load %arg3[%c1_595, %c8_596, %c0_597, %c0_598] : memref<2x9x4x32xbf16, #tpu.memory_space<vmem>>, vector<1x1x4x32xbf16>
    %792 = vector.shape_cast %791 : vector<1x1x4x32xbf16> to vector<4x32xbf16>
    %cst_599 = arith.constant dense<0.000000e+00> : vector<4x256xf32>
    %793 = tpu.matmul %792, %790, %cst_599 {dimension_numbers = #tpu.dot_dimension_numbers<[1], [0], [0], [1], [0, 0, 1, 1], [], []>} : vector<4x32xbf16>, vector<32x256xbf16>, vector<4x256xf32> -> vector<4x256xf32>
    %794 = arith.addf %789, %793 : vector<4x256xf32>
    %795 = vector.broadcast %28 : vector<4x1xf32> to vector<4x256xf32>
    %796 = arith.addf %794, %795 : vector<4x256xf32>
    %c0_600 = arith.constant 0 : index
    %c0_601 = arith.constant 0 : index
    %c0_602 = arith.constant 0 : index
    %797 = vector.load %arg7[%c0_600, %c0_601, %c0_602] : memref<1x4x256xf32, #tpu.memory_space<vmem>>, vector<1x4x256xf32>
    %798 = vector.shape_cast %797 : vector<1x4x256xf32> to vector<4x256xf32>
    %799 = vector.shape_cast %796 : vector<4x256xf32> to vector<1x4x256xf32>
    tpu.vector_store %arg7[%c0_600, %c0_601, %c0_602], %799 {strides = array<i32>} : memref<1x4x256xf32, #tpu.memory_space<vmem>>, vector<1x4x256xf32>,
    return
  }
  func.func @transform_0(%arg0: i32) -> (i32, i32, i32) {
    %c0_i32 = arith.constant 0 : i32
    %c0_i32_0 = arith.constant 0 : i32
    %c0_i32_1 = arith.constant 0 : i32
    return %arg0, %c0_i32, %c0_i32_0 : i32, i32, i32
  }
  func.func @transform_1(%arg0: i32) -> (i32, i32, i32, i32) {
    %c0_i32 = arith.constant 0 : i32
    %c0_i32_0 = arith.constant 0 : i32
    %c0_i32_1 = arith.constant 0 : i32
    %c0_i32_2 = arith.constant 0 : i32
    %c0_i32_3 = arith.constant 0 : i32
    return %c0_i32, %c0_i32_0, %c0_i32_1, %c0_i32_2 : i32, i32, i32, i32
  }
  func.func @transform_2(%arg0: i32) -> (i32, i32, i32, i32) {
    %c0_i32 = arith.constant 0 : i32
    %c0_i32_0 = arith.constant 0 : i32
    %c0_i32_1 = arith.constant 0 : i32
    %c0_i32_2 = arith.constant 0 : i32
    %c0_i32_3 = arith.constant 0 : i32
    return %c0_i32, %c0_i32_0, %c0_i32_1, %c0_i32_2 : i32, i32, i32, i32
  }
  func.func @transform_3(%arg0: i32) -> (i32, i32, i32) {
    %c0_i32 = arith.constant 0 : i32
    %c0_i32_0 = arith.constant 0 : i32
    %c0_i32_1 = arith.constant 0 : i32
    %c0_i32_2 = arith.constant 0 : i32
    return %c0_i32, %c0_i32_0, %c0_i32_1 : i32, i32, i32
  }
  func.func @transform_4(%arg0: i32) -> (i32, i32, i32) {
    %c0_i32 = arith.constant 0 : i32
    %c0_i32_0 = arith.constant 0 : i32
    %c0_i32_1 = arith.constant 0 : i32
    %c0_i32_2 = arith.constant 0 : i32
    return %c0_i32, %c0_i32_0, %c0_i32_1 : i32, i32, i32
  }
  func.func @transform_5(%arg0: i32) -> (i32, i32, i32) {
    %c0_i32 = arith.constant 0 : i32
    %c0_i32_0 = arith.constant 0 : i32
    %c0_i32_1 = arith.constant 0 : i32
    return %arg0, %c0_i32, %c0_i32_0 : i32, i32, i32
  }
  func.func @transform_6(%arg0: i32) -> (i32, i32, i32) {
    %c0_i32 = arith.constant 0 : i32
    %c0_i32_0 = arith.constant 0 : i32
    %c0_i32_1 = arith.constant 0 : i32
    return %arg0, %c0_i32, %c0_i32_0 : i32, i32, i32
  }
}

</mosaic_0001>

<bundles_post_ra>
// kernel: model_forward.1
= control target key start
LH: loop header
LB: loop body
LE: loop exit
PB: predicated region body
PF: predicated region fallthrough
CT: control target
= control target key end

     0   :  { %s10125_s21 = smov 0   ;;  %s12654_s0 = inlined_call_operand.vmem [shape: f32[2,4,256], index: 0, kind: input, shape index: {}]   ;;  %s12655_s1 = inlined_call_operand.vmem [shape: bf16[2,9,32,4], index: 1, kind: input, shape index: {}]   ;;  %s12656_s2 = inlined_call_operand.vmem [shape: bf16[2,9,4,32], index: 2, kind: input, shape index: {}]   ;;  %s12657_s3 = inlined_call_operand.vmem [shape: f32[2,32,1], index: 3, kind: input, shape index: {}]   ;;  %s12658_s4 = inlined_call_operand.vmem [shape: f32[2,4,1], index: 4, kind: input, shape index: {}]   ;;  %s12659_s5 = inlined_call_operand.vmem [shape: f32[2,4,256], index: 5, kind: output, shape index: {0}]   ;;  %s12660_s6 = inlined_call_operand.vmem [shape: f32[2,4,256], index: 6, kind: output, shape index: {1}]  }
   0x1 LB: > { %s9195_s22 = sadd.s32 4294967295, %s10078_s21   ;;  %p9199_p0 = scmp.ge.s32.totalorder %s10078_s21, 1  ;;  %s10078_s21 = sphi %s10125_s21, %s17_s21  }
   0x2   : > { %p215_p1 = scmp.lt.s32.totalorder %s10078_s21, 3 }
   0x4   : > { %p216_p2 = pnand %p9199_p0, %p215_p1 }
   0x5   : > { %p250_p3 = scmp.lt.s32.totalorder (!%p216_p2), %s9195_s22, 1  ;;  %v266_v0 = vlaneseq (!%p216_p2)  ;;  %s10080_s27 = smov (!%p216_p2), 17   ;;  %v10081_v21 = vmov (!%p216_p2), 0   ;;  %vm327_vm4 = vcmask (!%p216_p2), 138240   ;;  %vm12663_vm5 = vcmask (!%p216_p2), 1039360   ;;  %v9982_v43 = vld [vmem:[%s12655_s1 + $0x10] sm:$0xff] (!%p216_p2)  }
   0x6   : > { %219 = sbr.rel (%p216_p2) target bundleno = 6891 (0x1aeb), region = 40  ;;  %443 = vmatprep.mubr.bf16.mxu0 (!%p216_p2), %v10081_v21  ;;  %9979 = vset.pattern.permute.xlu0 (!%p216_p2), %v10081_v21  ;;  %s10082_s28 = smov (!%p216_p2), 127   ;;  %vm404_vm6 = vcmask (!%p216_p2), 1041408   ;;  %vm12661_vm7 = vcmask (!%p216_p2), 31744   ;;  %vm561_vm8 = vcmask (!%p216_p2), 1031168   ;;  %v9983_v49 = vld [vmem:[%s12655_s1 + $0x18] sm:$0xff] (!%p216_p2)  }
   0x7   : > { %v267_v1 = vand.u32 (!%p216_p2), 127, %v266_v0  ;;  %9980 = vset.pattern.permute.xlu1 (!%p216_p2), %v10081_v21  ;;  %1418 = vmatprep.mubr.bf16.mxu1 (!%p216_p2), %v10081_v21  ;;  %s10083_s29 = smov (!%p216_p2), 126   ;;  %s10084_s30 = smov (!%p216_p2), 112   ;;  %v297_v51 = vld [vmem:[%s12657_s3] sm:$0xff] (!%p216_p2)  ;;  %v298_v52 = vld [vmem:[%s12657_s3 + $0x8] sm:$0xff] (!%p216_p2)  ;;  %v300_v53 = vld [vmem:[%s12657_s3 + $0x18] sm:$0xff] (!%p216_p2) }
   0x8   : > { %s10085_s7 = smov (!%p216_p2), 111   ;;  %s10086_s8 = smov (!%p216_p2), 110   ;;  %v299_v55 = vld [vmem:[%s12657_s3 + $0x10] sm:$0xff] (!%p216_p2)  ;;  %vm660_vm9 = vcmask (!%p216_p2), 916480   ;;  %v9984_v56 = vld [vmem:[%s12655_s1] sm:$0xff] (!%p216_p2)   ;;  %v9985_v61 = vld [vmem:[%s12655_s1 + $0x8] sm:$0xff] (!%p216_p2)  }
   0x9   : > { %v273_v2 = vand.u32 (!%p216_p2), 15, %v267_v1  ;;  %v268_v3 = vadd.s32 (!%p216_p2), 128, %v267_v1  ;;  %s10087_s9 = smov (!%p216_p2), 96   ;;  %s10088_s10 = smov (!%p216_p2), 95   ;;  %v9986_v0 = vld [vmem:[%s12655_s1 + $0x20] sm:$0xff] (!%p216_p2)   ;;  %vm12667_vm10 = vcmask (!%p216_p2), 908288  }
   0xa   : > { %s10089_s11 = smov (!%p216_p2), 94   ;;  %vm12666_vm11 = vcmask (!%p216_p2), 900096   ;;  %vm12665_vm12 = vcmask (!%p216_p2), 785408   ;;  %vm12664_vm13 = vcmask (!%p216_p2), 777216   ;;  %vm1145_vm14 = vcmask (!%p216_p2), 769024  }
   0xb   : > { %vm10139_vm0 = vcmp.ge.s32.totalorder (!%p216_p2), %v273_v2, 1  ;;  %v280_v6 = vand.u32 (!%p216_p2), 15, %v268_v3  ;;  %vm10143_vm1 = vcmp.le.s32.totalorder (!%p216_p2), %v273_v2, 14  ;;  %vm12662_vm15 = vcmask (!%p216_p2), 261120  }
   0xd   : > { %s12924_s22 = smov (!%p250_p3, %s9195_s22), 1  ;;  %vm10151_vm2 = vcmp.ge.s32.totalorder %v280_v6, 1  ;;  %vm10155_vm3 = vcmp.le.s32.totalorder %v280_v6, 14  ;;  %v9987_v6 = vld [vmem:[%s12655_s1 + $0x28] sm:$0xff]  }
   0xe   : > { %s10133_s23 = sshll.u32 %s12924_s22, 3 }
   0xf   : > { %s254_s26 = scalar_lea.vmem %s12654_s0, %s10133_s23  ;;  %s259_s17 = scalar_lea.vmem %s12659_s5, %s10133_s23 }
  0x10   : > { %v309_v4 = vld [vmem:[%s254_s26] sm:$0xff] }
  0x11   : > { %v335_v8 = vpack.c.bf16 %v309_v4, %v309_v4  ;;  %v352_v9 = vsel %vm10139_vm0, %v309_v4, 0.0  ;;  %v315_v10 = vcombine.high %v309_v4, %v309_v4  ;;  %v317_v11 = vsel %vm10143_vm1, %v309_v4, 0.0 }
  0x12   : > { %v354_v12 = vpack.c.bf16 %v352_v9, %v352_v9  ;;  %v319_v19 = vpack.c.bf16 %v317_v11, %v317_v11  ;;  %v9988_v9 = vld [vmem:[%s12655_s1 + $0x30] sm:$0xff]  }
  0x13   : > { %339 = vrot.lane.b32.xlu0 %v335_v8, %s10080_s27  ;;  %v336_v15 = vpack.c.bf16 %v315_v10, %v315_v10  ;;  %v353_v16 = vsel %vm10151_vm2, %v315_v10, 0.0  ;;  %v318_v17 = vsel %vm10155_vm3, %v315_v10, 0.0 }
  0x14   : > { %358 = vrot.lane.b32.xlu1 %v354_v12, %s10080_s27  ;;  %v355_v18 = vpack.c.bf16 %v353_v16, %v353_v16  ;;  %v320_v20 = vpack.c.bf16 %v318_v17, %v318_v17  ;;  %v9989_v17 = vld [vmem:[%s12655_s1 + $0x38] sm:$0xff]  }
  0x17   : > { %341 = vrot.lane.b32.xlu0 %v336_v15, %s10080_s27 }
  0x18   : > { %360 = vrot.lane.b32.xlu1 %v355_v18, %s10080_s27 }
  0x1b   : > { %323 = vrot.lane.b32.xlu0 %v319_v19, %s10080_s27  ;;  %v9990_v19 = vld [vmem:[%s12655_s1 + $0x40] sm:$0xff]  }
  0x1c   : > { %325 = vrot.lane.b32.xlu1 %v320_v20, %s10080_s27 }
  0x85   : > { %v340_v22 = vpop.permute.xlu0 %339 }
  0x86   : > { %v345_v23 = vsel %vm327_vm4, 0, %v340_v22  ;;  %v359_v24 = vpop.permute.xlu1 %358 }
  0x87   : > { %388 = vrot.lane.b32.xlu0 %v345_v23, %s10082_s28  ;;  %v364_v30 = vsel %vm327_vm4, 0, %v359_v24 }
  0x89   : > { %v342_v25 = vpop.permute.xlu0 %341 }
  0x8a   : > { %v347_v26 = vsel %vm327_vm4, %v342_v25, 0  ;;  %v343_v27 = vsel %vm327_vm4, %v340_v22, %v342_v25  ;;  %v361_v28 = vpop.permute.xlu1 %360 }
  0x8b   : > { %392 = vrot.lane.b32.xlu0 %v347_v26, %s10082_s28  ;;  %390 = vrot.lane.b32.xlu1 %v343_v27, %s10082_s28  ;;  %v362_v29 = vsel %vm327_vm4, %v359_v24, %v361_v28  ;;  %v366_v33 = vsel %vm327_vm4, %v361_v28, 0  ;;  %v9992_v28 = vld [vmem:[%s12655_s1 + $0x50] sm:$0xff]  }
  0x8d   : > { %v324_v31 = vpop.permute.xlu0 %323 }
  0x8e   : > { %v332_v32 = vsel %vm327_vm4, 0, %v324_v31  ;;  %v326_v34 = vpop.permute.xlu1 %325 }
  0x8f   : > { %557 = vrot.lane.b32.xlu0 %v362_v29, %s10083_s29  ;;  %555 = vrot.lane.b32.xlu1 %v364_v30, %s10083_s29  ;;  %v334_v35 = vsel %vm327_vm4, %v326_v34, 0  ;;  %v328_v36 = vsel %vm327_vm4, %v324_v31, %v326_v34  ;;  %v480_v45 = vsel %vm404_vm6, %v332_v32, 0  ;;  %v9993_v34 = vld [vmem:[%s12655_s1 + $0x58] sm:$0xff]  }
  0x93   : > { %654 = vrot.lane.b32.xlu0 %v332_v32, %s10084_s30  ;;  %559 = vrot.lane.b32.xlu1 %v366_v33, %s10083_s29 }
  0x97   : > { %658 = vrot.lane.b32.xlu0 %v334_v35, %s10084_s30  ;;  %656 = vrot.lane.b32.xlu1 %v328_v36, %s10084_s30 }
  0x9b   : > { %753 = vrot.lane.b32.xlu0 %v343_v27, %s10085_s7  ;;  %751 = vrot.lane.b32.xlu1 %v345_v23, %s10085_s7 }
  0x9f   : > { %848 = vrot.lane.b32.xlu0 %v364_v30, %s10086_s8  ;;  %755 = vrot.lane.b32.xlu1 %v347_v26, %s10085_s7 }
  0xa3   : > { %852 = vrot.lane.b32.xlu0 %v366_v33, %s10086_s8  ;;  %850 = vrot.lane.b32.xlu1 %v362_v29, %s10086_s8 }
  0xa7   : > { %947 = vrot.lane.b32.xlu0 %v328_v36, %s10087_s9  ;;  %945 = vrot.lane.b32.xlu1 %v332_v32, %s10087_s9 }
  0xab   : > { %1042 = vrot.lane.b32.xlu0 %v345_v23, %s10088_s10  ;;  %949 = vrot.lane.b32.xlu1 %v334_v35, %s10087_s9 }
  0xaf   : > { %1046 = vrot.lane.b32.xlu0 %v347_v26, %s10088_s10  ;;  %1044 = vrot.lane.b32.xlu1 %v343_v27, %s10088_s10  ;;  %v9991_v26 = vld [vmem:[%s12655_s1 + $0x48] sm:$0xff]  }
  0xb3   : > { %1141 = vrot.lane.b32.xlu0 %v362_v29, %s10089_s11  ;;  %1139 = vrot.lane.b32.xlu1 %v364_v30, %s10089_s11 }
  0xb7   : > { %1143 = vrot.lane.b32.xlu1 %v366_v33, %s10089_s11  ;;  %1223 = vperm.xlu0 %9979, %v297_v51  }
  0xbb   : > { %1228 = vperm.xlu1 %9980, %v298_v52   ;;  %1238 = vperm.xlu0 %9979, %v300_v53  }
  0xbf   : > { %1233 = vperm.xlu1 %9980, %v299_v55  }
  0xf9   : > { %v389_v37 = vpop.permute.xlu0 %388 }
  0xfd   : > { %v393_v38 = vpop.permute.xlu0 %392  ;;  %v391_v39 = vpop.permute.xlu1 %390 }
  0xfe   : > { %v396_v40 = vsel %vm12663_vm5, %v391_v39, %v393_v38  ;;  %v395_v41 = vsel %vm12663_vm5, %v389_v37, %v391_v39 }
  0xff   : > { %9217 = vmatprep.subr.msk.bf16.mxu0 %vm404_vm6, %v396_v40  ;;  %v406_v42 = vsel %vm404_vm6, %v395_v41, 0 }
 0x100   : > { %412 = vmatpush1.bf16.msra.mxu0 %v406_v42  ;;  %v10318_v42 = vld [vmem:[%s12655_s1 + $0x68] sm:$0xff]  }
 0x101   : > { %9222 = vmatprep.subr.msk.bf16.mxu0 %vm404_vm6, %v328_v36  ;;  %v556_v44 = vpop.permute.xlu1 %555  ;;  %v558_v46 = vpop.permute.xlu0 %557  ;;  %v9994_v36 = vld [vmem:[%s12655_s1 + $0x60] sm:$0xff]  }
 0x102   : > { %v562_v54 = vsel %vm561_vm8, %v556_v44, %v558_v46 }
 0x103   : > { %9218 = vmatmul.mubr.msk.bf16.vlgmr.msra.gmra.mrb[0].mxu0 %vm12661_vm7, %v9982_v43  ;;  %v571_v57 = vsel %vm404_vm6, %v562_v54, 0  ;;  %v10326_v43 = vld [vmem:[%s12655_s1 + $0x70] sm:$0xff]  }
 0x104   : > { %486 = vmatpush1.bf16.msra.mxu0 %v480_v45  ;;  %453 = vmatprep.mubr.bf16.mxu0 %v10081_v21 }
 0x105   : > { %v560_v47 = vpop.permute.xlu1 %559  ;;  %v655_v50 = vpop.permute.xlu0 %654 }
 0x106   : > { %v563_v48 = vsel %vm561_vm8, %v558_v46, %v560_v47  ;;  %v10336_v46 = vld [vmem:[%s12655_s1 + $0x78] sm:$0xff]   ;;  %v10344_v47 = vld [vmem:[%s12655_s1 + $0x80] sm:$0xff]  }
 0x107   : > { %9231 = vmatprep.subr.msk.bf16.mxu0 %vm404_vm6, %v563_v48  ;;  %v10352_v48 = vld [vmem:[%s12655_s1 + $0x88] sm:$0xff]  }
 0x109   : > { %v659_v58 = vpop.permute.xlu0 %658  ;;  %v657_v59 = vpop.permute.xlu1 %656 }
 0x10a   : > { %v662_v60 = vsel %vm660_vm9, %v657_v59, %v659_v58  ;;  %v661_v63 = vsel %vm660_vm9, %v655_v50, %v657_v59 }
 0x10b   : > { %9219 = vmatmul.mubr.msk.bf16.gmra.mrb[4].mxu0 %vm12661_vm7, %v9983_v49  ;;  %v670_v2 = vsel %vm404_vm6, %v661_v63, 0 }
 0x10c   : > { %517 = vmatprep.mubr.bf16.mxu0 %v10081_v21 }
 0x10d   : > { %v752_v62 = vpop.permute.xlu1 %751  ;;  %v754_v3 = vpop.permute.xlu0 %753 }
 0x10e   : > { %v758_v10 = vsel %vm12667_vm10, %v752_v62, %v754_v3 }
 0x10f   : > { %v767_v11 = vsel %vm404_vm6, %v758_v10, 0 }
 0x111   : > { %v756_v1 = vpop.permute.xlu1 %755  ;;  %v849_v8 = vpop.permute.xlu0 %848 }
 0x112   : > { %v759_v4 = vsel %vm12667_vm10, %v754_v3, %v756_v1 }
 0x113   : > { %9223 = vmatmul.mubr.msk.bf16.vlgmr.msra.gmra.mrb[0].mxu0 %vm12661_vm7, %v9984_v56 }
 0x114   : > { %577 = vmatpush1.bf16.msra.mxu0 %v571_v57  ;;  %527 = vmatprep.mubr.bf16.mxu0 %v10081_v21 }
 0x115   : > { %9240 = vmatprep.subr.msk.bf16.mxu0 %vm404_vm6, %v662_v60  ;;  %v853_v12 = vpop.permute.xlu0 %852  ;;  %v851_v15 = vpop.permute.xlu1 %850 }
 0x116   : > { %v856_v16 = vsel %vm12666_vm11, %v851_v15, %v853_v12  ;;  %v855_v20 = vsel %vm12666_vm11, %v849_v8, %v851_v15 }
 0x117   : > { %v864_v24 = vsel %vm404_vm6, %v855_v20, 0 }
 0x119   : > { %v946_v18 = vpop.permute.xlu1 %945  ;;  %v948_v22 = vpop.permute.xlu0 %947 }
 0x11a   : > { %v952_v29 = vsel %vm12665_vm12, %v946_v18, %v948_v22 }
 0x11b   : > { %9224 = vmatmul.mubr.msk.bf16.gmra.mrb[4].mxu0 %vm12661_vm7, %v9985_v61  ;;  %v961_v32 = vsel %vm404_vm6, %v952_v29, 0 }
 0x11c   : > { %608 = vmatprep.mubr.bf16.mxu0 %v10081_v21 }
 0x11d   : > { %v950_v23 = vpop.permute.xlu1 %949  ;;  %v1043_v27 = vpop.permute.xlu0 %1042 }
 0x11e   : > { %v953_v25 = vsel %vm12665_vm12, %v948_v22, %v950_v23 }
 0x121   : > { %v1047_v30 = vpop.permute.xlu0 %1046  ;;  %v1045_v31 = vpop.permute.xlu1 %1044 }
 0x122   : > { %v1050_v33 = vsel %vm12664_vm13, %v1045_v31, %v1047_v30  ;;  %v1049_v37 = vsel %vm12664_vm13, %v1043_v27, %v1045_v31 }
 0x123   : > { %9232 = vmatmul.mubr.msk.bf16.vlgmr.msra.gmra.mrb[0].mxu0 %vm12661_vm7, %v9986_v0  ;;  %v1058_v40 = vsel %vm404_vm6, %v1049_v37, 0 }
 0x124   : > { %676 = vmatpush1.bf16.msra.mxu0 %v670_v2  ;;  %618 = vmatprep.mubr.bf16.mxu0 %v10081_v21 }
 0x125   : > { %9249 = vmatprep.subr.msk.bf16.mxu0 %vm404_vm6, %v759_v4  ;;  %v1140_v35 = vpop.permute.xlu1 %1139  ;;  %v1142_v39 = vpop.permute.xlu0 %1141 }
 0x126   : > { %v1146_v44 = vsel %vm1145_vm14, %v1140_v35, %v1142_v39 }
 0x127   : > { %v1155_v45 = vsel %vm404_vm6, %v1146_v44, 0 }
 0x129   : > { %v1144_v38 = vpop.permute.xlu1 %1143 }
 0x12a   : > { %v1147_v41 = vsel %vm1145_vm14, %v1142_v39, %v1144_v38 }
 0x12b   : > { %9233 = vmatmul.mubr.msk.bf16.gmra.mrb[4].mxu0 %vm12661_vm7, %v9987_v6 }
 0x12c   : > { %707 = vmatprep.mubr.bf16.mxu0 %v10081_v21 }
 0x133   : > { %9241 = vmatmul.mubr.msk.bf16.vlgmr.msra.gmra.mrb[0].mxu0 %vm12661_vm7, %v9988_v9 }
 0x134   : > { %773 = vmatpush1.bf16.msra.mxu0 %v767_v11  ;;  %717 = vmatprep.mubr.bf16.mxu0 %v10081_v21 }
 0x135   : > { %9258 = vmatprep.subr.msk.bf16.mxu0 %vm404_vm6, %v856_v16 }
 0x136   : > { %v10357_v49 = vpop.permute.xlu0 %1223 }
 0x13a   : > { %v10359_v51 = vpop.permute.xlu1 %1228  ;;  %v10385_v20 = vpop.permute.xlu0 %1238 }
 0x13b   : > { %9242 = vmatmul.mubr.msk.bf16.gmra.mrb[4].mxu0 %vm12661_vm7, %v9989_v17 }
 0x13c   : > { %804 = vmatprep.mubr.bf16.mxu0 %v10081_v21 }
 0x13e   : > { %v10375_v6 = vpop.permute.xlu1 %1233 }
 0x143   : > { %9250 = vmatmul.mubr.msk.bf16.vlgmr.msra.gmra.mrb[0].mxu0 %vm12661_vm7, %v9990_v19 }
 0x144   : > { %870 = vmatpush1.bf16.msra.mxu0 %v864_v24  ;;  %814 = vmatprep.mubr.bf16.mxu0 %v10081_v21 }
 0x145   : > { %9267 = vmatprep.subr.msk.bf16.mxu0 %vm404_vm6, %v953_v25 }
 0x14b   : > { %9251 = vmatmul.mubr.msk.bf16.gmra.mrb[4].mxu0 %vm12661_vm7, %v9991_v26 }
 0x14c   : > { %901 = vmatprep.mubr.bf16.mxu0 %v10081_v21 }
 0x153   : > { %9259 = vmatmul.mubr.msk.bf16.vlgmr.msra.gmra.mrb[0].mxu0 %vm12661_vm7, %v9992_v28 }
 0x154   : > { %967 = vmatpush1.bf16.msra.mxu0 %v961_v32  ;;  %911 = vmatprep.mubr.bf16.mxu0 %v10081_v21 }
 0x155   : > { %9276 = vmatprep.subr.msk.bf16.mxu0 %vm404_vm6, %v1050_v33 }
 0x15b   : > { %9260 = vmatmul.mubr.msk.bf16.gmra.mrb[4].mxu0 %vm12661_vm7, %v9993_v34 }
 0x15c   : > { %998 = vmatprep.mubr.bf16.mxu0 %v10081_v21 }
 0x163   : > { %9268 = vmatmul.mubr.msk.bf16.vlgmr.msra.gmra.mrb[0].mxu0 %vm12661_vm7, %v9994_v36 }
 0x164   : > { %1064 = vmatpush1.bf16.msra.mxu0 %v1058_v40  ;;  %1008 = vmatprep.mubr.bf16.mxu0 %v10081_v21 }
 0x165   : > { %9285 = vmatprep.subr.msk.bf16.mxu0 %vm404_vm6, %v1147_v41 }
 0x16b   : > { %9269 = vmatmul.mubr.msk.bf16.gmra.mrb[4].mxu0 %vm12661_vm7, %v10318_v42 }
 0x16c   : > { %1095 = vmatprep.mubr.bf16.mxu0 %v10081_v21 }
 0x173   : > { %9277 = vmatmul.mubr.msk.bf16.vlgmr.msra.gmra.mrb[0].mxu0 %vm12661_vm7, %v10326_v43 }
 0x174   : > { %1161 = vmatpush1.bf16.msra.mxu0 %v1155_v45  ;;  %1105 = vmatprep.mubr.bf16.mxu0 %v10081_v21 }
 0x17b   : > { %9278 = vmatmul.mubr.msk.bf16.gmra.mrb[4].mxu0 %vm12661_vm7, %v10336_v46 }
 0x17c   : > { %1192 = vmatprep.mubr.bf16.mxu0 %v10081_v21 }
 0x183   : > { %9286 = vmatmul.mubr.msk.bf16.vlgmr.msra.gmra.mrb[0].mxu0 %vm12661_vm7, %v10344_v47 }
 0x184   : > { %1202 = vmatprep.mubr.bf16.mxu0 %v10081_v21 }
 0x18b   : > { %9287 = vmatmul.mubr.msk.bf16.gmra.mrb[4].mxu0 %vm12661_vm7, %v10352_v48  ;;  %vm10516_vm7 = vmneg %vm327_vm4 }
 0x18c   : > { %2831 = vmatprep.mubr.bf16.mxu0 %v10081_v21 }
 0x256   : > { %v1194_v50 = vpop.f32.mrb[0].mxu0 }
 0x257   : > { %v1241_v52 = vadd.f32 %v10357_v49, %v1194_v50  ;;  %v1196_v53 = vpop.f32.mrb[1].mxu0 }
 0x258   : > { %v1242_v54 = vadd.f32 %v10357_v49, %v1196_v53  ;;  %v1198_v55 = vpop.f32.mrb[2].mxu0 }
 0x259   : > { %v1249_v56 = vmax.f32 %v1241_v52, 0.0  ;;  %v1200_v57 = vpop.f32.mrb[3].mxu0  ;;  %v1243_v58 = vadd.f32 %v10359_v51, %v1198_v55 }
 0x25a   : > { %v1250_v59 = vmax.f32 %v1242_v54, 0.0  ;;  %v1244_v60 = vadd.f32 %v10359_v51, %v1200_v57 }
 0x25b   : > { %v1251_v61 = vmax.f32 %v1243_v58, 0.0  ;;  %v1321_v63 = vsel %vm10139_vm0, %v1249_v56, 0.0  ;;  %v1257_v0 = vsel %vm10143_vm1, %v1249_v56, 0.0 }
 0x25c   : > { %v1252_v62 = vmax.f32 %v1244_v60, 0.0  ;;  %v1322_v3 = vsel %vm10151_vm2, %v1250_v59, 0.0  ;;  %v1258_v18 = vsel %vm10155_vm3, %v1250_v59, 0.0 }
 0x25d   : > { %v1295_v1 = vpack.c.bf16 %v1251_v61, %v1249_v56  ;;  %v1323_v2 = vsel %vm10139_vm0, %v1251_v61, 0.0  ;;  %v1259_v4 = vsel %vm10143_vm1, %v1251_v61, 0.0 }
 0x25e   : > { %v1204_v8 = vpop.f32.mrb[4].mxu0  ;;  %v1296_v9 = vpack.c.bf16 %v1252_v62, %v1250_v59  ;;  %v1329_v10 = vpack.c.bf16 %v1323_v2, %v1321_v63  ;;  %v1324_v11 = vsel %vm10151_vm2, %v1252_v62, 0.0  ;;  %v1265_v12 = vpack.c.bf16 %v1259_v4, %v1257_v0 }
 0x25f   : > { %v1245_v15 = vadd.f32 %v10375_v6, %v1204_v8  ;;  %v1206_v16 = vpop.f32.mrb[5].mxu0  ;;  %1303 = vrot.lane.b32.xlu1 %v1295_v1, %s10080_s27  ;;  %v1330_v17 = vpack.c.bf16 %v1324_v11, %v1322_v3  ;;  %v1260_v19 = vsel %vm10155_vm3, %v1252_v62, 0.0 }
 0x260   : > { %v1246_v22 = vadd.f32 %v10375_v6, %v1206_v16  ;;  %v1208_v23 = vpop.f32.mrb[6].mxu0  ;;  %1305 = vrot.lane.b32.xlu0 %v1296_v9, %s10080_s27  ;;  %v1266_v24 = vpack.c.bf16 %v1260_v19, %v1258_v18 }
 0x261   : > { %v1253_v25 = vmax.f32 %v1245_v15, 0.0  ;;  %v1247_v26 = vadd.f32 %v10385_v20, %v1208_v23  ;;  %v1210_v27 = vpop.f32.mrb[7].mxu0 }
 0x262   : > { %v1254_v28 = vmax.f32 %v1246_v22, 0.0  ;;  %v1248_v29 = vadd.f32 %v10385_v20, %v1210_v27 }
 0x263   : > { %v1255_v30 = vmax.f32 %v1247_v26, 0.0  ;;  %v1325_v32 = vsel %vm10139_vm0, %v1253_v25, 0.0  ;;  %v1261_v33 = vsel %vm10143_vm1, %v1253_v25, 0.0  ;;  %v306_v26 = vld [vmem:[%s12658_s4] sm:$0xf] }
 0x264   : > { %v1256_v31 = vmax.f32 %v1248_v29, 0.0  ;;  %v1326_v36 = vsel %vm10151_vm2, %v1254_v28, 0.0  ;;  %v1262_v45 = vsel %vm10155_vm3, %v1254_v28, 0.0 }
 0x265   : > { %v1297_v34 = vpack.c.bf16 %v1255_v30, %v1253_v25  ;;  %v1327_v35 = vsel %vm10139_vm0, %v1255_v30, 0.0  ;;  %v1263_v37 = vsel %vm10143_vm1, %v1255_v30, 0.0 }
 0x266   : > { %v1298_v38 = vpack.c.bf16 %v1256_v31, %v1254_v28  ;;  %v1331_v39 = vpack.c.bf16 %v1327_v35, %v1325_v32  ;;  %v1328_v40 = vsel %vm10151_vm2, %v1256_v31, 0.0  ;;  %v1267_v41 = vpack.c.bf16 %v1263_v37, %v1261_v33 }
 0x267   : > { %1307 = vrot.lane.b32.xlu1 %v1297_v34, %s10080_s27  ;;  %v1332_v44 = vpack.c.bf16 %v1328_v40, %v1326_v36  ;;  %v1264_v50 = vsel %vm10155_vm3, %v1256_v31, 0.0 }
 0x268   : > { %1309 = vrot.lane.b32.xlu0 %v1298_v38, %s10080_s27  ;;  %v1268_v52 = vpack.c.bf16 %v1264_v50, %v1262_v45 }
 0x26b   : > { %1337 = vrot.lane.b32.xlu1 %v1329_v10, %s10080_s27 }
 0x26c   : > { %1339 = vrot.lane.b32.xlu0 %v1330_v17, %s10080_s27 }
 0x26f   : > { %1341 = vrot.lane.b32.xlu1 %v1331_v39, %s10080_s27 }
 0x270   : > { %1343 = vrot.lane.b32.xlu0 %v1332_v44, %s10080_s27 }
 0x273   : > { %1273 = vrot.lane.b32.xlu1 %v1265_v12, %s10080_s27 }
 0x274   : > { %1275 = vrot.lane.b32.xlu0 %v1266_v24, %s10080_s27 }
 0x277   : > { %1277 = vrot.lane.b32.xlu1 %v1267_v41, %s10080_s27 }
 0x278   : > { %1279 = vrot.lane.b32.xlu0 %v1268_v52, %s10080_s27 }
 0x2d1   : > { %v1304_v53 = vpop.permute.xlu1 %1303 }
 0x2d2   : > { %v1306_v54 = vpop.permute.xlu0 %1305  ;;  %v10418_v55 = vsel %vm327_vm4, 0, %v1304_v53 }
 0x2d3   : > { %1362 = vrot.lane.b32.xlu1 %v10418_v55, %s10082_s28  ;;  %v1318_v56 = vsel %vm327_vm4, %v1306_v54, 0  ;;  %v1311_v57 = vsel %vm327_vm4, %v1304_v53, %v1306_v54  ;;  %v10512_v54 = vld [vmem:[%s12656_s2 + $0x2] sm:$0x3] }
 0x2d4   : > { %1366 = vrot.lane.b32.xlu0 %v1318_v56, %s10082_s28 }
 0x2d7   : > { %1364 = vrot.lane.b32.xlu1 %v1311_v57, %s10082_s28 }
 0x2d8   : > { %1621 = vrot.lane.b32.xlu0 %v1318_v56, %s10085_s7 }
 0x2d9   : > { %v1308_v58 = vpop.permute.xlu1 %1307 }
 0x2da   : > { %v1310_v59 = vpop.permute.xlu0 %1309  ;;  %v1316_v9 = vsel %vm327_vm4, 0, %v1308_v58 }
 0x2db   : > { %v1312_v11 = vsel %vm327_vm4, %v1308_v58, %v1310_v59  ;;  %v1320_v15 = vsel %vm327_vm4, %v1310_v59, 0 }
 0x2dd   : > { %v1338_v60 = vpop.permute.xlu1 %1337 }
 0x2de   : > { %v1340_v61 = vpop.permute.xlu0 %1339  ;;  %v1348_v62 = vsel %vm327_vm4, 0, %v1338_v60 }
 0x2df   : > { %1477 = vrot.lane.b32.xlu1 %v1348_v62, %s10083_s29  ;;  %v1352_v63 = vsel %vm327_vm4, %v1340_v61, 0  ;;  %v1345_v10 = vsel %vm327_vm4, %v1338_v60, %v1340_v61  ;;  %v10533_v61 = vld [vmem:[%s12656_s2] sm:$0x3] }
 0x2e0   : > { %1481 = vrot.lane.b32.xlu0 %v1352_v63, %s10083_s29 }
 0x2e1   : > { %v1342_v0 = vpop.permute.xlu1 %1341 }
 0x2e2   : > { %v1344_v1 = vpop.permute.xlu0 %1343  ;;  %v1350_v16 = vsel %vm327_vm4, 0, %v1342_v0 }
 0x2e3   : > { %v1346_v19 = vsel %vm327_vm4, %v1342_v0, %v1344_v1  ;;  %v1354_v22 = vsel %vm327_vm4, %v1344_v1, 0 }
 0x2e5   : > { %v10431_v2 = vpop.permute.xlu1 %1273 }
 0x2e6   : > { %v1276_v3 = vpop.permute.xlu0 %1275  ;;  %v1286_v4 = vsel %vm327_vm4, 0, %v10431_v2 }
 0x2e7   : > { %1549 = vrot.lane.b32.xlu1 %v1286_v4, %s10084_s30  ;;  %v1292_v8 = vsel %vm327_vm4, %v1276_v3, 0  ;;  %v10447_v12 = vsel %vm327_vm4, %v10431_v2, %v1276_v3 }
 0x2e8   : > { %1553 = vrot.lane.b32.xlu0 %v1292_v8, %s10084_s30 }
 0x2e9   : > { %v10455_v17 = vpop.permute.xlu1 %1277 }
 0x2ea   : > { %v1289_v18 = vsel %vm327_vm4, 0, %v10455_v17  ;;  %v1280_v23 = vpop.permute.xlu0 %1279 }
 0x2eb   : > { %1619 = vrot.lane.b32.xlu1 %v1311_v57, %s10085_s7  ;;  %v1282_v24 = vsel %vm327_vm4, %v10455_v17, %v1280_v23  ;;  %v1294_v25 = vsel %vm327_vm4, %v1280_v23, 0 }
 0x2ec   : > { %1368 = vrot.lane.b32.xlu0 %v1316_v9, %s10082_s28 }
 0x2ef   : > { %1479 = vrot.lane.b32.xlu1 %v1345_v10, %s10083_s29 }
 0x2f0   : > { %1370 = vrot.lane.b32.xlu0 %v1312_v11, %s10082_s28 }
 0x2f3   : > { %1551 = vrot.lane.b32.xlu1 %v10447_v12, %s10084_s30 }
 0x2f4   : > { %1623 = vrot.lane.b32.xlu0 %v1316_v9, %s10085_s7 }
 0x2f7   : > { %1372 = vrot.lane.b32.xlu1 %v1320_v15, %s10082_s28 }
 0x2f8   : > { %1483 = vrot.lane.b32.xlu0 %v1350_v16, %s10083_s29 }
 0x2fb   : > { %1617 = vrot.lane.b32.xlu1 %v10418_v55, %s10085_s7 }
 0x2fc   : > { %1555 = vrot.lane.b32.xlu0 %v1289_v18, %s10084_s30 }
 0x2ff   : > { %1687 = vrot.lane.b32.xlu1 %v1345_v10, %s10086_s8 }
 0x300   : > { %1625 = vrot.lane.b32.xlu0 %v1312_v11, %s10085_s7 }
 0x303   : > { %1627 = vrot.lane.b32.xlu1 %v1320_v15, %s10085_s7 }
 0x304   : > { %1485 = vrot.lane.b32.xlu0 %v1346_v19, %s10083_s29 }
 0x307   : > { %1487 = vrot.lane.b32.xlu1 %v1354_v22, %s10083_s29 }
 0x308   : > { %1689 = vrot.lane.b32.xlu0 %v1352_v63, %s10086_s8 }
 0x30b   : > { %1685 = vrot.lane.b32.xlu1 %v1348_v62, %s10086_s8 }
 0x30c   : > { %1557 = vrot.lane.b32.xlu0 %v1282_v24, %s10084_s30 }
 0x30f   : > { %1559 = vrot.lane.b32.xlu1 %v1294_v25, %s10084_s30 }
 0x310   : > { %1691 = vrot.lane.b32.xlu0 %v1350_v16, %s10086_s8 }
 0x313   : > { %1755 = vrot.lane.b32.xlu1 %v10447_v12, %s10087_s9 }
 0x314   : > { %1757 = vrot.lane.b32.xlu0 %v1292_v8, %s10087_s9 }
 0x317   : > { %1753 = vrot.lane.b32.xlu1 %v1286_v4, %s10087_s9 }
 0x318   : > { %1759 = vrot.lane.b32.xlu0 %v1289_v18, %s10087_s9 }
 0x31b   : > { %1823 = vrot.lane.b32.xlu1 %v1311_v57, %s10088_s10 }
 0x31c   : > { %1693 = vrot.lane.b32.xlu0 %v1346_v19, %s10086_s8 }
 0x31f   : > { %1695 = vrot.lane.b32.xlu1 %v1354_v22, %s10086_s8 }
 0x320   : > { %1825 = vrot.lane.b32.xlu0 %v1318_v56, %s10088_s10 }
 0x323   : > { %1821 = vrot.lane.b32.xlu1 %v10418_v55, %s10088_s10 }
 0x324   : > { %1761 = vrot.lane.b32.xlu0 %v1282_v24, %s10087_s9 }
 0x327   : > { %1763 = vrot.lane.b32.xlu1 %v1294_v25, %s10087_s9 }
 0x328   : > { %1829 = vrot.lane.b32.xlu0 %v1312_v11, %s10088_s10 }
 0x32b   : > { %1831 = vrot.lane.b32.xlu1 %v1320_v15, %s10088_s10 }
 0x32c   : > { %1827 = vrot.lane.b32.xlu0 %v1316_v9, %s10088_s10  ;;  %v10545_v9 = vld [vmem:[%s12656_s2 + $0x4] sm:$0x3] }
 0x32f   : > { %1891 = vrot.lane.b32.xlu1 %v1345_v10, %s10089_s11 }
 0x330   : > { %1893 = vrot.lane.b32.xlu0 %v1352_v63, %s10089_s11 }
 0x333   : > { %1889 = vrot.lane.b32.xlu1 %v1348_v62, %s10089_s11 }
 0x334   : > { %1897 = vrot.lane.b32.xlu0 %v1346_v19, %s10089_s11 }
 0x337   : > { %1899 = vrot.lane.b32.xlu1 %v1354_v22, %s10089_s11  ;;  %v10557_v22 = vld [vmem:[%s12656_s2 + $0x6] sm:$0x3] }
 0x338   : > { %1895 = vrot.lane.b32.xlu0 %v1350_v16, %s10089_s11 }
 0x33b   : > { %1957 = vperm.xlu1 %9980, %v306_v26  }
 0x345   : > { %v1363_v27 = vpop.permute.xlu1 %1362 }
 0x346   : > { %v1367_v28 = vpop.permute.xlu0 %1366 }
 0x349   : > { %v1365_v29 = vpop.permute.xlu1 %1364 }
 0x34a   : > { %v1375_v30 = vsel %vm12663_vm5, %v1365_v29, %v1367_v28  ;;  %v1374_v31 = vsel %vm12663_vm5, %v1363_v27, %v1365_v29  ;;  %v1622_v32 = vpop.permute.xlu0 %1621 }
 0x34b   : > { %1386 = vmatprep.subr.bf16.mxu1 %v1375_v30 }
 0x34c   : > { %1387 = vmatpush1.bf16.msra.mxu1 %v1374_v31  ;;  %v10570_v31 = vld [vmem:[%s12656_s2 + $0x8] sm:$0x3] }
 0x351   : > { %v1478_v33 = vpop.permute.xlu1 %1477 }
 0x352   : > { %v1482_v34 = vpop.permute.xlu0 %1481 }
 0x359   : > { %v1550_v35 = vpop.permute.xlu1 %1549 }
 0x35a   : > { %v1554_v36 = vpop.permute.xlu0 %1553 }
 0x35d   : > { %v1620_v37 = vpop.permute.xlu1 %1619 }
 0x35e   : > { %v1369_v38 = vpop.permute.xlu0 %1368  ;;  %v1630_v19 = vsel %vm12667_vm10, %v1620_v37, %v1622_v32 }
 0x361   : > { %v1480_v39 = vpop.permute.xlu1 %1479 }
 0x362   : > { %v1371_v40 = vpop.permute.xlu0 %1370  ;;  %v1490_v60 = vsel %vm561_vm8, %v1480_v39, %v1482_v34  ;;  %v1489_v0 = vsel %vm561_vm8, %v1478_v33, %v1480_v39 }
 0x363   : > { %v1376_v53 = vsel %vm12663_vm5, %v1369_v38, %v1371_v40 }
 0x365   : > { %v1552_v41 = vpop.permute.xlu1 %1551 }
 0x366   : > { %v10505_v44 = vpop.permute.xlu0 %1623  ;;  %v1562_v8 = vsel %vm660_vm9, %v1552_v41, %v1554_v36 }
 0x369   : > { %v1373_v45 = vpop.permute.xlu1 %1372 }
 0x36a   : > { %v1484_v50 = vpop.permute.xlu0 %1483  ;;  %v1377_v52 = vsel %vm12663_vm5, %v1371_v40, %v1373_v45  ;;  %v10582_v40 = vld [vmem:[%s12656_s2 + $0xa] sm:$0x3] }
 0x36b   : > { %1388 = vmatprep.subr.bf16.mxu1 %v1377_v52 }
 0x36c   : > { %1389 = vmatpush1.bf16.msra.mxu1 %v1376_v53 }
 0x36d   : > { %1430 = vmatprep.subr.bf16.mxu1 %v10447_v12  ;;  %v1618_v55 = vpop.permute.xlu1 %1617  ;;  %v1561_v12 = vsel %vm660_vm9, %v1550_v35, %v1552_v41 }
 0x36e   : > { %v1556_v57 = vpop.permute.xlu0 %1555  ;;  %v1629_v25 = vsel %vm12667_vm10, %v1618_v55, %v1620_v37 }
 0x36f   : > { %9289 = vmatmul.mubr.msk.bf16.vlgmr.msra.gmra.mrb[0].mxu1 %vm12662_vm15, %v10512_v54 }
 0x370   : > { %9291 = vmatpush1.bf16.msk.msra.mxu1 %vm10516_vm7, %v10431_v2  ;;  %1462 = vmatprep.mubr.bf16.mxu1 %v10081_v21 }
 0x371   : > { %1432 = vmatprep.subr.bf16.mxu1 %v1282_v24  ;;  %v1688_v58 = vpop.permute.xlu1 %1687 }
 0x372   : > { %v1626_v59 = vpop.permute.xlu0 %1625 }
 0x373   : > { %v1631_v29 = vsel %vm12667_vm10, %v10505_v44, %v1626_v59 }
 0x374   : > { %9293 = vmatpush1.bf16.msk.msra.mxu1 %vm10516_vm7, %v10455_v17 }
 0x375   : > { %1500 = vmatprep.subr.bf16.mxu1 %v1490_v60  ;;  %v1628_v62 = vpop.permute.xlu1 %1627 }
 0x376   : > { %v1486_v63 = vpop.permute.xlu0 %1485  ;;  %v1632_v26 = vsel %vm12667_vm10, %v1626_v59, %v1628_v62 }
 0x377   : > { %9294 = vmatmul.mubr.msk.bf16.vlgmr.msra.gmra.mrb[4].mxu1 %vm12662_vm15, %v10533_v61  ;;  %v1491_v4 = vsel %vm561_vm8, %v1484_v50, %v1486_v63 }
 0x378   : > { %1501 = vmatpush1.bf16.msra.mxu1 %v1489_v0  ;;  %1532 = vmatprep.mubr.bf16.mxu1 %v10081_v21 }
 0x379   : > { %v1488_v1 = vpop.permute.xlu1 %1487 }
 0x37a   : > { %v1690_v2 = vpop.permute.xlu0 %1689  ;;  %v1492_v3 = vsel %vm561_vm8, %v1486_v63, %v1488_v1 }
 0x37b   : > { %1502 = vmatprep.subr.bf16.mxu1 %v1492_v3  ;;  %v1698_v30 = vsel %vm12666_vm11, %v1688_v58, %v1690_v2 }
 0x37c   : > { %1503 = vmatpush1.bf16.msra.mxu1 %v1491_v4  ;;  %v10606_v4 = vld [vmem:[%s12656_s2 + $0xe] sm:$0x3] }
 0x37d   : > { %1572 = vmatprep.subr.bf16.mxu1 %v1562_v8  ;;  %v1686_v10 = vpop.permute.xlu1 %1685 }
 0x37e   : > { %v1558_v11 = vpop.permute.xlu0 %1557  ;;  %v1697_v34 = vsel %vm12666_vm11, %v1686_v10, %v1688_v58  ;;  %v10594_v58 = vld [vmem:[%s12656_s2 + $0xc] sm:$0x3] }
 0x37f   : > { %9296 = vmatmul.mubr.msk.bf16.vlgmr.msra.gmra.mrb[8].mxu1 %vm12662_vm15, %v10545_v9  ;;  %v1563_v18 = vsel %vm660_vm9, %v1556_v57, %v1558_v11 }
 0x380   : > { %1573 = vmatpush1.bf16.msra.mxu1 %v1561_v12  ;;  %1604 = vmatprep.mubr.bf16.mxu1 %v10081_v21 }
 0x381   : > { %v1560_v15 = vpop.permute.xlu1 %1559 }
 0x382   : > { %v1692_v16 = vpop.permute.xlu0 %1691  ;;  %v1564_v17 = vsel %vm660_vm9, %v1558_v11, %v1560_v15 }
 0x383   : > { %1574 = vmatprep.subr.bf16.mxu1 %v1564_v17 }
 0x384   : > { %1575 = vmatpush1.bf16.msra.mxu1 %v1563_v18  ;;  %v10617_v18 = vld [vmem:[%s12656_s2 + $0x10] sm:$0x3] }
 0x385   : > { %1640 = vmatprep.subr.bf16.mxu1 %v1630_v19  ;;  %v1756_v23 = vpop.permute.xlu1 %1755 }
 0x386   : > { %v1758_v24 = vpop.permute.xlu0 %1757 }
 0x387   : > { %9298 = vmatmul.mubr.msk.bf16.vlgmr.msra.gmra.mrb[12].mxu1 %vm12662_vm15, %v10557_v22  ;;  %v1766_v39 = vsel %vm12665_vm12, %v1756_v23, %v1758_v24 }
 0x388   : > { %1641 = vmatpush1.bf16.msra.mxu1 %v1629_v25  ;;  %1672 = vmatprep.mubr.bf16.mxu1 %v10081_v21 }
 0x389   : > { %1642 = vmatprep.subr.bf16.mxu1 %v1632_v26  ;;  %v1754_v27 = vpop.permute.xlu1 %1753 }
 0x38a   : > { %v1760_v28 = vpop.permute.xlu0 %1759  ;;  %v1765_v45 = vsel %vm12665_vm12, %v1754_v27, %v1756_v23 }
 0x38c   : > { %1643 = vmatpush1.bf16.msra.mxu1 %v1631_v29 }
 0x38d   : > { %1708 = vmatprep.subr.bf16.mxu1 %v1698_v30  ;;  %v1824_v32 = vpop.permute.xlu1 %1823 }
 0x38e   : > { %v1694_v33 = vpop.permute.xlu0 %1693 }
 0x38f   : > { %9300 = vmatmul.mubr.msk.bf16.vlgmr.msra.gmra.mrb[16].mxu1 %vm12662_vm15, %v10570_v31  ;;  %v1699_v38 = vsel %vm12666_vm11, %v1692_v16, %v1694_v33 }
 0x390   : > { %1709 = vmatpush1.bf16.msra.mxu1 %v1697_v34  ;;  %1740 = vmatprep.mubr.bf16.mxu1 %v10081_v21 }
 0x391   : > { %v1696_v35 = vpop.permute.xlu1 %1695 }
 0x392   : > { %v1826_v36 = vpop.permute.xlu0 %1825  ;;  %v1700_v37 = vsel %vm12666_vm11, %v1694_v33, %v1696_v35 }
 0x393   : > { %1710 = vmatprep.subr.bf16.mxu1 %v1700_v37  ;;  %v1834_v57 = vsel %vm12664_vm13, %v1824_v32, %v1826_v36 }
 0x394   : > { %1711 = vmatpush1.bf16.msra.mxu1 %v1699_v38 }
 0x395   : > { %1776 = vmatprep.subr.bf16.mxu1 %v1766_v39  ;;  %v1822_v41 = vpop.permute.xlu1 %1821 }
 0x396   : > { %v1762_v44 = vpop.permute.xlu0 %1761  ;;  %v1833_v62 = vsel %vm12664_vm13, %v1822_v41, %v1824_v32 }
 0x397   : > { %9302 = vmatmul.mubr.msk.bf16.vlgmr.msra.gmra.mrb[20].mxu1 %vm12662_vm15, %v10582_v40  ;;  %v1767_v55 = vsel %vm12665_vm12, %v1760_v28, %v1762_v44 }
 0x398   : > { %1777 = vmatpush1.bf16.msra.mxu1 %v1765_v45  ;;  %1808 = vmatprep.mubr.bf16.mxu1 %v10081_v21 }
 0x399   : > { %v1764_v50 = vpop.permute.xlu1 %1763 }
 0x39a   : > { %v1830_v52 = vpop.permute.xlu0 %1829  ;;  %v1768_v53 = vsel %vm12665_vm12, %v1762_v44, %v1764_v50 }
 0x39b   : > { %1778 = vmatprep.subr.bf16.mxu1 %v1768_v53 }
 0x39c   : > { %1779 = vmatpush1.bf16.msra.mxu1 %v1767_v55 }
 0x39d   : > { %1844 = vmatprep.subr.bf16.mxu1 %v1834_v57  ;;  %v1832_v59 = vpop.permute.xlu1 %1831 }
 0x39e   : > { %v1828_v60 = vpop.permute.xlu0 %1827  ;;  %v1836_v63 = vsel %vm12664_vm13, %v1830_v52, %v1832_v59 }
 0x39f   : > { %9304 = vmatmul.mubr.msk.bf16.vlgmr.msra.gmra.mrb[24].mxu1 %vm12662_vm15, %v10594_v58  ;;  %v1835_v2 = vsel %vm12664_vm13, %v1828_v60, %v1830_v52 }
 0x3a0   : > { %1845 = vmatpush1.bf16.msra.mxu1 %v1833_v62  ;;  %1876 = vmatprep.mubr.bf16.mxu1 %v10081_v21 }
 0x3a1   : > { %1846 = vmatprep.subr.bf16.mxu1 %v1836_v63  ;;  %v1892_v0 = vpop.permute.xlu1 %1891 }
 0x3a2   : > { %v1894_v1 = vpop.permute.xlu0 %1893 }
 0x3a3   : > { %v1902_v3 = vsel %vm1145_vm14, %v1892_v0, %v1894_v1 }
 0x3a4   : > { %1847 = vmatpush1.bf16.msra.mxu1 %v1835_v2 }
 0x3a5   : > { %1912 = vmatprep.subr.bf16.mxu1 %v1902_v3  ;;  %v1890_v8 = vpop.permute.xlu1 %1889 }
 0x3a6   : > { %v1901_v10 = vsel %vm1145_vm14, %v1890_v8, %v1892_v0  ;;  %v1898_v11 = vpop.permute.xlu0 %1897 }
 0x3a7   : > { %9306 = vmatmul.mubr.msk.bf16.vlgmr.msra.gmra.mrb[28].mxu1 %vm12662_vm15, %v10606_v4 }
 0x3a8   : > { %1913 = vmatpush1.bf16.msra.mxu1 %v1901_v10  ;;  %1944 = vmatprep.mubr.bf16.mxu1 %v10081_v21 }
 0x3a9   : > { %v1900_v12 = vpop.permute.xlu1 %1899 }
 0x3aa   : > { %v1896_v15 = vpop.permute.xlu0 %1895  ;;  %v1904_v16 = vsel %vm1145_vm14, %v1898_v11, %v1900_v12 }
 0x3ab   : > { %v1903_v17 = vsel %vm1145_vm14, %v1896_v15, %v1898_v11  ;;  %1914 = vmatprep.subr.bf16.mxu1 %v1904_v16 }
 0x3ac   : > { %1915 = vmatpush1.bf16.msra.mxu1 %v1903_v17 }
 0x3af   : > { %9308 = vmatmul.mubr.msk.bf16.vlgmr.msra.gmra.mrb[32].mxu1 %vm12662_vm15, %v10617_v18  ;;  %vm12678_vm15 = vcmask 31744  }
 0x3b0   : > { %2053 = vmatprep.mubr.bf16.mxu1 %v10081_v21 }
 0x442   : > { %v1420_v19 = vpop.f32.mrb[0].mxu1 }
 0x443   : > { %v1422_v23 = vpop.f32.mrb[1].mxu1 }
 0x444   : > { %v1424_v24 = vpop.f32.mrb[2].mxu1 }
 0x445   : > { %v1425_v25 = vpop.f32.mrb[3].mxu1 }
 0x44a   : > { %v1464_v26 = vpop.f32.mrb[4].mxu1 }
 0x44b   : > { %v1465_v27 = vadd.f32 %v1464_v26, %v1420_v19  ;;  %v1466_v28 = vpop.f32.mrb[5].mxu1 }
 0x44c   : > { %v1467_v29 = vadd.f32 %v1466_v28, %v1422_v23  ;;  %v1468_v30 = vpop.f32.mrb[6].mxu1 }
 0x44d   : > { %v1469_v32 = vpop.f32.mrb[7].mxu1 }
 0x44e   : > { %v10622_v32 = vpop.permute.xlu1 %1957 }
 0x452   : > { %v1534_v33 = vpop.f32.mrb[8].mxu1 }
 0x453   : > { %v1541_v34 = vadd.f32 %v1534_v33, %v1465_v27  ;;  %v1536_v35 = vpop.f32.mrb[9].mxu1 }
 0x454   : > { %v1542_v36 = vadd.f32 %v1536_v35, %v1467_v29  ;;  %v1538_v37 = vpop.f32.mrb[10].mxu1 }
 0x455   : > { %v1539_v38 = vpop.f32.mrb[11].mxu1 }
 0x45a   : > { %v1606_v39 = vpop.f32.mrb[12].mxu1 }
 0x45b   : > { %v1613_v41 = vadd.f32 %v1606_v39, %v1541_v34  ;;  %v1608_v44 = vpop.f32.mrb[13].mxu1 }
 0x45c   : > { %v1614_v45 = vadd.f32 %v1608_v44, %v1542_v36  ;;  %v1610_v50 = vpop.f32.mrb[14].mxu1 }
 0x45d   : > { %v1611_v52 = vpop.f32.mrb[15].mxu1 }
 0x462   : > { %v1674_v53 = vpop.f32.mrb[16].mxu1 }
 0x463   : > { %v1681_v55 = vadd.f32 %v1674_v53, %v1613_v41  ;;  %v1676_v57 = vpop.f32.mrb[17].mxu1 }
 0x464   : > { %v1682_v59 = vadd.f32 %v1676_v57, %v1614_v45  ;;  %v1678_v60 = vpop.f32.mrb[18].mxu1 }
 0x465   : > { %v1679_v62 = vpop.f32.mrb[19].mxu1 }
 0x46a   : > { %v1742_v63 = vpop.f32.mrb[20].mxu1 }
 0x46b   : > { %v1749_v0 = vadd.f32 %v1742_v63, %v1681_v55  ;;  %v1744_v1 = vpop.f32.mrb[21].mxu1 }
 0x46c   : > { %v1750_v2 = vadd.f32 %v1744_v1, %v1682_v59  ;;  %v1746_v3 = vpop.f32.mrb[22].mxu1 }
 0x46d   : > { %v1747_v8 = vpop.f32.mrb[23].mxu1 }
 0x472   : > { %v1810_v10 = vpop.f32.mrb[24].mxu1 }
 0x473   : > { %v1817_v11 = vadd.f32 %v1810_v10, %v1749_v0  ;;  %v1812_v12 = vpop.f32.mrb[25].mxu1 }
 0x474   : > { %v1818_v15 = vadd.f32 %v1812_v12, %v1750_v2  ;;  %v1814_v16 = vpop.f32.mrb[26].mxu1 }
 0x475   : > { %v1815_v17 = vpop.f32.mrb[27].mxu1 }
 0x47a   : > { %v1878_v19 = vpop.f32.mrb[28].mxu1 }
 0x47b   : > { %v1885_v23 = vadd.f32 %v1878_v19, %v1817_v11  ;;  %v1880_v24 = vpop.f32.mrb[29].mxu1 }
 0x47c   : > { %v1886_v25 = vadd.f32 %v1880_v24, %v1818_v15  ;;  %v1882_v26 = vpop.f32.mrb[30].mxu1 }
 0x47d   : > { %v1883_v27 = vpop.f32.mrb[31].mxu1 }
 0x482   : > { %v1946_v28 = vpop.f32.mrb[32].mxu1 }
 0x483   : > { %v1953_v29 = vadd.f32 %v1946_v28, %v1885_v23  ;;  %v1948_v30 = vpop.f32.mrb[33].mxu1 }
 0x484   : > { %v1954_v33 = vadd.f32 %v1948_v30, %v1886_v25  ;;  %v1950_v34 = vpop.f32.mrb[34].mxu1 }
 0x485   : > { %v10625_v35 = vadd.f32 %v10622_v32, %v1953_v29  ;;  %v1951_v36 = vpop.f32.mrb[35].mxu1  ;;  %v10694_v34 = vld [vmem:[%s12655_s1 + $0x10] sm:$0xff]  }
 0x486   : > { %v10628_v37 = vadd.f32 %v10622_v32, %v1954_v33 }
 0x487   : > { %v1977_v38 = vpack.c.bf16 %v10625_v35, %v10625_v35  ;;  %v1990_v41 = vsel %vm10139_vm0, %v10625_v35, 0.0  ;;  %v1962_v52 = vsel %vm10143_vm1, %v10625_v35, 0.0 }
 0x488   : > { %v1978_v39 = vpack.c.bf16 %v10628_v37, %v10628_v37  ;;  %v1991_v44 = vsel %vm10151_vm2, %v10628_v37, 0.0  ;;  %v1992_v45 = vpack.c.bf16 %v1990_v41, %v1990_v41  ;;  %v1963_v53 = vsel %vm10155_vm3, %v10628_v37, 0.0 }
 0x489   : > { %1981 = vrot.lane.b32.xlu0 %v1977_v38, %s10080_s27  ;;  %v1993_v50 = vpack.c.bf16 %v1991_v44, %v1991_v44  ;;  %v1964_v55 = vpack.c.bf16 %v1962_v52, %v1962_v52  ;;  %v1965_v57 = vpack.c.bf16 %v1963_v53, %v1963_v53 }
 0x48a   : > { %1983 = vrot.lane.b32.xlu1 %v1978_v39, %s10080_s27  ;;  %v10704_v39 = vld [vmem:[%s12655_s1 + $0x18] sm:$0xff]  }
 0x48d   : > { %1996 = vrot.lane.b32.xlu0 %v1992_v45, %s10080_s27 }
 0x48e   : > { %1998 = vrot.lane.b32.xlu1 %v1993_v50, %s10080_s27  ;;  %v10713_v50 = vld [vmem:[%s12655_s1] sm:$0xff]  }
 0x491   : > { %1968 = vrot.lane.b32.xlu0 %v1964_v55, %s10080_s27 }
 0x492   : > { %1970 = vrot.lane.b32.xlu1 %v1965_v57, %s10080_s27  ;;  %v10724_v57 = vld [vmem:[%s12655_s1 + $0x8] sm:$0xff]  }
 0x4fb   : > { %v1982_v59 = vpop.permute.xlu0 %1981 }
 0x4fc   : > { %v1984_v60 = vpop.permute.xlu1 %1983  ;;  %v1987_v62 = vsel %vm327_vm4, 0, %v1982_v59 }
 0x4fd   : > { %2007 = vrot.lane.b32.xlu0 %v1987_v62, %s10082_s28  ;;  %v1985_v63 = vsel %vm327_vm4, %v1982_v59, %v1984_v60  ;;  %v1989_v2 = vsel %vm327_vm4, %v1984_v60, 0 }
 0x4fe   : > { %2009 = vrot.lane.b32.xlu1 %v1985_v63, %s10082_s28 }
 0x4ff   : > { %v1997_v0 = vpop.permute.xlu0 %1996 }
 0x500   : > { %v1999_v1 = vpop.permute.xlu1 %1998  ;;  %v2002_v3 = vsel %vm327_vm4, 0, %v1997_v0 }
 0x501   : > { %2011 = vrot.lane.b32.xlu0 %v1989_v2, %s10082_s28  ;;  %v2000_v8 = vsel %vm327_vm4, %v1997_v0, %v1999_v1  ;;  %v2004_v11 = vsel %vm327_vm4, %v1999_v1, 0 }
 0x502   : > { %2134 = vrot.lane.b32.xlu1 %v2002_v3, %s10083_s29 }
 0x503   : > { %v1969_v10 = vpop.permute.xlu0 %1968 }
 0x504   : > { %v1971_v12 = vpop.permute.xlu1 %1970  ;;  %v1974_v15 = vsel %vm327_vm4, 0, %v1969_v10 }
 0x505   : > { %2136 = vrot.lane.b32.xlu0 %v2000_v8, %s10083_s29  ;;  %v1972_v16 = vsel %vm327_vm4, %v1969_v10, %v1971_v12  ;;  %v1976_v17 = vsel %vm327_vm4, %v1971_v12, 0  ;;  %v2074_v36 = vsel %vm404_vm6, %v1974_v15, 0  ;;  %v10753_v12 = vld [vmem:[%s12655_s1 + $0x30] sm:$0xff]  }
 0x506   : > { %2138 = vrot.lane.b32.xlu1 %v2004_v11, %s10083_s29 }
 0x509   : > { %2211 = vrot.lane.b32.xlu0 %v1974_v15, %s10084_s30 }
 0x50a   : > { %2213 = vrot.lane.b32.xlu1 %v1972_v16, %s10084_s30 }
 0x50d   : > { %2215 = vrot.lane.b32.xlu0 %v1976_v17, %s10084_s30 }
 0x50e   : > { %2286 = vrot.lane.b32.xlu1 %v1987_v62, %s10085_s7 }
 0x511   : > { %2288 = vrot.lane.b32.xlu0 %v1985_v63, %s10085_s7 }
 0x512   : > { %2290 = vrot.lane.b32.xlu1 %v1989_v2, %s10085_s7 }
 0x515   : > { %2361 = vrot.lane.b32.xlu0 %v2002_v3, %s10086_s8 }
 0x516   : > { %2363 = vrot.lane.b32.xlu1 %v2000_v8, %s10086_s8 }
 0x519   : > { %2365 = vrot.lane.b32.xlu0 %v2004_v11, %s10086_s8 }
 0x51a   : > { %2436 = vrot.lane.b32.xlu1 %v1974_v15, %s10087_s9 }
 0x51d   : > { %2438 = vrot.lane.b32.xlu0 %v1972_v16, %s10087_s9 }
 0x51e   : > { %2440 = vrot.lane.b32.xlu1 %v1976_v17, %s10087_s9 }
 0x521   : > { %2511 = vrot.lane.b32.xlu0 %v1987_v62, %s10088_s10 }
 0x522   : > { %2513 = vrot.lane.b32.xlu1 %v1985_v63, %s10088_s10  ;;  %v10733_v63 = vld [vmem:[%s12655_s1 + $0x20] sm:$0xff]  }
 0x525   : > { %2515 = vrot.lane.b32.xlu0 %v1989_v2, %s10088_s10 }
 0x526   : > { %2586 = vrot.lane.b32.xlu1 %v2002_v3, %s10089_s11  ;;  %v10744_v3 = vld [vmem:[%s12655_s1 + $0x28] sm:$0xff]  }
 0x529   : > { %2588 = vrot.lane.b32.xlu0 %v2000_v8, %s10089_s11 }
 0x52a   : > { %2590 = vrot.lane.b32.xlu1 %v2004_v11, %s10089_s11 }
 0x56f   : > { %v2008_v19 = vpop.permute.xlu0 %2007 }
 0x570   : > { %v2010_v23 = vpop.permute.xlu1 %2009 }
 0x571   : > { %v2013_v24 = vsel %vm12663_vm5, %v2008_v19, %v2010_v23  ;;  %v10764_v19 = vld [vmem:[%s12655_s1 + $0x38] sm:$0xff]  }
 0x572   : > { %v2016_v28 = vsel %vm404_vm6, %v2013_v24, 0 }
 0x573   : > { %v2012_v25 = vpop.permute.xlu0 %2011 }
 0x574   : > { %v2014_v26 = vsel %vm12663_vm5, %v2010_v23, %v2012_v25  ;;  %v2135_v27 = vpop.permute.xlu1 %2134  ;;  %vm12679_vm5 = vmmov %vm12678_vm15 }
 0x575   : > { %9309 = vmatprep.subr.msk.bf16.mxu1 %vm404_vm6, %v2014_v26  ;;  %v10773_v26 = vld [vmem:[%s12655_s1 + $0x40] sm:$0xff]  }
 0x576   : > { %2022 = vmatpush1.bf16.msra.mxu1 %v2016_v28 }
 0x577   : > { %9312 = vmatprep.subr.msk.bf16.mxu1 %vm404_vm6, %v1972_v16  ;;  %v2137_v29 = vpop.permute.xlu0 %2136 }
 0x578   : > { %v2139_v30 = vpop.permute.xlu1 %2138  ;;  %v2140_v41 = vsel %vm561_vm8, %v2135_v27, %v2137_v29 }
 0x579   : > { %v2141_v33 = vsel %vm561_vm8, %v2137_v29, %v2139_v30  ;;  %9310 = vmatmul.mubr.msk.bf16.vlgmr.msra.gmra.mrb[36].mxu1 %vm12678_vm15, %v10694_v34  ;;  %vm12680_vm15 = vmmov %vm12679_vm5  ;;  %v2143_v52 = vsel %vm404_vm6, %v2140_v41, 0  ;;  %v10784_v30 = vld [vmem:[%s12655_s1 + $0x48] sm:$0xff]   ;;  %v10793_v41 = vld [vmem:[%s12655_s1 + $0x50] sm:$0xff]  }
 0x57a   : > { %2080 = vmatpush1.bf16.msra.mxu1 %v2074_v36  ;;  %2063 = vmatprep.mubr.bf16.mxu1 %v10081_v21 }
 0x57b   : > { %9315 = vmatprep.subr.msk.bf16.mxu1 %vm404_vm6, %v2141_v33  ;;  %v2212_v38 = vpop.permute.xlu0 %2211 }
 0x57c   : > { %v2214_v45 = vpop.permute.xlu1 %2213 }
 0x57d   : > { %v2217_v59 = vsel %vm660_vm9, %v2212_v38, %v2214_v45 }
 0x57e   : > { %v2220_v0 = vsel %vm404_vm6, %v2217_v59, 0 }
 0x57f   : > { %v2216_v44 = vpop.permute.xlu0 %2215 }
 0x580   : > { %v2218_v53 = vsel %vm660_vm9, %v2214_v45, %v2216_v44  ;;  %v2287_v55 = vpop.permute.xlu1 %2286 }
 0x581   : > { %9311 = vmatmul.mubr.msk.bf16.gmra.mrb[40].mxu1 %vm12679_vm5, %v10704_v39 }
 0x582   : > { %2111 = vmatprep.mubr.bf16.mxu1 %v10081_v21 }
 0x583   : > { %v2289_v60 = vpop.permute.xlu0 %2288 }
 0x584   : > { %v2291_v62 = vpop.permute.xlu1 %2290  ;;  %v2292_v8 = vsel %vm12667_vm10, %v2287_v55, %v2289_v60 }
 0x585   : > { %v2293_v1 = vsel %vm12667_vm10, %v2289_v60, %v2291_v62  ;;  %v2295_v15 = vsel %vm404_vm6, %v2292_v8, 0  ;;  %v10813_v62 = vld [vmem:[%s12655_s1 + $0x60] sm:$0xff]  }
 0x587   : > { %v2362_v2 = vpop.permute.xlu0 %2361 }
 0x588   : > { %v2364_v11 = vpop.permute.xlu1 %2363 }
 0x589   : > { %9313 = vmatmul.mubr.msk.bf16.vlgmr.msra.gmra.mrb[36].mxu1 %vm12680_vm15, %v10713_v50  ;;  %vm12681_vm15 = vmmov %vm12679_vm5  ;;  %v2367_v23 = vsel %vm12666_vm11, %v2362_v2, %v2364_v11 }
 0x58a   : > { %2149 = vmatpush1.bf16.msra.mxu1 %v2143_v52  ;;  %2121 = vmatprep.mubr.bf16.mxu1 %v10081_v21  ;;  %v2370_v27 = vsel %vm404_vm6, %v2367_v23, 0 }
 0x58b   : > { %9318 = vmatprep.subr.msk.bf16.mxu1 %vm404_vm6, %v2218_v53  ;;  %v2366_v10 = vpop.permute.xlu0 %2365  ;;  %v10804_v53 = vld [vmem:[%s12655_s1 + $0x58] sm:$0xff]  }
 0x58c   : > { %v2368_v16 = vsel %vm12666_vm11, %v2364_v11, %v2366_v10  ;;  %v2437_v17 = vpop.permute.xlu1 %2436 }
 0x58f   : > { %v2439_v24 = vpop.permute.xlu0 %2438 }
 0x590   : > { %v2441_v25 = vpop.permute.xlu1 %2440  ;;  %v2442_v33 = vsel %vm12665_vm12, %v2437_v17, %v2439_v24 }
 0x591   : > { %9314 = vmatmul.mubr.msk.bf16.gmra.mrb[40].mxu1 %vm12679_vm5, %v10724_v57  ;;  %v2443_v28 = vsel %vm12665_vm12, %v2439_v24, %v2441_v25  ;;  %v2445_v44 = vsel %vm404_vm6, %v2442_v33, 0  ;;  %vm12688_vm12 = vmmov %vm12679_vm5 }
 0x592   : > { %2180 = vmatprep.mubr.bf16.mxu1 %v10081_v21 }
 0x593   : > { %v2512_v29 = vpop.permute.xlu0 %2511 }
 0x594   : > { %v2514_v38 = vpop.permute.xlu1 %2513 }
 0x595   : > { %v2517_v55 = vsel %vm12664_vm13, %v2512_v29, %v2514_v38 }
 0x597   : > { %v2516_v36 = vpop.permute.xlu0 %2515 }
 0x598   : > { %v2518_v45 = vsel %vm12664_vm13, %v2514_v38, %v2516_v36  ;;  %v2587_v52 = vpop.permute.xlu1 %2586  ;;  %vm12686_vm13 = vmmov %vm12679_vm5 }
 0x599   : > { %9316 = vmatmul.mubr.msk.bf16.vlgmr.msra.gmra.mrb[36].mxu1 %vm12681_vm15, %v10733_v63  ;;  %vm12682_vm15 = vmmov %vm12679_vm5 }
 0x59a   : > { %2226 = vmatpush1.bf16.msra.mxu1 %v2220_v0  ;;  %2190 = vmatprep.mubr.bf16.mxu1 %v10081_v21  ;;  %v2520_v0 = vsel %vm404_vm6, %v2517_v55, 0 }
 0x59b   : > { %9321 = vmatprep.subr.msk.bf16.mxu1 %vm404_vm6, %v2293_v1  ;;  %v2589_v59 = vpop.permute.xlu0 %2588 }
 0x59c   : > { %v2591_v60 = vpop.permute.xlu1 %2590  ;;  %v2592_v2 = vsel %vm1145_vm14, %v2587_v52, %v2589_v59 }
 0x59d   : > { %v2593_v1 = vsel %vm1145_vm14, %v2589_v59, %v2591_v60  ;;  %v2595_v8 = vsel %vm404_vm6, %v2592_v2, 0 }
 0x5a1   : > { %9317 = vmatmul.mubr.msk.bf16.gmra.mrb[40].mxu1 %vm12679_vm5, %v10744_v3 }
 0x5a2   : > { %2257 = vmatprep.mubr.bf16.mxu1 %v10081_v21 }
 0x5a9   : > { %9319 = vmatmul.mubr.msk.bf16.vlgmr.msra.gmra.mrb[36].mxu1 %vm12682_vm15, %v10753_v12  ;;  %vm12683_vm15 = vmmov %vm12679_vm5 }
 0x5aa   : > { %2301 = vmatpush1.bf16.msra.mxu1 %v2295_v15  ;;  %2267 = vmatprep.mubr.bf16.mxu1 %v10081_v21 }
 0x5ab   : > { %9324 = vmatprep.subr.msk.bf16.mxu1 %vm404_vm6, %v2368_v16 }
 0x5b1   : > { %9320 = vmatmul.mubr.msk.bf16.gmra.mrb[40].mxu1 %vm12679_vm5, %v10764_v19 }
 0x5b2   : > { %2332 = vmatprep.mubr.bf16.mxu1 %v10081_v21 }
 0x5b9   : > { %9322 = vmatmul.mubr.msk.bf16.vlgmr.msra.gmra.mrb[36].mxu1 %vm12683_vm15, %v10773_v26  ;;  %vm12684_vm15 = vmmov %vm12679_vm5 }
 0x5ba   : > { %2376 = vmatpush1.bf16.msra.mxu1 %v2370_v27  ;;  %2342 = vmatprep.mubr.bf16.mxu1 %v10081_v21 }
 0x5bb   : > { %9327 = vmatprep.subr.msk.bf16.mxu1 %vm404_vm6, %v2443_v28 }
 0x5c1   : > { %9323 = vmatmul.mubr.msk.bf16.gmra.mrb[40].mxu1 %vm12679_vm5, %v10784_v30 }
 0x5c2   : > { %2407 = vmatprep.mubr.bf16.mxu1 %v10081_v21 }
 0x5c9   : > { %9325 = vmatmul.mubr.msk.bf16.vlgmr.msra.gmra.mrb[36].mxu1 %vm12684_vm15, %v10793_v41  ;;  %vm12685_vm15 = vmmov %vm12679_vm5 }
 0x5ca   : > { %2451 = vmatpush1.bf16.msra.mxu1 %v2445_v44  ;;  %2417 = vmatprep.mubr.bf16.mxu1 %v10081_v21 }
 0x5cb   : > { %9330 = vmatprep.subr.msk.bf16.mxu1 %vm404_vm6, %v2518_v45 }
 0x5d1   : > { %9326 = vmatmul.mubr.msk.bf16.gmra.mrb[40].mxu1 %vm12679_vm5, %v10804_v53 }
 0x5d2   : > { %2482 = vmatprep.mubr.bf16.mxu1 %v10081_v21 }
 0x5d9   : > { %9328 = vmatmul.mubr.msk.bf16.vlgmr.msra.gmra.mrb[36].mxu1 %vm12685_vm15, %v10813_v62  ;;  %vm12687_vm15 = vmmov %vm12679_vm5 }
 0x5da   : > { %2526 = vmatpush1.bf16.msra.mxu1 %v2520_v0  ;;  %2492 = vmatprep.mubr.bf16.mxu1 %v10081_v21 }
 0x5db   : > { %9333 = vmatprep.subr.msk.bf16.mxu1 %vm404_vm6, %v2593_v1 }
 0x5e1   : > { %9329 = vmatmul.mubr.msk.bf16.gmra.mrb[40].mxu1 %vm12679_vm5, %v10318_v42 }
 0x5e2   : > { %2557 = vmatprep.mubr.bf16.mxu1 %v10081_v21 }
 0x5e9   : > { %9331 = vmatmul.mubr.msk.bf16.vlgmr.msra.gmra.mrb[36].mxu1 %vm12686_vm13, %v10326_v43 }
 0x5ea   : > { %2601 = vmatpush1.bf16.msra.mxu1 %v2595_v8  ;;  %2567 = vmatprep.mubr.bf16.mxu1 %v10081_v21 }
 0x5f1   : > { %9332 = vmatmul.mubr.msk.bf16.gmra.mrb[40].mxu1 %vm12687_vm15, %v10336_v46 }
 0x5f2   : > { %2632 = vmatprep.mubr.bf16.mxu1 %v10081_v21 }
 0x5f9   : > { %9334 = vmatmul.mubr.msk.bf16.vlgmr.msra.gmra.mrb[36].mxu1 %vm12688_vm12, %v10344_v47  ;;  %vm12689_vm12 = vcmask 1039360  }
 0x5fa   : > { %2642 = vmatprep.mubr.bf16.mxu1 %v10081_v21  ;;  %vm12690_vm13 = vmmov %vm12689_vm12 }
 0x5fb   : > { %vm12691_vm15 = vmmov %vm12689_vm12 }
 0x601   : > { %9335 = vmatmul.mubr.msk.bf16.gmra.mrb[40].mxu1 %vm12679_vm5, %v10352_v48  ;;  %vm12692_vm5 = vmmov %vm12689_vm12 }
 0x602   : > { %4205 = vmatprep.mubr.bf16.mxu1 %v10081_v21 }
 0x6cc   : > { %v2634_v42 = vpop.f32.mrb[36].mxu1 }
 0x6cd   : > { %v2661_v43 = vadd.f32 %v2634_v42, %v10357_v49  ;;  %v2636_v10 = vpop.f32.mrb[37].mxu1 }
 0x6ce   : > { %v2662_v11 = vadd.f32 %v2636_v10, %v10357_v49  ;;  %v2638_v15 = vpop.f32.mrb[38].mxu1 }
 0x6cf   : > { %v2669_v46 = vmax.f32 %v2661_v43, 0.0  ;;  %v2663_v16 = vadd.f32 %v2638_v15, %v10359_v51  ;;  %v2640_v17 = vpop.f32.mrb[39].mxu1 }
 0x6d0   : > { %v2670_v23 = vmax.f32 %v2662_v11, 0.0  ;;  %v2664_v47 = vadd.f32 %v2640_v17, %v10359_v51 }
 0x6d1   : > { %v2671_v24 = vmax.f32 %v2663_v16, 0.0  ;;  %v2677_v48 = vsel %vm10143_vm1, %v2669_v46, 0.0  ;;  %v2741_v25 = vsel %vm10139_vm0, %v2669_v46, 0.0 }
 0x6d2   : > { %v2672_v27 = vmax.f32 %v2664_v47, 0.0  ;;  %v2678_v28 = vsel %vm10155_vm3, %v2670_v23, 0.0  ;;  %v2742_v59 = vsel %vm10151_vm2, %v2670_v23, 0.0 }
 0x6d3   : > { %v2679_v29 = vsel %vm10143_vm1, %v2671_v24, 0.0  ;;  %v2715_v33 = vpack.c.bf16 %v2671_v24, %v2669_v46  ;;  %v2743_v36 = vsel %vm10139_vm0, %v2671_v24, 0.0 }
 0x6d4   : > { %v2685_v38 = vpack.c.bf16 %v2679_v29, %v2677_v48  ;;  %v2749_v44 = vpack.c.bf16 %v2743_v36, %v2741_v25  ;;  %v2680_v45 = vsel %vm10155_vm3, %v2672_v27, 0.0  ;;  %v2716_v52 = vpack.c.bf16 %v2672_v27, %v2670_v23  ;;  %v2644_v55 = vpop.f32.mrb[40].mxu1 }
 0x6d5   : > { %v2686_v60 = vpack.c.bf16 %v2680_v45, %v2678_v28  ;;  %v2744_v0 = vsel %vm10151_vm2, %v2672_v27, 0.0  ;;  %v2665_v1 = vadd.f32 %v2644_v55, %v10375_v6  ;;  %2723 = vrot.lane.b32.xlu0 %v2715_v33, %s10080_s27  ;;  %v2646_v2 = vpop.f32.mrb[41].mxu1 }
 0x6d6   : > { %v2750_v8 = vpack.c.bf16 %v2744_v0, %v2742_v59  ;;  %v2666_v42 = vadd.f32 %v2646_v2, %v10375_v6  ;;  %2725 = vrot.lane.b32.xlu1 %v2716_v52, %s10080_s27  ;;  %v2648_v43 = vpop.f32.mrb[42].mxu1 }
 0x6d7   : > { %v2673_v10 = vmax.f32 %v2665_v1, 0.0  ;;  %v2667_v11 = vadd.f32 %v2648_v43, %v10385_v20  ;;  %v2650_v15 = vpop.f32.mrb[43].mxu1 }
 0x6d8   : > { %v2674_v46 = vmax.f32 %v2666_v42, 0.0  ;;  %v2668_v16 = vadd.f32 %v2650_v15, %v10385_v20 }
 0x6d9   : > { %v2675_v17 = vmax.f32 %v2667_v11, 0.0  ;;  %v2681_v23 = vsel %vm10143_vm1, %v2673_v10, 0.0  ;;  %v2745_v47 = vsel %vm10139_vm0, %v2673_v10, 0.0 }
 0x6da   : > { %v2676_v24 = vmax.f32 %v2668_v16, 0.0  ;;  %v2682_v48 = vsel %vm10155_vm3, %v2674_v46, 0.0  ;;  %v2746_v52 = vsel %vm10151_vm2, %v2674_v46, 0.0 }
 0x6db   : > { %v2683_v25 = vsel %vm10143_vm1, %v2675_v17, 0.0  ;;  %v2717_v27 = vpack.c.bf16 %v2675_v17, %v2673_v10  ;;  %v2747_v28 = vsel %vm10139_vm0, %v2675_v17, 0.0 }
 0x6dc   : > { %v2687_v29 = vpack.c.bf16 %v2683_v25, %v2681_v23  ;;  %v2751_v33 = vpack.c.bf16 %v2747_v28, %v2745_v47  ;;  %v2684_v36 = vsel %vm10155_vm3, %v2676_v24, 0.0  ;;  %v2718_v45 = vpack.c.bf16 %v2676_v24, %v2674_v46 }
 0x6dd   : > { %v2688_v55 = vpack.c.bf16 %v2684_v36, %v2682_v48  ;;  %v2748_v59 = vsel %vm10151_vm2, %v2676_v24, 0.0  ;;  %2727 = vrot.lane.b32.xlu0 %v2717_v27, %s10080_s27 }
 0x6de   : > { %v2752_v0 = vpack.c.bf16 %v2748_v59, %v2746_v52  ;;  %2729 = vrot.lane.b32.xlu1 %v2718_v45, %s10080_s27 }
 0x6e1   : > { %2757 = vrot.lane.b32.xlu0 %v2749_v44, %s10080_s27 }
 0x6e2   : > { %2759 = vrot.lane.b32.xlu1 %v2750_v8, %s10080_s27 }
 0x6e5   : > { %2761 = vrot.lane.b32.xlu0 %v2751_v33, %s10080_s27 }
 0x6e6   : > { %2763 = vrot.lane.b32.xlu1 %v2752_v0, %s10080_s27 }
 0x6e9   : > { %2693 = vrot.lane.b32.xlu0 %v2685_v38, %s10080_s27 }
 0x6ea   : > { %2695 = vrot.lane.b32.xlu1 %v2686_v60, %s10080_s27 }
 0x6ed   : > { %2697 = vrot.lane.b32.xlu0 %v2687_v29, %s10080_s27 }
 0x6ee   : > { %2699 = vrot.lane.b32.xlu1 %v2688_v55, %s10080_s27 }
 0x747   : > { %v2724_v1 = vpop.permute.xlu0 %2723 }
 0x748   : > { %v2726_v2 = vpop.permute.xlu1 %2725  ;;  %v10891_v42 = vsel %vm327_vm4, 0, %v2724_v1 }
 0x749   : > { %2779 = vrot.lane.b32.xlu0 %v10891_v42, %s10082_s28  ;;  %v2738_v44 = vsel %vm327_vm4, %v2726_v2, 0  ;;  %v2731_v38 = vsel %vm327_vm4, %v2724_v1, %v2726_v2 }
 0x74a   : > { %2783 = vrot.lane.b32.xlu1 %v2738_v44, %s10082_s28 }
 0x74d   : > { %2781 = vrot.lane.b32.xlu0 %v2731_v38, %s10082_s28 }
 0x74e   : > { %3019 = vrot.lane.b32.xlu1 %v2738_v44, %s10085_s7 }
 0x74f   : > { %v2728_v60 = vpop.permute.xlu0 %2727 }
 0x750   : > { %v2730_v8 = vpop.permute.xlu1 %2729  ;;  %v2736_v48 = vsel %vm327_vm4, 0, %v2728_v60 }
 0x751   : > { %v2732_v27 = vsel %vm327_vm4, %v2728_v60, %v2730_v8  ;;  %v2740_v29 = vsel %vm327_vm4, %v2730_v8, 0 }
 0x753   : > { %v2758_v43 = vpop.permute.xlu0 %2757 }
 0x754   : > { %v2760_v10 = vpop.permute.xlu1 %2759  ;;  %v2768_v11 = vsel %vm327_vm4, 0, %v2758_v43 }
 0x755   : > { %2885 = vrot.lane.b32.xlu0 %v2768_v11, %s10083_s29  ;;  %v2772_v15 = vsel %vm327_vm4, %v2760_v10, 0  ;;  %v2765_v25 = vsel %vm327_vm4, %v2758_v43, %v2760_v10 }
 0x756   : > { %2889 = vrot.lane.b32.xlu1 %v2772_v15, %s10083_s29 }
 0x757   : > { %v2762_v46 = vpop.permute.xlu0 %2761 }
 0x758   : > { %v2764_v16 = vpop.permute.xlu1 %2763  ;;  %v2770_v33 = vsel %vm327_vm4, 0, %v2762_v46 }
 0x759   : > { %v2766_v52 = vsel %vm327_vm4, %v2762_v46, %v2764_v16  ;;  %v2774_v55 = vsel %vm327_vm4, %v2764_v16, 0 }
 0x75b   : > { %v10904_v17 = vpop.permute.xlu0 %2693 }
 0x75c   : > { %v2696_v23 = vpop.permute.xlu1 %2695  ;;  %v2706_v47 = vsel %vm327_vm4, 0, %v10904_v17 }
 0x75d   : > { %2952 = vrot.lane.b32.xlu0 %v2706_v47, %s10084_s30  ;;  %v2712_v24 = vsel %vm327_vm4, %v2696_v23, 0  ;;  %v10920_v28 = vsel %vm327_vm4, %v10904_v17, %v2696_v23 }
 0x75e   : > { %2956 = vrot.lane.b32.xlu1 %v2712_v24, %s10084_s30 }
 0x75f   : > { %v10928_v36 = vpop.permute.xlu0 %2697 }
 0x760   : > { %v2709_v45 = vsel %vm327_vm4, 0, %v10928_v36  ;;  %v2700_v59 = vpop.permute.xlu1 %2699 }
 0x761   : > { %3017 = vrot.lane.b32.xlu0 %v2731_v38, %s10085_s7  ;;  %v2702_v0 = vsel %vm327_vm4, %v10928_v36, %v2700_v59  ;;  %v2714_v1 = vsel %vm327_vm4, %v2700_v59, 0 }
 0x762   : > { %2785 = vrot.lane.b32.xlu1 %v2736_v48, %s10082_s28 }
 0x765   : > { %2887 = vrot.lane.b32.xlu0 %v2765_v25, %s10083_s29 }
 0x766   : > { %2787 = vrot.lane.b32.xlu1 %v2732_v27, %s10082_s28 }
 0x769   : > { %2954 = vrot.lane.b32.xlu0 %v10920_v28, %s10084_s30 }
 0x76a   : > { %3021 = vrot.lane.b32.xlu1 %v2736_v48, %s10085_s7 }
 0x76d   : > { %2789 = vrot.lane.b32.xlu0 %v2740_v29, %s10082_s28 }
 0x76e   : > { %2891 = vrot.lane.b32.xlu1 %v2770_v33, %s10083_s29 }
 0x771   : > { %3015 = vrot.lane.b32.xlu0 %v10891_v42, %s10085_s7 }
 0x772   : > { %2958 = vrot.lane.b32.xlu1 %v2709_v45, %s10084_s30 }
 0x775   : > { %3080 = vrot.lane.b32.xlu0 %v2765_v25, %s10086_s8 }
 0x776   : > { %3023 = vrot.lane.b32.xlu1 %v2732_v27, %s10085_s7 }
 0x779   : > { %3025 = vrot.lane.b32.xlu0 %v2740_v29, %s10085_s7 }
 0x77a   : > { %2893 = vrot.lane.b32.xlu1 %v2766_v52, %s10083_s29 }
 0x77d   : > { %2895 = vrot.lane.b32.xlu0 %v2774_v55, %s10083_s29 }
 0x77e   : > { %3082 = vrot.lane.b32.xlu1 %v2772_v15, %s10086_s8 }
 0x781   : > { %3078 = vrot.lane.b32.xlu0 %v2768_v11, %s10086_s8 }
 0x782   : > { %2960 = vrot.lane.b32.xlu1 %v2702_v0, %s10084_s30 }
 0x785   : > { %2962 = vrot.lane.b32.xlu0 %v2714_v1, %s10084_s30 }
 0x786   : > { %3084 = vrot.lane.b32.xlu1 %v2770_v33, %s10086_s8 }
 0x789   : > { %3143 = vrot.lane.b32.xlu0 %v10920_v28, %s10087_s9 }
 0x78a   : > { %3145 = vrot.lane.b32.xlu1 %v2712_v24, %s10087_s9 }
 0x78d   : > { %3141 = vrot.lane.b32.xlu0 %v2706_v47, %s10087_s9 }
 0x78e   : > { %3147 = vrot.lane.b32.xlu1 %v2709_v45, %s10087_s9 }
 0x791   : > { %3206 = vrot.lane.b32.xlu0 %v2731_v38, %s10088_s10 }
 0x792   : > { %3086 = vrot.lane.b32.xlu1 %v2766_v52, %s10086_s8 }
 0x795   : > { %3088 = vrot.lane.b32.xlu0 %v2774_v55, %s10086_s8 }
 0x796   : > { %3208 = vrot.lane.b32.xlu1 %v2738_v44, %s10088_s10 }
 0x799   : > { %3204 = vrot.lane.b32.xlu0 %v10891_v42, %s10088_s10 }
 0x79a   : > { %3149 = vrot.lane.b32.xlu1 %v2702_v0, %s10087_s9 }
 0x79d   : > { %3151 = vrot.lane.b32.xlu0 %v2714_v1, %s10087_s9 }
 0x79e   : > { %3212 = vrot.lane.b32.xlu1 %v2732_v27, %s10088_s10 }
 0x7a1   : > { %3214 = vrot.lane.b32.xlu0 %v2740_v29, %s10088_s10 }
 0x7a2   : > { %3210 = vrot.lane.b32.xlu1 %v2736_v48, %s10088_s10 }
 0x7a5   : > { %3269 = vrot.lane.b32.xlu0 %v2765_v25, %s10089_s11 }
 0x7a6   : > { %3271 = vrot.lane.b32.xlu1 %v2772_v15, %s10089_s11 }
 0x7a9   : > { %3267 = vrot.lane.b32.xlu0 %v2768_v11, %s10089_s11 }
 0x7aa   : > { %3275 = vrot.lane.b32.xlu1 %v2766_v52, %s10089_s11 }
 0x7ad   : > { %3277 = vrot.lane.b32.xlu0 %v2774_v55, %s10089_s11 }
 0x7ae   : > { %3273 = vrot.lane.b32.xlu1 %v2770_v33, %s10089_s11 }
 0x7bb   : > { %v2780_v2 = vpop.permute.xlu0 %2779 }
 0x7bc   : > { %v2784_v42 = vpop.permute.xlu1 %2783 }
 0x7bf   : > { %v2782_v44 = vpop.permute.xlu0 %2781 }
 0x7c0   : > { %v2792_v38 = vsel %vm12689_vm12, %v2782_v44, %v2784_v42  ;;  %v2791_v60 = vsel %vm12690_vm13, %v2780_v2, %v2782_v44  ;;  %v3020_v8 = vpop.permute.xlu1 %3019  ;;  %vm12693_vm12 = vcmask 261120  }
 0x7c1   : > { %2799 = vmatprep.subr.bf16.mxu0 %v2792_v38  ;;  %vm12694_vm13 = vmmov %vm12693_vm12 }
 0x7c2   : > { %2800 = vmatpush1.bf16.msra.mxu0 %v2791_v60 }
 0x7c7   : > { %v2886_v43 = vpop.permute.xlu0 %2885 }
 0x7c8   : > { %v2890_v10 = vpop.permute.xlu1 %2889 }
 0x7cf   : > { %v2953_v15 = vpop.permute.xlu0 %2952 }
 0x7d0   : > { %v2957_v11 = vpop.permute.xlu1 %2956 }
 0x7d3   : > { %v3018_v46 = vpop.permute.xlu0 %3017 }
 0x7d4   : > { %v2786_v16 = vpop.permute.xlu1 %2785 }
 0x7d7   : > { %v2888_v23 = vpop.permute.xlu0 %2887 }
 0x7d8   : > { %v2788_v47 = vpop.permute.xlu1 %2787  ;;  %v2898_v1 = vsel %vm561_vm8, %v2888_v23, %v2890_v10 }
 0x7d9   : > { %v2793_v33 = vsel %vm12692_vm5, %v2786_v16, %v2788_v47  ;;  %vm12696_vm5 = vmmov %vm12693_vm12 }
 0x7db   : > { %v2955_v24 = vpop.permute.xlu0 %2954 }
 0x7dc   : > { %v3022_v48 = vpop.permute.xlu1 %3021  ;;  %v2965_v44 = vsel %vm660_vm9, %v2955_v24, %v2957_v11  ;;  %v3028_v11 = vsel %vm12667_vm10, %v3018_v46, %v3020_v8 }
 0x7df   : > { %v2790_v25 = vpop.permute.xlu0 %2789 }
 0x7e0   : > { %v2892_v27 = vpop.permute.xlu1 %2891  ;;  %v2794_v29 = vsel %vm12691_vm15, %v2788_v47, %v2790_v25  ;;  %vm12695_vm15 = vmmov %vm12693_vm12 }
 0x7e1   : > { %2801 = vmatprep.subr.bf16.mxu0 %v2794_v29 }
 0x7e2   : > { %2802 = vmatpush1.bf16.msra.mxu0 %v2793_v33 }
 0x7e3   : > { %v3016_v45 = vpop.permute.xlu0 %3015  ;;  %2840 = vmatprep.subr.bf16.mxu0 %v10920_v28 }
 0x7e4   : > { %v2959_v52 = vpop.permute.xlu1 %2958 }
 0x7e5   : > { %9336 = vmatmul.mubr.msk.bf16.vlgmr.msra.gmra.mrb[8].mxu0 %vm12693_vm12, %v10512_v54  ;;  %v2897_v54 = vsel %vm561_vm8, %v2886_v43, %v2888_v23  ;;  %vm12697_vm12 = vmmov %vm12696_vm5 }
 0x7e6   : > { %9338 = vmatpush1.bf16.msk.msra.mxu0 %vm10516_vm7, %v10904_v17  ;;  %2872 = vmatprep.mubr.bf16.mxu0 %v10081_v21 }
 0x7e7   : > { %v3081_v55 = vpop.permute.xlu0 %3080  ;;  %2842 = vmatprep.subr.bf16.mxu0 %v2702_v0 }
 0x7e8   : > { %v3024_v59 = vpop.permute.xlu1 %3023 }
 0x7e9   : > { %v3029_v29 = vsel %vm12667_vm10, %v3022_v48, %v3024_v59 }
 0x7ea   : > { %9340 = vmatpush1.bf16.msk.msra.mxu0 %vm10516_vm7, %v10928_v36 }
 0x7eb   : > { %v3026_v28 = vpop.permute.xlu0 %3025  ;;  %2905 = vmatprep.subr.bf16.mxu0 %v2898_v1 }
 0x7ec   : > { %v2894_v2 = vpop.permute.xlu1 %2893 }
 0x7ed   : > { %9341 = vmatmul.mubr.msk.bf16.vlgmr.msra.gmra.mrb[12].mxu0 %vm12694_vm13, %v10533_v61  ;;  %v2899_v36 = vsel %vm561_vm8, %v2892_v27, %v2894_v2  ;;  %v2964_v61 = vsel %vm660_vm9, %v2953_v15, %v2955_v24  ;;  %v3030_v15 = vsel %vm12667_vm10, %v3024_v59, %v3026_v28  ;;  %vm12698_vm13 = vcmask 785408  }
 0x7ee   : > { %2906 = vmatpush1.bf16.msra.mxu0 %v2897_v54  ;;  %2937 = vmatprep.mubr.bf16.mxu0 %v10081_v21 }
 0x7ef   : > { %v2896_v17 = vpop.permute.xlu0 %2895 }
 0x7f0   : > { %v3083_v0 = vpop.permute.xlu1 %3082  ;;  %v2900_v42 = vsel %vm561_vm8, %v2894_v2, %v2896_v17 }
 0x7f1   : > { %2907 = vmatprep.subr.bf16.mxu0 %v2900_v42  ;;  %v3091_v8 = vsel %vm12666_vm11, %v3081_v55, %v3083_v0 }
 0x7f2   : > { %2908 = vmatpush1.bf16.msra.mxu0 %v2899_v36 }
 0x7f3   : > { %v3079_v38 = vpop.permute.xlu0 %3078  ;;  %2972 = vmatprep.subr.bf16.mxu0 %v2965_v44 }
 0x7f4   : > { %v2961_v60 = vpop.permute.xlu1 %2960 }
 0x7f5   : > { %9342 = vmatmul.mubr.msk.bf16.vlgmr.msra.gmra.mrb[16].mxu0 %vm12695_vm15, %v10545_v9  ;;  %v2966_v23 = vsel %vm660_vm9, %v2959_v52, %v2961_v60  ;;  %v3027_v9 = vsel %vm12667_vm10, %v3016_v45, %v3018_v46  ;;  %v3090_v46 = vsel %vm12666_vm11, %v3079_v38, %v3081_v55  ;;  %vm12699_vm15 = vmmov %vm12698_vm13 }
 0x7f6   : > { %2973 = vmatpush1.bf16.msra.mxu0 %v2964_v61  ;;  %3004 = vmatprep.mubr.bf16.mxu0 %v10081_v21 }
 0x7f7   : > { %v2963_v43 = vpop.permute.xlu0 %2962 }
 0x7f8   : > { %v3085_v10 = vpop.permute.xlu1 %3084  ;;  %v2967_v16 = vsel %vm660_vm9, %v2961_v60, %v2963_v43 }
 0x7f9   : > { %2974 = vmatprep.subr.bf16.mxu0 %v2967_v16 }
 0x7fa   : > { %2975 = vmatpush1.bf16.msra.mxu0 %v2966_v23 }
 0x7fb   : > { %v3144_v47 = vpop.permute.xlu0 %3143  ;;  %3035 = vmatprep.subr.bf16.mxu0 %v3028_v11 }
 0x7fc   : > { %v3146_v25 = vpop.permute.xlu1 %3145 }
 0x7fd   : > { %9343 = vmatmul.mubr.msk.bf16.vlgmr.msra.gmra.mrb[20].mxu0 %vm12696_vm5, %v10557_v22  ;;  %v3154_v59 = vsel %vm12698_vm13, %v3144_v47, %v3146_v25 }
 0x7fe   : > { %3036 = vmatpush1.bf16.msra.mxu0 %v3027_v9  ;;  %3067 = vmatprep.mubr.bf16.mxu0 %v10081_v21 }
 0x7ff   : > { %v3142_v24 = vpop.permute.xlu0 %3141  ;;  %3037 = vmatprep.subr.bf16.mxu0 %v3030_v15 }
 0x800   : > { %v3148_v27 = vpop.permute.xlu1 %3147  ;;  %v3153_v55 = vsel %vm12699_vm15, %v3142_v24, %v3144_v47 }
 0x802   : > { %3038 = vmatpush1.bf16.msra.mxu0 %v3029_v29 }
 0x803   : > { %v3207_v33 = vpop.permute.xlu0 %3206  ;;  %3098 = vmatprep.subr.bf16.mxu0 %v3091_v8 }
 0x804   : > { %v3087_v52 = vpop.permute.xlu1 %3086 }
 0x805   : > { %9344 = vmatmul.mubr.msk.bf16.vlgmr.msra.gmra.mrb[24].mxu0 %vm12697_vm12, %v10570_v31  ;;  %v3092_v48 = vsel %vm12666_vm11, %v3085_v10, %v3087_v52  ;;  %vm12700_vm12 = vmmov %vm12698_vm13  ;;  %vm12702_vm13 = vcmask 777216  }
 0x806   : > { %3099 = vmatpush1.bf16.msra.mxu0 %v3090_v46  ;;  %3130 = vmatprep.mubr.bf16.mxu0 %v10081_v21  ;;  %vm12703_vm15 = vmmov %vm12702_vm13 }
 0x807   : > { %v3089_v22 = vpop.permute.xlu0 %3088  ;;  %vm12704_vm10 = vmmov %vm12702_vm13 }
 0x808   : > { %v3209_v45 = vpop.permute.xlu1 %3208  ;;  %v3093_v1 = vsel %vm12666_vm11, %v3087_v52, %v3089_v22  ;;  %vm12701_vm11 = vmmov %vm12700_vm12 }
 0x809   : > { %3100 = vmatprep.subr.bf16.mxu0 %v3093_v1  ;;  %v3217_v42 = vsel %vm12702_vm13, %v3207_v33, %v3209_v45  ;;  %vm12708_vm13 = vcmask 1039360  }
 0x80a   : > { %3101 = vmatpush1.bf16.msra.mxu0 %v3092_v48 }
 0x80b   : > { %v3205_v28 = vpop.permute.xlu0 %3204  ;;  %3161 = vmatprep.subr.bf16.mxu0 %v3154_v59 }
 0x80c   : > { %v3150_v2 = vpop.permute.xlu1 %3149  ;;  %v3216_v38 = vsel %vm12703_vm15, %v3205_v28, %v3207_v33  ;;  %vm12709_vm15 = vmmov %vm12708_vm13 }
 0x80d   : > { %9345 = vmatmul.mubr.msk.bf16.vlgmr.msra.gmra.mrb[28].mxu0 %vm12696_vm5, %v10582_v40  ;;  %v3155_v0 = vsel %vm12701_vm11, %v3148_v27, %v3150_v2  ;;  %vm12705_vm11 = vmmov %vm12704_vm10 }
 0x80e   : > { %3162 = vmatpush1.bf16.msra.mxu0 %v3153_v55  ;;  %3193 = vmatprep.mubr.bf16.mxu0 %v10081_v21 }
 0x80f   : > { %v3152_v31 = vpop.permute.xlu0 %3151 }
 0x810   : > { %v3213_v54 = vpop.permute.xlu1 %3212  ;;  %v3156_v17 = vsel %vm12700_vm12, %v3150_v2, %v3152_v31  ;;  %vm12706_vm12 = vmmov %vm12696_vm5 }
 0x811   : > { %3163 = vmatprep.subr.bf16.mxu0 %v3156_v17 }
 0x812   : > { %3164 = vmatpush1.bf16.msra.mxu0 %v3155_v0 }
 0x813   : > { %v3215_v36 = vpop.permute.xlu0 %3214  ;;  %3224 = vmatprep.subr.bf16.mxu0 %v3217_v42 }
 0x814   : > { %v3211_v44 = vpop.permute.xlu1 %3210  ;;  %v3219_v40 = vsel %vm12704_vm10, %v3213_v54, %v3215_v36  ;;  %vm12707_vm10 = vmmov %vm12696_vm5 }
 0x815   : > { %9346 = vmatmul.mubr.msk.bf16.vlgmr.msra.gmra.mrb[32].mxu0 %vm12696_vm5, %v10594_v58  ;;  %v3218_v43 = vsel %vm12705_vm11, %v3211_v44, %v3213_v54  ;;  %vm12710_vm5 = vcmask 31744  }
 0x816   : > { %3225 = vmatpush1.bf16.msra.mxu0 %v3216_v38  ;;  %3256 = vmatprep.mubr.bf16.mxu0 %v10081_v21  ;;  %vm12711_vm11 = vmmov %vm12710_vm5 }
 0x817   : > { %v3270_v60 = vpop.permute.xlu0 %3269  ;;  %3226 = vmatprep.subr.bf16.mxu0 %v3219_v40 }
 0x818   : > { %v3272_v61 = vpop.permute.xlu1 %3271 }
 0x819   : > { %v3280_v10 = vsel %vm1145_vm14, %v3270_v60, %v3272_v61 }
 0x81a   : > { %3227 = vmatpush1.bf16.msra.mxu0 %v3218_v43 }
 0x81b   : > { %v3268_v16 = vpop.permute.xlu0 %3267  ;;  %3287 = vmatprep.subr.bf16.mxu0 %v3280_v10 }
 0x81c   : > { %v3279_v23 = vsel %vm1145_vm14, %v3268_v16, %v3270_v60  ;;  %v3276_v11 = vpop.permute.xlu1 %3275 }
 0x81d   : > { %9347 = vmatmul.mubr.msk.bf16.vlgmr.msra.gmra.mrb[36].mxu0 %vm12706_vm12, %v10606_v4  ;;  %vm12712_vm12 = vmmov %vm12710_vm5 }
 0x81e   : > { %3288 = vmatpush1.bf16.msra.mxu0 %v3279_v23  ;;  %3319 = vmatprep.mubr.bf16.mxu0 %v10081_v21 }
 0x81f   : > { %v3278_v58 = vpop.permute.xlu0 %3277 }
 0x820   : > { %v3274_v47 = vpop.permute.xlu1 %3273  ;;  %v3282_v25 = vsel %vm1145_vm14, %v3276_v11, %v3278_v58 }
 0x821   : > { %v3281_v9 = vsel %vm1145_vm14, %v3274_v47, %v3276_v11  ;;  %3289 = vmatprep.subr.bf16.mxu0 %v3282_v25 }
 0x822   : > { %3290 = vmatpush1.bf16.msra.mxu0 %v3281_v9 }
 0x825   : > { %9348 = vmatmul.mubr.msk.bf16.vlgmr.msra.gmra.mrb[40].mxu0 %vm12707_vm10, %v10617_v18  ;;  %vm12713_vm10 = vmmov %vm12710_vm5 }
 0x826   : > { %3427 = vmatprep.mubr.bf16.mxu0 %v10081_v21 }
 0x8b8   : > { %v2833_v15 = vpop.f32.mrb[8].mxu0 }
 0x8b9   : > { %v2835_v24 = vpop.f32.mrb[9].mxu0 }
 0x8ba   : > { %v2837_v27 = vpop.f32.mrb[10].mxu0 }
 0x8bb   : > { %v2838_v4 = vpop.f32.mrb[11].mxu0 }
 0x8c0   : > { %v2874_v29 = vpop.f32.mrb[12].mxu0 }
 0x8c1   : > { %v2875_v8 = vadd.f32 %v2874_v29, %v2833_v15  ;;  %v2876_v33 = vpop.f32.mrb[13].mxu0 }
 0x8c2   : > { %v2877_v52 = vadd.f32 %v2876_v33, %v2835_v24  ;;  %v2878_v46 = vpop.f32.mrb[14].mxu0 }
 0x8c3   : > { %v2879_v22 = vpop.f32.mrb[15].mxu0 }
 0x8c8   : > { %v2939_v45 = vpop.f32.mrb[16].mxu0 }
 0x8c9   : > { %v2946_v1 = vadd.f32 %v2939_v45, %v2875_v8  ;;  %v2941_v48 = vpop.f32.mrb[17].mxu0 }
 0x8ca   : > { %v2947_v59 = vadd.f32 %v2941_v48, %v2877_v52  ;;  %v2943_v28 = vpop.f32.mrb[18].mxu0 }
 0x8cb   : > { %v2944_v2 = vpop.f32.mrb[19].mxu0 }
 0x8d0   : > { %v3006_v55 = vpop.f32.mrb[20].mxu0 }
 0x8d1   : > { %v3013_v18 = vadd.f32 %v3006_v55, %v2946_v1  ;;  %v3008_v31 = vpop.f32.mrb[21].mxu0 }
 0x8d2   : > { %v3014_v54 = vadd.f32 %v3008_v31, %v2947_v59  ;;  %v3010_v17 = vpop.f32.mrb[22].mxu0 }
 0x8d3   : > { %v3011_v0 = vpop.f32.mrb[23].mxu0 }
 0x8d8   : > { %v3069_v42 = vpop.f32.mrb[24].mxu0 }
 0x8d9   : > { %v3076_v36 = vadd.f32 %v3069_v42, %v3013_v18  ;;  %v3071_v44 = vpop.f32.mrb[25].mxu0 }
 0x8da   : > { %v3077_v38 = vadd.f32 %v3071_v44, %v3014_v54  ;;  %v3073_v40 = vpop.f32.mrb[26].mxu0 }
 0x8db   : > { %v3074_v60 = vpop.f32.mrb[27].mxu0 }
 0x8e0   : > { %v3132_v61 = vpop.f32.mrb[28].mxu0 }
 0x8e1   : > { %v3139_v43 = vadd.f32 %v3132_v61, %v3076_v36  ;;  %v3134_v10 = vpop.f32.mrb[29].mxu0 }
 0x8e2   : > { %v3140_v16 = vadd.f32 %v3134_v10, %v3077_v38  ;;  %v3136_v23 = vpop.f32.mrb[30].mxu0 }
 0x8e3   : > { %v3137_v11 = vpop.f32.mrb[31].mxu0 }
 0x8e8   : > { %v3195_v58 = vpop.f32.mrb[32].mxu0 }
 0x8e9   : > { %v3202_v47 = vadd.f32 %v3195_v58, %v3139_v43  ;;  %v3197_v25 = vpop.f32.mrb[33].mxu0 }
 0x8ea   : > { %v3203_v9 = vadd.f32 %v3197_v25, %v3140_v16  ;;  %v3199_v15 = vpop.f32.mrb[34].mxu0 }
 0x8eb   : > { %v3200_v24 = vpop.f32.mrb[35].mxu0 }
 0x8f0   : > { %v3258_v27 = vpop.f32.mrb[36].mxu0 }
 0x8f1   : > { %v3265_v4 = vadd.f32 %v3258_v27, %v3202_v47  ;;  %v3260_v29 = vpop.f32.mrb[37].mxu0 }
 0x8f2   : > { %v3266_v8 = vadd.f32 %v3260_v29, %v3203_v9  ;;  %v3262_v33 = vpop.f32.mrb[38].mxu0 }
 0x8f3   : > { %v3263_v52 = vpop.f32.mrb[39].mxu0 }
 0x8f8   : > { %v3321_v46 = vpop.f32.mrb[40].mxu0 }
 0x8f9   : > { %v3328_v22 = vadd.f32 %v3321_v46, %v3265_v4  ;;  %v3323_v45 = vpop.f32.mrb[41].mxu0 }
 0x8fa   : > { %v3329_v1 = vadd.f32 %v3323_v45, %v3266_v8  ;;  %v3325_v48 = vpop.f32.mrb[42].mxu0 }
 0x8fb   : > { %v11040_v59 = vadd.f32 %v3328_v22, %v10622_v32  ;;  %v3326_v28 = vpop.f32.mrb[43].mxu0 }
 0x8fc   : > { %v11043_v2 = vadd.f32 %v3329_v1, %v10622_v32 }
 0x8fd   : > { %v3332_v55 = vmul.f32 0.05, %v11040_v59 }
 0x8fe   : > { %v3333_v18 = vmul.f32 0.05, %v11043_v2 }
 0x8ff   : > { %v3334_v31 = vadd.f32 %v3332_v55, %v10625_v35 }
 0x900   : > { %v3335_v54 = vadd.f32 %v3333_v18, %v10628_v37 }
 0x901   : > { %v3351_v17 = vpack.c.bf16 %v3334_v31, %v3334_v31  ;;  %v3364_v42 = vsel %vm10139_vm0, %v3334_v31, 0.0  ;;  %v3336_v40 = vsel %vm10143_vm1, %v3334_v31, 0.0 }
 0x902   : > { %v3352_v0 = vpack.c.bf16 %v3335_v54, %v3335_v54  ;;  %v3365_v36 = vsel %vm10151_vm2, %v3335_v54, 0.0  ;;  %v3366_v44 = vpack.c.bf16 %v3364_v42, %v3364_v42  ;;  %v3337_v60 = vsel %vm10155_vm3, %v3335_v54, 0.0 }
 0x903   : > { %3355 = vrot.lane.b32.xlu0 %v3351_v17, %s10080_s27  ;;  %v3367_v38 = vpack.c.bf16 %v3365_v36, %v3365_v36  ;;  %v3338_v61 = vpack.c.bf16 %v3336_v40, %v3336_v40  ;;  %v3339_v43 = vpack.c.bf16 %v3337_v60, %v3337_v60 }
 0x904   : > { %3357 = vrot.lane.b32.xlu1 %v3352_v0, %s10080_s27 }
 0x907   : > { %3370 = vrot.lane.b32.xlu0 %v3366_v44, %s10080_s27 }
 0x908   : > { %3372 = vrot.lane.b32.xlu1 %v3367_v38, %s10080_s27 }
 0x90b   : > { %3342 = vrot.lane.b32.xlu0 %v3338_v61, %s10080_s27 }
 0x90c   : > { %3344 = vrot.lane.b32.xlu1 %v3339_v43, %s10080_s27 }
 0x975   : > { %v3356_v10 = vpop.permute.xlu0 %3355 }
 0x976   : > { %v3358_v16 = vpop.permute.xlu1 %3357  ;;  %v3361_v23 = vsel %vm327_vm4, 0, %v3356_v10 }
 0x977   : > { %3381 = vrot.lane.b32.xlu0 %v3361_v23, %s10082_s28  ;;  %v3359_v11 = vsel %vm327_vm4, %v3356_v10, %v3358_v16  ;;  %v3363_v25 = vsel %vm327_vm4, %v3358_v16, 0 }
 0x978   : > { %3383 = vrot.lane.b32.xlu1 %v3359_v11, %s10082_s28 }
 0x979   : > { %v3371_v58 = vpop.permute.xlu0 %3370 }
 0x97a   : > { %v3373_v47 = vpop.permute.xlu1 %3372  ;;  %v3376_v9 = vsel %vm327_vm4, 0, %v3371_v58 }
 0x97b   : > { %3385 = vrot.lane.b32.xlu0 %v3363_v25, %s10082_s28  ;;  %v3374_v15 = vsel %vm327_vm4, %v3371_v58, %v3373_v47  ;;  %v3378_v27 = vsel %vm327_vm4, %v3373_v47, 0 }
 0x97c   : > { %3508 = vrot.lane.b32.xlu1 %v3376_v9, %s10083_s29 }
 0x97d   : > { %v3343_v24 = vpop.permute.xlu0 %3342 }
 0x97e   : > { %v3345_v4 = vpop.permute.xlu1 %3344  ;;  %v3348_v29 = vsel %vm327_vm4, 0, %v3343_v24 }
 0x97f   : > { %3510 = vrot.lane.b32.xlu0 %v3374_v15, %s10083_s29  ;;  %v3346_v8 = vsel %vm327_vm4, %v3343_v24, %v3345_v4  ;;  %v3350_v33 = vsel %vm327_vm4, %v3345_v4, 0  ;;  %v3448_v54 = vsel %vm404_vm6, %v3348_v29, 0 }
 0x980   : > { %3512 = vrot.lane.b32.xlu1 %v3378_v27, %s10083_s29 }
 0x983   : > { %3585 = vrot.lane.b32.xlu0 %v3348_v29, %s10084_s30 }
 0x984   : > { %3587 = vrot.lane.b32.xlu1 %v3346_v8, %s10084_s30 }
 0x987   : > { %3589 = vrot.lane.b32.xlu0 %v3350_v33, %s10084_s30 }
 0x988   : > { %3660 = vrot.lane.b32.xlu1 %v3361_v23, %s10085_s7 }
 0x98b   : > { %3662 = vrot.lane.b32.xlu0 %v3359_v11, %s10085_s7 }
 0x98c   : > { %3664 = vrot.lane.b32.xlu1 %v3363_v25, %s10085_s7 }
 0x98f   : > { %3735 = vrot.lane.b32.xlu0 %v3376_v9, %s10086_s8 }
 0x990   : > { %3737 = vrot.lane.b32.xlu1 %v3374_v15, %s10086_s8 }
 0x993   : > { %3739 = vrot.lane.b32.xlu0 %v3378_v27, %s10086_s8 }
 0x994   : > { %3810 = vrot.lane.b32.xlu1 %v3348_v29, %s10087_s9 }
 0x997   : > { %3812 = vrot.lane.b32.xlu0 %v3346_v8, %s10087_s9 }
 0x998   : > { %3814 = vrot.lane.b32.xlu1 %v3350_v33, %s10087_s9 }
 0x99b   : > { %3885 = vrot.lane.b32.xlu0 %v3361_v23, %s10088_s10 }
 0x99c   : > { %3887 = vrot.lane.b32.xlu1 %v3359_v11, %s10088_s10 }
 0x99f   : > { %3889 = vrot.lane.b32.xlu0 %v3363_v25, %s10088_s10 }
 0x9a0   : > { %3960 = vrot.lane.b32.xlu1 %v3376_v9, %s10089_s11 }
 0x9a3   : > { %3962 = vrot.lane.b32.xlu0 %v3374_v15, %s10089_s11 }
 0x9a4   : > { %3964 = vrot.lane.b32.xlu1 %v3378_v27, %s10089_s11 }
 0x9e9   : > { %v3382_v52 = vpop.permute.xlu0 %3381 }
 0x9ea   : > { %v3384_v46 = vpop.permute.xlu1 %3383 }
 0x9eb   : > { %v3387_v22 = vsel %vm12708_vm13, %v3382_v52, %v3384_v46  ;;  %vm12714_vm13 = vmmov %vm12710_vm5  ;;  %v11179_v52 = vld [vmem:[%s12655_s1 + $0x70] sm:$0xff]  }
 0x9ec   : > { %v3390_v28 = vsel %vm404_vm6, %v3387_v22, 0  ;;  %v11188_v22 = vld [vmem:[%s12655_s1 + $0x78] sm:$0xff]  }
 0x9ed   : > { %v3386_v45 = vpop.permute.xlu0 %3385 }
 0x9ee   : > { %v3388_v1 = vsel %vm12709_vm15, %v3384_v46, %v3386_v45  ;;  %v3509_v48 = vpop.permute.xlu1 %3508  ;;  %vm12715_vm15 = vcmask 908288   ;;  %v11196_v45 = vld [vmem:[%s12655_s1 + $0x80] sm:$0xff]  }
 0x9ef   : > { %9349 = vmatprep.subr.msk.bf16.mxu0 %vm404_vm6, %v3388_v1  ;;  %v11204_v1 = vld [vmem:[%s12655_s1 + $0x88] sm:$0xff]  }
 0x9f0   : > { %3396 = vmatpush1.bf16.msra.mxu0 %v3390_v28 }
 0x9f1   : > { %v3511_v55 = vpop.permute.xlu0 %3510  ;;  %9352 = vmatprep.subr.msk.bf16.mxu0 %vm404_vm6, %v3346_v8 }
 0x9f2   : > { %v3513_v18 = vpop.permute.xlu1 %3512  ;;  %v3514_v0 = vsel %vm561_vm8, %v3509_v48, %v3511_v55 }
 0x9f3   : > { %v3515_v31 = vsel %vm561_vm8, %v3511_v55, %v3513_v18  ;;  %9350 = vmatmul.mubr.msk.bf16.vlgmr.msra.gmra.mrb[44].mxu0 %vm12710_vm5, %v10694_v34  ;;  %v3517_v34 = vsel %vm404_vm6, %v3514_v0, 0 }
 0x9f4   : > { %3454 = vmatpush1.bf16.msra.mxu0 %v3448_v54  ;;  %3437 = vmatprep.mubr.bf16.mxu0 %v10081_v21 }
 0x9f5   : > { %9355 = vmatprep.subr.msk.bf16.mxu0 %vm404_vm6, %v3515_v31  ;;  %v3586_v17 = vpop.permute.xlu0 %3585 }
 0x9f6   : > { %v3588_v36 = vpop.permute.xlu1 %3587 }
 0x9f9   : > { %v3590_v42 = vpop.permute.xlu0 %3589 }
 0x9fa   : > { %v3592_v44 = vsel %vm660_vm9, %v3588_v36, %v3590_v42  ;;  %v3661_v38 = vpop.permute.xlu1 %3660 }
 0x9fb   : > { %9351 = vmatmul.mubr.msk.bf16.gmra.mrb[48].mxu0 %vm12711_vm11, %v10704_v39  ;;  %v3591_v39 = vsel %vm660_vm9, %v3586_v17, %v3588_v36  ;;  %vm12716_vm11 = vmmov %vm12715_vm15 }
 0x9fc   : > { %3485 = vmatprep.mubr.bf16.mxu0 %v10081_v21 }
 0x9fd   : > { %v3663_v40 = vpop.permute.xlu0 %3662 }
 0x9fe   : > { %v3665_v60 = vpop.permute.xlu1 %3664 }
 0x9ff   : > { %v3667_v61 = vsel %vm12715_vm15, %v3663_v40, %v3665_v60 }
 0xa01   : > { %v3736_v43 = vpop.permute.xlu0 %3735 }
 0xa02   : > { %v3738_v16 = vpop.permute.xlu1 %3737 }
 0xa03   : > { %9353 = vmatmul.mubr.msk.bf16.vlgmr.msra.gmra.mrb[44].mxu0 %vm12712_vm12, %v10713_v50  ;;  %v3594_v50 = vsel %vm404_vm6, %v3591_v39, 0  ;;  %vm12717_vm12 = vmmov %vm12710_vm5 }
 0xa04   : > { %3523 = vmatpush1.bf16.msra.mxu0 %v3517_v34  ;;  %3495 = vmatprep.mubr.bf16.mxu0 %v10081_v21 }
 0xa05   : > { %9358 = vmatprep.subr.msk.bf16.mxu0 %vm404_vm6, %v3592_v44  ;;  %v3740_v10 = vpop.permute.xlu0 %3739 }
 0xa06   : > { %v3811_v11 = vpop.permute.xlu1 %3810 }
 0xa09   : > { %v3813_v58 = vpop.permute.xlu0 %3812 }
 0xa0a   : > { %v3815_v47 = vpop.permute.xlu1 %3814 }
 0xa0b   : > { %9354 = vmatmul.mubr.msk.bf16.gmra.mrb[48].mxu0 %vm12713_vm10, %v10724_v57  ;;  %v3666_v57 = vsel %vm12716_vm11, %v3661_v38, %v3663_v40  ;;  %vm12718_vm10 = vcmask 900096   ;;  %vm12721_vm11 = vcmask 785408  }
 0xa0c   : > { %3554 = vmatprep.mubr.bf16.mxu0 %v10081_v21  ;;  %v3742_v23 = vsel %vm12718_vm10, %v3738_v16, %v3740_v10  ;;  %vm12720_vm15 = vmmov %vm12718_vm10  ;;  %v3817_v25 = vsel %vm12721_vm11, %v3813_v58, %v3815_v47 }
 0xa0d   : > { %v3886_v9 = vpop.permute.xlu0 %3885  ;;  %vm12723_vm10 = vmmov %vm12721_vm11 }
 0xa0e   : > { %v3888_v24 = vpop.permute.xlu1 %3887 }
 0xa11   : > { %v3890_v15 = vpop.permute.xlu0 %3889 }
 0xa12   : > { %v3961_v4 = vpop.permute.xlu1 %3960 }
 0xa13   : > { %9356 = vmatmul.mubr.msk.bf16.vlgmr.msra.gmra.mrb[44].mxu0 %vm12714_vm13, %v10733_v63  ;;  %v3669_v63 = vsel %vm404_vm6, %v3666_v57, 0  ;;  %vm12719_vm13 = vmmov %vm12710_vm5 }
 0xa14   : > { %3600 = vmatpush1.bf16.msra.mxu0 %v3594_v50  ;;  %3564 = vmatprep.mubr.bf16.mxu0 %v10081_v21 }
 0xa15   : > { %9361 = vmatprep.subr.msk.bf16.mxu0 %vm404_vm6, %v3667_v61  ;;  %v3963_v29 = vpop.permute.xlu0 %3962 }
 0xa16   : > { %v3965_v8 = vpop.permute.xlu1 %3964 }
 0xa17   : > { %v3967_v33 = vsel %vm1145_vm14, %v3963_v29, %v3965_v8 }
 0xa1b   : > { %9357 = vmatmul.mubr.msk.bf16.gmra.mrb[48].mxu0 %vm12710_vm5, %v10744_v3  ;;  %v3741_v3 = vsel %vm12720_vm15, %v3736_v43, %v3738_v16  ;;  %vm12725_vm15 = vcmask 777216  }
 0xa1c   : > { %3631 = vmatprep.mubr.bf16.mxu0 %v10081_v21  ;;  %v3892_v27 = vsel %vm12725_vm15, %v3888_v24, %v3890_v15  ;;  %vm12726_vm11 = vmmov %vm12725_vm15 }
 0xa1d   : > { %vm12730_vm15 = vmmov %vm12710_vm5 }
 0xa23   : > { %9359 = vmatmul.mubr.msk.bf16.vlgmr.msra.gmra.mrb[44].mxu0 %vm12717_vm12, %v10753_v12  ;;  %v3744_v12 = vsel %vm404_vm6, %v3741_v3, 0  ;;  %vm12722_vm12 = vmmov %vm12710_vm5 }
 0xa24   : > { %3675 = vmatpush1.bf16.msra.mxu0 %v3669_v63  ;;  %3641 = vmatprep.mubr.bf16.mxu0 %v10081_v21 }
 0xa25   : > { %9364 = vmatprep.subr.msk.bf16.mxu0 %vm404_vm6, %v3742_v23 }
 0xa2b   : > { %9360 = vmatmul.mubr.msk.bf16.gmra.mrb[48].mxu0 %vm12719_vm13, %v10764_v19  ;;  %v3816_v19 = vsel %vm12723_vm10, %v3811_v11, %v3813_v58  ;;  %vm12724_vm13 = vmmov %vm12710_vm5 }
 0xa2c   : > { %3706 = vmatprep.mubr.bf16.mxu0 %v10081_v21  ;;  %vm12728_vm10 = vmmov %vm12710_vm5 }
 0xa33   : > { %9362 = vmatmul.mubr.msk.bf16.vlgmr.msra.gmra.mrb[44].mxu0 %vm12710_vm5, %v10773_v26  ;;  %v3819_v26 = vsel %vm404_vm6, %v3816_v19, 0 }
 0xa34   : > { %3750 = vmatpush1.bf16.msra.mxu0 %v3744_v12  ;;  %3716 = vmatprep.mubr.bf16.mxu0 %v10081_v21 }
 0xa35   : > { %9367 = vmatprep.subr.msk.bf16.mxu0 %vm404_vm6, %v3817_v25 }
 0xa3b   : > { %9363 = vmatmul.mubr.msk.bf16.gmra.mrb[48].mxu0 %vm12722_vm12, %v10784_v30  ;;  %v3891_v30 = vsel %vm12726_vm11, %v3886_v9, %v3888_v24  ;;  %vm12727_vm12 = vmmov %vm12710_vm5 }
 0xa3c   : > { %3781 = vmatprep.mubr.bf16.mxu0 %v10081_v21  ;;  %vm12731_vm11 = vmmov %vm12710_vm5 }
 0xa43   : > { %9365 = vmatmul.mubr.msk.bf16.vlgmr.msra.gmra.mrb[44].mxu0 %vm12724_vm13, %v10793_v41  ;;  %v3894_v41 = vsel %vm404_vm6, %v3891_v30, 0  ;;  %vm12729_vm13 = vmmov %vm12710_vm5 }
 0xa44   : > { %3825 = vmatpush1.bf16.msra.mxu0 %v3819_v26  ;;  %3791 = vmatprep.mubr.bf16.mxu0 %v10081_v21 }
 0xa45   : > { %9370 = vmatprep.subr.msk.bf16.mxu0 %vm404_vm6, %v3892_v27 }
 0xa4b   : > { %9366 = vmatmul.mubr.msk.bf16.gmra.mrb[48].mxu0 %vm12710_vm5, %v10804_v53  ;;  %v11170_v53 = vld [vmem:[%s12655_s1 + $0x68] sm:$0xff]  }
 0xa4c   : > { %3856 = vmatprep.mubr.bf16.mxu0 %v10081_v21 }
 0xa53   : > { %9368 = vmatmul.mubr.msk.bf16.vlgmr.msra.gmra.mrb[44].mxu0 %vm12727_vm12, %v10813_v62  ;;  %v3966_v62 = vsel %vm1145_vm14, %v3961_v4, %v3963_v29  ;;  %vm12732_vm12 = vcmask 1039360  }
 0xa54   : > { %3900 = vmatpush1.bf16.msra.mxu0 %v3894_v41  ;;  %3866 = vmatprep.mubr.bf16.mxu0 %v10081_v21  ;;  %v3969_v46 = vsel %vm404_vm6, %v3966_v62, 0 }
 0xa55   : > { %9373 = vmatprep.subr.msk.bf16.mxu0 %vm404_vm6, %v3967_v33 }
 0xa5b   : > { %9369 = vmatmul.mubr.msk.bf16.gmra.mrb[48].mxu0 %vm12728_vm10, %v11170_v53  ;;  %vm12733_vm10 = vmmov %vm12732_vm12 }
 0xa5c   : > { %3931 = vmatprep.mubr.bf16.mxu0 %v10081_v21 }
 0xa63   : > { %9371 = vmatmul.mubr.msk.bf16.vlgmr.msra.gmra.mrb[44].mxu0 %vm12729_vm13, %v11179_v52  ;;  %vm12734_vm13 = vmmov %vm12733_vm10 }
 0xa64   : > { %3975 = vmatpush1.bf16.msra.mxu0 %v3969_v46  ;;  %3941 = vmatprep.mubr.bf16.mxu0 %v10081_v21 }
 0xa6b   : > { %9372 = vmatmul.mubr.msk.bf16.gmra.mrb[48].mxu0 %vm12730_vm15, %v11188_v22  ;;  %vm12735_vm15 = vmmov %vm12733_vm10 }
 0xa6c   : > { %4006 = vmatprep.mubr.bf16.mxu0 %v10081_v21 }
 0xa73   : > { %9374 = vmatmul.mubr.msk.bf16.vlgmr.msra.gmra.mrb[44].mxu0 %vm12710_vm5, %v11196_v45  ;;  %vm12736_vm5 = vcmask 261120  }
 0xa74   : > { %4016 = vmatprep.mubr.bf16.mxu0 %v10081_v21 }
 0xa7b   : > { %9375 = vmatmul.mubr.msk.bf16.gmra.mrb[48].mxu0 %vm12731_vm11, %v11204_v1  ;;  %vm12737_vm11 = vmmov %vm12736_vm5 }
 0xa7c   : > { %5579 = vmatprep.mubr.bf16.mxu0 %v10081_v21 }
 0xb46   : > { %v4008_v48 = vpop.f32.mrb[44].mxu0 }
 0xb47   : > { %v4035_v28 = vadd.f32 %v4008_v48, %v10357_v49  ;;  %v4010_v55 = vpop.f32.mrb[45].mxu0 }
 0xb48   : > { %v4036_v18 = vadd.f32 %v4010_v55, %v10357_v49  ;;  %v4012_v31 = vpop.f32.mrb[46].mxu0 }
 0xb49   : > { %v4043_v54 = vmax.f32 %v4035_v28, 0.0  ;;  %v4037_v17 = vadd.f32 %v4012_v31, %v10359_v51  ;;  %v4014_v0 = vpop.f32.mrb[47].mxu0 }
 0xb4a   : > { %v4044_v42 = vmax.f32 %v4036_v18, 0.0  ;;  %v4038_v36 = vadd.f32 %v4014_v0, %v10359_v51 }
 0xb4b   : > { %v4045_v34 = vmax.f32 %v4037_v17, 0.0  ;;  %v4051_v44 = vsel %vm10143_vm1, %v4043_v54, 0.0  ;;  %v4115_v38 = vsel %vm10139_vm0, %v4043_v54, 0.0 }
 0xb4c   : > { %v4046_v39 = vmax.f32 %v4038_v36, 0.0  ;;  %v4052_v40 = vsel %vm10155_vm3, %v4044_v42, 0.0  ;;  %v4116_v23 = vsel %vm10151_vm2, %v4044_v42, 0.0 }
 0xb4d   : > { %v4053_v60 = vsel %vm10143_vm1, %v4045_v34, 0.0  ;;  %v4089_v50 = vpack.c.bf16 %v4045_v34, %v4043_v54  ;;  %v4117_v61 = vsel %vm10139_vm0, %v4045_v34, 0.0 }
 0xb4e   : > { %v4059_v43 = vpack.c.bf16 %v4053_v60, %v4051_v44  ;;  %v4123_v57 = vpack.c.bf16 %v4117_v61, %v4115_v38  ;;  %v4054_v10 = vsel %vm10155_vm3, %v4046_v39, 0.0  ;;  %v4090_v16 = vpack.c.bf16 %v4046_v39, %v4044_v42  ;;  %v4018_v63 = vpop.f32.mrb[48].mxu0 }
 0xb4f   : > { %v4060_v11 = vpack.c.bf16 %v4054_v10, %v4052_v40  ;;  %v4118_v3 = vsel %vm10151_vm2, %v4046_v39, 0.0  ;;  %v4039_v58 = vadd.f32 %v4018_v63, %v10375_v6  ;;  %4097 = vrot.lane.b32.xlu0 %v4089_v50, %s10080_s27  ;;  %v4020_v47 = vpop.f32.mrb[49].mxu0 }
 0xb50   : > { %v4124_v12 = vpack.c.bf16 %v4118_v3, %v4116_v23  ;;  %v4040_v25 = vadd.f32 %v4020_v47, %v10375_v6  ;;  %4099 = vrot.lane.b32.xlu1 %v4090_v16, %s10080_s27  ;;  %v4022_v9 = vpop.f32.mrb[50].mxu0 }
 0xb51   : > { %v4047_v19 = vmax.f32 %v4039_v58, 0.0  ;;  %v4041_v15 = vadd.f32 %v4022_v9, %v10385_v20  ;;  %v4024_v24 = vpop.f32.mrb[51].mxu0 }
 0xb52   : > { %v4048_v26 = vmax.f32 %v4040_v25, 0.0  ;;  %v4042_v27 = vadd.f32 %v4024_v24, %v10385_v20 }
 0xb53   : > { %v4049_v4 = vmax.f32 %v4041_v15, 0.0  ;;  %v4055_v30 = vsel %vm10143_vm1, %v4047_v19, 0.0  ;;  %v4119_v29 = vsel %vm10139_vm0, %v4047_v19, 0.0 }
 0xb54   : > { %v4050_v8 = vmax.f32 %v4042_v27, 0.0  ;;  %v4056_v41 = vsel %vm10155_vm3, %v4048_v26, 0.0  ;;  %v4120_v31 = vsel %vm10151_vm2, %v4048_v26, 0.0 }
 0xb55   : > { %v4057_v33 = vsel %vm10143_vm1, %v4049_v4, 0.0  ;;  %v4091_v62 = vpack.c.bf16 %v4049_v4, %v4047_v19  ;;  %v4121_v46 = vsel %vm10139_vm0, %v4049_v4, 0.0 }
 0xb56   : > { %v4061_v48 = vpack.c.bf16 %v4057_v33, %v4055_v30  ;;  %v4125_v28 = vpack.c.bf16 %v4121_v46, %v4119_v29  ;;  %v4058_v55 = vsel %vm10155_vm3, %v4050_v8, 0.0  ;;  %v4092_v18 = vpack.c.bf16 %v4050_v8, %v4048_v26 }
 0xb57   : > { %v4062_v54 = vpack.c.bf16 %v4058_v55, %v4056_v41  ;;  %v4122_v17 = vsel %vm10151_vm2, %v4050_v8, 0.0  ;;  %4101 = vrot.lane.b32.xlu0 %v4091_v62, %s10080_s27 }
 0xb58   : > { %v4126_v0 = vpack.c.bf16 %v4122_v17, %v4120_v31  ;;  %4103 = vrot.lane.b32.xlu1 %v4092_v18, %s10080_s27 }
 0xb5b   : > { %4131 = vrot.lane.b32.xlu0 %v4123_v57, %s10080_s27 }
 0xb5c   : > { %4133 = vrot.lane.b32.xlu1 %v4124_v12, %s10080_s27 }
 0xb5f   : > { %4135 = vrot.lane.b32.xlu0 %v4125_v28, %s10080_s27 }
 0xb60   : > { %4137 = vrot.lane.b32.xlu1 %v4126_v0, %s10080_s27 }
 0xb63   : > { %4067 = vrot.lane.b32.xlu0 %v4059_v43, %s10080_s27 }
 0xb64   : > { %4069 = vrot.lane.b32.xlu1 %v4060_v11, %s10080_s27 }
 0xb67   : > { %4071 = vrot.lane.b32.xlu0 %v4061_v48, %s10080_s27 }
 0xb68   : > { %4073 = vrot.lane.b32.xlu1 %v4062_v54, %s10080_s27 }
 0xbc1   : > { %v4098_v42 = vpop.permute.xlu0 %4097 }
 0xbc2   : > { %v4100_v36 = vpop.permute.xlu1 %4099  ;;  %v11262_v34 = vsel %vm327_vm4, 0, %v4098_v42 }
 0xbc3   : > { %4153 = vrot.lane.b32.xlu0 %v11262_v34, %s10082_s28  ;;  %v4112_v44 = vsel %vm327_vm4, %v4100_v36, 0  ;;  %v4105_v38 = vsel %vm327_vm4, %v4098_v42, %v4100_v36 }
 0xbc4   : > { %4157 = vrot.lane.b32.xlu1 %v4112_v44, %s10082_s28 }
 0xbc7   : > { %4155 = vrot.lane.b32.xlu0 %v4105_v38, %s10082_s28 }
 0xbc8   : > { %4393 = vrot.lane.b32.xlu1 %v4112_v44, %s10085_s7 }
 0xbc9   : > { %v4102_v39 = vpop.permute.xlu0 %4101 }
 0xbca   : > { %v4104_v40 = vpop.permute.xlu1 %4103  ;;  %v4110_v3 = vsel %vm327_vm4, 0, %v4102_v39 }
 0xbcb   : > { %v4106_v47 = vsel %vm327_vm4, %v4102_v39, %v4104_v40  ;;  %v4114_v25 = vsel %vm327_vm4, %v4104_v40, 0 }
 0xbcd   : > { %v4132_v60 = vpop.permute.xlu0 %4131 }
 0xbce   : > { %v4134_v50 = vpop.permute.xlu1 %4133  ;;  %v4142_v61 = vsel %vm327_vm4, 0, %v4132_v60 }
 0xbcf   : > { %4259 = vrot.lane.b32.xlu0 %v4142_v61, %s10083_s29  ;;  %v4146_v43 = vsel %vm327_vm4, %v4134_v50, 0  ;;  %v4139_v58 = vsel %vm327_vm4, %v4132_v60, %v4134_v50  ;;  %v11352_v50 = vld [vmem:[%s12656_s2 + $0x2] sm:$0x3] }
 0xbd0   : > { %4263 = vrot.lane.b32.xlu1 %v4146_v43, %s10083_s29 }
 0xbd1   : > { %v4136_v57 = vpop.permute.xlu0 %4135 }
 0xbd2   : > { %v4138_v10 = vpop.permute.xlu1 %4137  ;;  %v4144_v9 = vsel %vm327_vm4, 0, %v4136_v57 }
 0xbd3   : > { %v4140_v24 = vsel %vm327_vm4, %v4136_v57, %v4138_v10  ;;  %v4148_v26 = vsel %vm327_vm4, %v4138_v10, 0 }
 0xbd5   : > { %v11275_v16 = vpop.permute.xlu0 %4067 }
 0xbd6   : > { %v4070_v63 = vpop.permute.xlu1 %4069  ;;  %v4080_v23 = vsel %vm327_vm4, 0, %v11275_v16 }
 0xbd7   : > { %4326 = vrot.lane.b32.xlu0 %v4080_v23, %s10084_s30  ;;  %v4086_v11 = vsel %vm327_vm4, %v4070_v63, 0  ;;  %v11291_v12 = vsel %vm327_vm4, %v11275_v16, %v4070_v63 }
 0xbd8   : > { %4330 = vrot.lane.b32.xlu1 %v4086_v11, %s10084_s30 }
 0xbd9   : > { %v11299_v19 = vpop.permute.xlu0 %4071 }
 0xbda   : > { %v4083_v15 = vsel %vm327_vm4, 0, %v11299_v19  ;;  %v4074_v27 = vpop.permute.xlu1 %4073 }
 0xbdb   : > { %4391 = vrot.lane.b32.xlu0 %v4105_v38, %s10085_s7  ;;  %v4076_v4 = vsel %vm327_vm4, %v11299_v19, %v4074_v27  ;;  %v4088_v30 = vsel %vm327_vm4, %v4074_v27, 0 }
 0xbdc   : > { %4159 = vrot.lane.b32.xlu1 %v4110_v3, %s10082_s28 }
 0xbdf   : > { %4261 = vrot.lane.b32.xlu0 %v4139_v58, %s10083_s29 }
 0xbe0   : > { %4161 = vrot.lane.b32.xlu1 %v4106_v47, %s10082_s28 }
 0xbe3   : > { %4328 = vrot.lane.b32.xlu0 %v11291_v12, %s10084_s30 }
 0xbe4   : > { %4395 = vrot.lane.b32.xlu1 %v4110_v3, %s10085_s7 }
 0xbe7   : > { %4163 = vrot.lane.b32.xlu0 %v4114_v25, %s10082_s28 }
 0xbe8   : > { %4265 = vrot.lane.b32.xlu1 %v4144_v9, %s10083_s29 }
 0xbeb   : > { %4389 = vrot.lane.b32.xlu0 %v11262_v34, %s10085_s7 }
 0xbec   : > { %4332 = vrot.lane.b32.xlu1 %v4083_v15, %s10084_s30 }
 0xbef   : > { %4454 = vrot.lane.b32.xlu0 %v4139_v58, %s10086_s8 }
 0xbf0   : > { %4397 = vrot.lane.b32.xlu1 %v4106_v47, %s10085_s7 }
 0xbf3   : > { %4399 = vrot.lane.b32.xlu0 %v4114_v25, %s10085_s7 }
 0xbf4   : > { %4267 = vrot.lane.b32.xlu1 %v4140_v24, %s10083_s29 }
 0xbf7   : > { %4269 = vrot.lane.b32.xlu0 %v4148_v26, %s10083_s29 }
 0xbf8   : > { %4456 = vrot.lane.b32.xlu1 %v4146_v43, %s10086_s8 }
 0xbfb   : > { %4452 = vrot.lane.b32.xlu0 %v4142_v61, %s10086_s8 }
 0xbfc   : > { %4334 = vrot.lane.b32.xlu1 %v4076_v4, %s10084_s30 }
 0xbff   : > { %4336 = vrot.lane.b32.xlu0 %v4088_v30, %s10084_s30 }
 0xc00   : > { %4458 = vrot.lane.b32.xlu1 %v4144_v9, %s10086_s8 }
 0xc03   : > { %4517 = vrot.lane.b32.xlu0 %v11291_v12, %s10087_s9 }
 0xc04   : > { %4519 = vrot.lane.b32.xlu1 %v4086_v11, %s10087_s9 }
 0xc07   : > { %4515 = vrot.lane.b32.xlu0 %v4080_v23, %s10087_s9  ;;  %v11367_v23 = vld [vmem:[%s12656_s2] sm:$0x3] }
 0xc08   : > { %4521 = vrot.lane.b32.xlu1 %v4083_v15, %s10087_s9 }
 0xc0b   : > { %4580 = vrot.lane.b32.xlu0 %v4105_v38, %s10088_s10 }
 0xc0c   : > { %4460 = vrot.lane.b32.xlu1 %v4140_v24, %s10086_s8 }
 0xc0f   : > { %4462 = vrot.lane.b32.xlu0 %v4148_v26, %s10086_s8 }
 0xc10   : > { %4582 = vrot.lane.b32.xlu1 %v4112_v44, %s10088_s10 }
 0xc13   : > { %4578 = vrot.lane.b32.xlu0 %v11262_v34, %s10088_s10 }
 0xc14   : > { %4523 = vrot.lane.b32.xlu1 %v4076_v4, %s10087_s9 }
 0xc17   : > { %4525 = vrot.lane.b32.xlu0 %v4088_v30, %s10087_s9 }
 0xc18   : > { %4586 = vrot.lane.b32.xlu1 %v4106_v47, %s10088_s10 }
 0xc1b   : > { %4588 = vrot.lane.b32.xlu0 %v4114_v25, %s10088_s10 }
 0xc1c   : > { %4584 = vrot.lane.b32.xlu1 %v4110_v3, %s10088_s10 }
 0xc1f   : > { %4643 = vrot.lane.b32.xlu0 %v4139_v58, %s10089_s11 }
 0xc20   : > { %4645 = vrot.lane.b32.xlu1 %v4146_v43, %s10089_s11 }
 0xc23   : > { %4641 = vrot.lane.b32.xlu0 %v4142_v61, %s10089_s11 }
 0xc24   : > { %4649 = vrot.lane.b32.xlu1 %v4140_v24, %s10089_s11 }
 0xc27   : > { %4651 = vrot.lane.b32.xlu0 %v4148_v26, %s10089_s11 }
 0xc28   : > { %4647 = vrot.lane.b32.xlu1 %v4144_v9, %s10089_s11 }
 0xc35   : > { %v4154_v29 = vpop.permute.xlu0 %4153 }
 0xc36   : > { %v4158_v8 = vpop.permute.xlu1 %4157 }
 0xc39   : > { %v4156_v41 = vpop.permute.xlu0 %4155 }
 0xc3a   : > { %v4166_v33 = vsel %vm12732_vm12, %v4156_v41, %v4158_v8  ;;  %v4165_v62 = vsel %vm12733_vm10, %v4154_v29, %v4156_v41  ;;  %v4394_v46 = vpop.permute.xlu1 %4393  ;;  %vm12738_vm12 = vmmov %vm12736_vm5  ;;  %vm12739_vm10 = vcmask 908288  }
 0xc3b   : > { %4173 = vmatprep.subr.bf16.mxu1 %v4166_v33  ;;  %v11392_v33 = vld [vmem:[%s12656_s2 + $0x6] sm:$0x3] }
 0xc3c   : > { %4174 = vmatpush1.bf16.msra.mxu1 %v4165_v62 }
 0xc41   : > { %v4260_v48 = vpop.permute.xlu0 %4259 }
 0xc42   : > { %v4264_v28 = vpop.permute.xlu1 %4263 }
 0xc49   : > { %v4327_v55 = vpop.permute.xlu0 %4326 }
 0xc4a   : > { %v4331_v18 = vpop.permute.xlu1 %4330 }
 0xc4d   : > { %v4392_v31 = vpop.permute.xlu0 %4391 }
 0xc4e   : > { %v4160_v54 = vpop.permute.xlu1 %4159  ;;  %v4402_v30 = vsel %vm12739_vm10, %v4392_v31, %v4394_v46 }
 0xc51   : > { %v4262_v17 = vpop.permute.xlu0 %4261 }
 0xc52   : > { %v4162_v0 = vpop.permute.xlu1 %4161  ;;  %v4272_v57 = vsel %vm561_vm8, %v4262_v17, %v4264_v28 }
 0xc53   : > { %v4167_v39 = vsel %vm12735_vm15, %v4160_v54, %v4162_v0  ;;  %vm12741_vm15 = vmmov %vm12736_vm5 }
 0xc55   : > { %v4329_v42 = vpop.permute.xlu0 %4328 }
 0xc56   : > { %v4396_v36 = vpop.permute.xlu1 %4395  ;;  %v4338_v15 = vsel %vm660_vm9, %v4327_v55, %v4329_v42 }
 0xc59   : > { %v4164_v34 = vpop.permute.xlu0 %4163 }
 0xc5a   : > { %v4266_v44 = vpop.permute.xlu1 %4265  ;;  %v4168_v38 = vsel %vm12734_vm13, %v4162_v0, %v4164_v34  ;;  %vm12740_vm13 = vmmov %vm12739_vm10 }
 0xc5b   : > { %4175 = vmatprep.subr.bf16.mxu1 %v4168_v38 }
 0xc5c   : > { %4176 = vmatpush1.bf16.msra.mxu1 %v4167_v39 }
 0xc5d   : > { %v4390_v40 = vpop.permute.xlu0 %4389  ;;  %4214 = vmatprep.subr.bf16.mxu1 %v11291_v12  ;;  %v4339_v12 = vsel %vm660_vm9, %v4329_v42, %v4331_v18 }
 0xc5e   : > { %v4333_v60 = vpop.permute.xlu1 %4332  ;;  %v4401_v41 = vsel %vm12740_vm13, %v4390_v40, %v4392_v31  ;;  %vm12746_vm13 = vmmov %vm12741_vm15 }
 0xc5f   : > { %9376 = vmatmul.mubr.msk.bf16.vlgmr.msra.gmra.mrb[44].mxu1 %vm12736_vm5, %v11352_v50  ;;  %vm12742_vm5 = vmmov %vm12739_vm10 }
 0xc60   : > { %9378 = vmatpush1.bf16.msk.msra.mxu1 %vm10516_vm7, %v11275_v16  ;;  %4246 = vmatprep.mubr.bf16.mxu1 %v10081_v21  ;;  %v4271_v16 = vsel %vm561_vm8, %v4260_v48, %v4262_v17  ;;  %v11404_v17 = vld [vmem:[%s12656_s2 + $0x8] sm:$0x3] }
 0xc61   : > { %v4455_v61 = vpop.permute.xlu0 %4454  ;;  %4216 = vmatprep.subr.bf16.mxu1 %v4076_v4 }
 0xc62   : > { %v4398_v43 = vpop.permute.xlu1 %4397 }
 0xc64   : > { %9380 = vmatpush1.bf16.msk.msra.mxu1 %vm10516_vm7, %v11299_v19  ;;  %v11379_v19 = vld [vmem:[%s12656_s2 + $0x4] sm:$0x3] }
 0xc65   : > { %v4400_v10 = vpop.permute.xlu0 %4399  ;;  %4279 = vmatprep.subr.bf16.mxu1 %v4272_v57 }
 0xc66   : > { %v4268_v63 = vpop.permute.xlu1 %4267  ;;  %v4404_v62 = vsel %vm12742_vm5, %v4398_v43, %v4400_v10 }
 0xc67   : > { %9381 = vmatmul.mubr.msk.bf16.vlgmr.msra.gmra.mrb[48].mxu1 %vm12737_vm11, %v11367_v23  ;;  %v4273_v47 = vsel %vm561_vm8, %v4266_v44, %v4268_v63  ;;  %vm12743_vm11 = vmmov %vm12742_vm5 }
 0xc68   : > { %4280 = vmatpush1.bf16.msra.mxu1 %v4271_v16  ;;  %4311 = vmatprep.mubr.bf16.mxu1 %v10081_v21  ;;  %v4403_v28 = vsel %vm12743_vm11, %v4396_v36, %v4398_v43  ;;  %vm12749_vm11 = vcmask 785408  }
 0xc69   : > { %v4270_v11 = vpop.permute.xlu0 %4269 }
 0xc6a   : > { %v4457_v3 = vpop.permute.xlu1 %4456  ;;  %v4274_v58 = vsel %vm561_vm8, %v4268_v63, %v4270_v11 }
 0xc6b   : > { %4281 = vmatprep.subr.bf16.mxu1 %v4274_v58  ;;  %v11428_v58 = vld [vmem:[%s12656_s2 + $0xc] sm:$0x3] }
 0xc6c   : > { %4282 = vmatpush1.bf16.msra.mxu1 %v4273_v47 }
 0xc6d   : > { %v4453_v25 = vpop.permute.xlu0 %4452  ;;  %4346 = vmatprep.subr.bf16.mxu1 %v4339_v12 }
 0xc6e   : > { %v4335_v9 = vpop.permute.xlu1 %4334 }
 0xc6f   : > { %9382 = vmatmul.mubr.msk.bf16.vlgmr.msra.gmra.mrb[52].mxu1 %vm12738_vm12, %v11379_v19  ;;  %v4340_v4 = vsel %vm660_vm9, %v4333_v60, %v4335_v9  ;;  %vm12744_vm12 = vcmask 900096   ;;  %v11416_v60 = vld [vmem:[%s12656_s2 + $0xa] sm:$0x3] }
 0xc70   : > { %4347 = vmatpush1.bf16.msra.mxu1 %v4338_v15  ;;  %4378 = vmatprep.mubr.bf16.mxu1 %v10081_v21  ;;  %v4465_v55 = vsel %vm12744_vm12, %v4455_v61, %v4457_v3  ;;  %vm12745_vm10 = vmmov %vm12744_vm12 }
 0xc71   : > { %v4337_v24 = vpop.permute.xlu0 %4336  ;;  %v4464_v54 = vsel %vm12745_vm10, %v4453_v25, %v4455_v61  ;;  %vm12748_vm5 = vmmov %vm12745_vm10 }
 0xc72   : > { %v4459_v26 = vpop.permute.xlu1 %4458  ;;  %v4341_v27 = vsel %vm660_vm9, %v4335_v9, %v4337_v24  ;;  %vm12750_vm12 = vmmov %vm12749_vm11 }
 0xc73   : > { %4348 = vmatprep.subr.bf16.mxu1 %v4341_v27 }
 0xc74   : > { %4349 = vmatpush1.bf16.msra.mxu1 %v4340_v4  ;;  %v11440_v4 = vld [vmem:[%s12656_s2 + $0xe] sm:$0x3] }
 0xc75   : > { %v4518_v29 = vpop.permute.xlu0 %4517  ;;  %4409 = vmatprep.subr.bf16.mxu1 %v4402_v30 }
 0xc76   : > { %v4520_v8 = vpop.permute.xlu1 %4519 }
 0xc77   : > { %9383 = vmatmul.mubr.msk.bf16.vlgmr.msra.gmra.mrb[56].mxu1 %vm12741_vm15, %v11392_v33  ;;  %vm12747_vm15 = vmmov %vm12745_vm10  ;;  %v4528_v44 = vsel %vm12749_vm11, %v4518_v29, %v4520_v8 }
 0xc78   : > { %4410 = vmatpush1.bf16.msra.mxu1 %v4401_v41  ;;  %4441 = vmatprep.mubr.bf16.mxu1 %v10081_v21  ;;  %vm12751_vm10 = vmmov %vm12746_vm13 }
 0xc79   : > { %v4516_v48 = vpop.permute.xlu0 %4515  ;;  %4411 = vmatprep.subr.bf16.mxu1 %v4404_v62  ;;  %v11450_v62 = vld [vmem:[%s12656_s2 + $0x10] sm:$0x3] }
 0xc7a   : > { %v4522_v46 = vpop.permute.xlu1 %4521  ;;  %v4527_v40 = vsel %vm12750_vm12, %v4516_v48, %v4518_v29  ;;  %vm12756_vm12 = vmmov %vm12751_vm10 }
 0xc7c   : > { %4412 = vmatpush1.bf16.msra.mxu1 %v4403_v28 }
 0xc7d   : > { %v4581_v18 = vpop.permute.xlu0 %4580  ;;  %4472 = vmatprep.subr.bf16.mxu1 %v4465_v55 }
 0xc7e   : > { %v4461_v31 = vpop.permute.xlu1 %4460 }
 0xc7f   : > { %9384 = vmatmul.mubr.msk.bf16.vlgmr.msra.gmra.mrb[60].mxu1 %vm12746_vm13, %v11404_v17  ;;  %v4466_v34 = vsel %vm12748_vm5, %v4459_v26, %v4461_v31  ;;  %vm12752_vm13 = vmmov %vm12749_vm11  ;;  %vm12754_vm5 = vcmask 777216  }
 0xc80   : > { %4473 = vmatpush1.bf16.msra.mxu1 %v4464_v54  ;;  %4504 = vmatprep.mubr.bf16.mxu1 %v10081_v21 }
 0xc81   : > { %v4463_v0 = vpop.permute.xlu0 %4462 }
 0xc82   : > { %v4583_v42 = vpop.permute.xlu1 %4582  ;;  %v4467_v36 = vsel %vm12747_vm15, %v4461_v31, %v4463_v0  ;;  %vm12753_vm15 = vmmov %vm12749_vm11 }
 0xc83   : > { %4474 = vmatprep.subr.bf16.mxu1 %v4467_v36  ;;  %v4591_v63 = vsel %vm12754_vm5, %v4581_v18, %v4583_v42  ;;  %vm12755_vm11 = vmmov %vm12754_vm5 }
 0xc84   : > { %4475 = vmatpush1.bf16.msra.mxu1 %v4466_v34 }
 0xc85   : > { %v4579_v38 = vpop.permute.xlu0 %4578  ;;  %4535 = vmatprep.subr.bf16.mxu1 %v4528_v44 }
 0xc86   : > { %v4524_v39 = vpop.permute.xlu1 %4523  ;;  %v4590_v3 = vsel %vm12755_vm11, %v4579_v38, %v4581_v18  ;;  %vm12761_vm11 = vcmask 1039360  }
 0xc87   : > { %9385 = vmatmul.mubr.msk.bf16.vlgmr.msra.gmra.mrb[64].mxu1 %vm12751_vm10, %v11416_v60  ;;  %v4529_v10 = vsel %vm12753_vm15, %v4522_v46, %v4524_v39  ;;  %vm12757_vm10 = vmmov %vm12754_vm5 }
 0xc88   : > { %4536 = vmatpush1.bf16.msra.mxu1 %v4527_v40  ;;  %4567 = vmatprep.mubr.bf16.mxu1 %v10081_v21  ;;  %vm12759_vm15 = vmmov %vm12756_vm12 }
 0xc89   : > { %v4526_v61 = vpop.permute.xlu0 %4525 }
 0xc8a   : > { %v4587_v43 = vpop.permute.xlu1 %4586  ;;  %v4530_v57 = vsel %vm12752_vm13, %v4524_v39, %v4526_v61  ;;  %vm12758_vm13 = vmmov %vm12754_vm5 }
 0xc8b   : > { %4537 = vmatprep.subr.bf16.mxu1 %v4530_v57  ;;  %vm12760_vm5 = vmmov %vm12756_vm12 }
 0xc8c   : > { %4538 = vmatpush1.bf16.msra.mxu1 %v4529_v10 }
 0xc8d   : > { %v4589_v16 = vpop.permute.xlu0 %4588  ;;  %4598 = vmatprep.subr.bf16.mxu1 %v4591_v63 }
 0xc8e   : > { %v4585_v11 = vpop.permute.xlu1 %4584  ;;  %v4593_v47 = vsel %vm12757_vm10, %v4587_v43, %v4589_v16  ;;  %vm12763_vm10 = vcmask 31744  }
 0xc8f   : > { %9386 = vmatmul.mubr.msk.bf16.vlgmr.msra.gmra.mrb[68].mxu1 %vm12756_vm12, %v11428_v58  ;;  %v4592_v9 = vsel %vm12758_vm13, %v4585_v11, %v4587_v43  ;;  %vm12762_vm12 = vmmov %vm12761_vm11 }
 0xc90   : > { %4599 = vmatpush1.bf16.msra.mxu1 %v4590_v3  ;;  %4630 = vmatprep.mubr.bf16.mxu1 %v10081_v21  ;;  %vm12764_vm13 = vmmov %vm12763_vm10 }
 0xc91   : > { %v4644_v12 = vpop.permute.xlu0 %4643  ;;  %4600 = vmatprep.subr.bf16.mxu1 %v4593_v47 }
 0xc92   : > { %v4646_v25 = vpop.permute.xlu1 %4645 }
 0xc93   : > { %v4654_v15 = vsel %vm1145_vm14, %v4644_v12, %v4646_v25 }
 0xc94   : > { %4601 = vmatpush1.bf16.msra.mxu1 %v4592_v9 }
 0xc95   : > { %v4642_v24 = vpop.permute.xlu0 %4641  ;;  %4661 = vmatprep.subr.bf16.mxu1 %v4654_v15 }
 0xc96   : > { %v4653_v26 = vsel %vm1145_vm14, %v4642_v24, %v4644_v12  ;;  %v4650_v27 = vpop.permute.xlu1 %4649 }
 0xc97   : > { %9387 = vmatmul.mubr.msk.bf16.vlgmr.msra.gmra.mrb[72].mxu1 %vm12759_vm15, %v11440_v4  ;;  %vm12765_vm15 = vmmov %vm12763_vm10 }
 0xc98   : > { %4662 = vmatpush1.bf16.msra.mxu1 %v4653_v26  ;;  %4693 = vmatprep.mubr.bf16.mxu1 %v10081_v21 }
 0xc99   : > { %v4652_v30 = vpop.permute.xlu0 %4651 }
 0xc9a   : > { %v4648_v29 = vpop.permute.xlu1 %4647  ;;  %v4656_v8 = vsel %vm1145_vm14, %v4650_v27, %v4652_v30 }
 0xc9b   : > { %v4655_v41 = vsel %vm1145_vm14, %v4648_v29, %v4650_v27  ;;  %4663 = vmatprep.subr.bf16.mxu1 %v4656_v8 }
 0xc9c   : > { %4664 = vmatpush1.bf16.msra.mxu1 %v4655_v41 }
 0xc9f   : > { %9388 = vmatmul.mubr.msk.bf16.vlgmr.msra.gmra.mrb[76].mxu1 %vm12760_vm5, %v11450_v62  ;;  %vm12766_vm5 = vmmov %vm12763_vm10 }
 0xca0   : > { %4801 = vmatprep.mubr.bf16.mxu1 %v10081_v21 }
 0xd32   : > { %v4207_v48 = vpop.f32.mrb[44].mxu1 }
 0xd33   : > { %v4209_v46 = vpop.f32.mrb[45].mxu1 }
 0xd34   : > { %v4211_v28 = vpop.f32.mrb[46].mxu1 }
 0xd35   : > { %v4212_v55 = vpop.f32.mrb[47].mxu1 }
 0xd3a   : > { %v4248_v18 = vpop.f32.mrb[48].mxu1 }
 0xd3b   : > { %v4249_v31 = vadd.f32 %v4248_v18, %v4207_v48  ;;  %v4250_v54 = vpop.f32.mrb[49].mxu1 }
 0xd3c   : > { %v4251_v0 = vadd.f32 %v4250_v54, %v4209_v46  ;;  %v4252_v42 = vpop.f32.mrb[50].mxu1 }
 0xd3d   : > { %v4253_v36 = vpop.f32.mrb[51].mxu1 }
 0xd42   : > { %v4313_v34 = vpop.f32.mrb[52].mxu1 }
 0xd43   : > { %v4320_v44 = vadd.f32 %v4313_v34, %v4249_v31  ;;  %v4315_v38 = vpop.f32.mrb[53].mxu1 }
 0xd44   : > { %v4321_v39 = vadd.f32 %v4315_v38, %v4251_v0  ;;  %v4317_v40 = vpop.f32.mrb[54].mxu1 }
 0xd45   : > { %v4318_v61 = vpop.f32.mrb[55].mxu1 }
 0xd4a   : > { %v4380_v43 = vpop.f32.mrb[56].mxu1 }
 0xd4b   : > { %v4387_v57 = vadd.f32 %v4380_v43, %v4320_v44  ;;  %v4382_v10 = vpop.f32.mrb[57].mxu1 }
 0xd4c   : > { %v4388_v63 = vadd.f32 %v4382_v10, %v4321_v39  ;;  %v4384_v16 = vpop.f32.mrb[58].mxu1 }
 0xd4d   : > { %v4385_v11 = vpop.f32.mrb[59].mxu1 }
 0xd52   : > { %v4443_v3 = vpop.f32.mrb[60].mxu1 }
 0xd53   : > { %v4450_v47 = vadd.f32 %v4443_v3, %v4387_v57  ;;  %v4445_v12 = vpop.f32.mrb[61].mxu1 }
 0xd54   : > { %v4451_v25 = vadd.f32 %v4445_v12, %v4388_v63  ;;  %v4447_v9 = vpop.f32.mrb[62].mxu1 }
 0xd55   : > { %v4448_v15 = vpop.f32.mrb[63].mxu1 }
 0xd5a   : > { %v4506_v24 = vpop.f32.mrb[64].mxu1 }
 0xd5b   : > { %v4513_v26 = vadd.f32 %v4506_v24, %v4450_v47  ;;  %v4508_v27 = vpop.f32.mrb[65].mxu1 }
 0xd5c   : > { %v4514_v30 = vadd.f32 %v4508_v27, %v4451_v25  ;;  %v4510_v29 = vpop.f32.mrb[66].mxu1 }
 0xd5d   : > { %v4511_v8 = vpop.f32.mrb[67].mxu1 }
 0xd62   : > { %v4569_v41 = vpop.f32.mrb[68].mxu1 }
 0xd63   : > { %v4576_v48 = vadd.f32 %v4569_v41, %v4513_v26  ;;  %v4571_v46 = vpop.f32.mrb[69].mxu1 }
 0xd64   : > { %v4577_v28 = vadd.f32 %v4571_v46, %v4514_v30  ;;  %v4573_v55 = vpop.f32.mrb[70].mxu1 }
 0xd65   : > { %v4574_v18 = vpop.f32.mrb[71].mxu1 }
 0xd6a   : > { %v4632_v31 = vpop.f32.mrb[72].mxu1 }
 0xd6b   : > { %v4639_v54 = vadd.f32 %v4632_v31, %v4576_v48  ;;  %v4634_v0 = vpop.f32.mrb[73].mxu1 }
 0xd6c   : > { %v4640_v42 = vadd.f32 %v4634_v0, %v4577_v28  ;;  %v4636_v36 = vpop.f32.mrb[74].mxu1 }
 0xd6d   : > { %v4637_v34 = vpop.f32.mrb[75].mxu1 }
 0xd72   : > { %v4695_v44 = vpop.f32.mrb[76].mxu1 }
 0xd73   : > { %v4702_v38 = vadd.f32 %v4695_v44, %v4639_v54  ;;  %v4697_v39 = vpop.f32.mrb[77].mxu1 }
 0xd74   : > { %v4703_v40 = vadd.f32 %v4697_v39, %v4640_v42  ;;  %v4699_v61 = vpop.f32.mrb[78].mxu1 }
 0xd75   : > { %v11456_v43 = vadd.f32 %v4702_v38, %v10622_v32  ;;  %v4700_v57 = vpop.f32.mrb[79].mxu1 }
 0xd76   : > { %v11459_v10 = vadd.f32 %v4703_v40, %v10622_v32 }
 0xd77   : > { %v4706_v63 = vmul.f32 0.05, %v11456_v43 }
 0xd78   : > { %v4707_v16 = vmul.f32 0.05, %v11459_v10 }
 0xd79   : > { %v4708_v11 = vadd.f32 %v4706_v63, %v10625_v35 }
 0xd7a   : > { %v4709_v3 = vadd.f32 %v4707_v16, %v10628_v37 }
 0xd7b   : > { %v4725_v47 = vpack.c.bf16 %v4708_v11, %v4708_v11  ;;  %v4738_v25 = vsel %vm10139_vm0, %v4708_v11, 0.0  ;;  %v4710_v26 = vsel %vm10143_vm1, %v4708_v11, 0.0 }
 0xd7c   : > { %v4726_v12 = vpack.c.bf16 %v4709_v3, %v4709_v3  ;;  %v4739_v9 = vsel %vm10151_vm2, %v4709_v3, 0.0  ;;  %v4740_v15 = vpack.c.bf16 %v4738_v25, %v4738_v25  ;;  %v4711_v27 = vsel %vm10155_vm3, %v4709_v3, 0.0  ;;  %v11521_v25 = vld [vmem:[%s12655_s1 + $0x10] sm:$0xff]  }
 0xd7d   : > { %4729 = vrot.lane.b32.xlu0 %v4725_v47, %s10080_s27  ;;  %v4741_v24 = vpack.c.bf16 %v4739_v9, %v4739_v9  ;;  %v4712_v30 = vpack.c.bf16 %v4710_v26, %v4710_v26  ;;  %v4713_v29 = vpack.c.bf16 %v4711_v27, %v4711_v27 }
 0xd7e   : > { %4731 = vrot.lane.b32.xlu1 %v4726_v12, %s10080_s27 }
 0xd81   : > { %4744 = vrot.lane.b32.xlu0 %v4740_v15, %s10080_s27 }
 0xd82   : > { %4746 = vrot.lane.b32.xlu1 %v4741_v24, %s10080_s27  ;;  %v11531_v24 = vld [vmem:[%s12655_s1 + $0x18] sm:$0xff]  }
 0xd85   : > { %4716 = vrot.lane.b32.xlu0 %v4712_v30, %s10080_s27 }
 0xd86   : > { %4718 = vrot.lane.b32.xlu1 %v4713_v29, %s10080_s27  ;;  %v11540_v29 = vld [vmem:[%s12655_s1] sm:$0xff]  }
 0xdef   : > { %v4730_v8 = vpop.permute.xlu0 %4729 }
 0xdf0   : > { %v4732_v41 = vpop.permute.xlu1 %4731  ;;  %v4735_v48 = vsel %vm327_vm4, 0, %v4730_v8 }
 0xdf1   : > { %4755 = vrot.lane.b32.xlu0 %v4735_v48, %s10082_s28  ;;  %v4733_v46 = vsel %vm327_vm4, %v4730_v8, %v4732_v41  ;;  %v4737_v18 = vsel %vm327_vm4, %v4732_v41, 0 }
 0xdf2   : > { %4757 = vrot.lane.b32.xlu1 %v4733_v46, %s10082_s28 }
 0xdf3   : > { %v4745_v28 = vpop.permute.xlu0 %4744 }
 0xdf4   : > { %v4747_v55 = vpop.permute.xlu1 %4746  ;;  %v4750_v31 = vsel %vm327_vm4, 0, %v4745_v28 }
 0xdf5   : > { %4759 = vrot.lane.b32.xlu0 %v4737_v18, %s10082_s28  ;;  %v4748_v54 = vsel %vm327_vm4, %v4745_v28, %v4747_v55  ;;  %v4752_v42 = vsel %vm327_vm4, %v4747_v55, 0 }
 0xdf6   : > { %4882 = vrot.lane.b32.xlu1 %v4750_v31, %s10083_s29 }
 0xdf7   : > { %v4717_v0 = vpop.permute.xlu0 %4716 }
 0xdf8   : > { %v4719_v36 = vpop.permute.xlu1 %4718  ;;  %v4722_v34 = vsel %vm327_vm4, 0, %v4717_v0 }
 0xdf9   : > { %4884 = vrot.lane.b32.xlu0 %v4748_v54, %s10083_s29  ;;  %v4720_v44 = vsel %vm327_vm4, %v4717_v0, %v4719_v36  ;;  %v4724_v38 = vsel %vm327_vm4, %v4719_v36, 0  ;;  %v4822_v9 = vsel %vm404_vm6, %v4722_v34, 0  ;;  %v11571_v36 = vld [vmem:[%s12655_s1 + $0x28] sm:$0xff]  }
 0xdfa   : > { %4886 = vrot.lane.b32.xlu1 %v4752_v42, %s10083_s29 }
 0xdfd   : > { %4959 = vrot.lane.b32.xlu0 %v4722_v34, %s10084_s30 }
 0xdfe   : > { %4961 = vrot.lane.b32.xlu1 %v4720_v44, %s10084_s30 }
 0xe01   : > { %4963 = vrot.lane.b32.xlu0 %v4724_v38, %s10084_s30 }
 0xe02   : > { %5034 = vrot.lane.b32.xlu1 %v4735_v48, %s10085_s7 }
 0xe05   : > { %5036 = vrot.lane.b32.xlu0 %v4733_v46, %s10085_s7 }
 0xe06   : > { %5038 = vrot.lane.b32.xlu1 %v4737_v18, %s10085_s7 }
 0xe09   : > { %5109 = vrot.lane.b32.xlu0 %v4750_v31, %s10086_s8 }
 0xe0a   : > { %5111 = vrot.lane.b32.xlu1 %v4748_v54, %s10086_s8 }
 0xe0d   : > { %5113 = vrot.lane.b32.xlu0 %v4752_v42, %s10086_s8 }
 0xe0e   : > { %5184 = vrot.lane.b32.xlu1 %v4722_v34, %s10087_s9 }
 0xe11   : > { %5186 = vrot.lane.b32.xlu0 %v4720_v44, %s10087_s9 }
 0xe12   : > { %5188 = vrot.lane.b32.xlu1 %v4724_v38, %s10087_s9 }
 0xe15   : > { %5259 = vrot.lane.b32.xlu0 %v4735_v48, %s10088_s10 }
 0xe16   : > { %5261 = vrot.lane.b32.xlu1 %v4733_v46, %s10088_s10  ;;  %v11551_v46 = vld [vmem:[%s12655_s1 + $0x8] sm:$0xff]  }
 0xe19   : > { %5263 = vrot.lane.b32.xlu0 %v4737_v18, %s10088_s10 }
 0xe1a   : > { %5334 = vrot.lane.b32.xlu1 %v4750_v31, %s10089_s11  ;;  %v11560_v31 = vld [vmem:[%s12655_s1 + $0x20] sm:$0xff]  }
 0xe1d   : > { %5336 = vrot.lane.b32.xlu0 %v4748_v54, %s10089_s11 }
 0xe1e   : > { %5338 = vrot.lane.b32.xlu1 %v4752_v42, %s10089_s11 }
 0xe63   : > { %v4756_v39 = vpop.permute.xlu0 %4755 }
 0xe64   : > { %v4758_v40 = vpop.permute.xlu1 %4757 }
 0xe65   : > { %v4761_v61 = vsel %vm12761_vm11, %v4756_v39, %v4758_v40  ;;  %vm12767_vm11 = vmmov %vm12766_vm5  ;;  %v11580_v39 = vld [vmem:[%s12655_s1 + $0x30] sm:$0xff]  }
 0xe66   : > { %v4764_v11 = vsel %vm404_vm6, %v4761_v61, 0 }
 0xe67   : > { %v4760_v57 = vpop.permute.xlu0 %4759 }
 0xe68   : > { %v4762_v63 = vsel %vm12762_vm12, %v4758_v40, %v4760_v57  ;;  %v4883_v16 = vpop.permute.xlu1 %4882  ;;  %vm12768_vm12 = vcmask 908288  }
 0xe69   : > { %9389 = vmatprep.subr.msk.bf16.mxu1 %vm404_vm6, %v4762_v63  ;;  %v11591_v63 = vld [vmem:[%s12655_s1 + $0x38] sm:$0xff]  }
 0xe6a   : > { %4770 = vmatpush1.bf16.msra.mxu1 %v4764_v11 }
 0xe6b   : > { %v4885_v3 = vpop.permute.xlu0 %4884  ;;  %9392 = vmatprep.subr.msk.bf16.mxu1 %vm404_vm6, %v4720_v44 }
 0xe6c   : > { %v4887_v47 = vpop.permute.xlu1 %4886  ;;  %v4888_v26 = vsel %vm561_vm8, %v4883_v16, %v4885_v3 }
 0xe6d   : > { %v4889_v12 = vsel %vm561_vm8, %v4885_v3, %v4887_v47  ;;  %9390 = vmatmul.mubr.msk.bf16.vlgmr.msra.gmra.mrb[80].mxu1 %vm12763_vm10, %v11521_v25  ;;  %v4891_v8 = vsel %vm404_vm6, %v4888_v26, 0  ;;  %vm12769_vm10 = vmmov %vm12766_vm5  ;;  %v11600_v47 = vld [vmem:[%s12655_s1 + $0x40] sm:$0xff]   ;;  %v11611_v26 = vld [vmem:[%s12655_s1 + $0x48] sm:$0xff]  }
 0xe6e   : > { %4828 = vmatpush1.bf16.msra.mxu1 %v4822_v9  ;;  %4811 = vmatprep.mubr.bf16.mxu1 %v10081_v21 }
 0xe6f   : > { %9395 = vmatprep.subr.msk.bf16.mxu1 %vm404_vm6, %v4889_v12  ;;  %v4960_v15 = vpop.permute.xlu0 %4959 }
 0xe70   : > { %v4962_v30 = vpop.permute.xlu1 %4961 }
 0xe71   : > { %v4965_v28 = vsel %vm660_vm9, %v4960_v15, %v4962_v30 }
 0xe72   : > { %v4968_v54 = vsel %vm404_vm6, %v4965_v28, 0 }
 0xe73   : > { %v4964_v27 = vpop.permute.xlu0 %4963 }
 0xe74   : > { %v4966_v41 = vsel %vm660_vm9, %v4962_v30, %v4964_v27  ;;  %v5035_v48 = vpop.permute.xlu1 %5034 }
 0xe75   : > { %9391 = vmatmul.mubr.msk.bf16.gmra.mrb[84].mxu1 %vm12764_vm13, %v11531_v24  ;;  %vm12770_vm13 = vmmov %vm12768_vm12 }
 0xe76   : > { %4859 = vmatprep.mubr.bf16.mxu1 %v10081_v21 }
 0xe77   : > { %v5037_v55 = vpop.permute.xlu0 %5036 }
 0xe78   : > { %v5039_v18 = vpop.permute.xlu1 %5038  ;;  %v5040_v34 = vsel %vm12770_vm13, %v5035_v48, %v5037_v55  ;;  %vm12775_vm13 = vcmask 785408  }
 0xe79   : > { %v5041_v0 = vsel %vm12768_vm12, %v5037_v55, %v5039_v18  ;;  %v5043_v40 = vsel %vm404_vm6, %v5040_v34, 0  ;;  %v11631_v18 = vld [vmem:[%s12655_s1 + $0x58] sm:$0xff]   ;;  %v11640_v34 = vld [vmem:[%s12655_s1 + $0x60] sm:$0xff]  }
 0xe7b   : > { %v5110_v42 = vpop.permute.xlu0 %5109 }
 0xe7c   : > { %v5112_v38 = vpop.permute.xlu1 %5111 }
 0xe7d   : > { %9393 = vmatmul.mubr.msk.bf16.vlgmr.msra.gmra.mrb[80].mxu1 %vm12765_vm15, %v11540_v29  ;;  %vm12771_vm15 = vmmov %vm12766_vm5 }
 0xe7e   : > { %4897 = vmatpush1.bf16.msra.mxu1 %v4891_v8  ;;  %4869 = vmatprep.mubr.bf16.mxu1 %v10081_v21 }
 0xe7f   : > { %9398 = vmatprep.subr.msk.bf16.mxu1 %vm404_vm6, %v4966_v41  ;;  %v5114_v44 = vpop.permute.xlu0 %5113  ;;  %v11620_v41 = vld [vmem:[%s12655_s1 + $0x50] sm:$0xff]  }
 0xe80   : > { %v5185_v57 = vpop.permute.xlu1 %5184 }
 0xe83   : > { %v5187_v11 = vpop.permute.xlu0 %5186 }
 0xe84   : > { %v5189_v3 = vpop.permute.xlu1 %5188 }
 0xe85   : > { %9394 = vmatmul.mubr.msk.bf16.gmra.mrb[84].mxu1 %vm12766_vm5, %v11551_v46  ;;  %vm12772_vm5 = vcmask 900096   ;;  %v5191_v9 = vsel %vm12775_vm13, %v5187_v11, %v5189_v3 }
 0xe86   : > { %4928 = vmatprep.mubr.bf16.mxu1 %v10081_v21  ;;  %v5116_v61 = vsel %vm12772_vm5, %v5112_v38, %v5114_v44  ;;  %vm12774_vm12 = vmmov %vm12772_vm5 }
 0xe87   : > { %v5115_v16 = vsel %vm12774_vm12, %v5110_v42, %v5112_v38  ;;  %v5260_v15 = vpop.permute.xlu0 %5259  ;;  %vm12777_vm5 = vmmov %vm12775_vm13  ;;  %vm12779_vm12 = vcmask 777216  }
 0xe88   : > { %v5118_v12 = vsel %vm404_vm6, %v5115_v16, 0  ;;  %v5190_v27 = vsel %vm12777_vm5, %v5185_v57, %v5187_v11  ;;  %v5262_v8 = vpop.permute.xlu1 %5261  ;;  %vm12780_vm13 = vmmov %vm12779_vm12 }
 0xe89   : > { %v5193_v48 = vsel %vm404_vm6, %v5190_v27, 0  ;;  %vm12782_vm5 = vmmov %vm12769_vm10 }
 0xe8b   : > { %v5264_v30 = vpop.permute.xlu0 %5263 }
 0xe8c   : > { %v5266_v28 = vsel %vm12779_vm12, %v5262_v8, %v5264_v30  ;;  %v5335_v55 = vpop.permute.xlu1 %5334  ;;  %vm12784_vm12 = vmmov %vm12782_vm5 }
 0xe8d   : > { %9396 = vmatmul.mubr.msk.bf16.vlgmr.msra.gmra.mrb[80].mxu1 %vm12767_vm11, %v11560_v31  ;;  %vm12773_vm11 = vmmov %vm12769_vm10 }
 0xe8e   : > { %4974 = vmatpush1.bf16.msra.mxu1 %v4968_v54  ;;  %4938 = vmatprep.mubr.bf16.mxu1 %v10081_v21  ;;  %v5265_v54 = vsel %vm12780_vm13, %v5260_v15, %v5262_v8  ;;  %vm12786_vm13 = vmmov %vm12782_vm5 }
 0xe8f   : > { %9401 = vmatprep.subr.msk.bf16.mxu1 %vm404_vm6, %v5041_v0  ;;  %v5337_v0 = vpop.permute.xlu0 %5336  ;;  %v5268_v44 = vsel %vm404_vm6, %v5265_v54, 0 }
 0xe90   : > { %v5339_v42 = vpop.permute.xlu1 %5338 }
 0xe91   : > { %v5341_v38 = vsel %vm1145_vm14, %v5337_v0, %v5339_v42 }
 0xe95   : > { %9397 = vmatmul.mubr.msk.bf16.gmra.mrb[84].mxu1 %vm12769_vm10, %v11571_v36 }
 0xe96   : > { %5005 = vmatprep.mubr.bf16.mxu1 %v10081_v21 }
 0xe9d   : > { %9399 = vmatmul.mubr.msk.bf16.vlgmr.msra.gmra.mrb[80].mxu1 %vm12771_vm15, %v11580_v39  ;;  %vm12776_vm15 = vmmov %vm12769_vm10 }
 0xe9e   : > { %5049 = vmatpush1.bf16.msra.mxu1 %v5043_v40  ;;  %5015 = vmatprep.mubr.bf16.mxu1 %v10081_v21  ;;  %v5340_v40 = vsel %vm1145_vm14, %v5335_v55, %v5337_v0 }
 0xe9f   : > { %9404 = vmatprep.subr.msk.bf16.mxu1 %vm404_vm6, %v5116_v61  ;;  %v5343_v61 = vsel %vm404_vm6, %v5340_v40, 0 }
 0xea5   : > { %9400 = vmatmul.mubr.msk.bf16.gmra.mrb[84].mxu1 %vm12773_vm11, %v11591_v63  ;;  %vm12778_vm11 = vmmov %vm12769_vm10 }
 0xea6   : > { %5080 = vmatprep.mubr.bf16.mxu1 %v10081_v21 }
 0xead   : > { %9402 = vmatmul.mubr.msk.bf16.vlgmr.msra.gmra.mrb[80].mxu1 %vm12769_vm10, %v11600_v47 }
 0xeae   : > { %5124 = vmatpush1.bf16.msra.mxu1 %v5118_v12  ;;  %5090 = vmatprep.mubr.bf16.mxu1 %v10081_v21 }
 0xeaf   : > { %9407 = vmatprep.subr.msk.bf16.mxu1 %vm404_vm6, %v5191_v9 }
 0xeb5   : > { %9403 = vmatmul.mubr.msk.bf16.gmra.mrb[84].mxu1 %vm12776_vm15, %v11611_v26  ;;  %vm12781_vm15 = vmmov %vm12769_vm10 }
 0xeb6   : > { %5155 = vmatprep.mubr.bf16.mxu1 %v10081_v21 }
 0xebd   : > { %9405 = vmatmul.mubr.msk.bf16.vlgmr.msra.gmra.mrb[80].mxu1 %vm12778_vm11, %v11620_v41  ;;  %vm12783_vm11 = vmmov %vm12782_vm5 }
 0xebe   : > { %5199 = vmatpush1.bf16.msra.mxu1 %v5193_v48  ;;  %5165 = vmatprep.mubr.bf16.mxu1 %v10081_v21 }
 0xebf   : > { %9410 = vmatprep.subr.msk.bf16.mxu1 %vm404_vm6, %v5266_v28 }
 0xec5   : > { %9406 = vmatmul.mubr.msk.bf16.gmra.mrb[84].mxu1 %vm12769_vm10, %v11631_v18  ;;  %vm12785_vm10 = vmmov %vm12782_vm5 }
 0xec6   : > { %5230 = vmatprep.mubr.bf16.mxu1 %v10081_v21 }
 0xecd   : > { %9408 = vmatmul.mubr.msk.bf16.vlgmr.msra.gmra.mrb[80].mxu1 %vm12781_vm15, %v11640_v34  ;;  %vm12787_vm15 = vcmask 1039360  }
 0xece   : > { %5274 = vmatpush1.bf16.msra.mxu1 %v5268_v44  ;;  %5240 = vmatprep.mubr.bf16.mxu1 %v10081_v21 }
 0xecf   : > { %9413 = vmatprep.subr.msk.bf16.mxu1 %vm404_vm6, %v5341_v38 }
 0xed5   : > { %9409 = vmatmul.mubr.msk.bf16.gmra.mrb[84].mxu1 %vm12782_vm5, %v11170_v53  ;;  %vm12788_vm5 = vmmov %vm12787_vm15 }
 0xed6   : > { %5305 = vmatprep.mubr.bf16.mxu1 %v10081_v21 }
 0xedd   : > { %9411 = vmatmul.mubr.msk.bf16.vlgmr.msra.gmra.mrb[80].mxu1 %vm12783_vm11, %v11179_v52  ;;  %vm12789_vm11 = vmmov %vm12788_vm5 }
 0xede   : > { %5349 = vmatpush1.bf16.msra.mxu1 %v5343_v61  ;;  %5315 = vmatprep.mubr.bf16.mxu1 %v10081_v21 }
 0xee5   : > { %9412 = vmatmul.mubr.msk.bf16.gmra.mrb[84].mxu1 %vm12784_vm12, %v11188_v22  ;;  %vm12790_vm12 = vmmov %vm12788_vm5 }
 0xee6   : > { %5380 = vmatprep.mubr.bf16.mxu1 %v10081_v21 }
 0xeed   : > { %9414 = vmatmul.mubr.msk.bf16.vlgmr.msra.gmra.mrb[80].mxu1 %vm12785_vm10, %v11196_v45  ;;  %vm12791_vm10 = vcmask 261120  }
 0xeee   : > { %5390 = vmatprep.mubr.bf16.mxu1 %v10081_v21 }
 0xef5   : > { %9415 = vmatmul.mubr.msk.bf16.gmra.mrb[84].mxu1 %vm12786_vm13, %v11204_v1  ;;  %vm12792_vm13 = vmmov %vm12791_vm10 }
 0xef6   : > { %6953 = vmatprep.mubr.bf16.mxu1 %v10081_v21 }
 0xfc0   : > { %v5382_v53 = vpop.f32.mrb[80].mxu1 }
 0xfc1   : > { %v5409_v52 = vadd.f32 %v5382_v53, %v10357_v49  ;;  %v5384_v57 = vpop.f32.mrb[81].mxu1 }
 0xfc2   : > { %v5410_v16 = vadd.f32 %v5384_v57, %v10357_v49  ;;  %v5386_v11 = vpop.f32.mrb[82].mxu1 }
 0xfc3   : > { %v5417_v22 = vmax.f32 %v5409_v52, 0.0  ;;  %v5411_v3 = vadd.f32 %v5386_v11, %v10359_v51  ;;  %v5388_v12 = vpop.f32.mrb[83].mxu1 }
 0xfc4   : > { %v5418_v9 = vmax.f32 %v5410_v16, 0.0  ;;  %v5412_v45 = vadd.f32 %v5388_v12, %v10359_v51 }
 0xfc5   : > { %v5419_v15 = vmax.f32 %v5411_v3, 0.0  ;;  %v5425_v1 = vsel %vm10143_vm1, %v5417_v22, 0.0  ;;  %v5489_v27 = vsel %vm10139_vm0, %v5417_v22, 0.0 }
 0xfc6   : > { %v5420_v30 = vmax.f32 %v5412_v45, 0.0  ;;  %v5426_v8 = vsel %vm10155_vm3, %v5418_v9, 0.0  ;;  %v5490_v40 = vsel %vm10151_vm2, %v5418_v9, 0.0 }
 0xfc7   : > { %v5427_v48 = vsel %vm10143_vm1, %v5419_v15, 0.0  ;;  %v5463_v28 = vpack.c.bf16 %v5419_v15, %v5417_v22  ;;  %v5491_v55 = vsel %vm10139_vm0, %v5419_v15, 0.0 }
 0xfc8   : > { %v5433_v54 = vpack.c.bf16 %v5427_v48, %v5425_v1  ;;  %v5497_v0 = vpack.c.bf16 %v5491_v55, %v5489_v27  ;;  %v5428_v42 = vsel %vm10155_vm3, %v5420_v30, 0.0  ;;  %v5464_v44 = vpack.c.bf16 %v5420_v30, %v5418_v9  ;;  %v5392_v38 = vpop.f32.mrb[84].mxu1 }
 0xfc9   : > { %v5434_v61 = vpack.c.bf16 %v5428_v42, %v5426_v8  ;;  %v5492_v53 = vsel %vm10151_vm2, %v5420_v30, 0.0  ;;  %v5413_v52 = vadd.f32 %v5392_v38, %v10375_v6  ;;  %5471 = vrot.lane.b32.xlu0 %v5463_v28, %s10080_s27  ;;  %v5394_v57 = vpop.f32.mrb[85].mxu1 }
 0xfca   : > { %v5498_v16 = vpack.c.bf16 %v5492_v53, %v5490_v40  ;;  %v5414_v11 = vadd.f32 %v5394_v57, %v10375_v6  ;;  %5473 = vrot.lane.b32.xlu1 %v5464_v44, %s10080_s27  ;;  %v5396_v22 = vpop.f32.mrb[86].mxu1 }
 0xfcb   : > { %v5421_v3 = vmax.f32 %v5413_v52, 0.0  ;;  %v5415_v12 = vadd.f32 %v5396_v22, %v10385_v20  ;;  %v5398_v45 = vpop.f32.mrb[87].mxu1 }
 0xfcc   : > { %v5422_v9 = vmax.f32 %v5414_v11, 0.0  ;;  %v5416_v15 = vadd.f32 %v5398_v45, %v10385_v20 }
 0xfcd   : > { %v5423_v1 = vmax.f32 %v5415_v12, 0.0  ;;  %v5429_v27 = vsel %vm10143_vm1, %v5421_v3, 0.0  ;;  %v5493_v30 = vsel %vm10139_vm0, %v5421_v3, 0.0 }
 0xfce   : > { %v5424_v8 = vmax.f32 %v5416_v15, 0.0  ;;  %v5430_v48 = vsel %vm10155_vm3, %v5422_v9, 0.0  ;;  %v5494_v52 = vsel %vm10151_vm2, %v5422_v9, 0.0 }
 0xfcf   : > { %v5431_v28 = vsel %vm10143_vm1, %v5423_v1, 0.0  ;;  %v5465_v55 = vpack.c.bf16 %v5423_v1, %v5421_v3  ;;  %v5495_v42 = vsel %vm10139_vm0, %v5423_v1, 0.0 }
 0xfd0   : > { %v5435_v44 = vpack.c.bf16 %v5431_v28, %v5429_v27  ;;  %v5499_v38 = vpack.c.bf16 %v5495_v42, %v5493_v30  ;;  %v5432_v40 = vsel %vm10155_vm3, %v5424_v8, 0.0  ;;  %v5466_v53 = vpack.c.bf16 %v5424_v8, %v5422_v9 }
 0xfd1   : > { %v5436_v57 = vpack.c.bf16 %v5432_v40, %v5430_v48  ;;  %v5496_v11 = vsel %vm10151_vm2, %v5424_v8, 0.0  ;;  %5475 = vrot.lane.b32.xlu0 %v5465_v55, %s10080_s27 }
 0xfd2   : > { %v5500_v22 = vpack.c.bf16 %v5496_v11, %v5494_v52  ;;  %5477 = vrot.lane.b32.xlu1 %v5466_v53, %s10080_s27 }
 0xfd5   : > { %5505 = vrot.lane.b32.xlu0 %v5497_v0, %s10080_s27 }
 0xfd6   : > { %5507 = vrot.lane.b32.xlu1 %v5498_v16, %s10080_s27 }
 0xfd9   : > { %5509 = vrot.lane.b32.xlu0 %v5499_v38, %s10080_s27 }
 0xfda   : > { %5511 = vrot.lane.b32.xlu1 %v5500_v22, %s10080_s27 }
 0xfdd   : > { %5441 = vrot.lane.b32.xlu0 %v5433_v54, %s10080_s27 }
 0xfde   : > { %5443 = vrot.lane.b32.xlu1 %v5434_v61, %s10080_s27 }
 0xfe1   : > { %5445 = vrot.lane.b32.xlu0 %v5435_v44, %s10080_s27 }
 0xfe2   : > { %5447 = vrot.lane.b32.xlu1 %v5436_v57, %s10080_s27 }
0x103b   : > { %v5472_v3 = vpop.permute.xlu0 %5471 }
0x103c   : > { %v5474_v12 = vpop.permute.xlu1 %5473  ;;  %v11718_v45 = vsel %vm327_vm4, 0, %v5472_v3 }
0x103d   : > { %5527 = vrot.lane.b32.xlu0 %v11718_v45, %s10082_s28  ;;  %v5486_v0 = vsel %vm327_vm4, %v5474_v12, 0  ;;  %v5479_v54 = vsel %vm327_vm4, %v5472_v3, %v5474_v12 }
0x103e   : > { %5531 = vrot.lane.b32.xlu1 %v5486_v0, %s10082_s28 }
0x1041   : > { %5529 = vrot.lane.b32.xlu0 %v5479_v54, %s10082_s28 }
0x1042   : > { %5767 = vrot.lane.b32.xlu1 %v5486_v0, %s10085_s7 }
0x1043   : > { %v5476_v61 = vpop.permute.xlu0 %5475 }
0x1044   : > { %v5478_v16 = vpop.permute.xlu1 %5477  ;;  %v5484_v44 = vsel %vm327_vm4, 0, %v5476_v61 }
0x1045   : > { %v5480_v40 = vsel %vm327_vm4, %v5476_v61, %v5478_v16  ;;  %v5488_v52 = vsel %vm327_vm4, %v5478_v16, 0 }
0x1047   : > { %v5506_v9 = vpop.permute.xlu0 %5505 }
0x1048   : > { %v5508_v15 = vpop.permute.xlu1 %5507  ;;  %v5516_v1 = vsel %vm327_vm4, 0, %v5506_v9 }
0x1049   : > { %5633 = vrot.lane.b32.xlu0 %v5516_v1, %s10083_s29  ;;  %v5520_v27 = vsel %vm327_vm4, %v5508_v15, 0  ;;  %v5513_v38 = vsel %vm327_vm4, %v5506_v9, %v5508_v15 }
0x104a   : > { %5637 = vrot.lane.b32.xlu1 %v5520_v27, %s10083_s29 }
0x104b   : > { %v5510_v30 = vpop.permute.xlu0 %5509 }
0x104c   : > { %v5512_v8 = vpop.permute.xlu1 %5511  ;;  %v5518_v57 = vsel %vm327_vm4, 0, %v5510_v30 }
0x104d   : > { %v5514_v3 = vsel %vm327_vm4, %v5510_v30, %v5512_v8  ;;  %v5522_v12 = vsel %vm327_vm4, %v5512_v8, 0 }
0x104f   : > { %v11731_v48 = vpop.permute.xlu0 %5441 }
0x1050   : > { %v5444_v28 = vpop.permute.xlu1 %5443  ;;  %v5454_v55 = vsel %vm327_vm4, 0, %v11731_v48 }
0x1051   : > { %5700 = vrot.lane.b32.xlu0 %v5454_v55, %s10084_s30  ;;  %v5460_v42 = vsel %vm327_vm4, %v5444_v28, 0  ;;  %v11747_v53 = vsel %vm327_vm4, %v11731_v48, %v5444_v28 }
0x1052   : > { %5704 = vrot.lane.b32.xlu1 %v5460_v42, %s10084_s30 }
0x1053   : > { %v11755_v11 = vpop.permute.xlu0 %5445 }
0x1054   : > { %v5457_v22 = vsel %vm327_vm4, 0, %v11755_v11  ;;  %v5448_v61 = vpop.permute.xlu1 %5447 }
0x1055   : > { %5765 = vrot.lane.b32.xlu0 %v5479_v54, %s10085_s7  ;;  %v5450_v16 = vsel %vm327_vm4, %v11755_v11, %v5448_v61  ;;  %v5462_v9 = vsel %vm327_vm4, %v5448_v61, 0 }
0x1056   : > { %5533 = vrot.lane.b32.xlu1 %v5484_v44, %s10082_s28 }
0x1059   : > { %5635 = vrot.lane.b32.xlu0 %v5513_v38, %s10083_s29 }
0x105a   : > { %5535 = vrot.lane.b32.xlu1 %v5480_v40, %s10082_s28 }
0x105d   : > { %5702 = vrot.lane.b32.xlu0 %v11747_v53, %s10084_s30 }
0x105e   : > { %5769 = vrot.lane.b32.xlu1 %v5484_v44, %s10085_s7 }
0x1061   : > { %5537 = vrot.lane.b32.xlu0 %v5488_v52, %s10082_s28 }
0x1062   : > { %5639 = vrot.lane.b32.xlu1 %v5518_v57, %s10083_s29 }
0x1065   : > { %5763 = vrot.lane.b32.xlu0 %v11718_v45, %s10085_s7 }
0x1066   : > { %5706 = vrot.lane.b32.xlu1 %v5457_v22, %s10084_s30 }
0x1069   : > { %5828 = vrot.lane.b32.xlu0 %v5513_v38, %s10086_s8 }
0x106a   : > { %5771 = vrot.lane.b32.xlu1 %v5480_v40, %s10085_s7 }
0x106d   : > { %5773 = vrot.lane.b32.xlu0 %v5488_v52, %s10085_s7 }
0x106e   : > { %5641 = vrot.lane.b32.xlu1 %v5514_v3, %s10083_s29 }
0x1071   : > { %5643 = vrot.lane.b32.xlu0 %v5522_v12, %s10083_s29 }
0x1072   : > { %5830 = vrot.lane.b32.xlu1 %v5520_v27, %s10086_s8 }
0x1075   : > { %5826 = vrot.lane.b32.xlu0 %v5516_v1, %s10086_s8 }
0x1076   : > { %5708 = vrot.lane.b32.xlu1 %v5450_v16, %s10084_s30 }
0x1079   : > { %5710 = vrot.lane.b32.xlu0 %v5462_v9, %s10084_s30 }
0x107a   : > { %5832 = vrot.lane.b32.xlu1 %v5518_v57, %s10086_s8 }
0x107d   : > { %5891 = vrot.lane.b32.xlu0 %v11747_v53, %s10087_s9 }
0x107e   : > { %5893 = vrot.lane.b32.xlu1 %v5460_v42, %s10087_s9 }
0x1081   : > { %5889 = vrot.lane.b32.xlu0 %v5454_v55, %s10087_s9 }
0x1082   : > { %5895 = vrot.lane.b32.xlu1 %v5457_v22, %s10087_s9 }
0x1085   : > { %5954 = vrot.lane.b32.xlu0 %v5479_v54, %s10088_s10 }
0x1086   : > { %5834 = vrot.lane.b32.xlu1 %v5514_v3, %s10086_s8 }
0x1089   : > { %5836 = vrot.lane.b32.xlu0 %v5522_v12, %s10086_s8 }
0x108a   : > { %5956 = vrot.lane.b32.xlu1 %v5486_v0, %s10088_s10 }
0x108d   : > { %5952 = vrot.lane.b32.xlu0 %v11718_v45, %s10088_s10 }
0x108e   : > { %5897 = vrot.lane.b32.xlu1 %v5450_v16, %s10087_s9 }
0x1091   : > { %5899 = vrot.lane.b32.xlu0 %v5462_v9, %s10087_s9 }
0x1092   : > { %5960 = vrot.lane.b32.xlu1 %v5480_v40, %s10088_s10 }
0x1095   : > { %5962 = vrot.lane.b32.xlu0 %v5488_v52, %s10088_s10 }
0x1096   : > { %5958 = vrot.lane.b32.xlu1 %v5484_v44, %s10088_s10 }
0x1099   : > { %6017 = vrot.lane.b32.xlu0 %v5513_v38, %s10089_s11 }
0x109a   : > { %6019 = vrot.lane.b32.xlu1 %v5520_v27, %s10089_s11 }
0x109d   : > { %6015 = vrot.lane.b32.xlu0 %v5516_v1, %s10089_s11 }
0x109e   : > { %6023 = vrot.lane.b32.xlu1 %v5514_v3, %s10089_s11 }
0x10a1   : > { %6025 = vrot.lane.b32.xlu0 %v5522_v12, %s10089_s11 }
0x10a2   : > { %6021 = vrot.lane.b32.xlu1 %v5518_v57, %s10089_s11 }
0x10af   : > { %v5528_v45 = vpop.permute.xlu0 %5527 }
0x10b0   : > { %v5532_v0 = vpop.permute.xlu1 %5531 }
0x10b3   : > { %v5530_v54 = vpop.permute.xlu0 %5529 }
0x10b4   : > { %v5540_v15 = vsel %vm12787_vm15, %v5530_v54, %v5532_v0  ;;  %v5539_v30 = vsel %vm12788_vm5, %v5528_v45, %v5530_v54  ;;  %v5768_v8 = vpop.permute.xlu1 %5767  ;;  %vm12793_vm15 = vmmov %vm12791_vm10  ;;  %vm12794_vm5 = vcmask 908288  }
0x10b5   : > { %5547 = vmatprep.subr.bf16.mxu0 %v5540_v15 }
0x10b6   : > { %5548 = vmatpush1.bf16.msra.mxu0 %v5539_v30 }
0x10bb   : > { %v5634_v28 = vpop.permute.xlu0 %5633 }
0x10bc   : > { %v5638_v27 = vpop.permute.xlu1 %5637 }
0x10c3   : > { %v5701_v55 = vpop.permute.xlu0 %5700 }
0x10c4   : > { %v5705_v1 = vpop.permute.xlu1 %5704 }
0x10c7   : > { %v5766_v42 = vpop.permute.xlu0 %5765 }
0x10c8   : > { %v5534_v44 = vpop.permute.xlu1 %5533 }
0x10cb   : > { %v5636_v38 = vpop.permute.xlu0 %5635 }
0x10cc   : > { %v5536_v40 = vpop.permute.xlu1 %5535  ;;  %v5646_v15 = vsel %vm561_vm8, %v5636_v38, %v5638_v27 }
0x10cd   : > { %v5541_v61 = vsel %vm12790_vm12, %v5534_v44, %v5536_v40  ;;  %vm12796_vm12 = vmmov %vm12791_vm10 }
0x10cf   : > { %v5703_v52 = vpop.permute.xlu0 %5702 }
0x10d0   : > { %v5770_v57 = vpop.permute.xlu1 %5769  ;;  %v5713_v27 = vsel %vm660_vm9, %v5703_v52, %v5705_v1  ;;  %v5776_v1 = vsel %vm12794_vm5, %v5766_v42, %v5768_v8 }
0x10d3   : > { %v5538_v22 = vpop.permute.xlu0 %5537 }
0x10d4   : > { %v5640_v3 = vpop.permute.xlu1 %5639  ;;  %v5542_v12 = vsel %vm12789_vm11, %v5536_v40, %v5538_v22  ;;  %vm12795_vm11 = vmmov %vm12794_vm5 }
0x10d5   : > { %5549 = vmatprep.subr.bf16.mxu0 %v5542_v12 }
0x10d6   : > { %5550 = vmatpush1.bf16.msra.mxu0 %v5541_v61 }
0x10d7   : > { %v5764_v9 = vpop.permute.xlu0 %5763  ;;  %5588 = vmatprep.subr.bf16.mxu0 %v11747_v53 }
0x10d8   : > { %v5707_v45 = vpop.permute.xlu1 %5706 }
0x10d9   : > { %9416 = vmatmul.mubr.msk.bf16.vlgmr.msra.gmra.mrb[52].mxu0 %vm12791_vm10, %v11352_v50  ;;  %v5645_v50 = vsel %vm561_vm8, %v5634_v28, %v5636_v38  ;;  %vm12797_vm10 = vmmov %vm12794_vm5 }
0x10da   : > { %9418 = vmatpush1.bf16.msk.msra.mxu0 %vm10516_vm7, %v11731_v48  ;;  %5620 = vmatprep.mubr.bf16.mxu0 %v10081_v21 }
0x10db   : > { %v5829_v0 = vpop.permute.xlu0 %5828  ;;  %5590 = vmatprep.subr.bf16.mxu0 %v5450_v16 }
0x10dc   : > { %v5772_v54 = vpop.permute.xlu1 %5771 }
0x10de   : > { %9420 = vmatpush1.bf16.msk.msra.mxu0 %vm10516_vm7, %v11755_v11 }
0x10df   : > { %v5774_v53 = vpop.permute.xlu0 %5773  ;;  %5653 = vmatprep.subr.bf16.mxu0 %v5646_v15 }
0x10e0   : > { %v5642_v30 = vpop.permute.xlu1 %5641 }
0x10e1   : > { %9421 = vmatmul.mubr.msk.bf16.vlgmr.msra.gmra.mrb[56].mxu0 %vm12792_vm13, %v11367_v23  ;;  %v5647_v11 = vsel %vm561_vm8, %v5640_v3, %v5642_v30  ;;  %v5712_v23 = vsel %vm660_vm9, %v5701_v55, %v5703_v52  ;;  %v5778_v55 = vsel %vm12797_vm10, %v5772_v54, %v5774_v53  ;;  %vm12798_vm13 = vmmov %vm12794_vm5 }
0x10e2   : > { %5654 = vmatpush1.bf16.msra.mxu0 %v5645_v50  ;;  %5685 = vmatprep.mubr.bf16.mxu0 %v10081_v21 }
0x10e3   : > { %v5644_v48 = vpop.permute.xlu0 %5643 }
0x10e4   : > { %v5831_v16 = vpop.permute.xlu1 %5830  ;;  %v5648_v44 = vsel %vm561_vm8, %v5642_v30, %v5644_v48 }
0x10e5   : > { %5655 = vmatprep.subr.bf16.mxu0 %v5648_v44 }
0x10e6   : > { %5656 = vmatpush1.bf16.msra.mxu0 %v5647_v11 }
0x10e7   : > { %v5827_v40 = vpop.permute.xlu0 %5826  ;;  %5720 = vmatprep.subr.bf16.mxu0 %v5713_v27 }
0x10e8   : > { %v5709_v22 = vpop.permute.xlu1 %5708 }
0x10e9   : > { %9422 = vmatmul.mubr.msk.bf16.vlgmr.msra.gmra.mrb[60].mxu0 %vm12793_vm15, %v11379_v19  ;;  %v5714_v3 = vsel %vm660_vm9, %v5707_v45, %v5709_v22  ;;  %v5775_v19 = vsel %vm12795_vm11, %v5764_v9, %v5766_v42  ;;  %v5777_v45 = vsel %vm12798_vm13, %v5770_v57, %v5772_v54  ;;  %vm12799_vm15 = vcmask 900096   ;;  %vm12801_vm11 = vmmov %vm12796_vm12 }
0x10ea   : > { %5721 = vmatpush1.bf16.msra.mxu0 %v5712_v23  ;;  %5752 = vmatprep.mubr.bf16.mxu0 %v10081_v21  ;;  %v5839_v8 = vsel %vm12799_vm15, %v5829_v0, %v5831_v16  ;;  %vm12800_vm5 = vmmov %vm12799_vm15  ;;  %vm12804_vm13 = vcmask 785408  }
0x10eb   : > { %v5711_v28 = vpop.permute.xlu0 %5710  ;;  %v5838_v42 = vsel %vm12800_vm5, %v5827_v40, %v5829_v0  ;;  %vm12803_vm10 = vmmov %vm12800_vm5 }
0x10ec   : > { %v5833_v38 = vpop.permute.xlu1 %5832  ;;  %v5715_v12 = vsel %vm660_vm9, %v5709_v22, %v5711_v28  ;;  %vm12805_vm15 = vmmov %vm12804_vm13 }
0x10ed   : > { %5722 = vmatprep.subr.bf16.mxu0 %v5715_v12 }
0x10ee   : > { %5723 = vmatpush1.bf16.msra.mxu0 %v5714_v3 }
0x10ef   : > { %v5892_v61 = vpop.permute.xlu0 %5891  ;;  %5783 = vmatprep.subr.bf16.mxu0 %v5776_v1 }
0x10f0   : > { %v5894_v15 = vpop.permute.xlu1 %5893 }
0x10f1   : > { %9423 = vmatmul.mubr.msk.bf16.vlgmr.msra.gmra.mrb[64].mxu0 %vm12796_vm12, %v11392_v33  ;;  %vm12802_vm12 = vmmov %vm12800_vm5  ;;  %v5902_v54 = vsel %vm12804_vm13, %v5892_v61, %v5894_v15 }
0x10f2   : > { %5784 = vmatpush1.bf16.msra.mxu0 %v5775_v19  ;;  %5815 = vmatprep.mubr.bf16.mxu0 %v10081_v21  ;;  %vm12806_vm5 = vmmov %vm12801_vm11 }
0x10f3   : > { %v5890_v52 = vpop.permute.xlu0 %5889  ;;  %5785 = vmatprep.subr.bf16.mxu0 %v5778_v55 }
0x10f4   : > { %v5896_v30 = vpop.permute.xlu1 %5895  ;;  %v5901_v0 = vsel %vm12805_vm15, %v5890_v52, %v5892_v61  ;;  %vm12811_vm15 = vmmov %vm12806_vm5 }
0x10f6   : > { %5786 = vmatpush1.bf16.msra.mxu0 %v5777_v45 }
0x10f7   : > { %v5955_v50 = vpop.permute.xlu0 %5954  ;;  %5846 = vmatprep.subr.bf16.mxu0 %v5839_v8 }
0x10f8   : > { %v5835_v48 = vpop.permute.xlu1 %5834 }
0x10f9   : > { %9424 = vmatmul.mubr.msk.bf16.vlgmr.msra.gmra.mrb[68].mxu0 %vm12801_vm11, %v11404_v17  ;;  %v5840_v57 = vsel %vm12803_vm10, %v5833_v38, %v5835_v48  ;;  %vm12807_vm11 = vmmov %vm12804_vm13  ;;  %vm12809_vm10 = vcmask 777216  }
0x10fa   : > { %5847 = vmatpush1.bf16.msra.mxu0 %v5838_v42  ;;  %5878 = vmatprep.mubr.bf16.mxu0 %v10081_v21  ;;  %vm12810_vm13 = vmmov %vm12809_vm10 }
0x10fb   : > { %v5837_v33 = vpop.permute.xlu0 %5836 }
0x10fc   : > { %v5957_v9 = vpop.permute.xlu1 %5956  ;;  %v5841_v53 = vsel %vm12802_vm12, %v5835_v48, %v5837_v33  ;;  %vm12808_vm12 = vmmov %vm12807_vm11 }
0x10fd   : > { %5848 = vmatprep.subr.bf16.mxu0 %v5841_v53  ;;  %v5965_v22 = vsel %vm12809_vm10, %v5955_v50, %v5957_v9 }
0x10fe   : > { %5849 = vmatpush1.bf16.msra.mxu0 %v5840_v57 }
0x10ff   : > { %v5953_v16 = vpop.permute.xlu0 %5952  ;;  %5909 = vmatprep.subr.bf16.mxu0 %v5902_v54 }
0x1100   : > { %v5898_v44 = vpop.permute.xlu1 %5897  ;;  %v5964_v38 = vsel %vm12810_vm13, %v5953_v16, %v5955_v50  ;;  %vm12816_vm13 = vcmask 1039360  }
0x1101   : > { %9425 = vmatmul.mubr.msk.bf16.vlgmr.msra.gmra.mrb[72].mxu0 %vm12806_vm5, %v11416_v60  ;;  %v5903_v40 = vsel %vm12808_vm12, %v5896_v30, %v5898_v44  ;;  %vm12812_vm5 = vmmov %vm12809_vm10 }
0x1102   : > { %5910 = vmatpush1.bf16.msra.mxu0 %v5901_v0  ;;  %5941 = vmatprep.mubr.bf16.mxu0 %v10081_v21  ;;  %vm12814_vm12 = vmmov %vm12811_vm15 }
0x1103   : > { %v5900_v17 = vpop.permute.xlu0 %5899  ;;  %vm12815_vm10 = vmmov %vm12814_vm12 }
0x1104   : > { %v5961_v11 = vpop.permute.xlu1 %5960  ;;  %v5904_v27 = vsel %vm12807_vm11, %v5898_v44, %v5900_v17  ;;  %vm12813_vm11 = vmmov %vm12812_vm5 }
0x1105   : > { %5911 = vmatprep.subr.bf16.mxu0 %v5904_v27 }
0x1106   : > { %5912 = vmatpush1.bf16.msra.mxu0 %v5903_v40 }
0x1107   : > { %v5963_v23 = vpop.permute.xlu0 %5962  ;;  %5972 = vmatprep.subr.bf16.mxu0 %v5965_v22 }
0x1108   : > { %v5959_v28 = vpop.permute.xlu1 %5958  ;;  %v5967_v60 = vsel %vm12812_vm5, %v5961_v11, %v5963_v23  ;;  %vm12818_vm5 = vcmask 31744  }
0x1109   : > { %9426 = vmatmul.mubr.msk.bf16.vlgmr.msra.gmra.mrb[76].mxu0 %vm12811_vm15, %v11428_v58  ;;  %v5966_v1 = vsel %vm12813_vm11, %v5959_v28, %v5961_v11  ;;  %vm12817_vm15 = vmmov %vm12816_vm13 }
0x110a   : > { %5973 = vmatpush1.bf16.msra.mxu0 %v5964_v38  ;;  %6004 = vmatprep.mubr.bf16.mxu0 %v10081_v21  ;;  %vm12819_vm11 = vmmov %vm12818_vm5 }
0x110b   : > { %v6018_v12 = vpop.permute.xlu0 %6017  ;;  %5974 = vmatprep.subr.bf16.mxu0 %v5967_v60 }
0x110c   : > { %v6020_v3 = vpop.permute.xlu1 %6019 }
0x110d   : > { %v6028_v61 = vsel %vm1145_vm14, %v6018_v12, %v6020_v3 }
0x110e   : > { %5975 = vmatpush1.bf16.msra.mxu0 %v5966_v1 }
0x110f   : > { %v6016_v15 = vpop.permute.xlu0 %6015  ;;  %6035 = vmatprep.subr.bf16.mxu0 %v6028_v61 }
0x1110   : > { %v6027_v19 = vsel %vm1145_vm14, %v6016_v15, %v6018_v12  ;;  %v6024_v55 = vpop.permute.xlu1 %6023 }
0x1111   : > { %9427 = vmatmul.mubr.msk.bf16.vlgmr.msra.gmra.mrb[80].mxu0 %vm12814_vm12, %v11440_v4  ;;  %vm12820_vm12 = vmmov %vm12818_vm5 }
0x1112   : > { %6036 = vmatpush1.bf16.msra.mxu0 %v6027_v19  ;;  %6067 = vmatprep.mubr.bf16.mxu0 %v10081_v21 }
0x1113   : > { %v6026_v58 = vpop.permute.xlu0 %6025 }
0x1114   : > { %v6022_v52 = vpop.permute.xlu1 %6021  ;;  %v6030_v30 = vsel %vm1145_vm14, %v6024_v55, %v6026_v58 }
0x1115   : > { %v6029_v45 = vsel %vm1145_vm14, %v6022_v52, %v6024_v55  ;;  %6037 = vmatprep.subr.bf16.mxu0 %v6030_v30 }
0x1116   : > { %6038 = vmatpush1.bf16.msra.mxu0 %v6029_v45 }
0x1119   : > { %9428 = vmatmul.mubr.msk.bf16.vlgmr.msra.gmra.mrb[84].mxu0 %vm12815_vm10, %v11450_v62  ;;  %vm12821_vm10 = vmmov %vm12818_vm5 }
0x111a   : > { %6175 = vmatprep.mubr.bf16.mxu0 %v10081_v21 }
0x11ac   : > { %v5581_v8 = vpop.f32.mrb[52].mxu0 }
0x11ad   : > { %v5583_v50 = vpop.f32.mrb[53].mxu0 }
0x11ae   : > { %v5585_v48 = vpop.f32.mrb[54].mxu0 }
0x11af   : > { %v5586_v4 = vpop.f32.mrb[55].mxu0 }
0x11b4   : > { %v5622_v42 = vpop.f32.mrb[56].mxu0 }
0x11b5   : > { %v5623_v33 = vadd.f32 %v5622_v42, %v5581_v8  ;;  %v5624_v9 = vpop.f32.mrb[57].mxu0 }
0x11b6   : > { %v5625_v53 = vadd.f32 %v5624_v9, %v5583_v50  ;;  %v5626_v57 = vpop.f32.mrb[58].mxu0 }
0x11b7   : > { %v5627_v54 = vpop.f32.mrb[59].mxu0 }
0x11bc   : > { %v5687_v16 = vpop.f32.mrb[60].mxu0 }
0x11bd   : > { %v5694_v44 = vadd.f32 %v5687_v16, %v5623_v33  ;;  %v5689_v0 = vpop.f32.mrb[61].mxu0 }
0x11be   : > { %v5695_v17 = vadd.f32 %v5689_v0, %v5625_v53  ;;  %v5691_v11 = vpop.f32.mrb[62].mxu0 }
0x11bf   : > { %v5692_v27 = vpop.f32.mrb[63].mxu0 }
0x11c4   : > { %v5754_v40 = vpop.f32.mrb[64].mxu0 }
0x11c5   : > { %v5761_v62 = vadd.f32 %v5754_v40, %v5694_v44  ;;  %v5756_v22 = vpop.f32.mrb[65].mxu0  ;;  %v7455_v40 = vmul.f32 2.0, %v11459_v10 }
0x11c6   : > { %v5762_v23 = vadd.f32 %v5756_v22, %v5695_v17  ;;  %v5758_v28 = vpop.f32.mrb[66].mxu0  ;;  %v7454_v17 = vmul.f32 2.0, %v11456_v43 }
0x11c7   : > { %v5759_v38 = vpop.f32.mrb[67].mxu0 }
0x11cc   : > { %v5817_v60 = vpop.f32.mrb[68].mxu0 }
0x11cd   : > { %v5824_v12 = vadd.f32 %v5817_v60, %v5761_v62  ;;  %v5819_v3 = vpop.f32.mrb[69].mxu0  ;;  %v7456_v60 = vadd.f32 %v7454_v17, %v11040_v59 }
0x11ce   : > { %v5825_v1 = vadd.f32 %v5819_v3, %v5762_v23  ;;  %v5821_v61 = vpop.f32.mrb[70].mxu0 }
0x11cf   : > { %v5822_v15 = vpop.f32.mrb[71].mxu0 }
0x11d4   : > { %v5880_v19 = vpop.f32.mrb[72].mxu0 }
0x11d5   : > { %v5887_v55 = vadd.f32 %v5880_v19, %v5824_v12  ;;  %v5882_v58 = vpop.f32.mrb[73].mxu0 }
0x11d6   : > { %v5888_v52 = vadd.f32 %v5882_v58, %v5825_v1  ;;  %v5884_v30 = vpop.f32.mrb[74].mxu0  ;;  %v7457_v1 = vadd.f32 %v7455_v40, %v11043_v2 }
0x11d7   : > { %v5885_v45 = vpop.f32.mrb[75].mxu0 }
0x11dc   : > { %v5943_v8 = vpop.f32.mrb[76].mxu0 }
0x11dd   : > { %v5950_v50 = vadd.f32 %v5943_v8, %v5887_v55  ;;  %v5945_v48 = vpop.f32.mrb[77].mxu0 }
0x11de   : > { %v5951_v4 = vadd.f32 %v5945_v48, %v5888_v52  ;;  %v5947_v42 = vpop.f32.mrb[78].mxu0 }
0x11df   : > { %v5948_v33 = vpop.f32.mrb[79].mxu0 }
0x11e4   : > { %v6006_v9 = vpop.f32.mrb[80].mxu0 }
0x11e5   : > { %v6013_v53 = vadd.f32 %v6006_v9, %v5950_v50  ;;  %v6008_v57 = vpop.f32.mrb[81].mxu0 }
0x11e6   : > { %v6014_v54 = vadd.f32 %v6008_v57, %v5951_v4  ;;  %v6010_v16 = vpop.f32.mrb[82].mxu0 }
0x11e7   : > { %v6011_v44 = vpop.f32.mrb[83].mxu0 }
0x11ec   : > { %v6069_v0 = vpop.f32.mrb[84].mxu0 }
0x11ed   : > { %v6076_v11 = vadd.f32 %v6069_v0, %v6013_v53  ;;  %v6071_v27 = vpop.f32.mrb[85].mxu0 }
0x11ee   : > { %v6077_v62 = vadd.f32 %v6071_v27, %v6014_v54  ;;  %v6073_v22 = vpop.f32.mrb[86].mxu0 }
0x11ef   : > { %v6078_v23 = vadd.f32 %v6076_v11, %v10622_v32  ;;  %v6074_v28 = vpop.f32.mrb[87].mxu0 }
0x11f0   : > { %v6079_v38 = vadd.f32 %v6077_v62, %v10622_v32 }
0x11f1   : > { %v6080_v12 = vmul.f32 0.1, %v6078_v23  ;;  %v7458_v3 = vmul.f32 2.0, %v6078_v23 }
0x11f2   : > { %v6081_v61 = vmul.f32 0.1, %v6079_v38  ;;  %v7459_v15 = vmul.f32 2.0, %v6079_v38 }
0x11f3   : > { %v6082_v43 = vadd.f32 %v6080_v12, %v10625_v35  ;;  %v11873_v19 = vadd.f32 %v7458_v3, %v7456_v60 }
0x11f4   : > { %v6083_v10 = vadd.f32 %v6081_v61, %v10628_v37  ;;  %v11876_v55 = vadd.f32 %v7459_v15, %v7457_v1 }
0x11f5   : > { %v6099_v58 = vpack.c.bf16 %v6082_v43, %v6082_v43  ;;  %v6112_v30 = vsel %vm10139_vm0, %v6082_v43, 0.0  ;;  %v6084_v8 = vsel %vm10143_vm1, %v6082_v43, 0.0 }
0x11f6   : > { %v6100_v52 = vpack.c.bf16 %v6083_v10, %v6083_v10  ;;  %v6113_v59 = vsel %vm10151_vm2, %v6083_v10, 0.0  ;;  %v6114_v2 = vpack.c.bf16 %v6112_v30, %v6112_v30  ;;  %v6085_v50 = vsel %vm10155_vm3, %v6083_v10, 0.0 }
0x11f7   : > { %6103 = vrot.lane.b32.xlu0 %v6099_v58, %s10080_s27  ;;  %v6115_v45 = vpack.c.bf16 %v6113_v59, %v6113_v59  ;;  %v6086_v48 = vpack.c.bf16 %v6084_v8, %v6084_v8  ;;  %v6087_v4 = vpack.c.bf16 %v6085_v50, %v6085_v50 }
0x11f8   : > { %6105 = vrot.lane.b32.xlu1 %v6100_v52, %s10080_s27 }
0x11fb   : > { %6118 = vrot.lane.b32.xlu0 %v6114_v2, %s10080_s27 }
0x11fc   : > { %6120 = vrot.lane.b32.xlu1 %v6115_v45, %s10080_s27 }
0x11ff   : > { %6090 = vrot.lane.b32.xlu0 %v6086_v48, %s10080_s27 }
0x1200   : > { %6092 = vrot.lane.b32.xlu1 %v6087_v4, %s10080_s27 }
0x1269   : > { %v6104_v42 = vpop.permute.xlu0 %6103 }
0x126a   : > { %v6106_v33 = vpop.permute.xlu1 %6105  ;;  %v6109_v9 = vsel %vm327_vm4, 0, %v6104_v42 }
0x126b   : > { %6129 = vrot.lane.b32.xlu0 %v6109_v9, %s10082_s28  ;;  %v6107_v53 = vsel %vm327_vm4, %v6104_v42, %v6106_v33  ;;  %v6111_v16 = vsel %vm327_vm4, %v6106_v33, 0 }
0x126c   : > { %6131 = vrot.lane.b32.xlu1 %v6107_v53, %s10082_s28 }
0x126d   : > { %v6119_v57 = vpop.permute.xlu0 %6118 }
0x126e   : > { %v6121_v54 = vpop.permute.xlu1 %6120  ;;  %v6124_v44 = vsel %vm327_vm4, 0, %v6119_v57 }
0x126f   : > { %6133 = vrot.lane.b32.xlu0 %v6111_v16, %s10082_s28  ;;  %v6122_v0 = vsel %vm327_vm4, %v6119_v57, %v6121_v54  ;;  %v6126_v11 = vsel %vm327_vm4, %v6121_v54, 0 }
0x1270   : > { %6256 = vrot.lane.b32.xlu1 %v6124_v44, %s10083_s29 }
0x1271   : > { %v6091_v17 = vpop.permute.xlu0 %6090 }
0x1272   : > { %v6093_v27 = vpop.permute.xlu1 %6092  ;;  %v6096_v40 = vsel %vm327_vm4, 0, %v6091_v17 }
0x1273   : > { %6258 = vrot.lane.b32.xlu0 %v6122_v0, %s10083_s29  ;;  %v6094_v62 = vsel %vm327_vm4, %v6091_v17, %v6093_v27  ;;  %v6098_v22 = vsel %vm327_vm4, %v6093_v27, 0  ;;  %v6196_v10 = vsel %vm404_vm6, %v6096_v40, 0 }
0x1274   : > { %6260 = vrot.lane.b32.xlu1 %v6126_v11, %s10083_s29 }
0x1277   : > { %6333 = vrot.lane.b32.xlu0 %v6096_v40, %s10084_s30 }
0x1278   : > { %6335 = vrot.lane.b32.xlu1 %v6094_v62, %s10084_s30 }
0x127b   : > { %6337 = vrot.lane.b32.xlu0 %v6098_v22, %s10084_s30 }
0x127c   : > { %6408 = vrot.lane.b32.xlu1 %v6109_v9, %s10085_s7 }
0x127f   : > { %6410 = vrot.lane.b32.xlu0 %v6107_v53, %s10085_s7 }
0x1280   : > { %6412 = vrot.lane.b32.xlu1 %v6111_v16, %s10085_s7 }
0x1283   : > { %6483 = vrot.lane.b32.xlu0 %v6124_v44, %s10086_s8 }
0x1284   : > { %6485 = vrot.lane.b32.xlu1 %v6122_v0, %s10086_s8 }
0x1287   : > { %6487 = vrot.lane.b32.xlu0 %v6126_v11, %s10086_s8 }
0x1288   : > { %6558 = vrot.lane.b32.xlu1 %v6096_v40, %s10087_s9 }
0x128b   : > { %6560 = vrot.lane.b32.xlu0 %v6094_v62, %s10087_s9 }
0x128c   : > { %6562 = vrot.lane.b32.xlu1 %v6098_v22, %s10087_s9 }
0x128f   : > { %6633 = vrot.lane.b32.xlu0 %v6109_v9, %s10088_s10 }
0x1290   : > { %6635 = vrot.lane.b32.xlu1 %v6107_v53, %s10088_s10 }
0x1293   : > { %6637 = vrot.lane.b32.xlu0 %v6111_v16, %s10088_s10 }
0x1294   : > { %6708 = vrot.lane.b32.xlu1 %v6124_v44, %s10089_s11 }
0x1297   : > { %6710 = vrot.lane.b32.xlu0 %v6122_v0, %s10089_s11 }
0x1298   : > { %6712 = vrot.lane.b32.xlu1 %v6126_v11, %s10089_s11 }
0x12dd   : > { %v6130_v23 = vpop.permute.xlu0 %6129 }
0x12de   : > { %v6132_v28 = vpop.permute.xlu1 %6131 }
0x12df   : > { %v6135_v38 = vsel %vm12816_vm13, %v6130_v23, %v6132_v28  ;;  %vm12822_vm13 = vmmov %vm12818_vm5 }
0x12e0   : > { %v6138_v1 = vsel %vm404_vm6, %v6135_v38, 0  ;;  %v10060_v38 = vld [vmem:[%s12655_s1 + $0x78] sm:$0xff]  }
0x12e1   : > { %v6134_v60 = vpop.permute.xlu0 %6133 }
0x12e2   : > { %v6136_v12 = vsel %vm12817_vm15, %v6132_v28, %v6134_v60  ;;  %v6257_v3 = vpop.permute.xlu1 %6256  ;;  %vm12823_vm15 = vcmask 908288   ;;  %v10061_v60 = vld [vmem:[%s12655_s1 + $0x80] sm:$0xff]  }
0x12e3   : > { %9429 = vmatprep.subr.msk.bf16.mxu0 %vm404_vm6, %v6136_v12  ;;  %v10062_v12 = vld [vmem:[%s12655_s1 + $0x88] sm:$0xff]  }
0x12e4   : > { %6144 = vmatpush1.bf16.msra.mxu0 %v6138_v1 }
0x12e5   : > { %v6259_v61 = vpop.permute.xlu0 %6258  ;;  %9432 = vmatprep.subr.msk.bf16.mxu0 %vm404_vm6, %v6094_v62 }
0x12e6   : > { %v6261_v15 = vpop.permute.xlu1 %6260  ;;  %v6262_v52 = vsel %vm561_vm8, %v6257_v3, %v6259_v61 }
0x12e7   : > { %v6263_v43 = vsel %vm561_vm8, %v6259_v61, %v6261_v15  ;;  %9430 = vmatmul.mubr.msk.bf16.vlgmr.msra.gmra.mrb[88].mxu0 %vm12818_vm5, %v11521_v25  ;;  %v6265_v25 = vsel %vm404_vm6, %v6262_v52, 0 }
0x12e8   : > { %6202 = vmatpush1.bf16.msra.mxu0 %v6196_v10  ;;  %6185 = vmatprep.mubr.bf16.mxu0 %v10081_v21 }
0x12e9   : > { %9435 = vmatprep.subr.msk.bf16.mxu0 %vm404_vm6, %v6263_v43  ;;  %v6334_v58 = vpop.permute.xlu0 %6333 }
0x12ea   : > { %v6336_v59 = vpop.permute.xlu1 %6335 }
0x12ed   : > { %v6338_v30 = vpop.permute.xlu0 %6337 }
0x12ee   : > { %v6340_v2 = vsel %vm660_vm9, %v6336_v59, %v6338_v30  ;;  %v6409_v45 = vpop.permute.xlu1 %6408 }
0x12ef   : > { %9431 = vmatmul.mubr.msk.bf16.gmra.mrb[92].mxu0 %vm12819_vm11, %v11531_v24  ;;  %v6339_v24 = vsel %vm660_vm9, %v6334_v58, %v6336_v59  ;;  %vm12824_vm11 = vmmov %vm12823_vm15 }
0x12f0   : > { %6233 = vmatprep.mubr.bf16.mxu0 %v10081_v21 }
0x12f1   : > { %v6411_v8 = vpop.permute.xlu0 %6410 }
0x12f2   : > { %v6413_v50 = vpop.permute.xlu1 %6412 }
0x12f3   : > { %v6415_v48 = vsel %vm12823_vm15, %v6411_v8, %v6413_v50 }
0x12f5   : > { %v6484_v4 = vpop.permute.xlu0 %6483 }
0x12f6   : > { %v6486_v33 = vpop.permute.xlu1 %6485 }
0x12f7   : > { %9433 = vmatmul.mubr.msk.bf16.vlgmr.msra.gmra.mrb[88].mxu0 %vm12820_vm12, %v11540_v29  ;;  %v6342_v29 = vsel %vm404_vm6, %v6339_v24, 0  ;;  %vm12825_vm12 = vmmov %vm12818_vm5 }
0x12f8   : > { %6271 = vmatpush1.bf16.msra.mxu0 %v6265_v25  ;;  %6243 = vmatprep.mubr.bf16.mxu0 %v10081_v21 }
0x12f9   : > { %9438 = vmatprep.subr.msk.bf16.mxu0 %vm404_vm6, %v6340_v2  ;;  %v6488_v42 = vpop.permute.xlu0 %6487 }
0x12fa   : > { %v6559_v53 = vpop.permute.xlu1 %6558 }
0x12fd   : > { %v6561_v57 = vpop.permute.xlu0 %6560 }
0x12fe   : > { %v6563_v54 = vpop.permute.xlu1 %6562 }
0x12ff   : > { %9434 = vmatmul.mubr.msk.bf16.gmra.mrb[92].mxu0 %vm12821_vm10, %v11551_v46  ;;  %v6414_v46 = vsel %vm12824_vm11, %v6409_v45, %v6411_v8  ;;  %vm12826_vm10 = vcmask 900096   ;;  %vm12829_vm11 = vcmask 785408  }
0x1300   : > { %6302 = vmatprep.mubr.bf16.mxu0 %v10081_v21  ;;  %v6490_v9 = vsel %vm12826_vm10, %v6486_v33, %v6488_v42  ;;  %vm12828_vm15 = vmmov %vm12826_vm10  ;;  %v6565_v16 = vsel %vm12829_vm11, %v6561_v57, %v6563_v54 }
0x1301   : > { %v6634_v44 = vpop.permute.xlu0 %6633  ;;  %vm12831_vm10 = vmmov %vm12829_vm11 }
0x1302   : > { %v6636_v17 = vpop.permute.xlu1 %6635 }
0x1305   : > { %v6638_v0 = vpop.permute.xlu0 %6637 }
0x1306   : > { %v6709_v27 = vpop.permute.xlu1 %6708 }
0x1307   : > { %9436 = vmatmul.mubr.msk.bf16.vlgmr.msra.gmra.mrb[88].mxu0 %vm12822_vm13, %v11560_v31  ;;  %v6417_v31 = vsel %vm404_vm6, %v6414_v46, 0  ;;  %vm12827_vm13 = vmmov %vm12818_vm5 }
0x1308   : > { %6348 = vmatpush1.bf16.msra.mxu0 %v6342_v29  ;;  %6312 = vmatprep.mubr.bf16.mxu0 %v10081_v21 }
0x1309   : > { %9441 = vmatprep.subr.msk.bf16.mxu0 %vm404_vm6, %v6415_v48  ;;  %v6711_v40 = vpop.permute.xlu0 %6710 }
0x130a   : > { %v6713_v62 = vpop.permute.xlu1 %6712  ;;  %v6714_v23 = vsel %vm1145_vm14, %v6709_v27, %v6711_v40 }
0x130b   : > { %v6715_v22 = vsel %vm1145_vm14, %v6711_v40, %v6713_v62  ;;  %v6717_v28 = vsel %vm404_vm6, %v6714_v23, 0 }
0x130f   : > { %9437 = vmatmul.mubr.msk.bf16.gmra.mrb[92].mxu0 %vm12818_vm5, %v11571_v36  ;;  %v6489_v36 = vsel %vm12828_vm15, %v6484_v4, %v6486_v33  ;;  %vm12833_vm15 = vcmask 777216  }
0x1310   : > { %6379 = vmatprep.mubr.bf16.mxu0 %v10081_v21  ;;  %v6640_v11 = vsel %vm12833_vm15, %v6636_v17, %v6638_v0  ;;  %vm12834_vm11 = vmmov %vm12833_vm15 }
0x1311   : > { %vm12838_vm15 = vmmov %vm12818_vm5 }
0x1317   : > { %9439 = vmatmul.mubr.msk.bf16.vlgmr.msra.gmra.mrb[88].mxu0 %vm12825_vm12, %v11580_v39  ;;  %v6492_v39 = vsel %vm404_vm6, %v6489_v36, 0  ;;  %vm12830_vm12 = vmmov %vm12818_vm5 }
0x1318   : > { %6423 = vmatpush1.bf16.msra.mxu0 %v6417_v31  ;;  %6389 = vmatprep.mubr.bf16.mxu0 %v10081_v21 }
0x1319   : > { %9444 = vmatprep.subr.msk.bf16.mxu0 %vm404_vm6, %v6490_v9 }
0x131f   : > { %9440 = vmatmul.mubr.msk.bf16.gmra.mrb[92].mxu0 %vm12827_vm13, %v11591_v63  ;;  %v6564_v63 = vsel %vm12831_vm10, %v6559_v53, %v6561_v57  ;;  %vm12832_vm13 = vmmov %vm12818_vm5 }
0x1320   : > { %6454 = vmatprep.mubr.bf16.mxu0 %v10081_v21  ;;  %vm12836_vm10 = vmmov %vm12818_vm5 }
0x1327   : > { %9442 = vmatmul.mubr.msk.bf16.vlgmr.msra.gmra.mrb[88].mxu0 %vm12818_vm5, %v11600_v47  ;;  %v6567_v47 = vsel %vm404_vm6, %v6564_v63, 0 }
0x1328   : > { %6498 = vmatpush1.bf16.msra.mxu0 %v6492_v39  ;;  %6464 = vmatprep.mubr.bf16.mxu0 %v10081_v21 }
0x1329   : > { %9447 = vmatprep.subr.msk.bf16.mxu0 %vm404_vm6, %v6565_v16 }
0x132f   : > { %9443 = vmatmul.mubr.msk.bf16.gmra.mrb[92].mxu0 %vm12830_vm12, %v11611_v26  ;;  %v6639_v26 = vsel %vm12834_vm11, %v6634_v44, %v6636_v17  ;;  %vm12835_vm12 = vmmov %vm12818_vm5 }
0x1330   : > { %6529 = vmatprep.mubr.bf16.mxu0 %v10081_v21  ;;  %vm12839_vm11 = vmmov %vm12818_vm5 }
0x1337   : > { %9445 = vmatmul.mubr.msk.bf16.vlgmr.msra.gmra.mrb[88].mxu0 %vm12832_vm13, %v11620_v41  ;;  %v6642_v41 = vsel %vm404_vm6, %v6639_v26, 0  ;;  %vm12837_vm13 = vmmov %vm12818_vm5 }
0x1338   : > { %6573 = vmatpush1.bf16.msra.mxu0 %v6567_v47  ;;  %6539 = vmatprep.mubr.bf16.mxu0 %v10081_v21 }
0x1339   : > { %9450 = vmatprep.subr.msk.bf16.mxu0 %vm404_vm6, %v6640_v11 }
0x133f   : > { %9446 = vmatmul.mubr.msk.bf16.gmra.mrb[92].mxu0 %vm12818_vm5, %v11631_v18  ;;  %v10058_v18 = vld [vmem:[%s12655_s1 + $0x68] sm:$0xff]  }
0x1340   : > { %6604 = vmatprep.mubr.bf16.mxu0 %v10081_v21 }
0x1347   : > { %9448 = vmatmul.mubr.msk.bf16.vlgmr.msra.gmra.mrb[88].mxu0 %vm12835_vm12, %v11640_v34  ;;  %v10059_v34 = vld [vmem:[%s12655_s1 + $0x70] sm:$0xff]   ;;  %vm12840_vm12 = vcmask 1039360  }
0x1348   : > { %6648 = vmatpush1.bf16.msra.mxu0 %v6642_v41  ;;  %6614 = vmatprep.mubr.bf16.mxu0 %v10081_v21 }
0x1349   : > { %9453 = vmatprep.subr.msk.bf16.mxu0 %vm404_vm6, %v6715_v22 }
0x134f   : > { %9449 = vmatmul.mubr.msk.bf16.gmra.mrb[92].mxu0 %vm12836_vm10, %v10058_v18  ;;  %vm12841_vm10 = vmmov %vm12840_vm12 }
0x1350   : > { %6679 = vmatprep.mubr.bf16.mxu0 %v10081_v21 }
0x1357   : > { %9451 = vmatmul.mubr.msk.bf16.vlgmr.msra.gmra.mrb[88].mxu0 %vm12837_vm13, %v10059_v34  ;;  %vm12842_vm13 = vmmov %vm12841_vm10 }
0x1358   : > { %6723 = vmatpush1.bf16.msra.mxu0 %v6717_v28  ;;  %6689 = vmatprep.mubr.bf16.mxu0 %v10081_v21 }
0x135f   : > { %9452 = vmatmul.mubr.msk.bf16.gmra.mrb[92].mxu0 %vm12838_vm15, %v10060_v38  ;;  %vm12843_vm15 = vmmov %vm12841_vm10 }
0x1360   : > { %6754 = vmatprep.mubr.bf16.mxu0 %v10081_v21 }
0x1367   : > { %9454 = vmatmul.mubr.msk.bf16.vlgmr.msra.gmra.mrb[88].mxu0 %vm12818_vm5, %v10061_v60  ;;  %vm12844_vm5 = vcmask 261120  }
0x1368   : > { %6764 = vmatprep.mubr.bf16.mxu0 %v10081_v21 }
0x136f   : > { %9455 = vmatmul.mubr.msk.bf16.gmra.mrb[92].mxu0 %vm12839_vm11, %v10062_v12  ;;  %vm12845_vm11 = vmmov %vm12844_vm5 }
0x1370   : > { %8558 = vmatprep.mubr.bf16.mxu0 %v10081_v21 }
0x143a   : > { %v6756_v3 = vpop.f32.mrb[88].mxu0 }
0x143b   : > { %v6783_v1 = vadd.f32 %v6756_v3, %v10357_v49  ;;  %v6758_v61 = vpop.f32.mrb[89].mxu0 }
0x143c   : > { %v6784_v15 = vadd.f32 %v6758_v61, %v10357_v49  ;;  %v6760_v43 = vpop.f32.mrb[90].mxu0 }
0x143d   : > { %v6791_v10 = vmax.f32 %v6783_v1, 0.0  ;;  %v6785_v58 = vadd.f32 %v6760_v43, %v10359_v51  ;;  %v6762_v52 = vpop.f32.mrb[91].mxu0 }
0x143e   : > { %v6792_v30 = vmax.f32 %v6784_v15, 0.0  ;;  %v6786_v59 = vadd.f32 %v6762_v52, %v10359_v51 }
0x143f   : > { %v6793_v25 = vmax.f32 %v6785_v58, 0.0  ;;  %v6799_v2 = vsel %vm10143_vm1, %v6791_v10, 0.0  ;;  %v6863_v45 = vsel %vm10139_vm0, %v6791_v10, 0.0 }
0x1440   : > { %v6794_v24 = vmax.f32 %v6786_v59, 0.0  ;;  %v6800_v8 = vsel %vm10155_vm3, %v6792_v30, 0.0  ;;  %v6864_v33 = vsel %vm10151_vm2, %v6792_v30, 0.0 }
0x1441   : > { %v6801_v49 = vsel %vm10143_vm1, %v6793_v25, 0.0  ;;  %v6837_v50 = vpack.c.bf16 %v6793_v25, %v6791_v10  ;;  %v6865_v29 = vsel %vm10139_vm0, %v6793_v25, 0.0 }
0x1442   : > { %v6807_v48 = vpack.c.bf16 %v6801_v49, %v6799_v2  ;;  %v6871_v51 = vpack.c.bf16 %v6865_v29, %v6863_v45  ;;  %v6802_v4 = vsel %vm10155_vm3, %v6794_v24, 0.0  ;;  %v6838_v46 = vpack.c.bf16 %v6794_v24, %v6792_v30  ;;  %v6766_v42 = vpop.f32.mrb[92].mxu0 }
0x1443   : > { %v6808_v31 = vpack.c.bf16 %v6802_v4, %v6800_v8  ;;  %v6866_v9 = vsel %vm10151_vm2, %v6794_v24, 0.0  ;;  %v6787_v53 = vadd.f32 %v6766_v42, %v10375_v6  ;;  %6845 = vrot.lane.b32.xlu0 %v6837_v50, %s10080_s27  ;;  %v6768_v36 = vpop.f32.mrb[93].mxu0 }
0x1444   : > { %v6872_v57 = vpack.c.bf16 %v6866_v9, %v6864_v33  ;;  %v6788_v54 = vadd.f32 %v6768_v36, %v10375_v6  ;;  %6847 = vrot.lane.b32.xlu1 %v6838_v46, %s10080_s27  ;;  %v6770_v39 = vpop.f32.mrb[94].mxu0 }
0x1445   : > { %v6795_v16 = vmax.f32 %v6787_v53, 0.0  ;;  %v6789_v44 = vadd.f32 %v6770_v39, %v10385_v20  ;;  %v6772_v63 = vpop.f32.mrb[95].mxu0 }
0x1446   : > { %v6796_v0 = vmax.f32 %v6788_v54, 0.0  ;;  %v6790_v17 = vadd.f32 %v6772_v63, %v10385_v20 }
0x1447   : > { %v6797_v47 = vmax.f32 %v6789_v44, 0.0  ;;  %v6803_v11 = vsel %vm10143_vm1, %v6795_v16, 0.0  ;;  %v6867_v27 = vsel %vm10139_vm0, %v6795_v16, 0.0 }
0x1448   : > { %v6798_v26 = vmax.f32 %v6790_v17, 0.0  ;;  %v6804_v6 = vsel %vm10155_vm3, %v6796_v0, 0.0  ;;  %v6868_v34 = vsel %vm10151_vm2, %v6796_v0, 0.0 }
0x1449   : > { %v6805_v40 = vsel %vm10143_vm1, %v6797_v47, 0.0  ;;  %v6839_v62 = vpack.c.bf16 %v6797_v47, %v6795_v16  ;;  %v6869_v41 = vsel %vm10139_vm0, %v6797_v47, 0.0 }
0x144a   : > { %v6809_v22 = vpack.c.bf16 %v6805_v40, %v6803_v11  ;;  %v6873_v20 = vpack.c.bf16 %v6869_v41, %v6867_v27  ;;  %v6806_v18 = vsel %vm10155_vm3, %v6798_v26, 0.0  ;;  %v6840_v23 = vpack.c.bf16 %v6798_v26, %v6796_v0 }
0x144b   : > { %v6810_v28 = vpack.c.bf16 %v6806_v18, %v6804_v6  ;;  %v6870_v38 = vsel %vm10151_vm2, %v6798_v26, 0.0  ;;  %6849 = vrot.lane.b32.xlu0 %v6839_v62, %s10080_s27 }
0x144c   : > { %v6874_v60 = vpack.c.bf16 %v6870_v38, %v6868_v34  ;;  %6851 = vrot.lane.b32.xlu1 %v6840_v23, %s10080_s27 }
0x144f   : > { %6879 = vrot.lane.b32.xlu0 %v6871_v51, %s10080_s27 }
0x1450   : > { %6881 = vrot.lane.b32.xlu1 %v6872_v57, %s10080_s27 }
0x1453   : > { %6883 = vrot.lane.b32.xlu0 %v6873_v20, %s10080_s27 }
0x1454   : > { %6885 = vrot.lane.b32.xlu1 %v6874_v60, %s10080_s27  ;;  %v10063_v60 = vld [vmem:[%s12656_s2 + $0x2] sm:$0x3] }
0x1457   : > { %6815 = vrot.lane.b32.xlu0 %v6807_v48, %s10080_s27 }
0x1458   : > { %6817 = vrot.lane.b32.xlu1 %v6808_v31, %s10080_s27 }
0x145b   : > { %6819 = vrot.lane.b32.xlu0 %v6809_v22, %s10080_s27 }
0x145c   : > { %6821 = vrot.lane.b32.xlu1 %v6810_v28, %s10080_s27 }
0x14b5   : > { %v6846_v12 = vpop.permute.xlu0 %6845 }
0x14b6   : > { %v6848_v3 = vpop.permute.xlu1 %6847  ;;  %v12076_v1 = vsel %vm327_vm4, 0, %v6846_v12 }
0x14b7   : > { %6901 = vrot.lane.b32.xlu0 %v12076_v1, %s10082_s28  ;;  %v6860_v61 = vsel %vm327_vm4, %v6848_v3, 0  ;;  %v6853_v15 = vsel %vm327_vm4, %v6846_v12, %v6848_v3 }
0x14b8   : > { %6905 = vrot.lane.b32.xlu1 %v6860_v61, %s10082_s28 }
0x14bb   : > { %6903 = vrot.lane.b32.xlu0 %v6853_v15, %s10082_s28 }
0x14bc   : > { %7141 = vrot.lane.b32.xlu1 %v6860_v61, %s10085_s7 }
0x14bd   : > { %v6850_v43 = vpop.permute.xlu0 %6849 }
0x14be   : > { %v6852_v10 = vpop.permute.xlu1 %6851  ;;  %v6858_v50 = vsel %vm327_vm4, 0, %v6850_v43 }
0x14bf   : > { %v6854_v48 = vsel %vm327_vm4, %v6850_v43, %v6852_v10  ;;  %v6862_v4 = vsel %vm327_vm4, %v6852_v10, 0  ;;  %v10064_v43 = vld [vmem:[%s12656_s2] sm:$0x3] }
0x14c1   : > { %v6880_v58 = vpop.permute.xlu0 %6879 }
0x14c2   : > { %v6882_v52 = vpop.permute.xlu1 %6881  ;;  %v6890_v30 = vsel %vm327_vm4, 0, %v6880_v58 }
0x14c3   : > { %7007 = vrot.lane.b32.xlu0 %v6890_v30, %s10083_s29  ;;  %v6894_v59 = vsel %vm327_vm4, %v6882_v52, 0  ;;  %v6887_v29 = vsel %vm327_vm4, %v6880_v58, %v6882_v52 }
0x14c4   : > { %7011 = vrot.lane.b32.xlu1 %v6894_v59, %s10083_s29 }
0x14c5   : > { %v6884_v25 = vpop.permute.xlu0 %6883 }
0x14c6   : > { %v6886_v2 = vpop.permute.xlu1 %6885  ;;  %v6892_v46 = vsel %vm327_vm4, 0, %v6884_v25 }
0x14c7   : > { %v6888_v31 = vsel %vm327_vm4, %v6884_v25, %v6886_v2  ;;  %v6896_v9 = vsel %vm327_vm4, %v6886_v2, 0 }
0x14c9   : > { %v12089_v45 = vpop.permute.xlu0 %6815 }
0x14ca   : > { %v6818_v24 = vpop.permute.xlu1 %6817  ;;  %v6828_v8 = vsel %vm327_vm4, 0, %v12089_v45 }
0x14cb   : > { %7074 = vrot.lane.b32.xlu0 %v6828_v8, %s10084_s30  ;;  %v6834_v49 = vsel %vm327_vm4, %v6818_v24, 0  ;;  %v12105_v51 = vsel %vm327_vm4, %v12089_v45, %v6818_v24  ;;  %v10065_v24 = vld [vmem:[%s12656_s2 + $0x4] sm:$0x3] }
0x14cc   : > { %7078 = vrot.lane.b32.xlu1 %v6834_v49, %s10084_s30 }
0x14cd   : > { %v12113_v42 = vpop.permute.xlu0 %6819 }
0x14ce   : > { %v6831_v33 = vsel %vm327_vm4, 0, %v12113_v42  ;;  %v6822_v53 = vpop.permute.xlu1 %6821 }
0x14cf   : > { %7139 = vrot.lane.b32.xlu0 %v6853_v15, %s10085_s7  ;;  %v6824_v36 = vsel %vm327_vm4, %v12113_v42, %v6822_v53  ;;  %v6836_v57 = vsel %vm327_vm4, %v6822_v53, 0 }
0x14d0   : > { %6907 = vrot.lane.b32.xlu1 %v6858_v50, %s10082_s28 }
0x14d3   : > { %7009 = vrot.lane.b32.xlu0 %v6887_v29, %s10083_s29 }
0x14d4   : > { %6909 = vrot.lane.b32.xlu1 %v6854_v48, %s10082_s28 }
0x14d7   : > { %7076 = vrot.lane.b32.xlu0 %v12105_v51, %s10084_s30 }
0x14d8   : > { %7143 = vrot.lane.b32.xlu1 %v6858_v50, %s10085_s7 }
0x14db   : > { %6911 = vrot.lane.b32.xlu0 %v6862_v4, %s10082_s28 }
0x14dc   : > { %7013 = vrot.lane.b32.xlu1 %v6892_v46, %s10083_s29 }
0x14df   : > { %7137 = vrot.lane.b32.xlu0 %v12076_v1, %s10085_s7 }
0x14e0   : > { %7080 = vrot.lane.b32.xlu1 %v6831_v33, %s10084_s30 }
0x14e3   : > { %7202 = vrot.lane.b32.xlu0 %v6887_v29, %s10086_s8 }
0x14e4   : > { %7145 = vrot.lane.b32.xlu1 %v6854_v48, %s10085_s7 }
0x14e7   : > { %7147 = vrot.lane.b32.xlu0 %v6862_v4, %s10085_s7 }
0x14e8   : > { %7015 = vrot.lane.b32.xlu1 %v6888_v31, %s10083_s29 }
0x14eb   : > { %7017 = vrot.lane.b32.xlu0 %v6896_v9, %s10083_s29 }
0x14ec   : > { %7204 = vrot.lane.b32.xlu1 %v6894_v59, %s10086_s8 }
0x14ef   : > { %7200 = vrot.lane.b32.xlu0 %v6890_v30, %s10086_s8 }
0x14f0   : > { %7082 = vrot.lane.b32.xlu1 %v6824_v36, %s10084_s30 }
0x14f3   : > { %7084 = vrot.lane.b32.xlu0 %v6836_v57, %s10084_s30 }
0x14f4   : > { %7206 = vrot.lane.b32.xlu1 %v6892_v46, %s10086_s8 }
0x14f7   : > { %7265 = vrot.lane.b32.xlu0 %v12105_v51, %s10087_s9 }
0x14f8   : > { %7267 = vrot.lane.b32.xlu1 %v6834_v49, %s10087_s9 }
0x14fb   : > { %7263 = vrot.lane.b32.xlu0 %v6828_v8, %s10087_s9 }
0x14fc   : > { %7269 = vrot.lane.b32.xlu1 %v6831_v33, %s10087_s9  ;;  %v10066_v33 = vld [vmem:[%s12656_s2 + $0x6] sm:$0x3] }
0x14ff   : > { %7328 = vrot.lane.b32.xlu0 %v6853_v15, %s10088_s10 }
0x1500   : > { %7208 = vrot.lane.b32.xlu1 %v6888_v31, %s10086_s8 }
0x1503   : > { %7210 = vrot.lane.b32.xlu0 %v6896_v9, %s10086_s8 }
0x1504   : > { %7330 = vrot.lane.b32.xlu1 %v6860_v61, %s10088_s10 }
0x1507   : > { %7326 = vrot.lane.b32.xlu0 %v12076_v1, %s10088_s10 }
0x1508   : > { %7271 = vrot.lane.b32.xlu1 %v6824_v36, %s10087_s9 }
0x150b   : > { %7273 = vrot.lane.b32.xlu0 %v6836_v57, %s10087_s9 }
0x150c   : > { %7334 = vrot.lane.b32.xlu1 %v6854_v48, %s10088_s10 }
0x150f   : > { %7336 = vrot.lane.b32.xlu0 %v6862_v4, %s10088_s10 }
0x1510   : > { %7332 = vrot.lane.b32.xlu1 %v6858_v50, %s10088_s10 }
0x1513   : > { %7391 = vrot.lane.b32.xlu0 %v6887_v29, %s10089_s11 }
0x1514   : > { %7393 = vrot.lane.b32.xlu1 %v6894_v59, %s10089_s11 }
0x1517   : > { %7389 = vrot.lane.b32.xlu0 %v6890_v30, %s10089_s11 }
0x1518   : > { %7397 = vrot.lane.b32.xlu1 %v6888_v31, %s10089_s11 }
0x151b   : > { %7399 = vrot.lane.b32.xlu0 %v6896_v9, %s10089_s11 }
0x151c   : > { %7395 = vrot.lane.b32.xlu1 %v6892_v46, %s10089_s11 }
0x1529   : > { %v6902_v54 = vpop.permute.xlu0 %6901 }
0x152a   : > { %v6906_v39 = vpop.permute.xlu1 %6905 }
0x152d   : > { %v6904_v16 = vpop.permute.xlu0 %6903 }
0x152e   : > { %v6914_v44 = vsel %vm12840_vm12, %v6904_v16, %v6906_v39  ;;  %v6913_v63 = vsel %vm12841_vm10, %v6902_v54, %v6904_v16  ;;  %v7142_v0 = vpop.permute.xlu1 %7141  ;;  %vm12846_vm12 = vmmov %vm12844_vm5  ;;  %vm12847_vm10 = vcmask 908288  }
0x152f   : > { %6921 = vmatprep.subr.bf16.mxu1 %v6914_v44  ;;  %v10067_v44 = vld [vmem:[%s12656_s2 + $0x8] sm:$0x3] }
0x1530   : > { %6922 = vmatpush1.bf16.msra.mxu1 %v6913_v63 }
0x1535   : > { %v7008_v17 = vpop.permute.xlu0 %7007 }
0x1536   : > { %v7012_v47 = vpop.permute.xlu1 %7011 }
0x153d   : > { %v7075_v11 = vpop.permute.xlu0 %7074 }
0x153e   : > { %v7079_v27 = vpop.permute.xlu1 %7078 }
0x1541   : > { %v7140_v26 = vpop.permute.xlu0 %7139 }
0x1542   : > { %v6908_v6 = vpop.permute.xlu1 %6907 }
0x1545   : > { %v7010_v40 = vpop.permute.xlu0 %7009 }
0x1546   : > { %v6910_v62 = vpop.permute.xlu1 %6909  ;;  %v7020_v1 = vsel %vm561_vm8, %v7010_v40, %v7012_v47  ;;  %v7019_v10 = vsel %vm561_vm8, %v7008_v17, %v7010_v40  ;;  %v10068_v40 = vld [vmem:[%s12656_s2 + $0xa] sm:$0x3] }
0x1547   : > { %v6915_v34 = vsel %vm12843_vm15, %v6908_v6, %v6910_v62  ;;  %vm12849_vm15 = vmmov %vm12844_vm5 }
0x1549   : > { %v7077_v41 = vpop.permute.xlu0 %7076 }
0x154a   : > { %v7144_v22 = vpop.permute.xlu1 %7143  ;;  %v7087_v25 = vsel %vm660_vm9, %v7077_v41, %v7079_v27  ;;  %v7086_v8 = vsel %vm660_vm9, %v7075_v11, %v7077_v41 }
0x154d   : > { %v6912_v20 = vpop.permute.xlu0 %6911 }
0x154e   : > { %v7014_v18 = vpop.permute.xlu1 %7013  ;;  %v6916_v23 = vsel %vm12842_vm13, %v6910_v62, %v6912_v20  ;;  %vm12848_vm13 = vmmov %vm12847_vm10 }
0x154f   : > { %6923 = vmatprep.subr.bf16.mxu1 %v6916_v23 }
0x1550   : > { %6924 = vmatpush1.bf16.msra.mxu1 %v6915_v34 }
0x1551   : > { %v7138_v28 = vpop.permute.xlu0 %7137  ;;  %6962 = vmatprep.subr.bf16.mxu1 %v12105_v51  ;;  %v7150_v51 = vsel %vm12847_vm10, %v7140_v26, %v7142_v0 }
0x1552   : > { %v7081_v38 = vpop.permute.xlu1 %7080 }
0x1553   : > { %9456 = vmatmul.mubr.msk.bf16.vlgmr.msra.gmra.mrb[88].mxu1 %vm12844_vm5, %v10063_v60  ;;  %vm12850_vm5 = vmmov %vm12847_vm10 }
0x1554   : > { %9458 = vmatpush1.bf16.msk.msra.mxu1 %vm10516_vm7, %v12089_v45  ;;  %6994 = vmatprep.mubr.bf16.mxu1 %v10081_v21 }
0x1555   : > { %v7203_v12 = vpop.permute.xlu0 %7202  ;;  %6964 = vmatprep.subr.bf16.mxu1 %v6824_v36 }
0x1556   : > { %v7146_v3 = vpop.permute.xlu1 %7145 }
0x1558   : > { %9460 = vmatpush1.bf16.msk.msra.mxu1 %vm10516_vm7, %v12113_v42  ;;  %v7149_v42 = vsel %vm12848_vm13, %v7138_v28, %v7140_v26  ;;  %vm12854_vm13 = vmmov %vm12849_vm15 }
0x1559   : > { %v7148_v61 = vpop.permute.xlu0 %7147  ;;  %7027 = vmatprep.subr.bf16.mxu1 %v7020_v1 }
0x155a   : > { %v7016_v15 = vpop.permute.xlu1 %7015  ;;  %v7152_v31 = vsel %vm12850_vm5, %v7146_v3, %v7148_v61 }
0x155b   : > { %9461 = vmatmul.mubr.msk.bf16.vlgmr.msra.gmra.mrb[92].mxu1 %vm12845_vm11, %v10064_v43  ;;  %v7021_v59 = vsel %vm561_vm8, %v7014_v18, %v7016_v15  ;;  %vm12851_vm11 = vmmov %vm12850_vm5 }
0x155c   : > { %7028 = vmatpush1.bf16.msra.mxu1 %v7019_v10  ;;  %7059 = vmatprep.mubr.bf16.mxu1 %v10081_v21  ;;  %v7151_v36 = vsel %vm12851_vm11, %v7144_v22, %v7146_v3  ;;  %vm12857_vm11 = vcmask 785408  }
0x155d   : > { %v7018_v58 = vpop.permute.xlu0 %7017 }
0x155e   : > { %v7205_v52 = vpop.permute.xlu1 %7204  ;;  %v7022_v30 = vsel %vm561_vm8, %v7016_v15, %v7018_v58  ;;  %v10070_v58 = vld [vmem:[%s12656_s2 + $0xe] sm:$0x3] }
0x155f   : > { %7029 = vmatprep.subr.bf16.mxu1 %v7022_v30 }
0x1560   : > { %7030 = vmatpush1.bf16.msra.mxu1 %v7021_v59 }
0x1561   : > { %v7201_v2 = vpop.permute.xlu0 %7200  ;;  %7094 = vmatprep.subr.bf16.mxu1 %v7087_v25 }
0x1562   : > { %v7083_v45 = vpop.permute.xlu1 %7082 }
0x1563   : > { %9462 = vmatmul.mubr.msk.bf16.vlgmr.msra.gmra.mrb[96].mxu1 %vm12846_vm12, %v10065_v24  ;;  %v7088_v48 = vsel %vm660_vm9, %v7081_v38, %v7083_v45  ;;  %vm12852_vm12 = vcmask 900096   ;;  %v10069_v38 = vld [vmem:[%s12656_s2 + $0xc] sm:$0x3] }
0x1564   : > { %7095 = vmatpush1.bf16.msra.mxu1 %v7086_v8  ;;  %7126 = vmatprep.mubr.bf16.mxu1 %v10081_v21  ;;  %v7213_v57 = vsel %vm12852_vm12, %v7203_v12, %v7205_v52  ;;  %vm12853_vm10 = vmmov %vm12852_vm12 }
0x1565   : > { %v7085_v49 = vpop.permute.xlu0 %7084  ;;  %v7212_v16 = vsel %vm12853_vm10, %v7201_v2, %v7203_v12  ;;  %vm12856_vm5 = vmmov %vm12853_vm10  ;;  %v10071_v2 = vld [vmem:[%s12656_s2 + $0x10] sm:$0x3] }
0x1566   : > { %v7207_v50 = vpop.permute.xlu1 %7206  ;;  %v7089_v29 = vsel %vm660_vm9, %v7083_v45, %v7085_v49  ;;  %vm12858_vm12 = vmmov %vm12857_vm11 }
0x1567   : > { %7096 = vmatprep.subr.bf16.mxu1 %v7089_v29 }
0x1568   : > { %7097 = vmatpush1.bf16.msra.mxu1 %v7088_v48 }
0x1569   : > { %v7266_v4 = vpop.permute.xlu0 %7265  ;;  %7157 = vmatprep.subr.bf16.mxu1 %v7150_v51 }
0x156a   : > { %v7268_v46 = vpop.permute.xlu1 %7267 }
0x156b   : > { %9463 = vmatmul.mubr.msk.bf16.vlgmr.msra.gmra.mrb[100].mxu1 %vm12849_vm15, %v10066_v33  ;;  %vm12855_vm15 = vmmov %vm12853_vm10  ;;  %v7276_v11 = vsel %vm12857_vm11, %v7266_v4, %v7268_v46 }
0x156c   : > { %7158 = vmatpush1.bf16.msra.mxu1 %v7149_v42  ;;  %7189 = vmatprep.mubr.bf16.mxu1 %v10081_v21  ;;  %vm12859_vm10 = vmmov %vm12854_vm13 }
0x156d   : > { %v7264_v9 = vpop.permute.xlu0 %7263  ;;  %7159 = vmatprep.subr.bf16.mxu1 %v7152_v31 }
0x156e   : > { %v7270_v53 = vpop.permute.xlu1 %7269  ;;  %v7275_v6 = vsel %vm12858_vm12, %v7264_v9, %v7266_v4  ;;  %vm12864_vm12 = vmmov %vm12859_vm10 }
0x1570   : > { %7160 = vmatpush1.bf16.msra.mxu1 %v7151_v36 }
0x1571   : > { %v7329_v54 = vpop.permute.xlu0 %7328  ;;  %7220 = vmatprep.subr.bf16.mxu1 %v7213_v57 }
0x1572   : > { %v7209_v39 = vpop.permute.xlu1 %7208 }
0x1573   : > { %9464 = vmatmul.mubr.msk.bf16.vlgmr.msra.gmra.mrb[104].mxu1 %vm12854_vm13, %v10067_v44  ;;  %v7214_v47 = vsel %vm12856_vm5, %v7207_v50, %v7209_v39  ;;  %vm12860_vm13 = vmmov %vm12857_vm11  ;;  %vm12862_vm5 = vcmask 777216  }
0x1574   : > { %7221 = vmatpush1.bf16.msra.mxu1 %v7212_v16  ;;  %7252 = vmatprep.mubr.bf16.mxu1 %v10081_v21 }
0x1575   : > { %v7211_v63 = vpop.permute.xlu0 %7210 }
0x1576   : > { %v7331_v0 = vpop.permute.xlu1 %7330  ;;  %v7215_v17 = vsel %vm12855_vm15, %v7209_v39, %v7211_v63  ;;  %vm12861_vm15 = vmmov %vm12857_vm11 }
0x1577   : > { %7222 = vmatprep.subr.bf16.mxu1 %v7215_v17  ;;  %v7339_v18 = vsel %vm12862_vm5, %v7329_v54, %v7331_v0  ;;  %vm12863_vm11 = vmmov %vm12862_vm5 }
0x1578   : > { %7223 = vmatpush1.bf16.msra.mxu1 %v7214_v47 }
0x1579   : > { %v7327_v27 = vpop.permute.xlu0 %7326  ;;  %7283 = vmatprep.subr.bf16.mxu1 %v7276_v11 }
0x157a   : > { %v7272_v26 = vpop.permute.xlu1 %7271  ;;  %v7338_v28 = vsel %vm12863_vm11, %v7327_v27, %v7329_v54  ;;  %vm12869_vm11 = vcmask 1039360  }
0x157b   : > { %9465 = vmatmul.mubr.msk.bf16.vlgmr.msra.gmra.mrb[108].mxu1 %vm12859_vm10, %v10068_v40  ;;  %v7277_v20 = vsel %vm12861_vm15, %v7270_v53, %v7272_v26  ;;  %vm12865_vm10 = vmmov %vm12862_vm5 }
0x157c   : > { %7284 = vmatpush1.bf16.msra.mxu1 %v7275_v6  ;;  %7315 = vmatprep.mubr.bf16.mxu1 %v10081_v21  ;;  %vm12867_vm15 = vmmov %vm12864_vm12 }
0x157d   : > { %v7274_v62 = vpop.permute.xlu0 %7273 }
0x157e   : > { %v7335_v41 = vpop.permute.xlu1 %7334  ;;  %v7278_v22 = vsel %vm12860_vm13, %v7272_v26, %v7274_v62  ;;  %vm12866_vm13 = vmmov %vm12862_vm5 }
0x157f   : > { %7285 = vmatprep.subr.bf16.mxu1 %v7278_v22  ;;  %vm12868_vm5 = vmmov %vm12864_vm12 }
0x1580   : > { %7286 = vmatpush1.bf16.msra.mxu1 %v7277_v20 }
0x1581   : > { %v7337_v23 = vpop.permute.xlu0 %7336  ;;  %7346 = vmatprep.subr.bf16.mxu1 %v7339_v18 }
0x1582   : > { %v7333_v34 = vpop.permute.xlu1 %7332  ;;  %v7341_v60 = vsel %vm12865_vm10, %v7335_v41, %v7337_v23  ;;  %vm12871_vm10 = vcmask 31744  }
0x1583   : > { %9466 = vmatmul.mubr.msk.bf16.vlgmr.msra.gmra.mrb[112].mxu1 %vm12864_vm12, %v10069_v38  ;;  %v7340_v1 = vsel %vm12866_vm13, %v7333_v34, %v7335_v41  ;;  %vm12870_vm12 = vmmov %vm12869_vm11 }
0x1584   : > { %7347 = vmatpush1.bf16.msra.mxu1 %v7338_v28  ;;  %7378 = vmatprep.mubr.bf16.mxu1 %v10081_v21  ;;  %vm12872_vm13 = vmmov %vm12871_vm10 }
0x1585   : > { %v7392_v12 = vpop.permute.xlu0 %7391  ;;  %7348 = vmatprep.subr.bf16.mxu1 %v7341_v60 }
0x1586   : > { %v7394_v3 = vpop.permute.xlu1 %7393 }
0x1587   : > { %v7402_v61 = vsel %vm1145_vm14, %v7392_v12, %v7394_v3 }
0x1588   : > { %7349 = vmatpush1.bf16.msra.mxu1 %v7340_v1 }
0x1589   : > { %v7390_v15 = vpop.permute.xlu0 %7389  ;;  %7409 = vmatprep.subr.bf16.mxu1 %v7402_v61 }
0x158a   : > { %v7401_v43 = vsel %vm1145_vm14, %v7390_v15, %v7392_v12  ;;  %v7398_v10 = vpop.permute.xlu1 %7397 }
0x158b   : > { %9467 = vmatmul.mubr.msk.bf16.vlgmr.msra.gmra.mrb[116].mxu1 %vm12867_vm15, %v10070_v58  ;;  %vm12873_vm15 = vmmov %vm12871_vm10 }
0x158c   : > { %7410 = vmatpush1.bf16.msra.mxu1 %v7401_v43  ;;  %7441 = vmatprep.mubr.bf16.mxu1 %v10081_v21 }
0x158d   : > { %v7400_v52 = vpop.permute.xlu0 %7399 }
0x158e   : > { %v7396_v30 = vpop.permute.xlu1 %7395  ;;  %v7404_v59 = vsel %vm1145_vm14, %v7398_v10, %v7400_v52 }
0x158f   : > { %v7403_v25 = vsel %vm1145_vm14, %v7396_v30, %v7398_v10  ;;  %7411 = vmatprep.subr.bf16.mxu1 %v7404_v59 }
0x1590   : > { %7412 = vmatpush1.bf16.msra.mxu1 %v7403_v25 }
0x1593   : > { %9468 = vmatmul.mubr.msk.bf16.vlgmr.msra.gmra.mrb[120].mxu1 %vm12868_vm5, %v10071_v2  ;;  %vm12874_vm5 = vmmov %vm12871_vm10 }
0x1594   : > { %7590 = vmatprep.mubr.bf16.mxu1 %v10081_v21 }
0x1626   : > { %v6955_v45 = vpop.f32.mrb[88].mxu1 }
0x1627   : > { %v6957_v24 = vpop.f32.mrb[89].mxu1 }
0x1628   : > { %v6959_v8 = vpop.f32.mrb[90].mxu1 }
0x1629   : > { %v6960_v49 = vpop.f32.mrb[91].mxu1 }
0x162e   : > { %v6996_v50 = vpop.f32.mrb[92].mxu1 }
0x162f   : > { %v6997_v29 = vadd.f32 %v6996_v50, %v6955_v45  ;;  %v6998_v48 = vpop.f32.mrb[93].mxu1 }
0x1630   : > { %v6999_v51 = vadd.f32 %v6998_v48, %v6957_v24  ;;  %v7000_v4 = vpop.f32.mrb[94].mxu1 }
0x1631   : > { %v7001_v46 = vpop.f32.mrb[95].mxu1 }
0x1636   : > { %v7061_v42 = vpop.f32.mrb[96].mxu1 }
0x1637   : > { %v7068_v33 = vadd.f32 %v7061_v42, %v6997_v29  ;;  %v7063_v31 = vpop.f32.mrb[97].mxu1 }
0x1638   : > { %v7069_v9 = vadd.f32 %v7063_v31, %v6999_v51  ;;  %v7065_v53 = vpop.f32.mrb[98].mxu1 }
0x1639   : > { %v7066_v36 = vpop.f32.mrb[99].mxu1 }
0x163e   : > { %v7128_v57 = vpop.f32.mrb[100].mxu1 }
0x163f   : > { %v7135_v54 = vadd.f32 %v7128_v57, %v7068_v33  ;;  %v7130_v39 = vpop.f32.mrb[101].mxu1 }
0x1640   : > { %v7136_v16 = vadd.f32 %v7130_v39, %v7069_v9  ;;  %v7132_v44 = vpop.f32.mrb[102].mxu1 }
0x1641   : > { %v7133_v63 = vpop.f32.mrb[103].mxu1 }
0x1646   : > { %v7191_v0 = vpop.f32.mrb[104].mxu1 }
0x1647   : > { %v7198_v17 = vadd.f32 %v7191_v0, %v7135_v54  ;;  %v7193_v47 = vpop.f32.mrb[105].mxu1 }
0x1648   : > { %v7199_v11 = vadd.f32 %v7193_v47, %v7136_v16  ;;  %v7195_v27 = vpop.f32.mrb[106].mxu1 }
0x1649   : > { %v7196_v26 = vpop.f32.mrb[107].mxu1 }
0x164e   : > { %v7254_v6 = vpop.f32.mrb[108].mxu1 }
0x164f   : > { %v7261_v40 = vadd.f32 %v7254_v6, %v7198_v17  ;;  %v7256_v62 = vpop.f32.mrb[109].mxu1  ;;  %v9206_v6 = vld [vmem:[%s12657_s3 + $0x20] sm:$0xff] }
0x1650   : > { %v7262_v41 = vadd.f32 %v7256_v62, %v7199_v11  ;;  %v7258_v22 = vpop.f32.mrb[110].mxu1  ;;  %v9208_v62 = vld [vmem:[%s12657_s3 + $0x30] sm:$0xff] }
0x1651   : > { %v7259_v20 = vpop.f32.mrb[111].mxu1 }
0x1656   : > { %v7317_v18 = vpop.f32.mrb[112].mxu1 }
0x1657   : > { %v7324_v23 = vadd.f32 %v7317_v18, %v7261_v40  ;;  %v7319_v34 = vpop.f32.mrb[113].mxu1  ;;  %v9207_v40 = vld [vmem:[%s12657_s3 + $0x28] sm:$0xff] }
0x1658   : > { %v7325_v28 = vadd.f32 %v7319_v34, %v7262_v41  ;;  %v7321_v38 = vpop.f32.mrb[114].mxu1  ;;  %v9209_v41 = vld [vmem:[%s12657_s3 + $0x38] sm:$0xff] }
0x1659   : > { %v7322_v60 = vpop.f32.mrb[115].mxu1 }
0x165a   : > { %v10000_v60 = vld [vmem:[%s12655_s1 + $0xa0] sm:$0xff]  }
0x165e   : > { %v7380_v12 = vpop.f32.mrb[116].mxu1 }
0x165f   : > { %v7387_v3 = vadd.f32 %v7380_v12, %v7324_v23  ;;  %v7382_v1 = vpop.f32.mrb[117].mxu1 }
0x1660   : > { %v7388_v61 = vadd.f32 %v7382_v1, %v7325_v28  ;;  %v7384_v15 = vpop.f32.mrb[118].mxu1 }
0x1661   : > { %v7385_v43 = vpop.f32.mrb[119].mxu1  ;;  %v10001_v15 = vld [vmem:[%s12655_s1 + $0xa8] sm:$0xff]  }
0x1666   : > { %v7443_v10 = vpop.f32.mrb[120].mxu1 }
0x1667   : > { %v7450_v58 = vadd.f32 %v7443_v10, %v7387_v3  ;;  %v7445_v52 = vpop.f32.mrb[121].mxu1  ;;  %v10002_v10 = vld [vmem:[%s12655_s1 + $0x90] sm:$0xff]  }
0x1668   : > { %v7451_v30 = vadd.f32 %v7445_v52, %v7388_v61  ;;  %v7447_v59 = vpop.f32.mrb[122].mxu1 }
0x1669   : > { %v7452_v25 = vadd.f32 %v7450_v58, %v10622_v32  ;;  %v7448_v2 = vpop.f32.mrb[123].mxu1 }
0x166a   : > { %v7453_v45 = vadd.f32 %v7451_v30, %v10622_v32  ;;  %v10003_v2 = vld [vmem:[%s12655_s1 + $0x98] sm:$0xff]  }
0x166b   : > { %v7462_v24 = vadd.f32 %v11873_v19, %v7452_v25 }
0x166c   : > { %v7463_v8 = vadd.f32 %v11876_v55, %v7453_v45 }
0x166d   : > { %v7464_v49 = vmul.f32 0.016666668, %v7462_v24  ;;  %v10004_v24 = vld [vmem:[%s12655_s1 + $0xb0] sm:$0xff]  }
0x166e   : > { %v7465_v50 = vmul.f32 0.016666668, %v7463_v8 }
0x166f   : > { %v7466_v29 = vadd.f32 %v7464_v49, %v10625_v35 }
0x1670   : > { %v7467_v48 = vadd.f32 %v7465_v50, %v10628_v37 }
0x1671   : > { %v7488_v51 = vpack.c.bf16 %v7466_v29, %v7466_v29  ;;  %v7501_v32 = vsel %vm10139_vm0, %v7466_v29, 0.0  ;;  %v7473_v55 = vsel %vm10143_vm1, %v7466_v29, 0.0 }
0x1672   : > { %v7470_v4 = vcombine.low %v7466_v29, %v7467_v48  ;;  %v7489_v46 = vpack.c.bf16 %v7467_v48, %v7467_v48  ;;  %v7502_v19 = vsel %vm10151_vm2, %v7467_v48, 0.0  ;;  %v7503_v35 = vpack.c.bf16 %v7501_v32, %v7501_v32 }
0x1673   : > { %7492 = vrot.lane.b32.xlu0 %v7488_v51, %s10080_s27  ;;  %v7504_v37 = vpack.c.bf16 %v7502_v19, %v7502_v19  ;;  %v7474_v42 = vsel %vm10155_vm3, %v7467_v48, 0.0  ;;  %v7475_v33 = vpack.c.bf16 %v7473_v55, %v7473_v55  ;;  %v10005_v51 = vld [vmem:[%s12655_s1 + $0xb8] sm:$0xff]  }
0x1674   : > { %7472 = vst [vmem:[%s259_s17] sm:$0xff] %v7470_v4  ;;  %7494 = vrot.lane.b32.xlu1 %v7489_v46, %s10080_s27  ;;  %v7476_v31 = vpack.c.bf16 %v7474_v42, %v7474_v42  ;;  %v10006_v46 = vld [vmem:[%s12655_s1 + $0xc0] sm:$0xff]   ;;  %v10007_v42 = vld [vmem:[%s12655_s1 + $0xc8] sm:$0xff]  }
0x1677   : > { %7507 = vrot.lane.b32.xlu0 %v7503_v35, %s10080_s27 }
0x1678   : > { %7509 = vrot.lane.b32.xlu1 %v7504_v37, %s10080_s27 }
0x167b   : > { %7479 = vrot.lane.b32.xlu0 %v7475_v33, %s10080_s27 }
0x167c   : > { %7481 = vrot.lane.b32.xlu1 %v7476_v31, %s10080_s27  ;;  %v10008_v31 = vld [vmem:[%s12655_s1 + $0xd0] sm:$0xff]  }
0x16e5   : > { %v7493_v9 = vpop.permute.xlu0 %7492 }
0x16e6   : > { %v7498_v53 = vsel %vm327_vm4, 0, %v7493_v9  ;;  %v7495_v36 = vpop.permute.xlu1 %7494 }
0x16e7   : > { %v7496_v57 = vsel %vm327_vm4, %v7493_v9, %v7495_v36  ;;  %7538 = vrot.lane.b32.xlu0 %v7498_v53, %s10082_s28  ;;  %v7500_v39 = vsel %vm327_vm4, %v7495_v36, 0 }
0x16e8   : > { %7540 = vrot.lane.b32.xlu1 %v7496_v57, %s10082_s28 }
0x16e9   : > { %v7508_v54 = vpop.permute.xlu0 %7507 }
0x16ea   : > { %v7513_v16 = vsel %vm327_vm4, 0, %v7508_v54  ;;  %v7510_v44 = vpop.permute.xlu1 %7509 }
0x16eb   : > { %7542 = vrot.lane.b32.xlu0 %v7500_v39, %s10082_s28  ;;  %v7511_v63 = vsel %vm327_vm4, %v7508_v54, %v7510_v44  ;;  %v7515_v0 = vsel %vm327_vm4, %v7510_v44, 0  ;;  %v10010_v44 = vld [vmem:[%s12655_s1 + $0xe0] sm:$0xff]  }
0x16ec   : > { %7702 = vrot.lane.b32.xlu1 %v7513_v16, %s10083_s29 }
0x16ed   : > { %v7480_v17 = vpop.permute.xlu0 %7479 }
0x16ee   : > { %v7482_v47 = vpop.permute.xlu1 %7481  ;;  %v7485_v11 = vsel %vm327_vm4, 0, %v7480_v17 }
0x16ef   : > { %7704 = vrot.lane.b32.xlu0 %v7511_v63, %s10083_s29  ;;  %v7483_v27 = vsel %vm327_vm4, %v7480_v17, %v7482_v47  ;;  %v7487_v26 = vsel %vm327_vm4, %v7482_v47, 0  ;;  %v7627_v61 = vsel %vm404_vm6, %v7485_v11, 0 }
0x16f0   : > { %7706 = vrot.lane.b32.xlu1 %v7515_v0, %s10083_s29 }
0x16f3   : > { %7800 = vrot.lane.b32.xlu0 %v7485_v11, %s10084_s30 }
0x16f4   : > { %7802 = vrot.lane.b32.xlu1 %v7483_v27, %s10084_s30 }
0x16f7   : > { %7804 = vrot.lane.b32.xlu0 %v7487_v26, %s10084_s30 }
0x16f8   : > { %7896 = vrot.lane.b32.xlu1 %v7498_v53, %s10085_s7 }
0x16fb   : > { %7898 = vrot.lane.b32.xlu0 %v7496_v57, %s10085_s7 }
0x16fc   : > { %7900 = vrot.lane.b32.xlu1 %v7500_v39, %s10085_s7 }
0x16ff   : > { %7992 = vrot.lane.b32.xlu0 %v7513_v16, %s10086_s8 }
0x1700   : > { %7994 = vrot.lane.b32.xlu1 %v7511_v63, %s10086_s8 }
0x1703   : > { %7996 = vrot.lane.b32.xlu0 %v7515_v0, %s10086_s8 }
0x1704   : > { %8088 = vrot.lane.b32.xlu1 %v7485_v11, %s10087_s9 }
0x1707   : > { %8090 = vrot.lane.b32.xlu0 %v7483_v27, %s10087_s9 }
0x1708   : > { %8092 = vrot.lane.b32.xlu1 %v7487_v26, %s10087_s9 }
0x170b   : > { %8184 = vrot.lane.b32.xlu0 %v7498_v53, %s10088_s10 }
0x170c   : > { %8186 = vrot.lane.b32.xlu1 %v7496_v57, %s10088_s10 }
0x170f   : > { %8188 = vrot.lane.b32.xlu0 %v7500_v39, %s10088_s10  ;;  %v10009_v39 = vld [vmem:[%s12655_s1 + $0xd8] sm:$0xff]  }
0x1710   : > { %8280 = vrot.lane.b32.xlu1 %v7513_v16, %s10089_s11 }
0x1713   : > { %8282 = vrot.lane.b32.xlu0 %v7511_v63, %s10089_s11 }
0x1714   : > { %8284 = vrot.lane.b32.xlu1 %v7515_v0, %s10089_s11 }
0x1717   : > { %8363 = vperm.xlu0 %9979, %v9206_v6   ;;  %v10012_v6 = vld [vmem:[%s12655_s1 + $0xf0] sm:$0xff]  }
0x1718   : > { %8368 = vperm.xlu1 %9980, %v9207_v40  }
0x171b   : > { %8373 = vperm.xlu0 %9979, %v9208_v62  }
0x171c   : > { %8378 = vperm.xlu1 %9980, %v9209_v41  }
0x1759   : > { %v7539_v22 = vpop.permute.xlu0 %7538 }
0x175a   : > { %v7541_v20 = vpop.permute.xlu1 %7540 }
0x175b   : > { %v7544_v18 = vsel %vm12869_vm11, %v7539_v22, %v7541_v20  ;;  %vm12875_vm11 = vmmov %vm12874_vm5 }
0x175c   : > { %v7553_v38 = vsel %vm404_vm6, %v7544_v18, 0  ;;  %v10013_v18 = vld [vmem:[%s12655_s1 + $0xf8] sm:$0xff]  }
0x175d   : > { %v7543_v23 = vpop.permute.xlu0 %7542 }
0x175e   : > { %v7545_v34 = vsel %vm12870_vm12, %v7541_v20, %v7543_v23  ;;  %v7703_v28 = vpop.permute.xlu1 %7702  ;;  %vm12876_vm12 = vcmask 908288   ;;  %v10014_v23 = vld [vmem:[%s12655_s1 + $0x100] sm:$0xff]  }
0x175f   : > { %9479 = vmatprep.subr.msk.bf16.mxu1 %vm404_vm6, %v7545_v34 }
0x1760   : > { %7559 = vmatpush1.bf16.msra.mxu1 %v7553_v38  ;;  %v10015_v38 = vld [vmem:[%s12655_s1 + $0x108] sm:$0xff]  }
0x1761   : > { %v7705_v12 = vpop.permute.xlu0 %7704  ;;  %9484 = vmatprep.subr.msk.bf16.mxu1 %vm404_vm6, %v7483_v27  ;;  %v10011_v27 = vld [vmem:[%s12655_s1 + $0xe8] sm:$0xff]  }
0x1762   : > { %v7707_v3 = vpop.permute.xlu1 %7706  ;;  %v7708_v58 = vsel %vm561_vm8, %v7703_v28, %v7705_v12 }
0x1763   : > { %v7709_v1 = vsel %vm561_vm8, %v7705_v12, %v7707_v3  ;;  %9480 = vmatmul.mubr.msk.bf16.vlgmr.msra.gmra.mrb[124].mxu1 %vm12871_vm10, %v10000_v60  ;;  %v7717_v30 = vsel %vm404_vm6, %v7708_v58, 0  ;;  %vm12877_vm10 = vmmov %vm12874_vm5  ;;  %v10016_v60 = vld [vmem:[%s12655_s1 + $0x110] sm:$0xff]   ;;  %v10017_v12 = vld [vmem:[%s12655_s1 + $0x118] sm:$0xff]  }
0x1764   : > { %7633 = vmatpush1.bf16.msra.mxu1 %v7627_v61  ;;  %7600 = vmatprep.mubr.bf16.mxu1 %v10081_v21 }
0x1765   : > { %9493 = vmatprep.subr.msk.bf16.mxu1 %vm404_vm6, %v7709_v1  ;;  %v7801_v43 = vpop.permute.xlu0 %7800 }
0x1766   : > { %v7803_v59 = vpop.permute.xlu1 %7802 }
0x1767   : > { %v7806_v8 = vsel %vm660_vm9, %v7801_v43, %v7803_v59 }
0x1768   : > { %v7815_v29 = vsel %vm404_vm6, %v7806_v8, 0 }
0x1769   : > { %v7805_v52 = vpop.permute.xlu0 %7804 }
0x176a   : > { %v7807_v25 = vsel %vm660_vm9, %v7803_v59, %v7805_v52  ;;  %v7897_v45 = vpop.permute.xlu1 %7896 }
0x176b   : > { %9481 = vmatmul.mubr.msk.bf16.gmra.mrb[128].mxu1 %vm12872_vm13, %v10001_v15  ;;  %vm12878_vm13 = vmmov %vm12876_vm12 }
0x176c   : > { %7664 = vmatprep.mubr.bf16.mxu1 %v10081_v21 }
0x176d   : > { %v7899_v49 = vpop.permute.xlu0 %7898 }
0x176e   : > { %v7901_v50 = vpop.permute.xlu1 %7900  ;;  %v7902_v32 = vsel %vm12878_vm13, %v7897_v45, %v7899_v49  ;;  %vm12883_vm13 = vcmask 785408  }
0x176f   : > { %v7903_v48 = vsel %vm12876_vm12, %v7899_v49, %v7901_v50  ;;  %v7911_v35 = vsel %vm404_vm6, %v7902_v32, 0 }
0x1771   : > { %v7993_v4 = vpop.permute.xlu0 %7992 }
0x1772   : > { %v7995_v37 = vpop.permute.xlu1 %7994 }
0x1773   : > { %9485 = vmatmul.mubr.msk.bf16.vlgmr.msra.gmra.mrb[124].mxu1 %vm12873_vm15, %v10002_v10  ;;  %vm12879_vm15 = vmmov %vm12874_vm5 }
0x1774   : > { %7723 = vmatpush1.bf16.msra.mxu1 %v7717_v30  ;;  %7674 = vmatprep.mubr.bf16.mxu1 %v10081_v21 }
0x1775   : > { %9502 = vmatprep.subr.msk.bf16.mxu1 %vm404_vm6, %v7807_v25  ;;  %v7997_v19 = vpop.permute.xlu0 %7996 }
0x1776   : > { %v8089_v33 = vpop.permute.xlu1 %8088 }
0x1779   : > { %v8091_v53 = vpop.permute.xlu0 %8090 }
0x177a   : > { %v8093_v36 = vpop.permute.xlu1 %8092 }
0x177b   : > { %9486 = vmatmul.mubr.msk.bf16.gmra.mrb[128].mxu1 %vm12874_vm5, %v10003_v2  ;;  %vm12880_vm5 = vcmask 900096   ;;  %v8095_v54 = vsel %vm12883_vm13, %v8091_v53, %v8093_v36 }
0x177c   : > { %7754 = vmatprep.mubr.bf16.mxu1 %v10081_v21  ;;  %v7999_v55 = vsel %vm12880_vm5, %v7995_v37, %v7997_v19  ;;  %vm12882_vm12 = vmmov %vm12880_vm5 }
0x177d   : > { %v7998_v9 = vsel %vm12882_vm12, %v7993_v4, %v7995_v37  ;;  %v8185_v16 = vpop.permute.xlu0 %8184  ;;  %vm12885_vm5 = vmmov %vm12883_vm13  ;;  %vm12887_vm12 = vcmask 777216  }
0x177e   : > { %v8007_v57 = vsel %vm404_vm6, %v7998_v9, 0  ;;  %v8094_v63 = vsel %vm12885_vm5, %v8089_v33, %v8091_v53  ;;  %v8187_v47 = vpop.permute.xlu1 %8186  ;;  %vm12888_vm13 = vmmov %vm12887_vm12 }
0x177f   : > { %v8103_v17 = vsel %vm404_vm6, %v8094_v63, 0  ;;  %v8190_v40 = vsel %vm12888_vm13, %v8185_v16, %v8187_v47  ;;  %vm12890_vm5 = vmmov %vm12877_vm10 }
0x1780   : > { %v8199_v22 = vsel %vm404_vm6, %v8190_v40, 0 }
0x1781   : > { %v8189_v0 = vpop.permute.xlu0 %8188 }
0x1782   : > { %v8191_v11 = vsel %vm12887_vm12, %v8187_v47, %v8189_v0  ;;  %v8281_v26 = vpop.permute.xlu1 %8280  ;;  %vm12892_vm12 = vmmov %vm12890_vm5 }
0x1783   : > { %9494 = vmatmul.mubr.msk.bf16.vlgmr.msra.gmra.mrb[124].mxu1 %vm12875_vm11, %v10004_v24  ;;  %vm12881_vm11 = vmmov %vm12877_vm10 }
0x1784   : > { %7821 = vmatpush1.bf16.msra.mxu1 %v7815_v29  ;;  %7764 = vmatprep.mubr.bf16.mxu1 %v10081_v21 }
0x1785   : > { %9511 = vmatprep.subr.msk.bf16.mxu1 %vm404_vm6, %v7903_v48  ;;  %v8283_v62 = vpop.permute.xlu0 %8282 }
0x1786   : > { %v8285_v41 = vpop.permute.xlu1 %8284  ;;  %v8286_v34 = vsel %vm1145_vm14, %v8281_v26, %v8283_v62 }
0x1787   : > { %v8287_v20 = vsel %vm1145_vm14, %v8283_v62, %v8285_v41  ;;  %v8295_v28 = vsel %vm404_vm6, %v8286_v34, 0 }
0x178b   : > { %9495 = vmatmul.mubr.msk.bf16.gmra.mrb[128].mxu1 %vm12877_vm10, %v10005_v51 }
0x178c   : > { %7852 = vmatprep.mubr.bf16.mxu1 %v10081_v21 }
0x1793   : > { %9503 = vmatmul.mubr.msk.bf16.vlgmr.msra.gmra.mrb[124].mxu1 %vm12879_vm15, %v10006_v46  ;;  %vm12884_vm15 = vmmov %vm12877_vm10 }
0x1794   : > { %7917 = vmatpush1.bf16.msra.mxu1 %v7911_v35  ;;  %7862 = vmatprep.mubr.bf16.mxu1 %v10081_v21 }
0x1795   : > { %9520 = vmatprep.subr.msk.bf16.mxu1 %vm404_vm6, %v7999_v55 }
0x1796   : > { %v8364_v3 = vpop.permute.xlu0 %8363 }
0x1797   : > { %v8369_v43 = vpop.permute.xlu1 %8368 }
0x179a   : > { %v8374_v4 = vpop.permute.xlu0 %8373 }
0x179b   : > { %9504 = vmatmul.mubr.msk.bf16.gmra.mrb[128].mxu1 %vm12881_vm11, %v10007_v42  ;;  %vm12886_vm11 = vmmov %vm12877_vm10  ;;  %v8379_v53 = vpop.permute.xlu1 %8378 }
0x179c   : > { %7948 = vmatprep.mubr.bf16.mxu1 %v10081_v21 }
0x17a3   : > { %9512 = vmatmul.mubr.msk.bf16.vlgmr.msra.gmra.mrb[124].mxu1 %vm12877_vm10, %v10008_v31 }
0x17a4   : > { %8013 = vmatpush1.bf16.msra.mxu1 %v8007_v57  ;;  %7958 = vmatprep.mubr.bf16.mxu1 %v10081_v21 }
0x17a5   : > { %9529 = vmatprep.subr.msk.bf16.mxu1 %vm404_vm6, %v8095_v54 }
0x17ab   : > { %9513 = vmatmul.mubr.msk.bf16.gmra.mrb[128].mxu1 %vm12884_vm15, %v10009_v39  ;;  %vm12889_vm15 = vmmov %vm12877_vm10 }
0x17ac   : > { %8044 = vmatprep.mubr.bf16.mxu1 %v10081_v21 }
0x17b3   : > { %9521 = vmatmul.mubr.msk.bf16.vlgmr.msra.gmra.mrb[124].mxu1 %vm12886_vm11, %v10010_v44  ;;  %vm12891_vm11 = vmmov %vm12890_vm5 }
0x17b4   : > { %8109 = vmatpush1.bf16.msra.mxu1 %v8103_v17  ;;  %8054 = vmatprep.mubr.bf16.mxu1 %v10081_v21 }
0x17b5   : > { %9538 = vmatprep.subr.msk.bf16.mxu1 %vm404_vm6, %v8191_v11 }
0x17bb   : > { %9522 = vmatmul.mubr.msk.bf16.gmra.mrb[128].mxu1 %vm12877_vm10, %v10011_v27  ;;  %vm12893_vm10 = vmmov %vm12890_vm5 }
0x17bc   : > { %8140 = vmatprep.mubr.bf16.mxu1 %v10081_v21 }
0x17c3   : > { %9530 = vmatmul.mubr.msk.bf16.vlgmr.msra.gmra.mrb[124].mxu1 %vm12889_vm15, %v10012_v6 }
0x17c4   : > { %8205 = vmatpush1.bf16.msra.mxu1 %v8199_v22  ;;  %8150 = vmatprep.mubr.bf16.mxu1 %v10081_v21 }
0x17c5   : > { %9547 = vmatprep.subr.msk.bf16.mxu1 %vm404_vm6, %v8287_v20  ;;  %vm12894_vm6 = vmmov %vm12890_vm5 }
0x17cb   : > { %9531 = vmatmul.mubr.msk.bf16.gmra.mrb[128].mxu1 %vm12890_vm5, %v10013_v18 }
0x17cc   : > { %8236 = vmatprep.mubr.bf16.mxu1 %v10081_v21 }
0x17d3   : > { %9539 = vmatmul.mubr.msk.bf16.vlgmr.msra.gmra.mrb[124].mxu1 %vm12891_vm11, %v10014_v23 }
0x17d4   : > { %8301 = vmatpush1.bf16.msra.mxu1 %v8295_v28  ;;  %8246 = vmatprep.mubr.bf16.mxu1 %v10081_v21 }
0x17db   : > { %9540 = vmatmul.mubr.msk.bf16.gmra.mrb[128].mxu1 %vm12892_vm12, %v10015_v38  ;;  %vm12907_vm12 = vcmask 900096  }
0x17dc   : > { %8332 = vmatprep.mubr.bf16.mxu1 %v10081_v21 }
0x17e3   : > { %9548 = vmatmul.mubr.msk.bf16.vlgmr.msra.gmra.mrb[124].mxu1 %vm12893_vm10, %v10016_v60  ;;  %vm12908_vm10 = vmmov %vm12907_vm12 }
0x17e4   : > { %8342 = vmatprep.mubr.bf16.mxu1 %v10081_v21 }
0x17eb   : > { %9549 = vmatmul.mubr.msk.bf16.gmra.mrb[128].mxu1 %vm12894_vm6, %v10017_v12 }
0x18b6   : > { %v8334_v1 = vpop.f32.mrb[124].mxu1 }
0x18b7   : > { %v8381_v61 = vadd.f32 %v8364_v3, %v8334_v1  ;;  %v8336_v15 = vpop.f32.mrb[125].mxu1 }
0x18b8   : > { %v8382_v10 = vadd.f32 %v8364_v3, %v8336_v15  ;;  %v8338_v58 = vpop.f32.mrb[126].mxu1 }
0x18b9   : > { %v8389_v52 = vmax.f32 %v8381_v61, 0.0  ;;  %v8383_v30 = vadd.f32 %v8369_v43, %v8338_v58  ;;  %v8340_v59 = vpop.f32.mrb[127].mxu1 }
0x18ba   : > { %v8390_v25 = vmax.f32 %v8382_v10, 0.0  ;;  %v8384_v2 = vadd.f32 %v8369_v43, %v8340_v59 }
0x18bb   : > { %v8391_v45 = vmax.f32 %v8383_v30, 0.0  ;;  %v8397_v24 = vsel %vm10143_vm1, %v8389_v52, 0.0  ;;  %v8461_v8 = vsel %vm10139_vm0, %v8389_v52, 0.0 }
0x18bc   : > { %v8392_v49 = vmax.f32 %v8384_v2, 0.0  ;;  %v8398_v50 = vsel %vm10155_vm3, %v8390_v25, 0.0  ;;  %v8462_v55 = vsel %vm10151_vm2, %v8390_v25, 0.0 }
0x18bd   : > { %v8399_v29 = vsel %vm10143_vm1, %v8391_v45, 0.0  ;;  %v8435_v48 = vpack.c.bf16 %v8391_v45, %v8389_v52  ;;  %v8463_v51 = vsel %vm10139_vm0, %v8391_v45, 0.0 }
0x18be   : > { %v8405_v46 = vpack.c.bf16 %v8399_v29, %v8397_v24  ;;  %v8469_v32 = vpack.c.bf16 %v8463_v51, %v8461_v8  ;;  %v8400_v19 = vsel %vm10155_vm3, %v8392_v49, 0.0  ;;  %v8436_v35 = vpack.c.bf16 %v8392_v49, %v8390_v25  ;;  %v8344_v37 = vpop.f32.mrb[128].mxu1 }
0x18bf   : > { %v8406_v42 = vpack.c.bf16 %v8400_v19, %v8398_v50  ;;  %v8464_v33 = vsel %vm10151_vm2, %v8392_v49, 0.0  ;;  %v8385_v31 = vadd.f32 %v8374_v4, %v8344_v37  ;;  %8443 = vrot.lane.b32.xlu0 %v8435_v48, %s10080_s27  ;;  %v8346_v9 = vpop.f32.mrb[129].mxu1 }
0x18c0   : > { %v8470_v36 = vpack.c.bf16 %v8464_v33, %v8462_v55  ;;  %v8386_v57 = vadd.f32 %v8374_v4, %v8346_v9  ;;  %8445 = vrot.lane.b32.xlu1 %v8436_v35, %s10080_s27  ;;  %v8348_v54 = vpop.f32.mrb[130].mxu1  ;;  %v9210_v35 = vld [vmem:[%s12658_s4 + $0x4] sm:$0xf] }
0x18c1   : > { %v8393_v39 = vmax.f32 %v8385_v31, 0.0  ;;  %v8387_v16 = vadd.f32 %v8379_v53, %v8348_v54  ;;  %v8350_v44 = vpop.f32.mrb[131].mxu1 }
0x18c2   : > { %v8394_v63 = vmax.f32 %v8386_v57, 0.0  ;;  %v8388_v0 = vadd.f32 %v8379_v53, %v8350_v44 }
0x18c3   : > { %v8395_v17 = vmax.f32 %v8387_v16, 0.0  ;;  %v8401_v47 = vsel %vm10143_vm1, %v8393_v39, 0.0  ;;  %v8465_v11 = vsel %vm10139_vm0, %v8393_v39, 0.0 }
0x18c4   : > { %v8396_v27 = vmax.f32 %v8388_v0, 0.0  ;;  %v8402_v26 = vsel %vm10155_vm3, %v8394_v63, 0.0  ;;  %v8466_v23 = vsel %vm10151_vm2, %v8394_v63, 0.0 }
0x18c5   : > { %v8403_v6 = vsel %vm10143_vm1, %v8395_v17, 0.0  ;;  %v8437_v40 = vpack.c.bf16 %v8395_v17, %v8393_v39  ;;  %v8467_v62 = vsel %vm10139_vm0, %v8395_v17, 0.0  ;;  %vm12895_vm0 = vcmask 1039360  }
0x18c6   : > { %v8407_v41 = vpack.c.bf16 %v8403_v6, %v8401_v47  ;;  %v8471_v22 = vpack.c.bf16 %v8467_v62, %v8465_v11  ;;  %v8404_v20 = vsel %vm10155_vm3, %v8396_v27, 0.0  ;;  %v8438_v18 = vpack.c.bf16 %v8396_v27, %v8394_v63  ;;  %vm12896_vm1 = vmmov %vm12895_vm0  ;;  %v9551_v6 = vld [vmem:[%s12656_s2 + $0x14] sm:$0x3] }
0x18c7   : > { %v8408_v34 = vpack.c.bf16 %v8404_v20, %v8402_v26  ;;  %v8468_v28 = vsel %vm10151_vm2, %v8396_v27, 0.0  ;;  %8447 = vrot.lane.b32.xlu0 %v8437_v40, %s10080_s27  ;;  %vm12897_vm2 = vmmov %vm12895_vm0 }
0x18c8   : > { %v8472_v7 = vpack.c.bf16 %v8468_v28, %v8466_v23  ;;  %8449 = vrot.lane.b32.xlu1 %v8438_v18, %s10080_s27  ;;  %vm12898_vm3 = vmmov %vm12895_vm0  ;;  %v9550_v18 = vld [vmem:[%s12656_s2 + $0x12] sm:$0x3] }
0x18cb   : > { %8477 = vrot.lane.b32.xlu0 %v8469_v32, %s10080_s27 }
0x18cc   : > { %8479 = vrot.lane.b32.xlu1 %v8470_v36, %s10080_s27 }
0x18cf   : > { %8481 = vrot.lane.b32.xlu0 %v8471_v22, %s10080_s27 }
0x18d0   : > { %8483 = vrot.lane.b32.xlu1 %v8472_v7, %s10080_s27 }
0x18d3   : > { %8413 = vrot.lane.b32.xlu0 %v8405_v46, %s10080_s27 }
0x18d4   : > { %8415 = vrot.lane.b32.xlu1 %v8406_v42, %s10080_s27 }
0x18d7   : > { %8417 = vrot.lane.b32.xlu0 %v8407_v41, %s10080_s27 }
0x18d8   : > { %8419 = vrot.lane.b32.xlu1 %v8408_v34, %s10080_s27  ;;  %s264_s27 = scalar_lea.vmem %s12660_s6, %s10133_s23 }
0x1931   : > { %v8444_v5 = vpop.permute.xlu0 %8443 }
0x1932   : > { %v12479_v13 = vsel %vm327_vm4, 0, %v8444_v5  ;;  %v8446_v14 = vpop.permute.xlu1 %8445 }
0x1933   : > { %v8458_v38 = vsel %vm327_vm4, %v8446_v14, 0  ;;  %8503 = vrot.lane.b32.xlu0 %v12479_v13, %s10082_s28  ;;  %v8451_v60 = vsel %vm327_vm4, %v8444_v5, %v8446_v14 }
0x1934   : > { %8507 = vrot.lane.b32.xlu1 %v8458_v38, %s10082_s28 }
0x1937   : > { %8505 = vrot.lane.b32.xlu0 %v8451_v60, %s10082_s28 }
0x1938   : > { %8761 = vrot.lane.b32.xlu1 %v8458_v38, %s10085_s7 }
0x1939   : > { %v8448_v12 = vpop.permute.xlu0 %8447 }
0x193a   : > { %v8450_v3 = vpop.permute.xlu1 %8449  ;;  %v8456_v2 = vsel %vm327_vm4, 0, %v8448_v12 }
0x193b   : > { %v8452_v24 = vsel %vm327_vm4, %v8448_v12, %v8450_v3  ;;  %v8460_v49 = vsel %vm327_vm4, %v8450_v3, 0 }
0x193d   : > { %v8478_v1 = vpop.permute.xlu0 %8477 }
0x193e   : > { %v8488_v61 = vsel %vm327_vm4, 0, %v8478_v1  ;;  %v8480_v15 = vpop.permute.xlu1 %8479 }
0x193f   : > { %v8492_v43 = vsel %vm327_vm4, %v8480_v15, 0  ;;  %8617 = vrot.lane.b32.xlu0 %v8488_v61, %s10083_s29  ;;  %v8485_v45 = vsel %vm327_vm4, %v8478_v1, %v8480_v15 }
0x1940   : > { %8621 = vrot.lane.b32.xlu1 %v8492_v43, %s10083_s29 }
0x1941   : > { %v8482_v10 = vpop.permute.xlu0 %8481 }
0x1942   : > { %v8484_v58 = vpop.permute.xlu1 %8483  ;;  %v8490_v50 = vsel %vm327_vm4, 0, %v8482_v10 }
0x1943   : > { %v8486_v51 = vsel %vm327_vm4, %v8482_v10, %v8484_v58  ;;  %v8494_v4 = vsel %vm327_vm4, %v8484_v58, 0  ;;  %v9560_v58 = vld [vmem:[%s12656_s2 + $0x18] sm:$0x3] }
0x1945   : > { %v12492_v52 = vpop.permute.xlu0 %8413 }
0x1946   : > { %v8416_v30 = vpop.permute.xlu1 %8415  ;;  %v8426_v59 = vsel %vm327_vm4, 0, %v12492_v52 }
0x1947   : > { %v8432_v25 = vsel %vm327_vm4, %v8416_v30, 0  ;;  %8689 = vrot.lane.b32.xlu0 %v8426_v59, %s10084_s30  ;;  %v12508_v8 = vsel %vm327_vm4, %v12492_v52, %v8416_v30 }
0x1948   : > { %8693 = vrot.lane.b32.xlu1 %v8432_v25, %s10084_s30 }
0x1949   : > { %v12516_v29 = vpop.permute.xlu0 %8417 }
0x194a   : > { %v8429_v48 = vsel %vm327_vm4, 0, %v12516_v29  ;;  %v8420_v46 = vpop.permute.xlu1 %8419 }
0x194b   : > { %8759 = vrot.lane.b32.xlu0 %v8451_v60, %s10085_s7  ;;  %v8422_v32 = vsel %vm327_vm4, %v12516_v29, %v8420_v46  ;;  %v8434_v19 = vsel %vm327_vm4, %v8420_v46, 0  ;;  %vm12899_vm4 = vcmask 261120  }
0x194c   : > { %8509 = vrot.lane.b32.xlu1 %v8456_v2, %s10082_s28  ;;  %vm12900_vm13 = vmmov %vm12899_vm4 }
0x194d   : > { %vm12904_vm5 = vmmov %vm12899_vm4 }
0x194e   : > { %vm12909_vm6 = vmmov %vm12899_vm4 }
0x194f   : > { %8619 = vrot.lane.b32.xlu0 %v8485_v45, %s10083_s29 }
0x1950   : > { %8511 = vrot.lane.b32.xlu1 %v8452_v24, %s10082_s28 }
0x1953   : > { %8691 = vrot.lane.b32.xlu0 %v12508_v8, %s10084_s30 }
0x1954   : > { %8763 = vrot.lane.b32.xlu1 %v8456_v2, %s10085_s7 }
0x1957   : > { %8513 = vrot.lane.b32.xlu0 %v8460_v49, %s10082_s28 }
0x1958   : > { %8623 = vrot.lane.b32.xlu1 %v8490_v50, %s10083_s29 }
0x195b   : > { %8757 = vrot.lane.b32.xlu0 %v12479_v13, %s10085_s7 }
0x195c   : > { %8695 = vrot.lane.b32.xlu1 %v8429_v48, %s10084_s30 }
0x195f   : > { %8827 = vrot.lane.b32.xlu0 %v8485_v45, %s10086_s8 }
0x1960   : > { %8765 = vrot.lane.b32.xlu1 %v8452_v24, %s10085_s7 }
0x1963   : > { %8767 = vrot.lane.b32.xlu0 %v8460_v49, %s10085_s7 }
0x1964   : > { %8625 = vrot.lane.b32.xlu1 %v8486_v51, %s10083_s29 }
0x1967   : > { %8627 = vrot.lane.b32.xlu0 %v8494_v4, %s10083_s29 }
0x1968   : > { %8829 = vrot.lane.b32.xlu1 %v8492_v43, %s10086_s8 }
0x196b   : > { %8825 = vrot.lane.b32.xlu0 %v8488_v61, %s10086_s8 }
0x196c   : > { %8697 = vrot.lane.b32.xlu1 %v8422_v32, %s10084_s30 }
0x196f   : > { %8699 = vrot.lane.b32.xlu0 %v8434_v19, %s10084_s30 }
0x1970   : > { %8831 = vrot.lane.b32.xlu1 %v8490_v50, %s10086_s8 }
0x1973   : > { %8895 = vrot.lane.b32.xlu0 %v12508_v8, %s10087_s9 }
0x1974   : > { %8897 = vrot.lane.b32.xlu1 %v8432_v25, %s10087_s9 }
0x1977   : > { %8893 = vrot.lane.b32.xlu0 %v8426_v59, %s10087_s9 }
0x1978   : > { %8899 = vrot.lane.b32.xlu1 %v8429_v48, %s10087_s9 }
0x197b   : > { %8963 = vrot.lane.b32.xlu0 %v8451_v60, %s10088_s10 }
0x197c   : > { %8833 = vrot.lane.b32.xlu1 %v8486_v51, %s10086_s8 }
0x197f   : > { %8835 = vrot.lane.b32.xlu0 %v8494_v4, %s10086_s8 }
0x1980   : > { %8965 = vrot.lane.b32.xlu1 %v8458_v38, %s10088_s10  ;;  %v9558_v38 = vld [vmem:[%s12656_s2 + $0x16] sm:$0x3] }
0x1983   : > { %8961 = vrot.lane.b32.xlu0 %v12479_v13, %s10088_s10 }
0x1984   : > { %8901 = vrot.lane.b32.xlu1 %v8422_v32, %s10087_s9 }
0x1987   : > { %8903 = vrot.lane.b32.xlu0 %v8434_v19, %s10087_s9 }
0x1988   : > { %8969 = vrot.lane.b32.xlu1 %v8452_v24, %s10088_s10 }
0x198b   : > { %8971 = vrot.lane.b32.xlu0 %v8460_v49, %s10088_s10  ;;  %v9562_v49 = vld [vmem:[%s12656_s2 + $0x1a] sm:$0x3] }
0x198c   : > { %8967 = vrot.lane.b32.xlu1 %v8456_v2, %s10088_s10 }
0x198f   : > { %9031 = vrot.lane.b32.xlu0 %v8485_v45, %s10089_s11 }
0x1990   : > { %9033 = vrot.lane.b32.xlu1 %v8492_v43, %s10089_s11 }
0x1993   : > { %9029 = vrot.lane.b32.xlu0 %v8488_v61, %s10089_s11 }
0x1994   : > { %9037 = vrot.lane.b32.xlu1 %v8486_v51, %s10089_s11 }
0x1997   : > { %9039 = vrot.lane.b32.xlu0 %v8494_v4, %s10089_s11 }
0x1998   : > { %9035 = vrot.lane.b32.xlu1 %v8490_v50, %s10089_s11 }
0x199b   : > { %9097 = vperm.xlu0 %9979, %v9210_v35   ;;  %v9564_v35 = vld [vmem:[%s12656_s2 + $0x1c] sm:$0x3] }
0x19a5   : > { %v8504_v37 = vpop.permute.xlu0 %8503 }
0x19a6   : > { %v8508_v55 = vpop.permute.xlu1 %8507 }
0x19a9   : > { %v8506_v42 = vpop.permute.xlu0 %8505 }
0x19aa   : > { %v8515_v33 = vsel %vm12895_vm0, %v8504_v37, %v8506_v42  ;;  %v8516_v31 = vsel %vm12896_vm1, %v8506_v42, %v8508_v55  ;;  %v8762_v9 = vpop.permute.xlu1 %8761  ;;  %vm12910_vm0 = vmmov %vm12908_vm10 }
0x19ab   : > { %8526 = vmatprep.subr.bf16.mxu0 %v8516_v31  ;;  %vm12911_vm1 = vmmov %vm12910_vm0 }
0x19ac   : > { %8527 = vmatpush1.bf16.msra.mxu0 %v8515_v33 }
0x19b1   : > { %v8618_v53 = vpop.permute.xlu0 %8617 }
0x19b2   : > { %v8622_v36 = vpop.permute.xlu1 %8621 }
0x19b9   : > { %v8690_v57 = vpop.permute.xlu0 %8689 }
0x19ba   : > { %v8694_v54 = vpop.permute.xlu1 %8693 }
0x19bd   : > { %v8760_v39 = vpop.permute.xlu0 %8759 }
0x19be   : > { %v8510_v16 = vpop.permute.xlu1 %8509 }
0x19c1   : > { %v8620_v44 = vpop.permute.xlu0 %8619 }
0x19c2   : > { %v8512_v63 = vpop.permute.xlu1 %8511  ;;  %v8630_v20 = vsel %vm561_vm8, %v8620_v44, %v8622_v36  ;;  %v8629_v28 = vsel %vm561_vm8, %v8618_v53, %v8620_v44 }
0x19c3   : > { %v8517_v26 = vsel %vm12898_vm3, %v8510_v16, %v8512_v63 }
0x19c5   : > { %v8692_v0 = vpop.permute.xlu0 %8691 }
0x19c6   : > { %v8764_v17 = vpop.permute.xlu1 %8763  ;;  %v8702_v14 = vsel %vm660_vm9, %v8692_v0, %v8694_v54  ;;  %v8701_v3 = vsel %vm660_vm9, %v8690_v57, %v8692_v0  ;;  %v9566_v57 = vld [vmem:[%s12656_s2 + $0x1e] sm:$0x3] }
0x19c9   : > { %v8514_v47 = vpop.permute.xlu0 %8513 }
0x19ca   : > { %v8624_v11 = vpop.permute.xlu1 %8623  ;;  %v8518_v27 = vsel %vm12897_vm2, %v8512_v63, %v8514_v47  ;;  %vm12912_vm2 = vcmask 785408  }
0x19cb   : > { %8528 = vmatprep.subr.bf16.mxu0 %v8518_v27  ;;  %vm12913_vm3 = vmmov %vm12912_vm2 }
0x19cc   : > { %8529 = vmatpush1.bf16.msra.mxu0 %v8517_v26 }
0x19cd   : > { %v8758_v40 = vpop.permute.xlu0 %8757  ;;  %8570 = vmatprep.subr.bf16.mxu0 %v12508_v8 }
0x19ce   : > { %v8696_v62 = vpop.permute.xlu1 %8695 }
0x19cf   : > { %9552 = vmatmul.mubr.msk.bf16.vlgmr.msra.gmra.mrb[96].mxu0 %vm12899_vm4, %v9551_v6 }
0x19d0   : > { %9554 = vmatpush1.bf16.msk.msra.mxu0 %vm10516_vm7, %v12492_v52  ;;  %8602 = vmatprep.mubr.bf16.mxu0 %v10081_v21 }
0x19d1   : > { %v8828_v41 = vpop.permute.xlu0 %8827  ;;  %8572 = vmatprep.subr.bf16.mxu0 %v8422_v32 }
0x19d2   : > { %v8766_v22 = vpop.permute.xlu1 %8765 }
0x19d4   : > { %9556 = vmatpush1.bf16.msk.msra.mxu0 %vm10516_vm7, %v12516_v29  ;;  %vm12901_vm7 = vmmov %vm12899_vm4 }
0x19d5   : > { %v8768_v23 = vpop.permute.xlu0 %8767  ;;  %8640 = vmatprep.subr.bf16.mxu0 %v8630_v20  ;;  %v9570_v20 = vld [vmem:[%s12656_s2 + $0x22] sm:$0x3] }
0x19d6   : > { %v8626_v34 = vpop.permute.xlu1 %8625 }
0x19d7   : > { %9557 = vmatmul.mubr.msk.bf16.vlgmr.msra.gmra.mrb[100].mxu0 %vm12900_vm13, %v9550_v18  ;;  %v8631_v13 = vsel %vm561_vm8, %v8624_v11, %v8626_v34  ;;  %vm12914_vm13 = vmmov %vm12912_vm2  ;;  %v9568_v11 = vld [vmem:[%s12656_s2 + $0x20] sm:$0x3] }
0x19d8   : > { %8641 = vmatpush1.bf16.msra.mxu0 %v8629_v28  ;;  %8672 = vmatprep.mubr.bf16.mxu0 %v10081_v21 }
0x19d9   : > { %v8628_v7 = vpop.permute.xlu0 %8627 }
0x19da   : > { %v8830_v5 = vpop.permute.xlu1 %8829  ;;  %v8632_v56 = vsel %vm561_vm8, %v8626_v34, %v8628_v7  ;;  %vm12902_vm8 = vcmask 908288  }
0x19db   : > { %8642 = vmatprep.subr.bf16.mxu0 %v8632_v56  ;;  %v8770_v10 = vsel %vm12902_vm8, %v8760_v39, %v8762_v9  ;;  %vm12903_vm15 = vmmov %vm12902_vm8  ;;  %v8838_v8 = vsel %vm12907_vm12, %v8828_v41, %v8830_v5 }
0x19dc   : > { %8643 = vmatpush1.bf16.msra.mxu0 %v8631_v13  ;;  %v8769_v59 = vsel %vm12903_vm15, %v8758_v40, %v8760_v39  ;;  %vm12905_vm11 = vmmov %vm12902_vm8 }
0x19dd   : > { %v8826_v60 = vpop.permute.xlu0 %8825  ;;  %8712 = vmatprep.subr.bf16.mxu0 %v8702_v14  ;;  %v8772_v25 = vsel %vm12905_vm11, %v8766_v22, %v8768_v23  ;;  %vm12921_vm12 = vmmov %vm12899_vm4 }
0x19de   : > { %v8698_v12 = vpop.permute.xlu1 %8697  ;;  %v8837_v48 = vsel %vm12908_vm10, %v8826_v60, %v8828_v41  ;;  %vm12922_vm10 = vmmov %vm12899_vm4 }
0x19df   : > { %9559 = vmatmul.mubr.msk.bf16.vlgmr.msra.gmra.mrb[104].mxu0 %vm12901_vm7, %v9558_v38  ;;  %v8703_v43 = vsel %vm660_vm9, %v8696_v62, %v8698_v12  ;;  %vm12915_vm7 = vmmov %vm12912_vm2 }
0x19e0   : > { %8713 = vmatpush1.bf16.msra.mxu0 %v8701_v3  ;;  %8744 = vmatprep.mubr.bf16.mxu0 %v10081_v21 }
0x19e1   : > { %v8700_v1 = vpop.permute.xlu0 %8699 }
0x19e2   : > { %v8832_v61 = vpop.permute.xlu1 %8831  ;;  %v8704_v15 = vsel %vm660_vm9, %v8698_v12, %v8700_v1  ;;  %vm12906_vm9 = vmmov %vm12902_vm8  ;;  %vm12916_vm8 = vcmask 777216  }
0x19e3   : > { %8714 = vmatprep.subr.bf16.mxu0 %v8704_v15  ;;  %v8771_v24 = vsel %vm12906_vm9, %v8764_v17, %v8766_v22  ;;  %vm12917_vm15 = vmmov %vm12916_vm8 }
0x19e4   : > { %8715 = vmatpush1.bf16.msra.mxu0 %v8703_v43  ;;  %vm12919_vm11 = vmmov %vm12916_vm8 }
0x19e5   : > { %v8896_v52 = vpop.permute.xlu0 %8895  ;;  %8780 = vmatprep.subr.bf16.mxu0 %v8770_v10  ;;  %vm12920_vm9 = vmmov %vm12916_vm8 }
0x19e6   : > { %v8898_v30 = vpop.permute.xlu1 %8897 }
0x19e7   : > { %9561 = vmatmul.mubr.msk.bf16.vlgmr.msra.gmra.mrb[108].mxu0 %vm12904_vm5, %v9560_v58  ;;  %v8906_v19 = vsel %vm12912_vm2, %v8896_v52, %v8898_v30  ;;  %vm12918_vm5 = vmmov %vm12899_vm4 }
0x19e8   : > { %8781 = vmatpush1.bf16.msra.mxu0 %v8769_v59  ;;  %8812 = vmatprep.mubr.bf16.mxu0 %v10081_v21 }
0x19e9   : > { %v8894_v2 = vpop.permute.xlu0 %8893  ;;  %8782 = vmatprep.subr.bf16.mxu0 %v8772_v25 }
0x19ea   : > { %v8900_v45 = vpop.permute.xlu1 %8899  ;;  %v8905_v42 = vsel %vm12913_vm3, %v8894_v2, %v8896_v52 }
0x19ec   : > { %8783 = vmatpush1.bf16.msra.mxu0 %v8771_v24 }
0x19ed   : > { %v8964_v50 = vpop.permute.xlu0 %8963  ;;  %8848 = vmatprep.subr.bf16.mxu0 %v8838_v8 }
0x19ee   : > { %v8834_v29 = vpop.permute.xlu1 %8833 }
0x19ef   : > { %9563 = vmatmul.mubr.msk.bf16.vlgmr.msra.gmra.mrb[112].mxu0 %vm12909_vm6, %v9562_v49  ;;  %v8839_v32 = vsel %vm12911_vm1, %v8832_v61, %v8834_v29 }
0x19f0   : > { %8849 = vmatpush1.bf16.msra.mxu0 %v8837_v48  ;;  %8880 = vmatprep.mubr.bf16.mxu0 %v10081_v21 }
0x19f1   : > { %v8836_v51 = vpop.permute.xlu0 %8835 }
0x19f2   : > { %v8966_v4 = vpop.permute.xlu1 %8965  ;;  %v8840_v46 = vsel %vm12910_vm0, %v8834_v29, %v8836_v51 }
0x19f3   : > { %8850 = vmatprep.subr.bf16.mxu0 %v8840_v46  ;;  %v8974_v36 = vsel %vm12916_vm8, %v8964_v50, %v8966_v4 }
0x19f4   : > { %8851 = vmatpush1.bf16.msra.mxu0 %v8839_v32 }
0x19f5   : > { %v8962_v37 = vpop.permute.xlu0 %8961  ;;  %8916 = vmatprep.subr.bf16.mxu0 %v8906_v19 }
0x19f6   : > { %v8902_v55 = vpop.permute.xlu1 %8901  ;;  %v8973_v16 = vsel %vm12917_vm15, %v8962_v37, %v8964_v50 }
0x19f7   : > { %9565 = vmatmul.mubr.msk.bf16.vlgmr.msra.gmra.mrb[116].mxu0 %vm12899_vm4, %v9564_v35  ;;  %v8907_v53 = vsel %vm12915_vm7, %v8900_v45, %v8902_v55 }
0x19f8   : > { %8917 = vmatpush1.bf16.msra.mxu0 %v8905_v42  ;;  %8948 = vmatprep.mubr.bf16.mxu0 %v10081_v21 }
0x19f9   : > { %v8904_v33 = vpop.permute.xlu0 %8903 }
0x19fa   : > { %v8970_v31 = vpop.permute.xlu1 %8969  ;;  %v8908_v9 = vsel %vm12914_vm13, %v8902_v55, %v8904_v33 }
0x19fb   : > { %8918 = vmatprep.subr.bf16.mxu0 %v8908_v9 }
0x19fc   : > { %8919 = vmatpush1.bf16.msra.mxu0 %v8907_v53 }
0x19fd   : > { %v8972_v54 = vpop.permute.xlu0 %8971  ;;  %8984 = vmatprep.subr.bf16.mxu0 %v8974_v36 }
0x19fe   : > { %v8968_v39 = vpop.permute.xlu1 %8967  ;;  %v8976_v44 = vsel %vm12919_vm11, %v8970_v31, %v8972_v54 }
0x19ff   : > { %9567 = vmatmul.mubr.msk.bf16.vlgmr.msra.gmra.mrb[120].mxu0 %vm12918_vm5, %v9566_v57  ;;  %v8975_v17 = vsel %vm12920_vm9, %v8968_v39, %v8970_v31 }
0x1a00   : > { %8985 = vmatpush1.bf16.msra.mxu0 %v8973_v16  ;;  %9016 = vmatprep.mubr.bf16.mxu0 %v10081_v21 }
0x1a01   : > { %v9032_v63 = vpop.permute.xlu0 %9031  ;;  %8986 = vmatprep.subr.bf16.mxu0 %v8976_v44 }
0x1a02   : > { %v9034_v0 = vpop.permute.xlu1 %9033 }
0x1a03   : > { %v9042_v47 = vsel %vm1145_vm14, %v9032_v63, %v9034_v0 }
0x1a04   : > { %8987 = vmatpush1.bf16.msra.mxu0 %v8975_v17 }
0x1a05   : > { %v9030_v27 = vpop.permute.xlu0 %9029  ;;  %9052 = vmatprep.subr.bf16.mxu0 %v9042_v47 }
0x1a06   : > { %v9041_v26 = vsel %vm1145_vm14, %v9030_v27, %v9032_v63  ;;  %v9038_v6 = vpop.permute.xlu1 %9037 }
0x1a07   : > { %9569 = vmatmul.mubr.msk.bf16.vlgmr.msra.gmra.mrb[124].mxu0 %vm12921_vm12, %v9568_v11 }
0x1a08   : > { %9053 = vmatpush1.bf16.msra.mxu0 %v9041_v26  ;;  %9084 = vmatprep.mubr.bf16.mxu0 %v10081_v21 }
0x1a09   : > { %v9040_v40 = vpop.permute.xlu0 %9039 }
0x1a0a   : > { %v9036_v62 = vpop.permute.xlu1 %9035  ;;  %v9044_v41 = vsel %vm1145_vm14, %v9038_v6, %v9040_v40 }
0x1a0b   : > { %v9043_v22 = vsel %vm1145_vm14, %v9036_v62, %v9038_v6  ;;  %9054 = vmatprep.subr.bf16.mxu0 %v9044_v41 }
0x1a0c   : > { %9055 = vmatpush1.bf16.msra.mxu0 %v9043_v22 }
0x1a0f   : > { %9571 = vmatmul.mubr.msk.bf16.vlgmr.msra.gmra.mrb[128].mxu0 %vm12922_vm10, %v9570_v20 }
0x1a1a   : > { %v9098_v16 = vpop.permute.xlu0 %9097 }
0x1aa2   : > { %v8560_v18 = vpop.f32.mrb[96].mxu0 }
0x1aa3   : > { %v8562_v23 = vpop.f32.mrb[97].mxu0 }
0x1aa4   : > { %v8564_v34 = vpop.f32.mrb[98].mxu0 }
0x1aa5   : > { %v8565_v28 = vpop.f32.mrb[99].mxu0 }
0x1aaa   : > { %v8604_v7 = vpop.f32.mrb[100].mxu0 }
0x1aab   : > { %v8605_v21 = vadd.f32 %v8604_v7, %v8560_v18  ;;  %v8606_v5 = vpop.f32.mrb[101].mxu0 }
0x1aac   : > { %v8607_v56 = vadd.f32 %v8606_v5, %v8562_v23  ;;  %v8608_v13 = vpop.f32.mrb[102].mxu0 }
0x1aad   : > { %v8609_v14 = vpop.f32.mrb[103].mxu0 }
0x1ab2   : > { %v8674_v38 = vpop.f32.mrb[104].mxu0 }
0x1ab3   : > { %v8681_v60 = vadd.f32 %v8674_v38, %v8605_v21  ;;  %v8676_v12 = vpop.f32.mrb[105].mxu0 }
0x1ab4   : > { %v8682_v3 = vadd.f32 %v8676_v12, %v8607_v56  ;;  %v8678_v1 = vpop.f32.mrb[106].mxu0 }
0x1ab5   : > { %v8679_v61 = vpop.f32.mrb[107].mxu0 }
0x1aba   : > { %v8746_v15 = vpop.f32.mrb[108].mxu0 }
0x1abb   : > { %v8753_v43 = vadd.f32 %v8746_v15, %v8681_v60  ;;  %v8748_v10 = vpop.f32.mrb[109].mxu0 }
0x1abc   : > { %v8754_v58 = vadd.f32 %v8748_v10, %v8682_v3  ;;  %v8750_v52 = vpop.f32.mrb[110].mxu0 }
0x1abd   : > { %v8751_v30 = vpop.f32.mrb[111].mxu0 }
0x1ac2   : > { %v8814_v59 = vpop.f32.mrb[112].mxu0 }
0x1ac3   : > { %v8821_v25 = vadd.f32 %v8814_v59, %v8753_v43  ;;  %v8816_v2 = vpop.f32.mrb[113].mxu0 }
0x1ac4   : > { %v8822_v45 = vadd.f32 %v8816_v2, %v8754_v58  ;;  %v8818_v24 = vpop.f32.mrb[114].mxu0 }
0x1ac5   : > { %v8819_v8 = vpop.f32.mrb[115].mxu0 }
0x1aca   : > { %v8882_v49 = vpop.f32.mrb[116].mxu0 }
0x1acb   : > { %v8889_v50 = vadd.f32 %v8882_v49, %v8821_v25  ;;  %v8884_v29 = vpop.f32.mrb[117].mxu0 }
0x1acc   : > { %v8890_v48 = vadd.f32 %v8884_v29, %v8822_v45  ;;  %v8886_v51 = vpop.f32.mrb[118].mxu0 }
0x1acd   : > { %v8887_v4 = vpop.f32.mrb[119].mxu0 }
0x1ad2   : > { %v8950_v46 = vpop.f32.mrb[120].mxu0 }
0x1ad3   : > { %v8957_v32 = vadd.f32 %v8950_v46, %v8889_v50  ;;  %v8952_v19 = vpop.f32.mrb[121].mxu0 }
0x1ad4   : > { %v8958_v35 = vadd.f32 %v8952_v19, %v8890_v48  ;;  %v8954_v37 = vpop.f32.mrb[122].mxu0 }
0x1ad5   : > { %v8955_v55 = vpop.f32.mrb[123].mxu0 }
0x1ada   : > { %v9018_v42 = vpop.f32.mrb[124].mxu0 }
0x1adb   : > { %v9025_v33 = vadd.f32 %v9018_v42, %v8957_v32  ;;  %v9020_v31 = vpop.f32.mrb[125].mxu0 }
0x1adc   : > { %v9026_v9 = vadd.f32 %v9020_v31, %v8958_v35  ;;  %v9022_v53 = vpop.f32.mrb[126].mxu0 }
0x1add   : > { %v9023_v36 = vpop.f32.mrb[127].mxu0 }
0x1ae2   : > { %v9086_v57 = vpop.f32.mrb[128].mxu0 }
0x1ae3   : > { %v9093_v54 = vadd.f32 %v9086_v57, %v9025_v33  ;;  %v9088_v39 = vpop.f32.mrb[129].mxu0 }
0x1ae4   : > { %v9094_v44 = vadd.f32 %v9088_v39, %v9026_v9  ;;  %v9090_v63 = vpop.f32.mrb[130].mxu0 }
0x1ae5   : > { %v9100_v0 = vadd.f32 %v9098_v16, %v9093_v54  ;;  %v9091_v17 = vpop.f32.mrb[131].mxu0 }
0x1ae6   : > { %v9101_v47 = vadd.f32 %v9098_v16, %v9094_v44 }
0x1ae8   : > { %v9104_v11 = vcombine.low %v9100_v0, %v9101_v47 }
0x1aea   : > { %9106 = vst [vmem:[%s264_s27] sm:$0xff] %v9104_v11 }
0x1aeb PF: > { %s17_s21 = sadd.s32 1, %s10078_s21  }
0x1aec   : > { %p14_p4 = scmp.ge.s32.totalorder %s17_s21, 4  }
0x1aee   :  { %16 = sbr.rel (!%p14_p4) target bundleno = 1 (0x1), region = 118 }

</bundles_post_ra>
